<compile_context>
chip_gen: v7x
topology: tpu7x:2x2x1
jax: 0.10.0
libtpu: 0.0.40
codegen_flags: <defaults>
</compile_context>

<pallas_src>
import jax
import jax.numpy as jnp
from jax.experimental import pallas as pl
from jax.experimental.pallas import tpu as pltpu


# ---------------------------------------------------------------------------
# Tap helpers
# ---------------------------------------------------------------------------
# 4x4 / stride-2 / pad-1 conv == 2x2-neighbourhood gather over the four
# stride-2 phases of the *unpadded* input.  Kernel index k in [0, 4) maps to
# (phase, spatial shift on the (H/2, W/2) output grid):
_S2_TAPS = ((1, -1), (0, 0), (1, 0), (0, 1))


def _tap_operand(x, di, dj, Hg, Wg, row_ids, col_ids):
    """bf16 MXU operand for conv tap (di, dj): zero-padded shifted activation.

    out[i*Wg + j, :] = x[(i+di)*Wg + (j+dj), :]  if (i+di, j+dj) is in-grid
                       0                          otherwise
    x: (Hg*Wg, C) activation (bf16 or f32); row_ids/col_ids: (Hg*Wg, 1) i32.
    The flat shift rides the XLU (pltpu.roll, 32-bit), the border select rides
    the VPU, and the MXU consumes the result directly -- no patches buffer,
    no partial stores.
    """
    npix = Hg * Wg
    delta = di * Wg + dj
    if delta != 0:
        x = pltpu.roll(x.astype(jnp.float32), (-delta) % npix, axis=0)
    x = x.astype(jnp.bfloat16)

    conds = []
    if di > 0:
        conds.append(row_ids < Hg - di)
    elif di < 0:
        conds.append(row_ids >= -di)
    if dj > 0:
        conds.append(col_ids < Wg - dj)
    elif dj < 0:
        conds.append(col_ids >= -dj)
    if conds:
        valid = conds[0]
        for c in conds[1:]:
            valid = jnp.logical_and(valid, c)
        x = jnp.where(valid, x, jnp.zeros((), x.dtype))
    return x


def _grid_ids(Hg, Wg):
    """Precomputed (Npix, 1) int32 row / col indices (avoids in-kernel div)."""
    npix = Hg * Wg
    flat = jnp.arange(npix, dtype=jnp.int32)
    return (flat // Wg).reshape(npix, 1), (flat % Wg).reshape(npix, 1)


# ---------------------------------------------------------------------------
# Kernel bodies
# ---------------------------------------------------------------------------
def _make_s2_conv_kernel(Hg, Wg, relu_out):
    """4x4 / stride-2 / pad-1 conv + bias (+ ReLU) from phase-split input."""

    def kernel(row_ref, col_ref, xs_ref, w_ref, b_ref, o_ref, acc_ref):
        row_ids = row_ref[...]
        col_ids = col_ref[...]
        first = True
        for ki in range(4):
            p, di = _S2_TAPS[ki]
            for kj in range(4):
                q, dj = _S2_TAPS[kj]
                xt = _tap_operand(xs_ref[2 * p + q], di, dj, Hg, Wg,
                                  row_ids, col_ids)
                part = jnp.dot(xt, w_ref[4 * ki + kj],
                               preferred_element_type=jnp.float32)
                if first:
                    acc_ref[...] = part
                    first = False
                else:
                    acc_ref[...] += part
        y = acc_ref[...] + b_ref[...]
        if relu_out:
            y = jnp.maximum(y, 0.0)
        o_ref[...] = y.astype(o_ref.dtype)

    return kernel


def _make_trunk_kernel(Hg, Wg, num_res_layers):
    """Fused conv3 (3x3 s1 p1 + bias) -> residual stack -> trailing ReLU."""
    taps3 = tuple((ki - 1, kj - 1) for ki in range(3) for kj in range(3))
    L = num_res_layers

    def kernel(*refs):
        if L > 0:
            (row_ref, col_ref, x_ref, w3_ref, b3_ref, wr3_ref, wr1_ref,
             o_ref, trunk_ref, hacc_ref) = refs
        else:
            (row_ref, col_ref, x_ref, w3_ref, b3_ref,
             o_ref, trunk_ref) = refs
        row_ids = row_ref[...]
        col_ids = col_ref[...]

        # conv3: f32 trunk accumulated in VMEM (no activation).
        for t, (di, dj) in enumerate(taps3):
            xt = _tap_operand(x_ref[...], di, dj, Hg, Wg, row_ids, col_ids)
            part = jnp.dot(xt, w3_ref[t], preferred_element_type=jnp.float32)
            if t == 0:
                trunk_ref[...] = part
            else:
                trunk_ref[...] += part
        trunk_ref[...] += b3_ref[...]

        # Residual stack: x + conv1x1(relu(conv3x3(relu(x)))).  The f32 trunk
        # and the (Npix, R) intermediate never leave VMEM.
        for layer in range(L):
            for t, (di, dj) in enumerate(taps3):
                xr = jnp.maximum(trunk_ref[...], 0.0)          # pre-conv ReLU
                xt = _tap_operand(xr, di, dj, Hg, Wg, row_ids, col_ids)
                part = jnp.dot(xt, wr3_ref[9 * layer + t],
                               preferred_element_type=jnp.float32)
                if t == 0:
                    hacc_ref[...] = part
                else:
                    hacc_ref[...] += part
            h = jnp.maximum(hacc_ref[...], 0.0).astype(jnp.bfloat16)
            trunk_ref[...] += jnp.dot(h, wr1_ref[layer],
                                      preferred_element_type=jnp.float32)

        # Trailing ReLU of the residual stack.
        o_ref[...] = jnp.maximum(trunk_ref[...], 0.0).astype(o_ref.dtype)

    return kernel


# ---------------------------------------------------------------------------
# pallas_call wrappers
# ---------------------------------------------------------------------------
def _conv_s2_4x4(x_nhwc, w_taps, b, relu_out, out_dtype=jnp.bfloat16):
    """4x4 / stride-2 / pad-1 conv. x: (N,H,W,C); w_taps: (16,C,O) bf16."""
    N, H, W, C = x_nhwc.shape
    assert H % 2 == 0 and W % 2 == 0, "stride-2 conv expects even spatial dims"
    Hg, Wg = H // 2, W // 2
    npix = Hg * Wg
    assert npix % 8 == 0, "flattened output grid must be sublane aligned"
    _, _, O = w_taps.shape

    # Stride-2 phase split of the *unpadded* input (single XLA transpose,
    # no jnp.pad pass; conv padding is handled by in-kernel masks).
    xs = x_nhwc.reshape(N, Hg, 2, Wg, 2, C).transpose(0, 2, 4, 1, 3, 5)
    xs = xs.reshape(N, 4, npix, C)
    row_ids, col_ids = _grid_ids(Hg, Wg)

    kernel = _make_s2_conv_kernel(Hg, Wg, relu_out)
    flops = int(2 * N * npix * 16 * C * O)
    bytes_accessed = int(N * 4 * npix * C * xs.dtype.itemsize
                         + N * npix * O * jnp.dtype(out_dtype).itemsize
                         + 16 * C * O * 2 + O * 4 + 2 * npix * 4)

    out = pl.pallas_call(
        kernel,
        out_shape=jax.ShapeDtypeStruct((N, npix, O), out_dtype),
        grid=(N,),
        in_specs=[
            pl.BlockSpec((npix, 1), lambda n: (0, 0)),
            pl.BlockSpec((npix, 1), lambda n: (0, 0)),
            pl.BlockSpec((None, 4, npix, C), lambda n: (n, 0, 0, 0)),
            pl.BlockSpec((16, C, O), lambda n: (0, 0, 0)),
            pl.BlockSpec((1, O), lambda n: (0, 0)),
        ],
        out_specs=pl.BlockSpec((None, npix, O), lambda n: (n, 0, 0)),
        scratch_shapes=[pltpu.VMEM((npix, O), jnp.float32)],
        compiler_params=pltpu.CompilerParams(
            dimension_semantics=("parallel",)),
        cost_estimate=pl.CostEstimate(flops=flops, transcendentals=0,
                                      bytes_accessed=bytes_accessed),
    )(row_ids, col_ids, xs, w_taps, b.reshape(1, O).astype(jnp.float32))
    return out.reshape(N, Hg, Wg, O)


def _conv3_plus_residual_stack(x_nhwc, w3_taps, b3, wr3_taps, wr1,
                               out_dtype=jnp.float32):
    """Fused conv3 + full residual stack + trailing ReLU (one pallas_call)."""
    N, Hg, Wg, C = x_nhwc.shape
    npix = Hg * Wg
    assert npix % 8 == 0, "flattened grid must be sublane aligned"
    L = 0 if wr3_taps is None else wr3_taps.shape[0] // 9
    R = 0 if wr3_taps is None else wr3_taps.shape[2]

    x_flat = x_nhwc.reshape(N, npix, C)
    row_ids, col_ids = _grid_ids(Hg, Wg)

    kernel = _make_trunk_kernel(Hg, Wg, L)

    in_specs = [
        pl.BlockSpec((npix, 1), lambda n: (0, 0)),
        pl.BlockSpec((npix, 1), lambda n: (0, 0)),
        pl.BlockSpec((None, npix, C), lambda n: (n, 0, 0)),
        pl.BlockSpec((9, C, C), lambda n: (0, 0, 0)),
        pl.BlockSpec((1, C), lambda n: (0, 0)),
    ]
    args = [row_ids, col_ids, x_flat, w3_taps,
            b3.reshape(1, C).astype(jnp.float32)]
    scratch = [pltpu.VMEM((npix, C), jnp.float32)]            # f32 trunk
    if L > 0:
        in_specs += [
            pl.BlockSpec((9 * L, C, R), lambda n: (0, 0, 0)),
            pl.BlockSpec((L, R, C), lambda n: (0, 0, 0)),
        ]
        args += [wr3_taps, wr1]
        scratch += [pltpu.VMEM((npix, R), jnp.float32)]       # f32 h accum

    flops = int(2 * N * npix * (9 * C * C + L * (9 * C * R + R * C)))
    bytes_accessed = int(N * npix * C * x_flat.dtype.itemsize
                         + N * npix * C * jnp.dtype(out_dtype).itemsize
                         + 9 * C * C * 2 + C * 4
                         + (0 if L == 0 else (9 * L * C * R + L * R * C) * 2)
                         + 2 * npix * 4)

    out = pl.pallas_call(
        kernel,
        out_shape=jax.ShapeDtypeStruct((N, npix, C), out_dtype),
        grid=(N,),
        in_specs=in_specs,
        out_specs=pl.BlockSpec((None, npix, C), lambda n: (n, 0, 0)),
        scratch_shapes=scratch,
        compiler_params=pltpu.CompilerParams(
            dimension_semantics=("parallel",)),
        cost_estimate=pl.CostEstimate(flops=flops, transcendentals=0,
                                      bytes_accessed=bytes_accessed),
    )(*args)
    return out.reshape(N, Hg, Wg, C)


# ---------------------------------------------------------------------------
# Parameters: raw PyTorch-layout init + one-time kernel-layout prep
# ---------------------------------------------------------------------------
def init_encoder_params(key, in_channels, num_hiddens,
                        num_residual_layers, num_residual_hiddens):
    keys = jax.random.split(key, 6 + 2 * num_residual_layers)
    nh2 = num_hiddens // 2

    def w(k, shape, fan_in):
        return jax.random.normal(k, shape, jnp.float32) / jnp.sqrt(fan_in)

    params = {
        "conv1_w": w(keys[0], (nh2, in_channels, 4, 4), in_channels * 16),
        "conv1_b": 0.01 * jax.random.normal(keys[1], (nh2,), jnp.float32),
        "conv2_w": w(keys[2], (num_hiddens, nh2, 4, 4), nh2 * 16),
        "conv2_b": 0.01 * jax.random.normal(keys[3], (num_hiddens,), jnp.float32),
        "conv3_w": w(keys[4], (num_hiddens, num_hiddens, 3, 3), num_hiddens * 9),
        "conv3_b": 0.01 * jax.random.normal(keys[5], (num_hiddens,), jnp.float32),
        "res": [],
    }
    for l in range(num_residual_layers):
        params["res"].append({
            # Residual: ReLU -> 3x3 conv (no bias) -> ReLU -> 1x1 conv (no bias)
            "w3": w(keys[6 + 2 * l],
                    (num_residual_hiddens, num_hiddens, 3, 3), num_hiddens * 9),
            "w1": w(keys[7 + 2 * l],
                    (num_hiddens, num_residual_hiddens, 1, 1),
                    num_residual_hiddens),
        })
    return params


def _taps_khkw(w_oihw):
    """(O, C, kh, kw) -> (kh*kw, C, O) bf16, tap index t = ki*kw + kj."""
    O, C, kh, kw = w_oihw.shape
    return (w_oihw.transpose(2, 3, 1, 0).reshape(kh * kw, C, O)
            .astype(jnp.bfloat16))


def prepare_encoder_params(params):
    """One-time weight transpose/cast to the kernels' per-tap (C, O) layout."""
    prepped = {
        "conv1_w": _taps_khkw(params["conv1_w"]),   # (16, Cin, nh/2)
        "conv1_b": params["conv1_b"],
        "conv2_w": _taps_khkw(params["conv2_w"]),   # (16, nh/2, nh)
        "conv2_b": params["conv2_b"],
        "conv3_w": _taps_khkw(params["conv3_w"]),   # (9, nh, nh)
        "conv3_b": params["conv3_b"],
    }
    if params["res"]:
        prepped["res_w3"] = jnp.concatenate(
            [_taps_khkw(rp["w3"]) for rp in params["res"]], axis=0)  # (9L,nh,R)
        prepped["res_w1"] = jnp.stack(
            [rp["w1"].reshape(rp["w1"].shape[0], rp["w1"].shape[1]).T
             .astype(jnp.bfloat16) for rp in params["res"]], axis=0)  # (L,R,nh)
    else:
        prepped["res_w3"] = None
        prepped["res_w1"] = None
    return prepped


# ---------------------------------------------------------------------------
# Encoder forward (NCHW in / NCHW out, like the PyTorch module)
# ---------------------------------------------------------------------------
def encoder_forward(prepped, x_nchw):
    # bf16 at every pallas_call boundary; f32 accumulation inside kernels.
    x = jnp.transpose(x_nchw, (0, 2, 3, 1)).astype(jnp.bfloat16)   # NHWC
    x = _conv_s2_4x4(x, prepped["conv1_w"], prepped["conv1_b"], relu_out=True)
    x = _conv_s2_4x4(x, prepped["conv2_w"], prepped["conv2_b"], relu_out=True)
    x = _conv3_plus_residual_stack(x, prepped["conv3_w"], prepped["conv3_b"],
                                   prepped["res_w3"], prepped["res_w1"],
                                   out_dtype=jnp.float32)
    return jnp.transpose(x, (0, 3, 1, 2))                          # NCHW


# ---------------------------------------------------------------------------
# Precision-matched reference (lax.conv, bf16 MXU operands, f32 accumulate)
# ---------------------------------------------------------------------------
def _ref_conv(x, w, b, stride, pad):
    dn = ("NHWC", "OIHW", "NHWC")
    y = jax.lax.conv_general_dilated(
        x.astype(jnp.bfloat16), w.astype(jnp.bfloat16),
        window_strides=(stride, stride), padding=[(pad, pad), (pad, pad)],
        dimension_numbers=dn, preferred_element_type=jnp.float32)
    if b is not None:
        y = y + b.reshape(1, 1, 1, -1)
    return y


def encoder_reference(params, x_nchw):
    x = jnp.transpose(x_nchw, (0, 2, 3, 1)).astype(jnp.float32)
    x = jax.nn.relu(_ref_conv(x, params["conv1_w"], params["conv1_b"], 2, 1))
    x = jax.nn.relu(_ref_conv(x, params["conv2_w"], params["conv2_b"], 2, 1))
    x = _ref_conv(x, params["conv3_w"], params["conv3_b"], 1, 1)
    for rp in params["res"]:
        h = _ref_conv(jax.nn.relu(x), rp["w3"], None, 1, 1)
        h = _ref_conv(jax.nn.relu(h), rp["w1"], None, 1, 0)
        x = x + h
    x = jax.nn.relu(x)
    return jnp.transpose(x, (0, 3, 1, 2))


if __name__ == "__main__":
    # Small shapes consistent with the module.
    batch, in_channels, spatial = 2, 3, 16
    num_hiddens, num_residual_layers, num_residual_hiddens = 32, 2, 8

    key = jax.random.PRNGKey(0)
    k_param, k_input = jax.random.split(key)
    params = init_encoder_params(k_param, in_channels, num_hiddens,
                                 num_residual_layers, num_residual_hiddens)
    prepped = prepare_encoder_params(params)
    x = jax.random.normal(k_input, (batch, in_channels, spatial, spatial),
                          jnp.float32)

    fwd = jax.jit(encoder_forward)
    out = jax.block_until_ready(fwd(prepped, x))

    # PyTorch Encoder output shape is (N, num_hiddens, H/4, W/4)
    assert out.shape == (batch, num_hiddens, spatial // 4, spatial // 4), out.shape

    ref = jax.block_until_ready(encoder_reference(params, x))
    max_err = float(jnp.max(jnp.abs(out - ref)))
    # bf16 MXU operands with f32 accumulation on both sides: robust tolerance.
    assert jnp.allclose(out, ref, atol=3e-2, rtol=3e-2), max_err

    print("KERNEL_OK")
</pallas_src>

<mosaic_0001>
module attributes {stable_mosaic.version = 11 : i64} {
  func.func @kernel(%arg0: i32, %arg1: memref<64x1xi32, #tpu.memory_space<vmem>>, %arg2: memref<64x1xi32, #tpu.memory_space<vmem>>, %arg3: memref<1x4x64x3xbf16, #tpu.memory_space<vmem>>, %arg4: memref<16x3x16xbf16, #tpu.memory_space<vmem>>, %arg5: memref<1x16xf32, #tpu.memory_space<vmem>>, %arg6: memref<1x64x16xbf16, #tpu.memory_space<vmem>>, %arg7: memref<64x16xf32, #tpu.memory_space<vmem>>) attributes {dimension_semantics = [#tpu.dimension_semantics<parallel>], iteration_bounds = array<i64: 2>, scalar_prefetch = 0 : i64, scratch_operands = 1 : i64, tpu.core_type = #tpu.core_type<tc>, window_params = [{pipeline_mode = #tpu.pipeline_mode<synchronous>, transform_indices = @transform_0, window_bounds = array<i64: 64, 1>}, {pipeline_mode = #tpu.pipeline_mode<synchronous>, transform_indices = @transform_1, window_bounds = array<i64: 64, 1>}, {transform_indices = @transform_2, window_bounds = array<i64: 1, 4, 64, 3>}, {pipeline_mode = #tpu.pipeline_mode<synchronous>, transform_indices = @transform_3, window_bounds = array<i64: 16, 3, 16>}, {pipeline_mode = #tpu.pipeline_mode<synchronous>, transform_indices = @transform_4, window_bounds = array<i64: 1, 16>}, {transform_indices = @transform_5, window_bounds = array<i64: 1, 64, 16>}]} {
    %c0 = arith.constant 0 : index
    %c0_0 = arith.constant 0 : index
    %0 = vector.load %arg1[%c0, %c0_0] : memref<64x1xi32, #tpu.memory_space<vmem>>, vector<64x1xi32>
    %c0_1 = arith.constant 0 : index
    %c0_2 = arith.constant 0 : index
    %1 = vector.load %arg2[%c0_1, %c0_2] : memref<64x1xi32, #tpu.memory_space<vmem>>, vector<64x1xi32>
    %c0_3 = arith.constant 0 : index
    %c3 = arith.constant 3 : index
    %c0_4 = arith.constant 0 : index
    %c0_5 = arith.constant 0 : index
    %2 = vector.load %arg3[%c0_3, %c3, %c0_4, %c0_5] : memref<1x4x64x3xbf16, #tpu.memory_space<vmem>>, vector<1x1x64x3xbf16>
    %3 = vector.shape_cast %2 : vector<1x1x64x3xbf16> to vector<64x3xbf16>
    %4 = arith.extf %3 : vector<64x3xbf16> to vector<64x3xf32>
    %c9_i32 = arith.constant 9 : i32
    %5 = tpu.dynamic_rotate %4 by %c9_i32 dim 0 : vector<64x3xf32>, i32 -> vector<64x3xf32>
    %6 = arith.truncf %5 : vector<64x3xf32> to vector<64x3xbf16>
    %c1_i32 = arith.constant 1 : i32
    %7 = vector.broadcast %c1_i32 : i32 to vector<64x1xi32>
    %8 = arith.cmpi sge, %0, %7 : vector<64x1xi32>
    %c1_i32_6 = arith.constant 1 : i32
    %9 = vector.broadcast %c1_i32_6 : i32 to vector<64x1xi32>
    %10 = arith.cmpi sge, %1, %9 : vector<64x1xi32>
    %11 = arith.andi %8, %10 : vector<64x1xi1>
    %cst = arith.constant 0.000000e+00 : bf16
    %12 = vector.shape_cast %11 : vector<64x1xi1> to vector<64x1xi1>
    %13 = vector.broadcast %12 : vector<64x1xi1> to vector<64x3xi1>
    %14 = vector.broadcast %cst : bf16 to vector<64x3xbf16>
    %15 = arith.select %13, %6, %14 : vector<64x3xi1>, vector<64x3xbf16>
    %c0_7 = arith.constant 0 : index
    %c0_8 = arith.constant 0 : index
    %c0_9 = arith.constant 0 : index
    %16 = vector.load %arg4[%c0_7, %c0_8, %c0_9] : memref<16x3x16xbf16, #tpu.memory_space<vmem>>, vector<1x3x16xbf16>
    %17 = vector.shape_cast %16 : vector<1x3x16xbf16> to vector<3x16xbf16>
    %cst_10 = arith.constant dense<0.000000e+00> : vector<64x16xf32>
    %18 = tpu.matmul %15, %17, %cst_10 {dimension_numbers = #tpu.dot_dimension_numbers<[1], [0], [0], [1], [0, 0, 1, 1], [], []>} : vector<64x3xbf16>, vector<3x16xbf16>, vector<64x16xf32> -> vector<64x16xf32>
    %c0_11 = arith.constant 0 : index
    %c0_12 = arith.constant 0 : index
    %19 = vector.load %arg7[%c0_11, %c0_12] : memref<64x16xf32, #tpu.memory_space<vmem>>, vector<64x16xf32>
    tpu.vector_store %arg7[%c0_11, %c0_12], %18 {strides = array<i32>} : memref<64x16xf32, #tpu.memory_space<vmem>>, vector<64x16xf32>,
    %c0_13 = arith.constant 0 : index
    %c2 = arith.constant 2 : index
    %c0_14 = arith.constant 0 : index
    %c0_15 = arith.constant 0 : index
    %20 = vector.load %arg3[%c0_13, %c2, %c0_14, %c0_15] : memref<1x4x64x3xbf16, #tpu.memory_space<vmem>>, vector<1x1x64x3xbf16>
    %21 = vector.shape_cast %20 : vector<1x1x64x3xbf16> to vector<64x3xbf16>
    %22 = arith.extf %21 : vector<64x3xbf16> to vector<64x3xf32>
    %c8_i32 = arith.constant 8 : i32
    %23 = tpu.dynamic_rotate %22 by %c8_i32 dim 0 : vector<64x3xf32>, i32 -> vector<64x3xf32>
    %24 = arith.truncf %23 : vector<64x3xf32> to vector<64x3xbf16>
    %c1_i32_16 = arith.constant 1 : i32
    %25 = vector.broadcast %c1_i32_16 : i32 to vector<64x1xi32>
    %26 = arith.cmpi sge, %0, %25 : vector<64x1xi32>
    %cst_17 = arith.constant 0.000000e+00 : bf16
    %27 = vector.shape_cast %26 : vector<64x1xi1> to vector<64x1xi1>
    %28 = vector.broadcast %27 : vector<64x1xi1> to vector<64x3xi1>
    %29 = vector.broadcast %cst_17 : bf16 to vector<64x3xbf16>
    %30 = arith.select %28, %24, %29 : vector<64x3xi1>, vector<64x3xbf16>
    %c1 = arith.constant 1 : index
    %c0_18 = arith.constant 0 : index
    %c0_19 = arith.constant 0 : index
    %31 = vector.load %arg4[%c1, %c0_18, %c0_19] : memref<16x3x16xbf16, #tpu.memory_space<vmem>>, vector<1x3x16xbf16>
    %32 = vector.shape_cast %31 : vector<1x3x16xbf16> to vector<3x16xbf16>
    %cst_20 = arith.constant dense<0.000000e+00> : vector<64x16xf32>
    %33 = tpu.matmul %30, %32, %cst_20 {dimension_numbers = #tpu.dot_dimension_numbers<[1], [0], [0], [1], [0, 0, 1, 1], [], []>} : vector<64x3xbf16>, vector<3x16xbf16>, vector<64x16xf32> -> vector<64x16xf32>
    %c0_21 = arith.constant 0 : index
    %c0_22 = arith.constant 0 : index
    %34 = vector.load %arg7[%c0_21, %c0_22] : memref<64x16xf32, #tpu.memory_space<vmem>>, vector<64x16xf32>
    %35 = arith.addf %34, %33 : vector<64x16xf32>
    %c0_23 = arith.constant 0 : index
    %c0_24 = arith.constant 0 : index
    %36 = vector.load %arg7[%c0_23, %c0_24] : memref<64x16xf32, #tpu.memory_space<vmem>>, vector<64x16xf32>
    tpu.vector_store %arg7[%c0_23, %c0_24], %35 {strides = array<i32>} : memref<64x16xf32, #tpu.memory_space<vmem>>, vector<64x16xf32>,
    %c0_25 = arith.constant 0 : index
    %c3_26 = arith.constant 3 : index
    %c0_27 = arith.constant 0 : index
    %c0_28 = arith.constant 0 : index
    %37 = vector.load %arg3[%c0_25, %c3_26, %c0_27, %c0_28] : memref<1x4x64x3xbf16, #tpu.memory_space<vmem>>, vector<1x1x64x3xbf16>
    %38 = vector.shape_cast %37 : vector<1x1x64x3xbf16> to vector<64x3xbf16>
    %39 = arith.extf %38 : vector<64x3xbf16> to vector<64x3xf32>
    %c8_i32_29 = arith.constant 8 : i32
    %40 = tpu.dynamic_rotate %39 by %c8_i32_29 dim 0 : vector<64x3xf32>, i32 -> vector<64x3xf32>
    %41 = arith.truncf %40 : vector<64x3xf32> to vector<64x3xbf16>
    %c1_i32_30 = arith.constant 1 : i32
    %42 = vector.broadcast %c1_i32_30 : i32 to vector<64x1xi32>
    %43 = arith.cmpi sge, %0, %42 : vector<64x1xi32>
    %cst_31 = arith.constant 0.000000e+00 : bf16
    %44 = vector.shape_cast %43 : vector<64x1xi1> to vector<64x1xi1>
    %45 = vector.broadcast %44 : vector<64x1xi1> to vector<64x3xi1>
    %46 = vector.broadcast %cst_31 : bf16 to vector<64x3xbf16>
    %47 = arith.select %45, %41, %46 : vector<64x3xi1>, vector<64x3xbf16>
    %c2_32 = arith.constant 2 : index
    %c0_33 = arith.constant 0 : index
    %c0_34 = arith.constant 0 : index
    %48 = vector.load %arg4[%c2_32, %c0_33, %c0_34] : memref<16x3x16xbf16, #tpu.memory_space<vmem>>, vector<1x3x16xbf16>
    %49 = vector.shape_cast %48 : vector<1x3x16xbf16> to vector<3x16xbf16>
    %cst_35 = arith.constant dense<0.000000e+00> : vector<64x16xf32>
    %50 = tpu.matmul %47, %49, %cst_35 {dimension_numbers = #tpu.dot_dimension_numbers<[1], [0], [0], [1], [0, 0, 1, 1], [], []>} : vector<64x3xbf16>, vector<3x16xbf16>, vector<64x16xf32> -> vector<64x16xf32>
    %c0_36 = arith.constant 0 : index
    %c0_37 = arith.constant 0 : index
    %51 = vector.load %arg7[%c0_36, %c0_37] : memref<64x16xf32, #tpu.memory_space<vmem>>, vector<64x16xf32>
    %52 = arith.addf %51, %50 : vector<64x16xf32>
    %c0_38 = arith.constant 0 : index
    %c0_39 = arith.constant 0 : index
    %53 = vector.load %arg7[%c0_38, %c0_39] : memref<64x16xf32, #tpu.memory_space<vmem>>, vector<64x16xf32>
    tpu.vector_store %arg7[%c0_38, %c0_39], %52 {strides = array<i32>} : memref<64x16xf32, #tpu.memory_space<vmem>>, vector<64x16xf32>,
    %c0_40 = arith.constant 0 : index
    %c2_41 = arith.constant 2 : index
    %c0_42 = arith.constant 0 : index
    %c0_43 = arith.constant 0 : index
    %54 = vector.load %arg3[%c0_40, %c2_41, %c0_42, %c0_43] : memref<1x4x64x3xbf16, #tpu.memory_space<vmem>>, vector<1x1x64x3xbf16>
    %55 = vector.shape_cast %54 : vector<1x1x64x3xbf16> to vector<64x3xbf16>
    %56 = arith.extf %55 : vector<64x3xbf16> to vector<64x3xf32>
    %c7_i32 = arith.constant 7 : i32
    %57 = tpu.dynamic_rotate %56 by %c7_i32 dim 0 : vector<64x3xf32>, i32 -> vector<64x3xf32>
    %58 = arith.truncf %57 : vector<64x3xf32> to vector<64x3xbf16>
    %c1_i32_44 = arith.constant 1 : i32
    %59 = vector.broadcast %c1_i32_44 : i32 to vector<64x1xi32>
    %60 = arith.cmpi sge, %0, %59 : vector<64x1xi32>
    %c7_i32_45 = arith.constant 7 : i32
    %61 = vector.broadcast %c7_i32_45 : i32 to vector<64x1xi32>
    %62 = arith.cmpi slt, %1, %61 : vector<64x1xi32>
    %63 = arith.andi %60, %62 : vector<64x1xi1>
    %cst_46 = arith.constant 0.000000e+00 : bf16
    %64 = vector.shape_cast %63 : vector<64x1xi1> to vector<64x1xi1>
    %65 = vector.broadcast %64 : vector<64x1xi1> to vector<64x3xi1>
    %66 = vector.broadcast %cst_46 : bf16 to vector<64x3xbf16>
    %67 = arith.select %65, %58, %66 : vector<64x3xi1>, vector<64x3xbf16>
    %c3_47 = arith.constant 3 : index
    %c0_48 = arith.constant 0 : index
    %c0_49 = arith.constant 0 : index
    %68 = vector.load %arg4[%c3_47, %c0_48, %c0_49] : memref<16x3x16xbf16, #tpu.memory_space<vmem>>, vector<1x3x16xbf16>
    %69 = vector.shape_cast %68 : vector<1x3x16xbf16> to vector<3x16xbf16>
    %cst_50 = arith.constant dense<0.000000e+00> : vector<64x16xf32>
    %70 = tpu.matmul %67, %69, %cst_50 {dimension_numbers = #tpu.dot_dimension_numbers<[1], [0], [0], [1], [0, 0, 1, 1], [], []>} : vector<64x3xbf16>, vector<3x16xbf16>, vector<64x16xf32> -> vector<64x16xf32>
    %c0_51 = arith.constant 0 : index
    %c0_52 = arith.constant 0 : index
    %71 = vector.load %arg7[%c0_51, %c0_52] : memref<64x16xf32, #tpu.memory_space<vmem>>, vector<64x16xf32>
    %72 = arith.addf %71, %70 : vector<64x16xf32>
    %c0_53 = arith.constant 0 : index
    %c0_54 = arith.constant 0 : index
    %73 = vector.load %arg7[%c0_53, %c0_54] : memref<64x16xf32, #tpu.memory_space<vmem>>, vector<64x16xf32>
    tpu.vector_store %arg7[%c0_53, %c0_54], %72 {strides = array<i32>} : memref<64x16xf32, #tpu.memory_space<vmem>>, vector<64x16xf32>,
    %c0_55 = arith.constant 0 : index
    %c1_56 = arith.constant 1 : index
    %c0_57 = arith.constant 0 : index
    %c0_58 = arith.constant 0 : index
    %74 = vector.load %arg3[%c0_55, %c1_56, %c0_57, %c0_58] : memref<1x4x64x3xbf16, #tpu.memory_space<vmem>>, vector<1x1x64x3xbf16>
    %75 = vector.shape_cast %74 : vector<1x1x64x3xbf16> to vector<64x3xbf16>
    %76 = arith.extf %75 : vector<64x3xbf16> to vector<64x3xf32>
    %c1_i32_59 = arith.constant 1 : i32
    %77 = tpu.dynamic_rotate %76 by %c1_i32_59 dim 0 : vector<64x3xf32>, i32 -> vector<64x3xf32>
    %78 = arith.truncf %77 : vector<64x3xf32> to vector<64x3xbf16>
    %c1_i32_60 = arith.constant 1 : i32
    %79 = vector.broadcast %c1_i32_60 : i32 to vector<64x1xi32>
    %80 = arith.cmpi sge, %1, %79 : vector<64x1xi32>
    %cst_61 = arith.constant 0.000000e+00 : bf16
    %81 = vector.shape_cast %80 : vector<64x1xi1> to vector<64x1xi1>
    %82 = vector.broadcast %81 : vector<64x1xi1> to vector<64x3xi1>
    %83 = vector.broadcast %cst_61 : bf16 to vector<64x3xbf16>
    %84 = arith.select %82, %78, %83 : vector<64x3xi1>, vector<64x3xbf16>
    %c4 = arith.constant 4 : index
    %c0_62 = arith.constant 0 : index
    %c0_63 = arith.constant 0 : index
    %85 = vector.load %arg4[%c4, %c0_62, %c0_63] : memref<16x3x16xbf16, #tpu.memory_space<vmem>>, vector<1x3x16xbf16>
    %86 = vector.shape_cast %85 : vector<1x3x16xbf16> to vector<3x16xbf16>
    %cst_64 = arith.constant dense<0.000000e+00> : vector<64x16xf32>
    %87 = tpu.matmul %84, %86, %cst_64 {dimension_numbers = #tpu.dot_dimension_numbers<[1], [0], [0], [1], [0, 0, 1, 1], [], []>} : vector<64x3xbf16>, vector<3x16xbf16>, vector<64x16xf32> -> vector<64x16xf32>
    %c0_65 = arith.constant 0 : index
    %c0_66 = arith.constant 0 : index
    %88 = vector.load %arg7[%c0_65, %c0_66] : memref<64x16xf32, #tpu.memory_space<vmem>>, vector<64x16xf32>
    %89 = arith.addf %88, %87 : vector<64x16xf32>
    %c0_67 = arith.constant 0 : index
    %c0_68 = arith.constant 0 : index
    %90 = vector.load %arg7[%c0_67, %c0_68] : memref<64x16xf32, #tpu.memory_space<vmem>>, vector<64x16xf32>
    tpu.vector_store %arg7[%c0_67, %c0_68], %89 {strides = array<i32>} : memref<64x16xf32, #tpu.memory_space<vmem>>, vector<64x16xf32>,
    %c0_69 = arith.constant 0 : index
    %c0_70 = arith.constant 0 : index
    %c0_71 = arith.constant 0 : index
    %c0_72 = arith.constant 0 : index
    %91 = vector.load %arg3[%c0_69, %c0_70, %c0_71, %c0_72] : memref<1x4x64x3xbf16, #tpu.memory_space<vmem>>, vector<1x1x64x3xbf16>
    %92 = vector.shape_cast %91 : vector<1x1x64x3xbf16> to vector<64x3xbf16>
    %c5 = arith.constant 5 : index
    %c0_73 = arith.constant 0 : index
    %c0_74 = arith.constant 0 : index
    %93 = vector.load %arg4[%c5, %c0_73, %c0_74] : memref<16x3x16xbf16, #tpu.memory_space<vmem>>, vector<1x3x16xbf16>
    %94 = vector.shape_cast %93 : vector<1x3x16xbf16> to vector<3x16xbf16>
    %cst_75 = arith.constant dense<0.000000e+00> : vector<64x16xf32>
    %95 = tpu.matmul %92, %94, %cst_75 {dimension_numbers = #tpu.dot_dimension_numbers<[1], [0], [0], [1], [0, 0, 1, 1], [], []>} : vector<64x3xbf16>, vector<3x16xbf16>, vector<64x16xf32> -> vector<64x16xf32>
    %c0_76 = arith.constant 0 : index
    %c0_77 = arith.constant 0 : index
    %96 = vector.load %arg7[%c0_76, %c0_77] : memref<64x16xf32, #tpu.memory_space<vmem>>, vector<64x16xf32>
    %97 = arith.addf %96, %95 : vector<64x16xf32>
    %c0_78 = arith.constant 0 : index
    %c0_79 = arith.constant 0 : index
    %98 = vector.load %arg7[%c0_78, %c0_79] : memref<64x16xf32, #tpu.memory_space<vmem>>, vector<64x16xf32>
    tpu.vector_store %arg7[%c0_78, %c0_79], %97 {strides = array<i32>} : memref<64x16xf32, #tpu.memory_space<vmem>>, vector<64x16xf32>,
    %c0_80 = arith.constant 0 : index
    %c1_81 = arith.constant 1 : index
    %c0_82 = arith.constant 0 : index
    %c0_83 = arith.constant 0 : index
    %99 = vector.load %arg3[%c0_80, %c1_81, %c0_82, %c0_83] : memref<1x4x64x3xbf16, #tpu.memory_space<vmem>>, vector<1x1x64x3xbf16>
    %100 = vector.shape_cast %99 : vector<1x1x64x3xbf16> to vector<64x3xbf16>
    %c6 = arith.constant 6 : index
    %c0_84 = arith.constant 0 : index
    %c0_85 = arith.constant 0 : index
    %101 = vector.load %arg4[%c6, %c0_84, %c0_85] : memref<16x3x16xbf16, #tpu.memory_space<vmem>>, vector<1x3x16xbf16>
    %102 = vector.shape_cast %101 : vector<1x3x16xbf16> to vector<3x16xbf16>
    %cst_86 = arith.constant dense<0.000000e+00> : vector<64x16xf32>
    %103 = tpu.matmul %100, %102, %cst_86 {dimension_numbers = #tpu.dot_dimension_numbers<[1], [0], [0], [1], [0, 0, 1, 1], [], []>} : vector<64x3xbf16>, vector<3x16xbf16>, vector<64x16xf32> -> vector<64x16xf32>
    %c0_87 = arith.constant 0 : index
    %c0_88 = arith.constant 0 : index
    %104 = vector.load %arg7[%c0_87, %c0_88] : memref<64x16xf32, #tpu.memory_space<vmem>>, vector<64x16xf32>
    %105 = arith.addf %104, %103 : vector<64x16xf32>
    %c0_89 = arith.constant 0 : index
    %c0_90 = arith.constant 0 : index
    %106 = vector.load %arg7[%c0_89, %c0_90] : memref<64x16xf32, #tpu.memory_space<vmem>>, vector<64x16xf32>
    tpu.vector_store %arg7[%c0_89, %c0_90], %105 {strides = array<i32>} : memref<64x16xf32, #tpu.memory_space<vmem>>, vector<64x16xf32>,
    %c0_91 = arith.constant 0 : index
    %c0_92 = arith.constant 0 : index
    %c0_93 = arith.constant 0 : index
    %c0_94 = arith.constant 0 : index
    %107 = vector.load %arg3[%c0_91, %c0_92, %c0_93, %c0_94] : memref<1x4x64x3xbf16, #tpu.memory_space<vmem>>, vector<1x1x64x3xbf16>
    %108 = vector.shape_cast %107 : vector<1x1x64x3xbf16> to vector<64x3xbf16>
    %109 = arith.extf %108 : vector<64x3xbf16> to vector<64x3xf32>
    %c63_i32 = arith.constant 63 : i32
    %110 = tpu.dynamic_rotate %109 by %c63_i32 dim 0 : vector<64x3xf32>, i32 -> vector<64x3xf32>
    %111 = arith.truncf %110 : vector<64x3xf32> to vector<64x3xbf16>
    %c7_i32_95 = arith.constant 7 : i32
    %112 = vector.broadcast %c7_i32_95 : i32 to vector<64x1xi32>
    %113 = arith.cmpi slt, %1, %112 : vector<64x1xi32>
    %cst_96 = arith.constant 0.000000e+00 : bf16
    %114 = vector.shape_cast %113 : vector<64x1xi1> to vector<64x1xi1>
    %115 = vector.broadcast %114 : vector<64x1xi1> to vector<64x3xi1>
    %116 = vector.broadcast %cst_96 : bf16 to vector<64x3xbf16>
    %117 = arith.select %115, %111, %116 : vector<64x3xi1>, vector<64x3xbf16>
    %c7 = arith.constant 7 : index
    %c0_97 = arith.constant 0 : index
    %c0_98 = arith.constant 0 : index
    %118 = vector.load %arg4[%c7, %c0_97, %c0_98] : memref<16x3x16xbf16, #tpu.memory_space<vmem>>, vector<1x3x16xbf16>
    %119 = vector.shape_cast %118 : vector<1x3x16xbf16> to vector<3x16xbf16>
    %cst_99 = arith.constant dense<0.000000e+00> : vector<64x16xf32>
    %120 = tpu.matmul %117, %119, %cst_99 {dimension_numbers = #tpu.dot_dimension_numbers<[1], [0], [0], [1], [0, 0, 1, 1], [], []>} : vector<64x3xbf16>, vector<3x16xbf16>, vector<64x16xf32> -> vector<64x16xf32>
    %c0_100 = arith.constant 0 : index
    %c0_101 = arith.constant 0 : index
    %121 = vector.load %arg7[%c0_100, %c0_101] : memref<64x16xf32, #tpu.memory_space<vmem>>, vector<64x16xf32>
    %122 = arith.addf %121, %120 : vector<64x16xf32>
    %c0_102 = arith.constant 0 : index
    %c0_103 = arith.constant 0 : index
    %123 = vector.load %arg7[%c0_102, %c0_103] : memref<64x16xf32, #tpu.memory_space<vmem>>, vector<64x16xf32>
    tpu.vector_store %arg7[%c0_102, %c0_103], %122 {strides = array<i32>} : memref<64x16xf32, #tpu.memory_space<vmem>>, vector<64x16xf32>,
    %c0_104 = arith.constant 0 : index
    %c3_105 = arith.constant 3 : index
    %c0_106 = arith.constant 0 : index
    %c0_107 = arith.constant 0 : index
    %124 = vector.load %arg3[%c0_104, %c3_105, %c0_106, %c0_107] : memref<1x4x64x3xbf16, #tpu.memory_space<vmem>>, vector<1x1x64x3xbf16>
    %125 = vector.shape_cast %124 : vector<1x1x64x3xbf16> to vector<64x3xbf16>
    %126 = arith.extf %125 : vector<64x3xbf16> to vector<64x3xf32>
    %c1_i32_108 = arith.constant 1 : i32
    %127 = tpu.dynamic_rotate %126 by %c1_i32_108 dim 0 : vector<64x3xf32>, i32 -> vector<64x3xf32>
    %128 = arith.truncf %127 : vector<64x3xf32> to vector<64x3xbf16>
    %c1_i32_109 = arith.constant 1 : i32
    %129 = vector.broadcast %c1_i32_109 : i32 to vector<64x1xi32>
    %130 = arith.cmpi sge, %1, %129 : vector<64x1xi32>
    %cst_110 = arith.constant 0.000000e+00 : bf16
    %131 = vector.shape_cast %130 : vector<64x1xi1> to vector<64x1xi1>
    %132 = vector.broadcast %131 : vector<64x1xi1> to vector<64x3xi1>
    %133 = vector.broadcast %cst_110 : bf16 to vector<64x3xbf16>
    %134 = arith.select %132, %128, %133 : vector<64x3xi1>, vector<64x3xbf16>
    %c8 = arith.constant 8 : index
    %c0_111 = arith.constant 0 : index
    %c0_112 = arith.constant 0 : index
    %135 = vector.load %arg4[%c8, %c0_111, %c0_112] : memref<16x3x16xbf16, #tpu.memory_space<vmem>>, vector<1x3x16xbf16>
    %136 = vector.shape_cast %135 : vector<1x3x16xbf16> to vector<3x16xbf16>
    %cst_113 = arith.constant dense<0.000000e+00> : vector<64x16xf32>
    %137 = tpu.matmul %134, %136, %cst_113 {dimension_numbers = #tpu.dot_dimension_numbers<[1], [0], [0], [1], [0, 0, 1, 1], [], []>} : vector<64x3xbf16>, vector<3x16xbf16>, vector<64x16xf32> -> vector<64x16xf32>
    %c0_114 = arith.constant 0 : index
    %c0_115 = arith.constant 0 : index
    %138 = vector.load %arg7[%c0_114, %c0_115] : memref<64x16xf32, #tpu.memory_space<vmem>>, vector<64x16xf32>
    %139 = arith.addf %138, %137 : vector<64x16xf32>
    %c0_116 = arith.constant 0 : index
    %c0_117 = arith.constant 0 : index
    %140 = vector.load %arg7[%c0_116, %c0_117] : memref<64x16xf32, #tpu.memory_space<vmem>>, vector<64x16xf32>
    tpu.vector_store %arg7[%c0_116, %c0_117], %139 {strides = array<i32>} : memref<64x16xf32, #tpu.memory_space<vmem>>, vector<64x16xf32>,
    %c0_118 = arith.constant 0 : index
    %c2_119 = arith.constant 2 : index
    %c0_120 = arith.constant 0 : index
    %c0_121 = arith.constant 0 : index
    %141 = vector.load %arg3[%c0_118, %c2_119, %c0_120, %c0_121] : memref<1x4x64x3xbf16, #tpu.memory_space<vmem>>, vector<1x1x64x3xbf16>
    %142 = vector.shape_cast %141 : vector<1x1x64x3xbf16> to vector<64x3xbf16>
    %c9 = arith.constant 9 : index
    %c0_122 = arith.constant 0 : index
    %c0_123 = arith.constant 0 : index
    %143 = vector.load %arg4[%c9, %c0_122, %c0_123] : memref<16x3x16xbf16, #tpu.memory_space<vmem>>, vector<1x3x16xbf16>
    %144 = vector.shape_cast %143 : vector<1x3x16xbf16> to vector<3x16xbf16>
    %cst_124 = arith.constant dense<0.000000e+00> : vector<64x16xf32>
    %145 = tpu.matmul %142, %144, %cst_124 {dimension_numbers = #tpu.dot_dimension_numbers<[1], [0], [0], [1], [0, 0, 1, 1], [], []>} : vector<64x3xbf16>, vector<3x16xbf16>, vector<64x16xf32> -> vector<64x16xf32>
    %c0_125 = arith.constant 0 : index
    %c0_126 = arith.constant 0 : index
    %146 = vector.load %arg7[%c0_125, %c0_126] : memref<64x16xf32, #tpu.memory_space<vmem>>, vector<64x16xf32>
    %147 = arith.addf %146, %145 : vector<64x16xf32>
    %c0_127 = arith.constant 0 : index
    %c0_128 = arith.constant 0 : index
    %148 = vector.load %arg7[%c0_127, %c0_128] : memref<64x16xf32, #tpu.memory_space<vmem>>, vector<64x16xf32>
    tpu.vector_store %arg7[%c0_127, %c0_128], %147 {strides = array<i32>} : memref<64x16xf32, #tpu.memory_space<vmem>>, vector<64x16xf32>,
    %c0_129 = arith.constant 0 : index
    %c3_130 = arith.constant 3 : index
    %c0_131 = arith.constant 0 : index
    %c0_132 = arith.constant 0 : index
    %149 = vector.load %arg3[%c0_129, %c3_130, %c0_131, %c0_132] : memref<1x4x64x3xbf16, #tpu.memory_space<vmem>>, vector<1x1x64x3xbf16>
    %150 = vector.shape_cast %149 : vector<1x1x64x3xbf16> to vector<64x3xbf16>
    %c10 = arith.constant 10 : index
    %c0_133 = arith.constant 0 : index
    %c0_134 = arith.constant 0 : index
    %151 = vector.load %arg4[%c10, %c0_133, %c0_134] : memref<16x3x16xbf16, #tpu.memory_space<vmem>>, vector<1x3x16xbf16>
    %152 = vector.shape_cast %151 : vector<1x3x16xbf16> to vector<3x16xbf16>
    %cst_135 = arith.constant dense<0.000000e+00> : vector<64x16xf32>
    %153 = tpu.matmul %150, %152, %cst_135 {dimension_numbers = #tpu.dot_dimension_numbers<[1], [0], [0], [1], [0, 0, 1, 1], [], []>} : vector<64x3xbf16>, vector<3x16xbf16>, vector<64x16xf32> -> vector<64x16xf32>
    %c0_136 = arith.constant 0 : index
    %c0_137 = arith.constant 0 : index
    %154 = vector.load %arg7[%c0_136, %c0_137] : memref<64x16xf32, #tpu.memory_space<vmem>>, vector<64x16xf32>
    %155 = arith.addf %154, %153 : vector<64x16xf32>
    %c0_138 = arith.constant 0 : index
    %c0_139 = arith.constant 0 : index
    %156 = vector.load %arg7[%c0_138, %c0_139] : memref<64x16xf32, #tpu.memory_space<vmem>>, vector<64x16xf32>
    tpu.vector_store %arg7[%c0_138, %c0_139], %155 {strides = array<i32>} : memref<64x16xf32, #tpu.memory_space<vmem>>, vector<64x16xf32>,
    %c0_140 = arith.constant 0 : index
    %c2_141 = arith.constant 2 : index
    %c0_142 = arith.constant 0 : index
    %c0_143 = arith.constant 0 : index
    %157 = vector.load %arg3[%c0_140, %c2_141, %c0_142, %c0_143] : memref<1x4x64x3xbf16, #tpu.memory_space<vmem>>, vector<1x1x64x3xbf16>
    %158 = vector.shape_cast %157 : vector<1x1x64x3xbf16> to vector<64x3xbf16>
    %159 = arith.extf %158 : vector<64x3xbf16> to vector<64x3xf32>
    %c63_i32_144 = arith.constant 63 : i32
    %160 = tpu.dynamic_rotate %159 by %c63_i32_144 dim 0 : vector<64x3xf32>, i32 -> vector<64x3xf32>
    %161 = arith.truncf %160 : vector<64x3xf32> to vector<64x3xbf16>
    %c7_i32_145 = arith.constant 7 : i32
    %162 = vector.broadcast %c7_i32_145 : i32 to vector<64x1xi32>
    %163 = arith.cmpi slt, %1, %162 : vector<64x1xi32>
    %cst_146 = arith.constant 0.000000e+00 : bf16
    %164 = vector.shape_cast %163 : vector<64x1xi1> to vector<64x1xi1>
    %165 = vector.broadcast %164 : vector<64x1xi1> to vector<64x3xi1>
    %166 = vector.broadcast %cst_146 : bf16 to vector<64x3xbf16>
    %167 = arith.select %165, %161, %166 : vector<64x3xi1>, vector<64x3xbf16>
    %c11 = arith.constant 11 : index
    %c0_147 = arith.constant 0 : index
    %c0_148 = arith.constant 0 : index
    %168 = vector.load %arg4[%c11, %c0_147, %c0_148] : memref<16x3x16xbf16, #tpu.memory_space<vmem>>, vector<1x3x16xbf16>
    %169 = vector.shape_cast %168 : vector<1x3x16xbf16> to vector<3x16xbf16>
    %cst_149 = arith.constant dense<0.000000e+00> : vector<64x16xf32>
    %170 = tpu.matmul %167, %169, %cst_149 {dimension_numbers = #tpu.dot_dimension_numbers<[1], [0], [0], [1], [0, 0, 1, 1], [], []>} : vector<64x3xbf16>, vector<3x16xbf16>, vector<64x16xf32> -> vector<64x16xf32>
    %c0_150 = arith.constant 0 : index
    %c0_151 = arith.constant 0 : index
    %171 = vector.load %arg7[%c0_150, %c0_151] : memref<64x16xf32, #tpu.memory_space<vmem>>, vector<64x16xf32>
    %172 = arith.addf %171, %170 : vector<64x16xf32>
    %c0_152 = arith.constant 0 : index
    %c0_153 = arith.constant 0 : index
    %173 = vector.load %arg7[%c0_152, %c0_153] : memref<64x16xf32, #tpu.memory_space<vmem>>, vector<64x16xf32>
    tpu.vector_store %arg7[%c0_152, %c0_153], %172 {strides = array<i32>} : memref<64x16xf32, #tpu.memory_space<vmem>>, vector<64x16xf32>,
    %c0_154 = arith.constant 0 : index
    %c1_155 = arith.constant 1 : index
    %c0_156 = arith.constant 0 : index
    %c0_157 = arith.constant 0 : index
    %174 = vector.load %arg3[%c0_154, %c1_155, %c0_156, %c0_157] : memref<1x4x64x3xbf16, #tpu.memory_space<vmem>>, vector<1x1x64x3xbf16>
    %175 = vector.shape_cast %174 : vector<1x1x64x3xbf16> to vector<64x3xbf16>
    %176 = arith.extf %175 : vector<64x3xbf16> to vector<64x3xf32>
    %c57_i32 = arith.constant 57 : i32
    %177 = tpu.dynamic_rotate %176 by %c57_i32 dim 0 : vector<64x3xf32>, i32 -> vector<64x3xf32>
    %178 = arith.truncf %177 : vector<64x3xf32> to vector<64x3xbf16>
    %c7_i32_158 = arith.constant 7 : i32
    %179 = vector.broadcast %c7_i32_158 : i32 to vector<64x1xi32>
    %180 = arith.cmpi slt, %0, %179 : vector<64x1xi32>
    %c1_i32_159 = arith.constant 1 : i32
    %181 = vector.broadcast %c1_i32_159 : i32 to vector<64x1xi32>
    %182 = arith.cmpi sge, %1, %181 : vector<64x1xi32>
    %183 = arith.andi %180, %182 : vector<64x1xi1>
    %cst_160 = arith.constant 0.000000e+00 : bf16
    %184 = vector.shape_cast %183 : vector<64x1xi1> to vector<64x1xi1>
    %185 = vector.broadcast %184 : vector<64x1xi1> to vector<64x3xi1>
    %186 = vector.broadcast %cst_160 : bf16 to vector<64x3xbf16>
    %187 = arith.select %185, %178, %186 : vector<64x3xi1>, vector<64x3xbf16>
    %c12 = arith.constant 12 : index
    %c0_161 = arith.constant 0 : index
    %c0_162 = arith.constant 0 : index
    %188 = vector.load %arg4[%c12, %c0_161, %c0_162] : memref<16x3x16xbf16, #tpu.memory_space<vmem>>, vector<1x3x16xbf16>
    %189 = vector.shape_cast %188 : vector<1x3x16xbf16> to vector<3x16xbf16>
    %cst_163 = arith.constant dense<0.000000e+00> : vector<64x16xf32>
    %190 = tpu.matmul %187, %189, %cst_163 {dimension_numbers = #tpu.dot_dimension_numbers<[1], [0], [0], [1], [0, 0, 1, 1], [], []>} : vector<64x3xbf16>, vector<3x16xbf16>, vector<64x16xf32> -> vector<64x16xf32>
    %c0_164 = arith.constant 0 : index
    %c0_165 = arith.constant 0 : index
    %191 = vector.load %arg7[%c0_164, %c0_165] : memref<64x16xf32, #tpu.memory_space<vmem>>, vector<64x16xf32>
    %192 = arith.addf %191, %190 : vector<64x16xf32>
    %c0_166 = arith.constant 0 : index
    %c0_167 = arith.constant 0 : index
    %193 = vector.load %arg7[%c0_166, %c0_167] : memref<64x16xf32, #tpu.memory_space<vmem>>, vector<64x16xf32>
    tpu.vector_store %arg7[%c0_166, %c0_167], %192 {strides = array<i32>} : memref<64x16xf32, #tpu.memory_space<vmem>>, vector<64x16xf32>,
    %c0_168 = arith.constant 0 : index
    %c0_169 = arith.constant 0 : index
    %c0_170 = arith.constant 0 : index
    %c0_171 = arith.constant 0 : index
    %194 = vector.load %arg3[%c0_168, %c0_169, %c0_170, %c0_171] : memref<1x4x64x3xbf16, #tpu.memory_space<vmem>>, vector<1x1x64x3xbf16>
    %195 = vector.shape_cast %194 : vector<1x1x64x3xbf16> to vector<64x3xbf16>
    %196 = arith.extf %195 : vector<64x3xbf16> to vector<64x3xf32>
    %c56_i32 = arith.constant 56 : i32
    %197 = tpu.dynamic_rotate %196 by %c56_i32 dim 0 : vector<64x3xf32>, i32 -> vector<64x3xf32>
    %198 = arith.truncf %197 : vector<64x3xf32> to vector<64x3xbf16>
    %c7_i32_172 = arith.constant 7 : i32
    %199 = vector.broadcast %c7_i32_172 : i32 to vector<64x1xi32>
    %200 = arith.cmpi slt, %0, %199 : vector<64x1xi32>
    %cst_173 = arith.constant 0.000000e+00 : bf16
    %201 = vector.shape_cast %200 : vector<64x1xi1> to vector<64x1xi1>
    %202 = vector.broadcast %201 : vector<64x1xi1> to vector<64x3xi1>
    %203 = vector.broadcast %cst_173 : bf16 to vector<64x3xbf16>
    %204 = arith.select %202, %198, %203 : vector<64x3xi1>, vector<64x3xbf16>
    %c13 = arith.constant 13 : index
    %c0_174 = arith.constant 0 : index
    %c0_175 = arith.constant 0 : index
    %205 = vector.load %arg4[%c13, %c0_174, %c0_175] : memref<16x3x16xbf16, #tpu.memory_space<vmem>>, vector<1x3x16xbf16>
    %206 = vector.shape_cast %205 : vector<1x3x16xbf16> to vector<3x16xbf16>
    %cst_176 = arith.constant dense<0.000000e+00> : vector<64x16xf32>
    %207 = tpu.matmul %204, %206, %cst_176 {dimension_numbers = #tpu.dot_dimension_numbers<[1], [0], [0], [1], [0, 0, 1, 1], [], []>} : vector<64x3xbf16>, vector<3x16xbf16>, vector<64x16xf32> -> vector<64x16xf32>
    %c0_177 = arith.constant 0 : index
    %c0_178 = arith.constant 0 : index
    %208 = vector.load %arg7[%c0_177, %c0_178] : memref<64x16xf32, #tpu.memory_space<vmem>>, vector<64x16xf32>
    %209 = arith.addf %208, %207 : vector<64x16xf32>
    %c0_179 = arith.constant 0 : index
    %c0_180 = arith.constant 0 : index
    %210 = vector.load %arg7[%c0_179, %c0_180] : memref<64x16xf32, #tpu.memory_space<vmem>>, vector<64x16xf32>
    tpu.vector_store %arg7[%c0_179, %c0_180], %209 {strides = array<i32>} : memref<64x16xf32, #tpu.memory_space<vmem>>, vector<64x16xf32>,
    %c0_181 = arith.constant 0 : index
    %c1_182 = arith.constant 1 : index
    %c0_183 = arith.constant 0 : index
    %c0_184 = arith.constant 0 : index
    %211 = vector.load %arg3[%c0_181, %c1_182, %c0_183, %c0_184] : memref<1x4x64x3xbf16, #tpu.memory_space<vmem>>, vector<1x1x64x3xbf16>
    %212 = vector.shape_cast %211 : vector<1x1x64x3xbf16> to vector<64x3xbf16>
    %213 = arith.extf %212 : vector<64x3xbf16> to vector<64x3xf32>
    %c56_i32_185 = arith.constant 56 : i32
    %214 = tpu.dynamic_rotate %213 by %c56_i32_185 dim 0 : vector<64x3xf32>, i32 -> vector<64x3xf32>
    %215 = arith.truncf %214 : vector<64x3xf32> to vector<64x3xbf16>
    %c7_i32_186 = arith.constant 7 : i32
    %216 = vector.broadcast %c7_i32_186 : i32 to vector<64x1xi32>
    %217 = arith.cmpi slt, %0, %216 : vector<64x1xi32>
    %cst_187 = arith.constant 0.000000e+00 : bf16
    %218 = vector.shape_cast %217 : vector<64x1xi1> to vector<64x1xi1>
    %219 = vector.broadcast %218 : vector<64x1xi1> to vector<64x3xi1>
    %220 = vector.broadcast %cst_187 : bf16 to vector<64x3xbf16>
    %221 = arith.select %219, %215, %220 : vector<64x3xi1>, vector<64x3xbf16>
    %c14 = arith.constant 14 : index
    %c0_188 = arith.constant 0 : index
    %c0_189 = arith.constant 0 : index
    %222 = vector.load %arg4[%c14, %c0_188, %c0_189] : memref<16x3x16xbf16, #tpu.memory_space<vmem>>, vector<1x3x16xbf16>
    %223 = vector.shape_cast %222 : vector<1x3x16xbf16> to vector<3x16xbf16>
    %cst_190 = arith.constant dense<0.000000e+00> : vector<64x16xf32>
    %224 = tpu.matmul %221, %223, %cst_190 {dimension_numbers = #tpu.dot_dimension_numbers<[1], [0], [0], [1], [0, 0, 1, 1], [], []>} : vector<64x3xbf16>, vector<3x16xbf16>, vector<64x16xf32> -> vector<64x16xf32>
    %c0_191 = arith.constant 0 : index
    %c0_192 = arith.constant 0 : index
    %225 = vector.load %arg7[%c0_191, %c0_192] : memref<64x16xf32, #tpu.memory_space<vmem>>, vector<64x16xf32>
    %226 = arith.addf %225, %224 : vector<64x16xf32>
    %c0_193 = arith.constant 0 : index
    %c0_194 = arith.constant 0 : index
    %227 = vector.load %arg7[%c0_193, %c0_194] : memref<64x16xf32, #tpu.memory_space<vmem>>, vector<64x16xf32>
    tpu.vector_store %arg7[%c0_193, %c0_194], %226 {strides = array<i32>} : memref<64x16xf32, #tpu.memory_space<vmem>>, vector<64x16xf32>,
    %c0_195 = arith.constant 0 : index
    %c0_196 = arith.constant 0 : index
    %c0_197 = arith.constant 0 : index
    %c0_198 = arith.constant 0 : index
    %228 = vector.load %arg3[%c0_195, %c0_196, %c0_197, %c0_198] : memref<1x4x64x3xbf16, #tpu.memory_space<vmem>>, vector<1x1x64x3xbf16>
    %229 = vector.shape_cast %228 : vector<1x1x64x3xbf16> to vector<64x3xbf16>
    %230 = arith.extf %229 : vector<64x3xbf16> to vector<64x3xf32>
    %c55_i32 = arith.constant 55 : i32
    %231 = tpu.dynamic_rotate %230 by %c55_i32 dim 0 : vector<64x3xf32>, i32 -> vector<64x3xf32>
    %232 = arith.truncf %231 : vector<64x3xf32> to vector<64x3xbf16>
    %c7_i32_199 = arith.constant 7 : i32
    %233 = vector.broadcast %c7_i32_199 : i32 to vector<64x1xi32>
    %234 = arith.cmpi slt, %0, %233 : vector<64x1xi32>
    %c7_i32_200 = arith.constant 7 : i32
    %235 = vector.broadcast %c7_i32_200 : i32 to vector<64x1xi32>
    %236 = arith.cmpi slt, %1, %235 : vector<64x1xi32>
    %237 = arith.andi %234, %236 : vector<64x1xi1>
    %cst_201 = arith.constant 0.000000e+00 : bf16
    %238 = vector.shape_cast %237 : vector<64x1xi1> to vector<64x1xi1>
    %239 = vector.broadcast %238 : vector<64x1xi1> to vector<64x3xi1>
    %240 = vector.broadcast %cst_201 : bf16 to vector<64x3xbf16>
    %241 = arith.select %239, %232, %240 : vector<64x3xi1>, vector<64x3xbf16>
    %c15 = arith.constant 15 : index
    %c0_202 = arith.constant 0 : index
    %c0_203 = arith.constant 0 : index
    %242 = vector.load %arg4[%c15, %c0_202, %c0_203] : memref<16x3x16xbf16, #tpu.memory_space<vmem>>, vector<1x3x16xbf16>
    %243 = vector.shape_cast %242 : vector<1x3x16xbf16> to vector<3x16xbf16>
    %cst_204 = arith.constant dense<0.000000e+00> : vector<64x16xf32>
    %244 = tpu.matmul %241, %243, %cst_204 {dimension_numbers = #tpu.dot_dimension_numbers<[1], [0], [0], [1], [0, 0, 1, 1], [], []>} : vector<64x3xbf16>, vector<3x16xbf16>, vector<64x16xf32> -> vector<64x16xf32>
    %c0_205 = arith.constant 0 : index
    %c0_206 = arith.constant 0 : index
    %245 = vector.load %arg7[%c0_205, %c0_206] : memref<64x16xf32, #tpu.memory_space<vmem>>, vector<64x16xf32>
    %246 = arith.addf %245, %244 : vector<64x16xf32>
    %c0_207 = arith.constant 0 : index
    %c0_208 = arith.constant 0 : index
    %247 = vector.load %arg7[%c0_207, %c0_208] : memref<64x16xf32, #tpu.memory_space<vmem>>, vector<64x16xf32>
    tpu.vector_store %arg7[%c0_207, %c0_208], %246 {strides = array<i32>} : memref<64x16xf32, #tpu.memory_space<vmem>>, vector<64x16xf32>,
    %c0_209 = arith.constant 0 : index
    %c0_210 = arith.constant 0 : index
    %248 = vector.load %arg7[%c0_209, %c0_210] : memref<64x16xf32, #tpu.memory_space<vmem>>, vector<64x16xf32>
    %c0_211 = arith.constant 0 : index
    %c0_212 = arith.constant 0 : index
    %249 = vector.load %arg5[%c0_211, %c0_212] : memref<1x16xf32, #tpu.memory_space<vmem>>, vector<1x16xf32>
    %250 = vector.broadcast %249 : vector<1x16xf32> to vector<64x16xf32>
    %251 = arith.addf %248, %250 : vector<64x16xf32>
    %cst_213 = arith.constant 0.000000e+00 : f32
    %252 = vector.broadcast %cst_213 : f32 to vector<64x16xf32>
    %253 = arith.maximumf %251, %252 : vector<64x16xf32>
    %254 = arith.truncf %253 : vector<64x16xf32> to vector<64x16xbf16>
    %c0_214 = arith.constant 0 : index
    %c0_215 = arith.constant 0 : index
    %c0_216 = arith.constant 0 : index
    %255 = vector.load %arg6[%c0_214, %c0_215, %c0_216] : memref<1x64x16xbf16, #tpu.memory_space<vmem>>, vector<1x64x16xbf16>
    %256 = vector.shape_cast %255 : vector<1x64x16xbf16> to vector<64x16xbf16>
    %257 = vector.shape_cast %254 : vector<64x16xbf16> to vector<1x64x16xbf16>
    tpu.vector_store %arg6[%c0_214, %c0_215, %c0_216], %257 {strides = array<i32>} : memref<1x64x16xbf16, #tpu.memory_space<vmem>>, vector<1x64x16xbf16>,
    return
  }
  func.func @transform_0(%arg0: i32) -> (i32, i32) {
    %c0_i32 = arith.constant 0 : i32
    %c0_i32_0 = arith.constant 0 : i32
    %c0_i32_1 = arith.constant 0 : i32
    return %c0_i32, %c0_i32_0 : i32, i32
  }
  func.func @transform_1(%arg0: i32) -> (i32, i32) {
    %c0_i32 = arith.constant 0 : i32
    %c0_i32_0 = arith.constant 0 : i32
    %c0_i32_1 = arith.constant 0 : i32
    return %c0_i32, %c0_i32_0 : i32, i32
  }
  func.func @transform_2(%arg0: i32) -> (i32, i32, i32, i32) {
    %c0_i32 = arith.constant 0 : i32
    %c0_i32_0 = arith.constant 0 : i32
    %c0_i32_1 = arith.constant 0 : i32
    %c0_i32_2 = arith.constant 0 : i32
    return %arg0, %c0_i32, %c0_i32_0, %c0_i32_1 : i32, i32, i32, i32
  }
  func.func @transform_3(%arg0: i32) -> (i32, i32, i32) {
    %c0_i32 = arith.constant 0 : i32
    %c0_i32_0 = arith.constant 0 : i32
    %c0_i32_1 = arith.constant 0 : i32
    %c0_i32_2 = arith.constant 0 : i32
    return %c0_i32, %c0_i32_0, %c0_i32_1 : i32, i32, i32
  }
  func.func @transform_4(%arg0: i32) -> (i32, i32) {
    %c0_i32 = arith.constant 0 : i32
    %c0_i32_0 = arith.constant 0 : i32
    %c0_i32_1 = arith.constant 0 : i32
    return %c0_i32, %c0_i32_0 : i32, i32
  }
  func.func @transform_5(%arg0: i32) -> (i32, i32, i32) {
    %c0_i32 = arith.constant 0 : i32
    %c0_i32_0 = arith.constant 0 : i32
    %c0_i32_1 = arith.constant 0 : i32
    return %arg0, %c0_i32, %c0_i32_0 : i32, i32, i32
  }
}

module attributes {stable_mosaic.version = 11 : i64} {
  func.func @kernel(%arg0: i32, %arg1: memref<16x1xi32, #tpu.memory_space<vmem>>, %arg2: memref<16x1xi32, #tpu.memory_space<vmem>>, %arg3: memref<1x4x16x16xbf16, #tpu.memory_space<vmem>>, %arg4: memref<16x16x32xbf16, #tpu.memory_space<vmem>>, %arg5: memref<1x32xf32, #tpu.memory_space<vmem>>, %arg6: memref<1x16x32xbf16, #tpu.memory_space<vmem>>, %arg7: memref<16x32xf32, #tpu.memory_space<vmem>>) attributes {dimension_semantics = [#tpu.dimension_semantics<parallel>], iteration_bounds = array<i64: 2>, scalar_prefetch = 0 : i64, scratch_operands = 1 : i64, tpu.core_type = #tpu.core_type<tc>, window_params = [{pipeline_mode = #tpu.pipeline_mode<synchronous>, transform_indices = @transform_0, window_bounds = array<i64: 16, 1>}, {pipeline_mode = #tpu.pipeline_mode<synchronous>, transform_indices = @transform_1, window_bounds = array<i64: 16, 1>}, {transform_indices = @transform_2, window_bounds = array<i64: 1, 4, 16, 16>}, {pipeline_mode = #tpu.pipeline_mode<synchronous>, transform_indices = @transform_3, window_bounds = array<i64: 16, 16, 32>}, {pipeline_mode = #tpu.pipeline_mode<synchronous>, transform_indices = @transform_4, window_bounds = array<i64: 1, 32>}, {transform_indices = @transform_5, window_bounds = array<i64: 1, 16, 32>}]} {
    %c0 = arith.constant 0 : index
    %c0_0 = arith.constant 0 : index
    %0 = vector.load %arg1[%c0, %c0_0] : memref<16x1xi32, #tpu.memory_space<vmem>>, vector<16x1xi32>
    %c0_1 = arith.constant 0 : index
    %c0_2 = arith.constant 0 : index
    %1 = vector.load %arg2[%c0_1, %c0_2] : memref<16x1xi32, #tpu.memory_space<vmem>>, vector<16x1xi32>
    %c0_3 = arith.constant 0 : index
    %c3 = arith.constant 3 : index
    %c0_4 = arith.constant 0 : index
    %c0_5 = arith.constant 0 : index
    %2 = vector.load %arg3[%c0_3, %c3, %c0_4, %c0_5] : memref<1x4x16x16xbf16, #tpu.memory_space<vmem>>, vector<1x1x16x16xbf16>
    %3 = vector.shape_cast %2 : vector<1x1x16x16xbf16> to vector<16x16xbf16>
    %4 = arith.extf %3 : vector<16x16xbf16> to vector<16x16xf32>
    %c5_i32 = arith.constant 5 : i32
    %5 = tpu.dynamic_rotate %4 by %c5_i32 dim 0 : vector<16x16xf32>, i32 -> vector<16x16xf32>
    %6 = arith.truncf %5 : vector<16x16xf32> to vector<16x16xbf16>
    %c1_i32 = arith.constant 1 : i32
    %7 = vector.broadcast %c1_i32 : i32 to vector<16x1xi32>
    %8 = arith.cmpi sge, %0, %7 : vector<16x1xi32>
    %c1_i32_6 = arith.constant 1 : i32
    %9 = vector.broadcast %c1_i32_6 : i32 to vector<16x1xi32>
    %10 = arith.cmpi sge, %1, %9 : vector<16x1xi32>
    %11 = arith.andi %8, %10 : vector<16x1xi1>
    %cst = arith.constant 0.000000e+00 : bf16
    %12 = vector.shape_cast %11 : vector<16x1xi1> to vector<16x1xi1>
    %13 = vector.broadcast %12 : vector<16x1xi1> to vector<16x16xi1>
    %14 = vector.broadcast %cst : bf16 to vector<16x16xbf16>
    %15 = arith.select %13, %6, %14 : vector<16x16xi1>, vector<16x16xbf16>
    %c0_7 = arith.constant 0 : index
    %c0_8 = arith.constant 0 : index
    %c0_9 = arith.constant 0 : index
    %16 = vector.load %arg4[%c0_7, %c0_8, %c0_9] : memref<16x16x32xbf16, #tpu.memory_space<vmem>>, vector<1x16x32xbf16>
    %17 = vector.shape_cast %16 : vector<1x16x32xbf16> to vector<16x32xbf16>
    %cst_10 = arith.constant dense<0.000000e+00> : vector<16x32xf32>
    %18 = tpu.matmul %15, %17, %cst_10 {dimension_numbers = #tpu.dot_dimension_numbers<[1], [0], [0], [1], [0, 0, 1, 1], [], []>} : vector<16x16xbf16>, vector<16x32xbf16>, vector<16x32xf32> -> vector<16x32xf32>
    %c0_11 = arith.constant 0 : index
    %c0_12 = arith.constant 0 : index
    %19 = vector.load %arg7[%c0_11, %c0_12] : memref<16x32xf32, #tpu.memory_space<vmem>>, vector<16x32xf32>
    tpu.vector_store %arg7[%c0_11, %c0_12], %18 {strides = array<i32>} : memref<16x32xf32, #tpu.memory_space<vmem>>, vector<16x32xf32>,
    %c0_13 = arith.constant 0 : index
    %c2 = arith.constant 2 : index
    %c0_14 = arith.constant 0 : index
    %c0_15 = arith.constant 0 : index
    %20 = vector.load %arg3[%c0_13, %c2, %c0_14, %c0_15] : memref<1x4x16x16xbf16, #tpu.memory_space<vmem>>, vector<1x1x16x16xbf16>
    %21 = vector.shape_cast %20 : vector<1x1x16x16xbf16> to vector<16x16xbf16>
    %22 = arith.extf %21 : vector<16x16xbf16> to vector<16x16xf32>
    %c4_i32 = arith.constant 4 : i32
    %23 = tpu.dynamic_rotate %22 by %c4_i32 dim 0 : vector<16x16xf32>, i32 -> vector<16x16xf32>
    %24 = arith.truncf %23 : vector<16x16xf32> to vector<16x16xbf16>
    %c1_i32_16 = arith.constant 1 : i32
    %25 = vector.broadcast %c1_i32_16 : i32 to vector<16x1xi32>
    %26 = arith.cmpi sge, %0, %25 : vector<16x1xi32>
    %cst_17 = arith.constant 0.000000e+00 : bf16
    %27 = vector.shape_cast %26 : vector<16x1xi1> to vector<16x1xi1>
    %28 = vector.broadcast %27 : vector<16x1xi1> to vector<16x16xi1>
    %29 = vector.broadcast %cst_17 : bf16 to vector<16x16xbf16>
    %30 = arith.select %28, %24, %29 : vector<16x16xi1>, vector<16x16xbf16>
    %c1 = arith.constant 1 : index
    %c0_18 = arith.constant 0 : index
    %c0_19 = arith.constant 0 : index
    %31 = vector.load %arg4[%c1, %c0_18, %c0_19] : memref<16x16x32xbf16, #tpu.memory_space<vmem>>, vector<1x16x32xbf16>
    %32 = vector.shape_cast %31 : vector<1x16x32xbf16> to vector<16x32xbf16>
    %cst_20 = arith.constant dense<0.000000e+00> : vector<16x32xf32>
    %33 = tpu.matmul %30, %32, %cst_20 {dimension_numbers = #tpu.dot_dimension_numbers<[1], [0], [0], [1], [0, 0, 1, 1], [], []>} : vector<16x16xbf16>, vector<16x32xbf16>, vector<16x32xf32> -> vector<16x32xf32>
    %c0_21 = arith.constant 0 : index
    %c0_22 = arith.constant 0 : index
    %34 = vector.load %arg7[%c0_21, %c0_22] : memref<16x32xf32, #tpu.memory_space<vmem>>, vector<16x32xf32>
    %35 = arith.addf %34, %33 : vector<16x32xf32>
    %c0_23 = arith.constant 0 : index
    %c0_24 = arith.constant 0 : index
    %36 = vector.load %arg7[%c0_23, %c0_24] : memref<16x32xf32, #tpu.memory_space<vmem>>, vector<16x32xf32>
    tpu.vector_store %arg7[%c0_23, %c0_24], %35 {strides = array<i32>} : memref<16x32xf32, #tpu.memory_space<vmem>>, vector<16x32xf32>,
    %c0_25 = arith.constant 0 : index
    %c3_26 = arith.constant 3 : index
    %c0_27 = arith.constant 0 : index
    %c0_28 = arith.constant 0 : index
    %37 = vector.load %arg3[%c0_25, %c3_26, %c0_27, %c0_28] : memref<1x4x16x16xbf16, #tpu.memory_space<vmem>>, vector<1x1x16x16xbf16>
    %38 = vector.shape_cast %37 : vector<1x1x16x16xbf16> to vector<16x16xbf16>
    %39 = arith.extf %38 : vector<16x16xbf16> to vector<16x16xf32>
    %c4_i32_29 = arith.constant 4 : i32
    %40 = tpu.dynamic_rotate %39 by %c4_i32_29 dim 0 : vector<16x16xf32>, i32 -> vector<16x16xf32>
    %41 = arith.truncf %40 : vector<16x16xf32> to vector<16x16xbf16>
    %c1_i32_30 = arith.constant 1 : i32
    %42 = vector.broadcast %c1_i32_30 : i32 to vector<16x1xi32>
    %43 = arith.cmpi sge, %0, %42 : vector<16x1xi32>
    %cst_31 = arith.constant 0.000000e+00 : bf16
    %44 = vector.shape_cast %43 : vector<16x1xi1> to vector<16x1xi1>
    %45 = vector.broadcast %44 : vector<16x1xi1> to vector<16x16xi1>
    %46 = vector.broadcast %cst_31 : bf16 to vector<16x16xbf16>
    %47 = arith.select %45, %41, %46 : vector<16x16xi1>, vector<16x16xbf16>
    %c2_32 = arith.constant 2 : index
    %c0_33 = arith.constant 0 : index
    %c0_34 = arith.constant 0 : index
    %48 = vector.load %arg4[%c2_32, %c0_33, %c0_34] : memref<16x16x32xbf16, #tpu.memory_space<vmem>>, vector<1x16x32xbf16>
    %49 = vector.shape_cast %48 : vector<1x16x32xbf16> to vector<16x32xbf16>
    %cst_35 = arith.constant dense<0.000000e+00> : vector<16x32xf32>
    %50 = tpu.matmul %47, %49, %cst_35 {dimension_numbers = #tpu.dot_dimension_numbers<[1], [0], [0], [1], [0, 0, 1, 1], [], []>} : vector<16x16xbf16>, vector<16x32xbf16>, vector<16x32xf32> -> vector<16x32xf32>
    %c0_36 = arith.constant 0 : index
    %c0_37 = arith.constant 0 : index
    %51 = vector.load %arg7[%c0_36, %c0_37] : memref<16x32xf32, #tpu.memory_space<vmem>>, vector<16x32xf32>
    %52 = arith.addf %51, %50 : vector<16x32xf32>
    %c0_38 = arith.constant 0 : index
    %c0_39 = arith.constant 0 : index
    %53 = vector.load %arg7[%c0_38, %c0_39] : memref<16x32xf32, #tpu.memory_space<vmem>>, vector<16x32xf32>
    tpu.vector_store %arg7[%c0_38, %c0_39], %52 {strides = array<i32>} : memref<16x32xf32, #tpu.memory_space<vmem>>, vector<16x32xf32>,
    %c0_40 = arith.constant 0 : index
    %c2_41 = arith.constant 2 : index
    %c0_42 = arith.constant 0 : index
    %c0_43 = arith.constant 0 : index
    %54 = vector.load %arg3[%c0_40, %c2_41, %c0_42, %c0_43] : memref<1x4x16x16xbf16, #tpu.memory_space<vmem>>, vector<1x1x16x16xbf16>
    %55 = vector.shape_cast %54 : vector<1x1x16x16xbf16> to vector<16x16xbf16>
    %56 = arith.extf %55 : vector<16x16xbf16> to vector<16x16xf32>
    %c3_i32 = arith.constant 3 : i32
    %57 = tpu.dynamic_rotate %56 by %c3_i32 dim 0 : vector<16x16xf32>, i32 -> vector<16x16xf32>
    %58 = arith.truncf %57 : vector<16x16xf32> to vector<16x16xbf16>
    %c1_i32_44 = arith.constant 1 : i32
    %59 = vector.broadcast %c1_i32_44 : i32 to vector<16x1xi32>
    %60 = arith.cmpi sge, %0, %59 : vector<16x1xi32>
    %c3_i32_45 = arith.constant 3 : i32
    %61 = vector.broadcast %c3_i32_45 : i32 to vector<16x1xi32>
    %62 = arith.cmpi slt, %1, %61 : vector<16x1xi32>
    %63 = arith.andi %60, %62 : vector<16x1xi1>
    %cst_46 = arith.constant 0.000000e+00 : bf16
    %64 = vector.shape_cast %63 : vector<16x1xi1> to vector<16x1xi1>
    %65 = vector.broadcast %64 : vector<16x1xi1> to vector<16x16xi1>
    %66 = vector.broadcast %cst_46 : bf16 to vector<16x16xbf16>
    %67 = arith.select %65, %58, %66 : vector<16x16xi1>, vector<16x16xbf16>
    %c3_47 = arith.constant 3 : index
    %c0_48 = arith.constant 0 : index
    %c0_49 = arith.constant 0 : index
    %68 = vector.load %arg4[%c3_47, %c0_48, %c0_49] : memref<16x16x32xbf16, #tpu.memory_space<vmem>>, vector<1x16x32xbf16>
    %69 = vector.shape_cast %68 : vector<1x16x32xbf16> to vector<16x32xbf16>
    %cst_50 = arith.constant dense<0.000000e+00> : vector<16x32xf32>
    %70 = tpu.matmul %67, %69, %cst_50 {dimension_numbers = #tpu.dot_dimension_numbers<[1], [0], [0], [1], [0, 0, 1, 1], [], []>} : vector<16x16xbf16>, vector<16x32xbf16>, vector<16x32xf32> -> vector<16x32xf32>
    %c0_51 = arith.constant 0 : index
    %c0_52 = arith.constant 0 : index
    %71 = vector.load %arg7[%c0_51, %c0_52] : memref<16x32xf32, #tpu.memory_space<vmem>>, vector<16x32xf32>
    %72 = arith.addf %71, %70 : vector<16x32xf32>
    %c0_53 = arith.constant 0 : index
    %c0_54 = arith.constant 0 : index
    %73 = vector.load %arg7[%c0_53, %c0_54] : memref<16x32xf32, #tpu.memory_space<vmem>>, vector<16x32xf32>
    tpu.vector_store %arg7[%c0_53, %c0_54], %72 {strides = array<i32>} : memref<16x32xf32, #tpu.memory_space<vmem>>, vector<16x32xf32>,
    %c0_55 = arith.constant 0 : index
    %c1_56 = arith.constant 1 : index
    %c0_57 = arith.constant 0 : index
    %c0_58 = arith.constant 0 : index
    %74 = vector.load %arg3[%c0_55, %c1_56, %c0_57, %c0_58] : memref<1x4x16x16xbf16, #tpu.memory_space<vmem>>, vector<1x1x16x16xbf16>
    %75 = vector.shape_cast %74 : vector<1x1x16x16xbf16> to vector<16x16xbf16>
    %76 = arith.extf %75 : vector<16x16xbf16> to vector<16x16xf32>
    %c1_i32_59 = arith.constant 1 : i32
    %77 = tpu.dynamic_rotate %76 by %c1_i32_59 dim 0 : vector<16x16xf32>, i32 -> vector<16x16xf32>
    %78 = arith.truncf %77 : vector<16x16xf32> to vector<16x16xbf16>
    %c1_i32_60 = arith.constant 1 : i32
    %79 = vector.broadcast %c1_i32_60 : i32 to vector<16x1xi32>
    %80 = arith.cmpi sge, %1, %79 : vector<16x1xi32>
    %cst_61 = arith.constant 0.000000e+00 : bf16
    %81 = vector.shape_cast %80 : vector<16x1xi1> to vector<16x1xi1>
    %82 = vector.broadcast %81 : vector<16x1xi1> to vector<16x16xi1>
    %83 = vector.broadcast %cst_61 : bf16 to vector<16x16xbf16>
    %84 = arith.select %82, %78, %83 : vector<16x16xi1>, vector<16x16xbf16>
    %c4 = arith.constant 4 : index
    %c0_62 = arith.constant 0 : index
    %c0_63 = arith.constant 0 : index
    %85 = vector.load %arg4[%c4, %c0_62, %c0_63] : memref<16x16x32xbf16, #tpu.memory_space<vmem>>, vector<1x16x32xbf16>
    %86 = vector.shape_cast %85 : vector<1x16x32xbf16> to vector<16x32xbf16>
    %cst_64 = arith.constant dense<0.000000e+00> : vector<16x32xf32>
    %87 = tpu.matmul %84, %86, %cst_64 {dimension_numbers = #tpu.dot_dimension_numbers<[1], [0], [0], [1], [0, 0, 1, 1], [], []>} : vector<16x16xbf16>, vector<16x32xbf16>, vector<16x32xf32> -> vector<16x32xf32>
    %c0_65 = arith.constant 0 : index
    %c0_66 = arith.constant 0 : index
    %88 = vector.load %arg7[%c0_65, %c0_66] : memref<16x32xf32, #tpu.memory_space<vmem>>, vector<16x32xf32>
    %89 = arith.addf %88, %87 : vector<16x32xf32>
    %c0_67 = arith.constant 0 : index
    %c0_68 = arith.constant 0 : index
    %90 = vector.load %arg7[%c0_67, %c0_68] : memref<16x32xf32, #tpu.memory_space<vmem>>, vector<16x32xf32>
    tpu.vector_store %arg7[%c0_67, %c0_68], %89 {strides = array<i32>} : memref<16x32xf32, #tpu.memory_space<vmem>>, vector<16x32xf32>,
    %c0_69 = arith.constant 0 : index
    %c0_70 = arith.constant 0 : index
    %c0_71 = arith.constant 0 : index
    %c0_72 = arith.constant 0 : index
    %91 = vector.load %arg3[%c0_69, %c0_70, %c0_71, %c0_72] : memref<1x4x16x16xbf16, #tpu.memory_space<vmem>>, vector<1x1x16x16xbf16>
    %92 = vector.shape_cast %91 : vector<1x1x16x16xbf16> to vector<16x16xbf16>
    %c5 = arith.constant 5 : index
    %c0_73 = arith.constant 0 : index
    %c0_74 = arith.constant 0 : index
    %93 = vector.load %arg4[%c5, %c0_73, %c0_74] : memref<16x16x32xbf16, #tpu.memory_space<vmem>>, vector<1x16x32xbf16>
    %94 = vector.shape_cast %93 : vector<1x16x32xbf16> to vector<16x32xbf16>
    %cst_75 = arith.constant dense<0.000000e+00> : vector<16x32xf32>
    %95 = tpu.matmul %92, %94, %cst_75 {dimension_numbers = #tpu.dot_dimension_numbers<[1], [0], [0], [1], [0, 0, 1, 1], [], []>} : vector<16x16xbf16>, vector<16x32xbf16>, vector<16x32xf32> -> vector<16x32xf32>
    %c0_76 = arith.constant 0 : index
    %c0_77 = arith.constant 0 : index
    %96 = vector.load %arg7[%c0_76, %c0_77] : memref<16x32xf32, #tpu.memory_space<vmem>>, vector<16x32xf32>
    %97 = arith.addf %96, %95 : vector<16x32xf32>
    %c0_78 = arith.constant 0 : index
    %c0_79 = arith.constant 0 : index
    %98 = vector.load %arg7[%c0_78, %c0_79] : memref<16x32xf32, #tpu.memory_space<vmem>>, vector<16x32xf32>
    tpu.vector_store %arg7[%c0_78, %c0_79], %97 {strides = array<i32>} : memref<16x32xf32, #tpu.memory_space<vmem>>, vector<16x32xf32>,
    %c0_80 = arith.constant 0 : index
    %c1_81 = arith.constant 1 : index
    %c0_82 = arith.constant 0 : index
    %c0_83 = arith.constant 0 : index
    %99 = vector.load %arg3[%c0_80, %c1_81, %c0_82, %c0_83] : memref<1x4x16x16xbf16, #tpu.memory_space<vmem>>, vector<1x1x16x16xbf16>
    %100 = vector.shape_cast %99 : vector<1x1x16x16xbf16> to vector<16x16xbf16>
    %c6 = arith.constant 6 : index
    %c0_84 = arith.constant 0 : index
    %c0_85 = arith.constant 0 : index
    %101 = vector.load %arg4[%c6, %c0_84, %c0_85] : memref<16x16x32xbf16, #tpu.memory_space<vmem>>, vector<1x16x32xbf16>
    %102 = vector.shape_cast %101 : vector<1x16x32xbf16> to vector<16x32xbf16>
    %cst_86 = arith.constant dense<0.000000e+00> : vector<16x32xf32>
    %103 = tpu.matmul %100, %102, %cst_86 {dimension_numbers = #tpu.dot_dimension_numbers<[1], [0], [0], [1], [0, 0, 1, 1], [], []>} : vector<16x16xbf16>, vector<16x32xbf16>, vector<16x32xf32> -> vector<16x32xf32>
    %c0_87 = arith.constant 0 : index
    %c0_88 = arith.constant 0 : index
    %104 = vector.load %arg7[%c0_87, %c0_88] : memref<16x32xf32, #tpu.memory_space<vmem>>, vector<16x32xf32>
    %105 = arith.addf %104, %103 : vector<16x32xf32>
    %c0_89 = arith.constant 0 : index
    %c0_90 = arith.constant 0 : index
    %106 = vector.load %arg7[%c0_89, %c0_90] : memref<16x32xf32, #tpu.memory_space<vmem>>, vector<16x32xf32>
    tpu.vector_store %arg7[%c0_89, %c0_90], %105 {strides = array<i32>} : memref<16x32xf32, #tpu.memory_space<vmem>>, vector<16x32xf32>,
    %c0_91 = arith.constant 0 : index
    %c0_92 = arith.constant 0 : index
    %c0_93 = arith.constant 0 : index
    %c0_94 = arith.constant 0 : index
    %107 = vector.load %arg3[%c0_91, %c0_92, %c0_93, %c0_94] : memref<1x4x16x16xbf16, #tpu.memory_space<vmem>>, vector<1x1x16x16xbf16>
    %108 = vector.shape_cast %107 : vector<1x1x16x16xbf16> to vector<16x16xbf16>
    %109 = arith.extf %108 : vector<16x16xbf16> to vector<16x16xf32>
    %c15_i32 = arith.constant 15 : i32
    %110 = tpu.dynamic_rotate %109 by %c15_i32 dim 0 : vector<16x16xf32>, i32 -> vector<16x16xf32>
    %111 = arith.truncf %110 : vector<16x16xf32> to vector<16x16xbf16>
    %c3_i32_95 = arith.constant 3 : i32
    %112 = vector.broadcast %c3_i32_95 : i32 to vector<16x1xi32>
    %113 = arith.cmpi slt, %1, %112 : vector<16x1xi32>
    %cst_96 = arith.constant 0.000000e+00 : bf16
    %114 = vector.shape_cast %113 : vector<16x1xi1> to vector<16x1xi1>
    %115 = vector.broadcast %114 : vector<16x1xi1> to vector<16x16xi1>
    %116 = vector.broadcast %cst_96 : bf16 to vector<16x16xbf16>
    %117 = arith.select %115, %111, %116 : vector<16x16xi1>, vector<16x16xbf16>
    %c7 = arith.constant 7 : index
    %c0_97 = arith.constant 0 : index
    %c0_98 = arith.constant 0 : index
    %118 = vector.load %arg4[%c7, %c0_97, %c0_98] : memref<16x16x32xbf16, #tpu.memory_space<vmem>>, vector<1x16x32xbf16>
    %119 = vector.shape_cast %118 : vector<1x16x32xbf16> to vector<16x32xbf16>
    %cst_99 = arith.constant dense<0.000000e+00> : vector<16x32xf32>
    %120 = tpu.matmul %117, %119, %cst_99 {dimension_numbers = #tpu.dot_dimension_numbers<[1], [0], [0], [1], [0, 0, 1, 1], [], []>} : vector<16x16xbf16>, vector<16x32xbf16>, vector<16x32xf32> -> vector<16x32xf32>
    %c0_100 = arith.constant 0 : index
    %c0_101 = arith.constant 0 : index
    %121 = vector.load %arg7[%c0_100, %c0_101] : memref<16x32xf32, #tpu.memory_space<vmem>>, vector<16x32xf32>
    %122 = arith.addf %121, %120 : vector<16x32xf32>
    %c0_102 = arith.constant 0 : index
    %c0_103 = arith.constant 0 : index
    %123 = vector.load %arg7[%c0_102, %c0_103] : memref<16x32xf32, #tpu.memory_space<vmem>>, vector<16x32xf32>
    tpu.vector_store %arg7[%c0_102, %c0_103], %122 {strides = array<i32>} : memref<16x32xf32, #tpu.memory_space<vmem>>, vector<16x32xf32>,
    %c0_104 = arith.constant 0 : index
    %c3_105 = arith.constant 3 : index
    %c0_106 = arith.constant 0 : index
    %c0_107 = arith.constant 0 : index
    %124 = vector.load %arg3[%c0_104, %c3_105, %c0_106, %c0_107] : memref<1x4x16x16xbf16, #tpu.memory_space<vmem>>, vector<1x1x16x16xbf16>
    %125 = vector.shape_cast %124 : vector<1x1x16x16xbf16> to vector<16x16xbf16>
    %126 = arith.extf %125 : vector<16x16xbf16> to vector<16x16xf32>
    %c1_i32_108 = arith.constant 1 : i32
    %127 = tpu.dynamic_rotate %126 by %c1_i32_108 dim 0 : vector<16x16xf32>, i32 -> vector<16x16xf32>
    %128 = arith.truncf %127 : vector<16x16xf32> to vector<16x16xbf16>
    %c1_i32_109 = arith.constant 1 : i32
    %129 = vector.broadcast %c1_i32_109 : i32 to vector<16x1xi32>
    %130 = arith.cmpi sge, %1, %129 : vector<16x1xi32>
    %cst_110 = arith.constant 0.000000e+00 : bf16
    %131 = vector.shape_cast %130 : vector<16x1xi1> to vector<16x1xi1>
    %132 = vector.broadcast %131 : vector<16x1xi1> to vector<16x16xi1>
    %133 = vector.broadcast %cst_110 : bf16 to vector<16x16xbf16>
    %134 = arith.select %132, %128, %133 : vector<16x16xi1>, vector<16x16xbf16>
    %c8 = arith.constant 8 : index
    %c0_111 = arith.constant 0 : index
    %c0_112 = arith.constant 0 : index
    %135 = vector.load %arg4[%c8, %c0_111, %c0_112] : memref<16x16x32xbf16, #tpu.memory_space<vmem>>, vector<1x16x32xbf16>
    %136 = vector.shape_cast %135 : vector<1x16x32xbf16> to vector<16x32xbf16>
    %cst_113 = arith.constant dense<0.000000e+00> : vector<16x32xf32>
    %137 = tpu.matmul %134, %136, %cst_113 {dimension_numbers = #tpu.dot_dimension_numbers<[1], [0], [0], [1], [0, 0, 1, 1], [], []>} : vector<16x16xbf16>, vector<16x32xbf16>, vector<16x32xf32> -> vector<16x32xf32>
    %c0_114 = arith.constant 0 : index
    %c0_115 = arith.constant 0 : index
    %138 = vector.load %arg7[%c0_114, %c0_115] : memref<16x32xf32, #tpu.memory_space<vmem>>, vector<16x32xf32>
    %139 = arith.addf %138, %137 : vector<16x32xf32>
    %c0_116 = arith.constant 0 : index
    %c0_117 = arith.constant 0 : index
    %140 = vector.load %arg7[%c0_116, %c0_117] : memref<16x32xf32, #tpu.memory_space<vmem>>, vector<16x32xf32>
    tpu.vector_store %arg7[%c0_116, %c0_117], %139 {strides = array<i32>} : memref<16x32xf32, #tpu.memory_space<vmem>>, vector<16x32xf32>,
    %c0_118 = arith.constant 0 : index
    %c2_119 = arith.constant 2 : index
    %c0_120 = arith.constant 0 : index
    %c0_121 = arith.constant 0 : index
    %141 = vector.load %arg3[%c0_118, %c2_119, %c0_120, %c0_121] : memref<1x4x16x16xbf16, #tpu.memory_space<vmem>>, vector<1x1x16x16xbf16>
    %142 = vector.shape_cast %141 : vector<1x1x16x16xbf16> to vector<16x16xbf16>
    %c9 = arith.constant 9 : index
    %c0_122 = arith.constant 0 : index
    %c0_123 = arith.constant 0 : index
    %143 = vector.load %arg4[%c9, %c0_122, %c0_123] : memref<16x16x32xbf16, #tpu.memory_space<vmem>>, vector<1x16x32xbf16>
    %144 = vector.shape_cast %143 : vector<1x16x32xbf16> to vector<16x32xbf16>
    %cst_124 = arith.constant dense<0.000000e+00> : vector<16x32xf32>
    %145 = tpu.matmul %142, %144, %cst_124 {dimension_numbers = #tpu.dot_dimension_numbers<[1], [0], [0], [1], [0, 0, 1, 1], [], []>} : vector<16x16xbf16>, vector<16x32xbf16>, vector<16x32xf32> -> vector<16x32xf32>
    %c0_125 = arith.constant 0 : index
    %c0_126 = arith.constant 0 : index
    %146 = vector.load %arg7[%c0_125, %c0_126] : memref<16x32xf32, #tpu.memory_space<vmem>>, vector<16x32xf32>
    %147 = arith.addf %146, %145 : vector<16x32xf32>
    %c0_127 = arith.constant 0 : index
    %c0_128 = arith.constant 0 : index
    %148 = vector.load %arg7[%c0_127, %c0_128] : memref<16x32xf32, #tpu.memory_space<vmem>>, vector<16x32xf32>
    tpu.vector_store %arg7[%c0_127, %c0_128], %147 {strides = array<i32>} : memref<16x32xf32, #tpu.memory_space<vmem>>, vector<16x32xf32>,
    %c0_129 = arith.constant 0 : index
    %c3_130 = arith.constant 3 : index
    %c0_131 = arith.constant 0 : index
    %c0_132 = arith.constant 0 : index
    %149 = vector.load %arg3[%c0_129, %c3_130, %c0_131, %c0_132] : memref<1x4x16x16xbf16, #tpu.memory_space<vmem>>, vector<1x1x16x16xbf16>
    %150 = vector.shape_cast %149 : vector<1x1x16x16xbf16> to vector<16x16xbf16>
    %c10 = arith.constant 10 : index
    %c0_133 = arith.constant 0 : index
    %c0_134 = arith.constant 0 : index
    %151 = vector.load %arg4[%c10, %c0_133, %c0_134] : memref<16x16x32xbf16, #tpu.memory_space<vmem>>, vector<1x16x32xbf16>
    %152 = vector.shape_cast %151 : vector<1x16x32xbf16> to vector<16x32xbf16>
    %cst_135 = arith.constant dense<0.000000e+00> : vector<16x32xf32>
    %153 = tpu.matmul %150, %152, %cst_135 {dimension_numbers = #tpu.dot_dimension_numbers<[1], [0], [0], [1], [0, 0, 1, 1], [], []>} : vector<16x16xbf16>, vector<16x32xbf16>, vector<16x32xf32> -> vector<16x32xf32>
    %c0_136 = arith.constant 0 : index
    %c0_137 = arith.constant 0 : index
    %154 = vector.load %arg7[%c0_136, %c0_137] : memref<16x32xf32, #tpu.memory_space<vmem>>, vector<16x32xf32>
    %155 = arith.addf %154, %153 : vector<16x32xf32>
    %c0_138 = arith.constant 0 : index
    %c0_139 = arith.constant 0 : index
    %156 = vector.load %arg7[%c0_138, %c0_139] : memref<16x32xf32, #tpu.memory_space<vmem>>, vector<16x32xf32>
    tpu.vector_store %arg7[%c0_138, %c0_139], %155 {strides = array<i32>} : memref<16x32xf32, #tpu.memory_space<vmem>>, vector<16x32xf32>,
    %c0_140 = arith.constant 0 : index
    %c2_141 = arith.constant 2 : index
    %c0_142 = arith.constant 0 : index
    %c0_143 = arith.constant 0 : index
    %157 = vector.load %arg3[%c0_140, %c2_141, %c0_142, %c0_143] : memref<1x4x16x16xbf16, #tpu.memory_space<vmem>>, vector<1x1x16x16xbf16>
    %158 = vector.shape_cast %157 : vector<1x1x16x16xbf16> to vector<16x16xbf16>
    %159 = arith.extf %158 : vector<16x16xbf16> to vector<16x16xf32>
    %c15_i32_144 = arith.constant 15 : i32
    %160 = tpu.dynamic_rotate %159 by %c15_i32_144 dim 0 : vector<16x16xf32>, i32 -> vector<16x16xf32>
    %161 = arith.truncf %160 : vector<16x16xf32> to vector<16x16xbf16>
    %c3_i32_145 = arith.constant 3 : i32
    %162 = vector.broadcast %c3_i32_145 : i32 to vector<16x1xi32>
    %163 = arith.cmpi slt, %1, %162 : vector<16x1xi32>
    %cst_146 = arith.constant 0.000000e+00 : bf16
    %164 = vector.shape_cast %163 : vector<16x1xi1> to vector<16x1xi1>
    %165 = vector.broadcast %164 : vector<16x1xi1> to vector<16x16xi1>
    %166 = vector.broadcast %cst_146 : bf16 to vector<16x16xbf16>
    %167 = arith.select %165, %161, %166 : vector<16x16xi1>, vector<16x16xbf16>
    %c11 = arith.constant 11 : index
    %c0_147 = arith.constant 0 : index
    %c0_148 = arith.constant 0 : index
    %168 = vector.load %arg4[%c11, %c0_147, %c0_148] : memref<16x16x32xbf16, #tpu.memory_space<vmem>>, vector<1x16x32xbf16>
    %169 = vector.shape_cast %168 : vector<1x16x32xbf16> to vector<16x32xbf16>
    %cst_149 = arith.constant dense<0.000000e+00> : vector<16x32xf32>
    %170 = tpu.matmul %167, %169, %cst_149 {dimension_numbers = #tpu.dot_dimension_numbers<[1], [0], [0], [1], [0, 0, 1, 1], [], []>} : vector<16x16xbf16>, vector<16x32xbf16>, vector<16x32xf32> -> vector<16x32xf32>
    %c0_150 = arith.constant 0 : index
    %c0_151 = arith.constant 0 : index
    %171 = vector.load %arg7[%c0_150, %c0_151] : memref<16x32xf32, #tpu.memory_space<vmem>>, vector<16x32xf32>
    %172 = arith.addf %171, %170 : vector<16x32xf32>
    %c0_152 = arith.constant 0 : index
    %c0_153 = arith.constant 0 : index
    %173 = vector.load %arg7[%c0_152, %c0_153] : memref<16x32xf32, #tpu.memory_space<vmem>>, vector<16x32xf32>
    tpu.vector_store %arg7[%c0_152, %c0_153], %172 {strides = array<i32>} : memref<16x32xf32, #tpu.memory_space<vmem>>, vector<16x32xf32>,
    %c0_154 = arith.constant 0 : index
    %c1_155 = arith.constant 1 : index
    %c0_156 = arith.constant 0 : index
    %c0_157 = arith.constant 0 : index
    %174 = vector.load %arg3[%c0_154, %c1_155, %c0_156, %c0_157] : memref<1x4x16x16xbf16, #tpu.memory_space<vmem>>, vector<1x1x16x16xbf16>
    %175 = vector.shape_cast %174 : vector<1x1x16x16xbf16> to vector<16x16xbf16>
    %176 = arith.extf %175 : vector<16x16xbf16> to vector<16x16xf32>
    %c13_i32 = arith.constant 13 : i32
    %177 = tpu.dynamic_rotate %176 by %c13_i32 dim 0 : vector<16x16xf32>, i32 -> vector<16x16xf32>
    %178 = arith.truncf %177 : vector<16x16xf32> to vector<16x16xbf16>
    %c3_i32_158 = arith.constant 3 : i32
    %179 = vector.broadcast %c3_i32_158 : i32 to vector<16x1xi32>
    %180 = arith.cmpi slt, %0, %179 : vector<16x1xi32>
    %c1_i32_159 = arith.constant 1 : i32
    %181 = vector.broadcast %c1_i32_159 : i32 to vector<16x1xi32>
    %182 = arith.cmpi sge, %1, %181 : vector<16x1xi32>
    %183 = arith.andi %180, %182 : vector<16x1xi1>
    %cst_160 = arith.constant 0.000000e+00 : bf16
    %184 = vector.shape_cast %183 : vector<16x1xi1> to vector<16x1xi1>
    %185 = vector.broadcast %184 : vector<16x1xi1> to vector<16x16xi1>
    %186 = vector.broadcast %cst_160 : bf16 to vector<16x16xbf16>
    %187 = arith.select %185, %178, %186 : vector<16x16xi1>, vector<16x16xbf16>
    %c12 = arith.constant 12 : index
    %c0_161 = arith.constant 0 : index
    %c0_162 = arith.constant 0 : index
    %188 = vector.load %arg4[%c12, %c0_161, %c0_162] : memref<16x16x32xbf16, #tpu.memory_space<vmem>>, vector<1x16x32xbf16>
    %189 = vector.shape_cast %188 : vector<1x16x32xbf16> to vector<16x32xbf16>
    %cst_163 = arith.constant dense<0.000000e+00> : vector<16x32xf32>
    %190 = tpu.matmul %187, %189, %cst_163 {dimension_numbers = #tpu.dot_dimension_numbers<[1], [0], [0], [1], [0, 0, 1, 1], [], []>} : vector<16x16xbf16>, vector<16x32xbf16>, vector<16x32xf32> -> vector<16x32xf32>
    %c0_164 = arith.constant 0 : index
    %c0_165 = arith.constant 0 : index
    %191 = vector.load %arg7[%c0_164, %c0_165] : memref<16x32xf32, #tpu.memory_space<vmem>>, vector<16x32xf32>
    %192 = arith.addf %191, %190 : vector<16x32xf32>
    %c0_166 = arith.constant 0 : index
    %c0_167 = arith.constant 0 : index
    %193 = vector.load %arg7[%c0_166, %c0_167] : memref<16x32xf32, #tpu.memory_space<vmem>>, vector<16x32xf32>
    tpu.vector_store %arg7[%c0_166, %c0_167], %192 {strides = array<i32>} : memref<16x32xf32, #tpu.memory_space<vmem>>, vector<16x32xf32>,
    %c0_168 = arith.constant 0 : index
    %c0_169 = arith.constant 0 : index
    %c0_170 = arith.constant 0 : index
    %c0_171 = arith.constant 0 : index
    %194 = vector.load %arg3[%c0_168, %c0_169, %c0_170, %c0_171] : memref<1x4x16x16xbf16, #tpu.memory_space<vmem>>, vector<1x1x16x16xbf16>
    %195 = vector.shape_cast %194 : vector<1x1x16x16xbf16> to vector<16x16xbf16>
    %196 = arith.extf %195 : vector<16x16xbf16> to vector<16x16xf32>
    %c12_i32 = arith.constant 12 : i32
    %197 = tpu.dynamic_rotate %196 by %c12_i32 dim 0 : vector<16x16xf32>, i32 -> vector<16x16xf32>
    %198 = arith.truncf %197 : vector<16x16xf32> to vector<16x16xbf16>
    %c3_i32_172 = arith.constant 3 : i32
    %199 = vector.broadcast %c3_i32_172 : i32 to vector<16x1xi32>
    %200 = arith.cmpi slt, %0, %199 : vector<16x1xi32>
    %cst_173 = arith.constant 0.000000e+00 : bf16
    %201 = vector.shape_cast %200 : vector<16x1xi1> to vector<16x1xi1>
    %202 = vector.broadcast %201 : vector<16x1xi1> to vector<16x16xi1>
    %203 = vector.broadcast %cst_173 : bf16 to vector<16x16xbf16>
    %204 = arith.select %202, %198, %203 : vector<16x16xi1>, vector<16x16xbf16>
    %c13 = arith.constant 13 : index
    %c0_174 = arith.constant 0 : index
    %c0_175 = arith.constant 0 : index
    %205 = vector.load %arg4[%c13, %c0_174, %c0_175] : memref<16x16x32xbf16, #tpu.memory_space<vmem>>, vector<1x16x32xbf16>
    %206 = vector.shape_cast %205 : vector<1x16x32xbf16> to vector<16x32xbf16>
    %cst_176 = arith.constant dense<0.000000e+00> : vector<16x32xf32>
    %207 = tpu.matmul %204, %206, %cst_176 {dimension_numbers = #tpu.dot_dimension_numbers<[1], [0], [0], [1], [0, 0, 1, 1], [], []>} : vector<16x16xbf16>, vector<16x32xbf16>, vector<16x32xf32> -> vector<16x32xf32>
    %c0_177 = arith.constant 0 : index
    %c0_178 = arith.constant 0 : index
    %208 = vector.load %arg7[%c0_177, %c0_178] : memref<16x32xf32, #tpu.memory_space<vmem>>, vector<16x32xf32>
    %209 = arith.addf %208, %207 : vector<16x32xf32>
    %c0_179 = arith.constant 0 : index
    %c0_180 = arith.constant 0 : index
    %210 = vector.load %arg7[%c0_179, %c0_180] : memref<16x32xf32, #tpu.memory_space<vmem>>, vector<16x32xf32>
    tpu.vector_store %arg7[%c0_179, %c0_180], %209 {strides = array<i32>} : memref<16x32xf32, #tpu.memory_space<vmem>>, vector<16x32xf32>,
    %c0_181 = arith.constant 0 : index
    %c1_182 = arith.constant 1 : index
    %c0_183 = arith.constant 0 : index
    %c0_184 = arith.constant 0 : index
    %211 = vector.load %arg3[%c0_181, %c1_182, %c0_183, %c0_184] : memref<1x4x16x16xbf16, #tpu.memory_space<vmem>>, vector<1x1x16x16xbf16>
    %212 = vector.shape_cast %211 : vector<1x1x16x16xbf16> to vector<16x16xbf16>
    %213 = arith.extf %212 : vector<16x16xbf16> to vector<16x16xf32>
    %c12_i32_185 = arith.constant 12 : i32
    %214 = tpu.dynamic_rotate %213 by %c12_i32_185 dim 0 : vector<16x16xf32>, i32 -> vector<16x16xf32>
    %215 = arith.truncf %214 : vector<16x16xf32> to vector<16x16xbf16>
    %c3_i32_186 = arith.constant 3 : i32
    %216 = vector.broadcast %c3_i32_186 : i32 to vector<16x1xi32>
    %217 = arith.cmpi slt, %0, %216 : vector<16x1xi32>
    %cst_187 = arith.constant 0.000000e+00 : bf16
    %218 = vector.shape_cast %217 : vector<16x1xi1> to vector<16x1xi1>
    %219 = vector.broadcast %218 : vector<16x1xi1> to vector<16x16xi1>
    %220 = vector.broadcast %cst_187 : bf16 to vector<16x16xbf16>
    %221 = arith.select %219, %215, %220 : vector<16x16xi1>, vector<16x16xbf16>
    %c14 = arith.constant 14 : index
    %c0_188 = arith.constant 0 : index
    %c0_189 = arith.constant 0 : index
    %222 = vector.load %arg4[%c14, %c0_188, %c0_189] : memref<16x16x32xbf16, #tpu.memory_space<vmem>>, vector<1x16x32xbf16>
    %223 = vector.shape_cast %222 : vector<1x16x32xbf16> to vector<16x32xbf16>
    %cst_190 = arith.constant dense<0.000000e+00> : vector<16x32xf32>
    %224 = tpu.matmul %221, %223, %cst_190 {dimension_numbers = #tpu.dot_dimension_numbers<[1], [0], [0], [1], [0, 0, 1, 1], [], []>} : vector<16x16xbf16>, vector<16x32xbf16>, vector<16x32xf32> -> vector<16x32xf32>
    %c0_191 = arith.constant 0 : index
    %c0_192 = arith.constant 0 : index
    %225 = vector.load %arg7[%c0_191, %c0_192] : memref<16x32xf32, #tpu.memory_space<vmem>>, vector<16x32xf32>
    %226 = arith.addf %225, %224 : vector<16x32xf32>
    %c0_193 = arith.constant 0 : index
    %c0_194 = arith.constant 0 : index
    %227 = vector.load %arg7[%c0_193, %c0_194] : memref<16x32xf32, #tpu.memory_space<vmem>>, vector<16x32xf32>
    tpu.vector_store %arg7[%c0_193, %c0_194], %226 {strides = array<i32>} : memref<16x32xf32, #tpu.memory_space<vmem>>, vector<16x32xf32>,
    %c0_195 = arith.constant 0 : index
    %c0_196 = arith.constant 0 : index
    %c0_197 = arith.constant 0 : index
    %c0_198 = arith.constant 0 : index
    %228 = vector.load %arg3[%c0_195, %c0_196, %c0_197, %c0_198] : memref<1x4x16x16xbf16, #tpu.memory_space<vmem>>, vector<1x1x16x16xbf16>
    %229 = vector.shape_cast %228 : vector<1x1x16x16xbf16> to vector<16x16xbf16>
    %230 = arith.extf %229 : vector<16x16xbf16> to vector<16x16xf32>
    %c11_i32 = arith.constant 11 : i32
    %231 = tpu.dynamic_rotate %230 by %c11_i32 dim 0 : vector<16x16xf32>, i32 -> vector<16x16xf32>
    %232 = arith.truncf %231 : vector<16x16xf32> to vector<16x16xbf16>
    %c3_i32_199 = arith.constant 3 : i32
    %233 = vector.broadcast %c3_i32_199 : i32 to vector<16x1xi32>
    %234 = arith.cmpi slt, %0, %233 : vector<16x1xi32>
    %c3_i32_200 = arith.constant 3 : i32
    %235 = vector.broadcast %c3_i32_200 : i32 to vector<16x1xi32>
    %236 = arith.cmpi slt, %1, %235 : vector<16x1xi32>
    %237 = arith.andi %234, %236 : vector<16x1xi1>
    %cst_201 = arith.constant 0.000000e+00 : bf16
    %238 = vector.shape_cast %237 : vector<16x1xi1> to vector<16x1xi1>
    %239 = vector.broadcast %238 : vector<16x1xi1> to vector<16x16xi1>
    %240 = vector.broadcast %cst_201 : bf16 to vector<16x16xbf16>
    %241 = arith.select %239, %232, %240 : vector<16x16xi1>, vector<16x16xbf16>
    %c15 = arith.constant 15 : index
    %c0_202 = arith.constant 0 : index
    %c0_203 = arith.constant 0 : index
    %242 = vector.load %arg4[%c15, %c0_202, %c0_203] : memref<16x16x32xbf16, #tpu.memory_space<vmem>>, vector<1x16x32xbf16>
    %243 = vector.shape_cast %242 : vector<1x16x32xbf16> to vector<16x32xbf16>
    %cst_204 = arith.constant dense<0.000000e+00> : vector<16x32xf32>
    %244 = tpu.matmul %241, %243, %cst_204 {dimension_numbers = #tpu.dot_dimension_numbers<[1], [0], [0], [1], [0, 0, 1, 1], [], []>} : vector<16x16xbf16>, vector<16x32xbf16>, vector<16x32xf32> -> vector<16x32xf32>
    %c0_205 = arith.constant 0 : index
    %c0_206 = arith.constant 0 : index
    %245 = vector.load %arg7[%c0_205, %c0_206] : memref<16x32xf32, #tpu.memory_space<vmem>>, vector<16x32xf32>
    %246 = arith.addf %245, %244 : vector<16x32xf32>
    %c0_207 = arith.constant 0 : index
    %c0_208 = arith.constant 0 : index
    %247 = vector.load %arg7[%c0_207, %c0_208] : memref<16x32xf32, #tpu.memory_space<vmem>>, vector<16x32xf32>
    tpu.vector_store %arg7[%c0_207, %c0_208], %246 {strides = array<i32>} : memref<16x32xf32, #tpu.memory_space<vmem>>, vector<16x32xf32>,
    %c0_209 = arith.constant 0 : index
    %c0_210 = arith.constant 0 : index
    %248 = vector.load %arg7[%c0_209, %c0_210] : memref<16x32xf32, #tpu.memory_space<vmem>>, vector<16x32xf32>
    %c0_211 = arith.constant 0 : index
    %c0_212 = arith.constant 0 : index
    %249 = vector.load %arg5[%c0_211, %c0_212] : memref<1x32xf32, #tpu.memory_space<vmem>>, vector<1x32xf32>
    %250 = vector.broadcast %249 : vector<1x32xf32> to vector<16x32xf32>
    %251 = arith.addf %248, %250 : vector<16x32xf32>
    %cst_213 = arith.constant 0.000000e+00 : f32
    %252 = vector.broadcast %cst_213 : f32 to vector<16x32xf32>
    %253 = arith.maximumf %251, %252 : vector<16x32xf32>
    %254 = arith.truncf %253 : vector<16x32xf32> to vector<16x32xbf16>
    %c0_214 = arith.constant 0 : index
    %c0_215 = arith.constant 0 : index
    %c0_216 = arith.constant 0 : index
    %255 = vector.load %arg6[%c0_214, %c0_215, %c0_216] : memref<1x16x32xbf16, #tpu.memory_space<vmem>>, vector<1x16x32xbf16>
    %256 = vector.shape_cast %255 : vector<1x16x32xbf16> to vector<16x32xbf16>
    %257 = vector.shape_cast %254 : vector<16x32xbf16> to vector<1x16x32xbf16>
    tpu.vector_store %arg6[%c0_214, %c0_215, %c0_216], %257 {strides = array<i32>} : memref<1x16x32xbf16, #tpu.memory_space<vmem>>, vector<1x16x32xbf16>,
    return
  }
  func.func @transform_0(%arg0: i32) -> (i32, i32) {
    %c0_i32 = arith.constant 0 : i32
    %c0_i32_0 = arith.constant 0 : i32
    %c0_i32_1 = arith.constant 0 : i32
    return %c0_i32, %c0_i32_0 : i32, i32
  }
  func.func @transform_1(%arg0: i32) -> (i32, i32) {
    %c0_i32 = arith.constant 0 : i32
    %c0_i32_0 = arith.constant 0 : i32
    %c0_i32_1 = arith.constant 0 : i32
    return %c0_i32, %c0_i32_0 : i32, i32
  }
  func.func @transform_2(%arg0: i32) -> (i32, i32, i32, i32) {
    %c0_i32 = arith.constant 0 : i32
    %c0_i32_0 = arith.constant 0 : i32
    %c0_i32_1 = arith.constant 0 : i32
    %c0_i32_2 = arith.constant 0 : i32
    return %arg0, %c0_i32, %c0_i32_0, %c0_i32_1 : i32, i32, i32, i32
  }
  func.func @transform_3(%arg0: i32) -> (i32, i32, i32) {
    %c0_i32 = arith.constant 0 : i32
    %c0_i32_0 = arith.constant 0 : i32
    %c0_i32_1 = arith.constant 0 : i32
    %c0_i32_2 = arith.constant 0 : i32
    return %c0_i32, %c0_i32_0, %c0_i32_1 : i32, i32, i32
  }
  func.func @transform_4(%arg0: i32) -> (i32, i32) {
    %c0_i32 = arith.constant 0 : i32
    %c0_i32_0 = arith.constant 0 : i32
    %c0_i32_1 = arith.constant 0 : i32
    return %c0_i32, %c0_i32_0 : i32, i32
  }
  func.func @transform_5(%arg0: i32) -> (i32, i32, i32) {
    %c0_i32 = arith.constant 0 : i32
    %c0_i32_0 = arith.constant 0 : i32
    %c0_i32_1 = arith.constant 0 : i32
    return %arg0, %c0_i32, %c0_i32_0 : i32, i32, i32
  }
}

module attributes {stable_mosaic.version = 11 : i64} {
  func.func @kernel(%arg0: i32, %arg1: memref<16x1xi32, #tpu.memory_space<vmem>>, %arg2: memref<16x1xi32, #tpu.memory_space<vmem>>, %arg3: memref<1x16x32xbf16, #tpu.memory_space<vmem>>, %arg4: memref<9x32x32xbf16, #tpu.memory_space<vmem>>, %arg5: memref<1x32xf32, #tpu.memory_space<vmem>>, %arg6: memref<18x32x8xbf16, #tpu.memory_space<vmem>>, %arg7: memref<2x8x32xbf16, #tpu.memory_space<vmem>>, %arg8: memref<1x16x32xf32, #tpu.memory_space<vmem>>, %arg9: memref<16x32xf32, #tpu.memory_space<vmem>>, %arg10: memref<16x8xf32, #tpu.memory_space<vmem>>) attributes {dimension_semantics = [#tpu.dimension_semantics<parallel>], iteration_bounds = array<i64: 2>, scalar_prefetch = 0 : i64, scratch_operands = 2 : i64, tpu.core_type = #tpu.core_type<tc>, window_params = [{pipeline_mode = #tpu.pipeline_mode<synchronous>, transform_indices = @transform_0, window_bounds = array<i64: 16, 1>}, {pipeline_mode = #tpu.pipeline_mode<synchronous>, transform_indices = @transform_1, window_bounds = array<i64: 16, 1>}, {transform_indices = @transform_2, window_bounds = array<i64: 1, 16, 32>}, {pipeline_mode = #tpu.pipeline_mode<synchronous>, transform_indices = @transform_3, window_bounds = array<i64: 9, 32, 32>}, {pipeline_mode = #tpu.pipeline_mode<synchronous>, transform_indices = @transform_4, window_bounds = array<i64: 1, 32>}, {pipeline_mode = #tpu.pipeline_mode<synchronous>, transform_indices = @transform_5, window_bounds = array<i64: 18, 32, 8>}, {pipeline_mode = #tpu.pipeline_mode<synchronous>, transform_indices = @transform_6, window_bounds = array<i64: 2, 8, 32>}, {transform_indices = @transform_7, window_bounds = array<i64: 1, 16, 32>}]} {
    %c0 = arith.constant 0 : index
    %c0_0 = arith.constant 0 : index
    %0 = vector.load %arg1[%c0, %c0_0] : memref<16x1xi32, #tpu.memory_space<vmem>>, vector<16x1xi32>
    %c0_1 = arith.constant 0 : index
    %c0_2 = arith.constant 0 : index
    %1 = vector.load %arg2[%c0_1, %c0_2] : memref<16x1xi32, #tpu.memory_space<vmem>>, vector<16x1xi32>
    %c0_3 = arith.constant 0 : index
    %c0_4 = arith.constant 0 : index
    %c0_5 = arith.constant 0 : index
    %2 = vector.load %arg3[%c0_3, %c0_4, %c0_5] : memref<1x16x32xbf16, #tpu.memory_space<vmem>>, vector<1x16x32xbf16>
    %3 = vector.shape_cast %2 : vector<1x16x32xbf16> to vector<16x32xbf16>
    %4 = arith.extf %3 : vector<16x32xbf16> to vector<16x32xf32>
    %c5_i32 = arith.constant 5 : i32
    %5 = tpu.dynamic_rotate %4 by %c5_i32 dim 0 : vector<16x32xf32>, i32 -> vector<16x32xf32>
    %6 = arith.truncf %5 : vector<16x32xf32> to vector<16x32xbf16>
    %c1_i32 = arith.constant 1 : i32
    %7 = vector.broadcast %c1_i32 : i32 to vector<16x1xi32>
    %8 = arith.cmpi sge, %0, %7 : vector<16x1xi32>
    %c1_i32_6 = arith.constant 1 : i32
    %9 = vector.broadcast %c1_i32_6 : i32 to vector<16x1xi32>
    %10 = arith.cmpi sge, %1, %9 : vector<16x1xi32>
    %11 = arith.andi %8, %10 : vector<16x1xi1>
    %cst = arith.constant 0.000000e+00 : bf16
    %12 = vector.shape_cast %11 : vector<16x1xi1> to vector<16x1xi1>
    %13 = vector.broadcast %12 : vector<16x1xi1> to vector<16x32xi1>
    %14 = vector.broadcast %cst : bf16 to vector<16x32xbf16>
    %15 = arith.select %13, %6, %14 : vector<16x32xi1>, vector<16x32xbf16>
    %c0_7 = arith.constant 0 : index
    %c0_8 = arith.constant 0 : index
    %c0_9 = arith.constant 0 : index
    %16 = vector.load %arg4[%c0_7, %c0_8, %c0_9] : memref<9x32x32xbf16, #tpu.memory_space<vmem>>, vector<1x32x32xbf16>
    %17 = vector.shape_cast %16 : vector<1x32x32xbf16> to vector<32x32xbf16>
    %cst_10 = arith.constant dense<0.000000e+00> : vector<16x32xf32>
    %18 = tpu.matmul %15, %17, %cst_10 {dimension_numbers = #tpu.dot_dimension_numbers<[1], [0], [0], [1], [0, 0, 1, 1], [], []>} : vector<16x32xbf16>, vector<32x32xbf16>, vector<16x32xf32> -> vector<16x32xf32>
    %c0_11 = arith.constant 0 : index
    %c0_12 = arith.constant 0 : index
    %19 = vector.load %arg9[%c0_11, %c0_12] : memref<16x32xf32, #tpu.memory_space<vmem>>, vector<16x32xf32>
    tpu.vector_store %arg9[%c0_11, %c0_12], %18 {strides = array<i32>} : memref<16x32xf32, #tpu.memory_space<vmem>>, vector<16x32xf32>,
    %c0_13 = arith.constant 0 : index
    %c0_14 = arith.constant 0 : index
    %c0_15 = arith.constant 0 : index
    %20 = vector.load %arg3[%c0_13, %c0_14, %c0_15] : memref<1x16x32xbf16, #tpu.memory_space<vmem>>, vector<1x16x32xbf16>
    %21 = vector.shape_cast %20 : vector<1x16x32xbf16> to vector<16x32xbf16>
    %22 = arith.extf %21 : vector<16x32xbf16> to vector<16x32xf32>
    %c4_i32 = arith.constant 4 : i32
    %23 = tpu.dynamic_rotate %22 by %c4_i32 dim 0 : vector<16x32xf32>, i32 -> vector<16x32xf32>
    %24 = arith.truncf %23 : vector<16x32xf32> to vector<16x32xbf16>
    %c1_i32_16 = arith.constant 1 : i32
    %25 = vector.broadcast %c1_i32_16 : i32 to vector<16x1xi32>
    %26 = arith.cmpi sge, %0, %25 : vector<16x1xi32>
    %cst_17 = arith.constant 0.000000e+00 : bf16
    %27 = vector.shape_cast %26 : vector<16x1xi1> to vector<16x1xi1>
    %28 = vector.broadcast %27 : vector<16x1xi1> to vector<16x32xi1>
    %29 = vector.broadcast %cst_17 : bf16 to vector<16x32xbf16>
    %30 = arith.select %28, %24, %29 : vector<16x32xi1>, vector<16x32xbf16>
    %c1 = arith.constant 1 : index
    %c0_18 = arith.constant 0 : index
    %c0_19 = arith.constant 0 : index
    %31 = vector.load %arg4[%c1, %c0_18, %c0_19] : memref<9x32x32xbf16, #tpu.memory_space<vmem>>, vector<1x32x32xbf16>
    %32 = vector.shape_cast %31 : vector<1x32x32xbf16> to vector<32x32xbf16>
    %cst_20 = arith.constant dense<0.000000e+00> : vector<16x32xf32>
    %33 = tpu.matmul %30, %32, %cst_20 {dimension_numbers = #tpu.dot_dimension_numbers<[1], [0], [0], [1], [0, 0, 1, 1], [], []>} : vector<16x32xbf16>, vector<32x32xbf16>, vector<16x32xf32> -> vector<16x32xf32>
    %c0_21 = arith.constant 0 : index
    %c0_22 = arith.constant 0 : index
    %34 = vector.load %arg9[%c0_21, %c0_22] : memref<16x32xf32, #tpu.memory_space<vmem>>, vector<16x32xf32>
    %35 = arith.addf %34, %33 : vector<16x32xf32>
    %c0_23 = arith.constant 0 : index
    %c0_24 = arith.constant 0 : index
    %36 = vector.load %arg9[%c0_23, %c0_24] : memref<16x32xf32, #tpu.memory_space<vmem>>, vector<16x32xf32>
    tpu.vector_store %arg9[%c0_23, %c0_24], %35 {strides = array<i32>} : memref<16x32xf32, #tpu.memory_space<vmem>>, vector<16x32xf32>,
    %c0_25 = arith.constant 0 : index
    %c0_26 = arith.constant 0 : index
    %c0_27 = arith.constant 0 : index
    %37 = vector.load %arg3[%c0_25, %c0_26, %c0_27] : memref<1x16x32xbf16, #tpu.memory_space<vmem>>, vector<1x16x32xbf16>
    %38 = vector.shape_cast %37 : vector<1x16x32xbf16> to vector<16x32xbf16>
    %39 = arith.extf %38 : vector<16x32xbf16> to vector<16x32xf32>
    %c3_i32 = arith.constant 3 : i32
    %40 = tpu.dynamic_rotate %39 by %c3_i32 dim 0 : vector<16x32xf32>, i32 -> vector<16x32xf32>
    %41 = arith.truncf %40 : vector<16x32xf32> to vector<16x32xbf16>
    %c1_i32_28 = arith.constant 1 : i32
    %42 = vector.broadcast %c1_i32_28 : i32 to vector<16x1xi32>
    %43 = arith.cmpi sge, %0, %42 : vector<16x1xi32>
    %c3_i32_29 = arith.constant 3 : i32
    %44 = vector.broadcast %c3_i32_29 : i32 to vector<16x1xi32>
    %45 = arith.cmpi slt, %1, %44 : vector<16x1xi32>
    %46 = arith.andi %43, %45 : vector<16x1xi1>
    %cst_30 = arith.constant 0.000000e+00 : bf16
    %47 = vector.shape_cast %46 : vector<16x1xi1> to vector<16x1xi1>
    %48 = vector.broadcast %47 : vector<16x1xi1> to vector<16x32xi1>
    %49 = vector.broadcast %cst_30 : bf16 to vector<16x32xbf16>
    %50 = arith.select %48, %41, %49 : vector<16x32xi1>, vector<16x32xbf16>
    %c2 = arith.constant 2 : index
    %c0_31 = arith.constant 0 : index
    %c0_32 = arith.constant 0 : index
    %51 = vector.load %arg4[%c2, %c0_31, %c0_32] : memref<9x32x32xbf16, #tpu.memory_space<vmem>>, vector<1x32x32xbf16>
    %52 = vector.shape_cast %51 : vector<1x32x32xbf16> to vector<32x32xbf16>
    %cst_33 = arith.constant dense<0.000000e+00> : vector<16x32xf32>
    %53 = tpu.matmul %50, %52, %cst_33 {dimension_numbers = #tpu.dot_dimension_numbers<[1], [0], [0], [1], [0, 0, 1, 1], [], []>} : vector<16x32xbf16>, vector<32x32xbf16>, vector<16x32xf32> -> vector<16x32xf32>
    %c0_34 = arith.constant 0 : index
    %c0_35 = arith.constant 0 : index
    %54 = vector.load %arg9[%c0_34, %c0_35] : memref<16x32xf32, #tpu.memory_space<vmem>>, vector<16x32xf32>
    %55 = arith.addf %54, %53 : vector<16x32xf32>
    %c0_36 = arith.constant 0 : index
    %c0_37 = arith.constant 0 : index
    %56 = vector.load %arg9[%c0_36, %c0_37] : memref<16x32xf32, #tpu.memory_space<vmem>>, vector<16x32xf32>
    tpu.vector_store %arg9[%c0_36, %c0_37], %55 {strides = array<i32>} : memref<16x32xf32, #tpu.memory_space<vmem>>, vector<16x32xf32>,
    %c0_38 = arith.constant 0 : index
    %c0_39 = arith.constant 0 : index
    %c0_40 = arith.constant 0 : index
    %57 = vector.load %arg3[%c0_38, %c0_39, %c0_40] : memref<1x16x32xbf16, #tpu.memory_space<vmem>>, vector<1x16x32xbf16>
    %58 = vector.shape_cast %57 : vector<1x16x32xbf16> to vector<16x32xbf16>
    %59 = arith.extf %58 : vector<16x32xbf16> to vector<16x32xf32>
    %c1_i32_41 = arith.constant 1 : i32
    %60 = tpu.dynamic_rotate %59 by %c1_i32_41 dim 0 : vector<16x32xf32>, i32 -> vector<16x32xf32>
    %61 = arith.truncf %60 : vector<16x32xf32> to vector<16x32xbf16>
    %c1_i32_42 = arith.constant 1 : i32
    %62 = vector.broadcast %c1_i32_42 : i32 to vector<16x1xi32>
    %63 = arith.cmpi sge, %1, %62 : vector<16x1xi32>
    %cst_43 = arith.constant 0.000000e+00 : bf16
    %64 = vector.shape_cast %63 : vector<16x1xi1> to vector<16x1xi1>
    %65 = vector.broadcast %64 : vector<16x1xi1> to vector<16x32xi1>
    %66 = vector.broadcast %cst_43 : bf16 to vector<16x32xbf16>
    %67 = arith.select %65, %61, %66 : vector<16x32xi1>, vector<16x32xbf16>
    %c3 = arith.constant 3 : index
    %c0_44 = arith.constant 0 : index
    %c0_45 = arith.constant 0 : index
    %68 = vector.load %arg4[%c3, %c0_44, %c0_45] : memref<9x32x32xbf16, #tpu.memory_space<vmem>>, vector<1x32x32xbf16>
    %69 = vector.shape_cast %68 : vector<1x32x32xbf16> to vector<32x32xbf16>
    %cst_46 = arith.constant dense<0.000000e+00> : vector<16x32xf32>
    %70 = tpu.matmul %67, %69, %cst_46 {dimension_numbers = #tpu.dot_dimension_numbers<[1], [0], [0], [1], [0, 0, 1, 1], [], []>} : vector<16x32xbf16>, vector<32x32xbf16>, vector<16x32xf32> -> vector<16x32xf32>
    %c0_47 = arith.constant 0 : index
    %c0_48 = arith.constant 0 : index
    %71 = vector.load %arg9[%c0_47, %c0_48] : memref<16x32xf32, #tpu.memory_space<vmem>>, vector<16x32xf32>
    %72 = arith.addf %71, %70 : vector<16x32xf32>
    %c0_49 = arith.constant 0 : index
    %c0_50 = arith.constant 0 : index
    %73 = vector.load %arg9[%c0_49, %c0_50] : memref<16x32xf32, #tpu.memory_space<vmem>>, vector<16x32xf32>
    tpu.vector_store %arg9[%c0_49, %c0_50], %72 {strides = array<i32>} : memref<16x32xf32, #tpu.memory_space<vmem>>, vector<16x32xf32>,
    %c0_51 = arith.constant 0 : index
    %c0_52 = arith.constant 0 : index
    %c0_53 = arith.constant 0 : index
    %74 = vector.load %arg3[%c0_51, %c0_52, %c0_53] : memref<1x16x32xbf16, #tpu.memory_space<vmem>>, vector<1x16x32xbf16>
    %75 = vector.shape_cast %74 : vector<1x16x32xbf16> to vector<16x32xbf16>
    %c4 = arith.constant 4 : index
    %c0_54 = arith.constant 0 : index
    %c0_55 = arith.constant 0 : index
    %76 = vector.load %arg4[%c4, %c0_54, %c0_55] : memref<9x32x32xbf16, #tpu.memory_space<vmem>>, vector<1x32x32xbf16>
    %77 = vector.shape_cast %76 : vector<1x32x32xbf16> to vector<32x32xbf16>
    %cst_56 = arith.constant dense<0.000000e+00> : vector<16x32xf32>
    %78 = tpu.matmul %75, %77, %cst_56 {dimension_numbers = #tpu.dot_dimension_numbers<[1], [0], [0], [1], [0, 0, 1, 1], [], []>} : vector<16x32xbf16>, vector<32x32xbf16>, vector<16x32xf32> -> vector<16x32xf32>
    %c0_57 = arith.constant 0 : index
    %c0_58 = arith.constant 0 : index
    %79 = vector.load %arg9[%c0_57, %c0_58] : memref<16x32xf32, #tpu.memory_space<vmem>>, vector<16x32xf32>
    %80 = arith.addf %79, %78 : vector<16x32xf32>
    %c0_59 = arith.constant 0 : index
    %c0_60 = arith.constant 0 : index
    %81 = vector.load %arg9[%c0_59, %c0_60] : memref<16x32xf32, #tpu.memory_space<vmem>>, vector<16x32xf32>
    tpu.vector_store %arg9[%c0_59, %c0_60], %80 {strides = array<i32>} : memref<16x32xf32, #tpu.memory_space<vmem>>, vector<16x32xf32>,
    %c0_61 = arith.constant 0 : index
    %c0_62 = arith.constant 0 : index
    %c0_63 = arith.constant 0 : index
    %82 = vector.load %arg3[%c0_61, %c0_62, %c0_63] : memref<1x16x32xbf16, #tpu.memory_space<vmem>>, vector<1x16x32xbf16>
    %83 = vector.shape_cast %82 : vector<1x16x32xbf16> to vector<16x32xbf16>
    %84 = arith.extf %83 : vector<16x32xbf16> to vector<16x32xf32>
    %c15_i32 = arith.constant 15 : i32
    %85 = tpu.dynamic_rotate %84 by %c15_i32 dim 0 : vector<16x32xf32>, i32 -> vector<16x32xf32>
    %86 = arith.truncf %85 : vector<16x32xf32> to vector<16x32xbf16>
    %c3_i32_64 = arith.constant 3 : i32
    %87 = vector.broadcast %c3_i32_64 : i32 to vector<16x1xi32>
    %88 = arith.cmpi slt, %1, %87 : vector<16x1xi32>
    %cst_65 = arith.constant 0.000000e+00 : bf16
    %89 = vector.shape_cast %88 : vector<16x1xi1> to vector<16x1xi1>
    %90 = vector.broadcast %89 : vector<16x1xi1> to vector<16x32xi1>
    %91 = vector.broadcast %cst_65 : bf16 to vector<16x32xbf16>
    %92 = arith.select %90, %86, %91 : vector<16x32xi1>, vector<16x32xbf16>
    %c5 = arith.constant 5 : index
    %c0_66 = arith.constant 0 : index
    %c0_67 = arith.constant 0 : index
    %93 = vector.load %arg4[%c5, %c0_66, %c0_67] : memref<9x32x32xbf16, #tpu.memory_space<vmem>>, vector<1x32x32xbf16>
    %94 = vector.shape_cast %93 : vector<1x32x32xbf16> to vector<32x32xbf16>
    %cst_68 = arith.constant dense<0.000000e+00> : vector<16x32xf32>
    %95 = tpu.matmul %92, %94, %cst_68 {dimension_numbers = #tpu.dot_dimension_numbers<[1], [0], [0], [1], [0, 0, 1, 1], [], []>} : vector<16x32xbf16>, vector<32x32xbf16>, vector<16x32xf32> -> vector<16x32xf32>
    %c0_69 = arith.constant 0 : index
    %c0_70 = arith.constant 0 : index
    %96 = vector.load %arg9[%c0_69, %c0_70] : memref<16x32xf32, #tpu.memory_space<vmem>>, vector<16x32xf32>
    %97 = arith.addf %96, %95 : vector<16x32xf32>
    %c0_71 = arith.constant 0 : index
    %c0_72 = arith.constant 0 : index
    %98 = vector.load %arg9[%c0_71, %c0_72] : memref<16x32xf32, #tpu.memory_space<vmem>>, vector<16x32xf32>
    tpu.vector_store %arg9[%c0_71, %c0_72], %97 {strides = array<i32>} : memref<16x32xf32, #tpu.memory_space<vmem>>, vector<16x32xf32>,
    %c0_73 = arith.constant 0 : index
    %c0_74 = arith.constant 0 : index
    %c0_75 = arith.constant 0 : index
    %99 = vector.load %arg3[%c0_73, %c0_74, %c0_75] : memref<1x16x32xbf16, #tpu.memory_space<vmem>>, vector<1x16x32xbf16>
    %100 = vector.shape_cast %99 : vector<1x16x32xbf16> to vector<16x32xbf16>
    %101 = arith.extf %100 : vector<16x32xbf16> to vector<16x32xf32>
    %c13_i32 = arith.constant 13 : i32
    %102 = tpu.dynamic_rotate %101 by %c13_i32 dim 0 : vector<16x32xf32>, i32 -> vector<16x32xf32>
    %103 = arith.truncf %102 : vector<16x32xf32> to vector<16x32xbf16>
    %c3_i32_76 = arith.constant 3 : i32
    %104 = vector.broadcast %c3_i32_76 : i32 to vector<16x1xi32>
    %105 = arith.cmpi slt, %0, %104 : vector<16x1xi32>
    %c1_i32_77 = arith.constant 1 : i32
    %106 = vector.broadcast %c1_i32_77 : i32 to vector<16x1xi32>
    %107 = arith.cmpi sge, %1, %106 : vector<16x1xi32>
    %108 = arith.andi %105, %107 : vector<16x1xi1>
    %cst_78 = arith.constant 0.000000e+00 : bf16
    %109 = vector.shape_cast %108 : vector<16x1xi1> to vector<16x1xi1>
    %110 = vector.broadcast %109 : vector<16x1xi1> to vector<16x32xi1>
    %111 = vector.broadcast %cst_78 : bf16 to vector<16x32xbf16>
    %112 = arith.select %110, %103, %111 : vector<16x32xi1>, vector<16x32xbf16>
    %c6 = arith.constant 6 : index
    %c0_79 = arith.constant 0 : index
    %c0_80 = arith.constant 0 : index
    %113 = vector.load %arg4[%c6, %c0_79, %c0_80] : memref<9x32x32xbf16, #tpu.memory_space<vmem>>, vector<1x32x32xbf16>
    %114 = vector.shape_cast %113 : vector<1x32x32xbf16> to vector<32x32xbf16>
    %cst_81 = arith.constant dense<0.000000e+00> : vector<16x32xf32>
    %115 = tpu.matmul %112, %114, %cst_81 {dimension_numbers = #tpu.dot_dimension_numbers<[1], [0], [0], [1], [0, 0, 1, 1], [], []>} : vector<16x32xbf16>, vector<32x32xbf16>, vector<16x32xf32> -> vector<16x32xf32>
    %c0_82 = arith.constant 0 : index
    %c0_83 = arith.constant 0 : index
    %116 = vector.load %arg9[%c0_82, %c0_83] : memref<16x32xf32, #tpu.memory_space<vmem>>, vector<16x32xf32>
    %117 = arith.addf %116, %115 : vector<16x32xf32>
    %c0_84 = arith.constant 0 : index
    %c0_85 = arith.constant 0 : index
    %118 = vector.load %arg9[%c0_84, %c0_85] : memref<16x32xf32, #tpu.memory_space<vmem>>, vector<16x32xf32>
    tpu.vector_store %arg9[%c0_84, %c0_85], %117 {strides = array<i32>} : memref<16x32xf32, #tpu.memory_space<vmem>>, vector<16x32xf32>,
    %c0_86 = arith.constant 0 : index
    %c0_87 = arith.constant 0 : index
    %c0_88 = arith.constant 0 : index
    %119 = vector.load %arg3[%c0_86, %c0_87, %c0_88] : memref<1x16x32xbf16, #tpu.memory_space<vmem>>, vector<1x16x32xbf16>
    %120 = vector.shape_cast %119 : vector<1x16x32xbf16> to vector<16x32xbf16>
    %121 = arith.extf %120 : vector<16x32xbf16> to vector<16x32xf32>
    %c12_i32 = arith.constant 12 : i32
    %122 = tpu.dynamic_rotate %121 by %c12_i32 dim 0 : vector<16x32xf32>, i32 -> vector<16x32xf32>
    %123 = arith.truncf %122 : vector<16x32xf32> to vector<16x32xbf16>
    %c3_i32_89 = arith.constant 3 : i32
    %124 = vector.broadcast %c3_i32_89 : i32 to vector<16x1xi32>
    %125 = arith.cmpi slt, %0, %124 : vector<16x1xi32>
    %cst_90 = arith.constant 0.000000e+00 : bf16
    %126 = vector.shape_cast %125 : vector<16x1xi1> to vector<16x1xi1>
    %127 = vector.broadcast %126 : vector<16x1xi1> to vector<16x32xi1>
    %128 = vector.broadcast %cst_90 : bf16 to vector<16x32xbf16>
    %129 = arith.select %127, %123, %128 : vector<16x32xi1>, vector<16x32xbf16>
    %c7 = arith.constant 7 : index
    %c0_91 = arith.constant 0 : index
    %c0_92 = arith.constant 0 : index
    %130 = vector.load %arg4[%c7, %c0_91, %c0_92] : memref<9x32x32xbf16, #tpu.memory_space<vmem>>, vector<1x32x32xbf16>
    %131 = vector.shape_cast %130 : vector<1x32x32xbf16> to vector<32x32xbf16>
    %cst_93 = arith.constant dense<0.000000e+00> : vector<16x32xf32>
    %132 = tpu.matmul %129, %131, %cst_93 {dimension_numbers = #tpu.dot_dimension_numbers<[1], [0], [0], [1], [0, 0, 1, 1], [], []>} : vector<16x32xbf16>, vector<32x32xbf16>, vector<16x32xf32> -> vector<16x32xf32>
    %c0_94 = arith.constant 0 : index
    %c0_95 = arith.constant 0 : index
    %133 = vector.load %arg9[%c0_94, %c0_95] : memref<16x32xf32, #tpu.memory_space<vmem>>, vector<16x32xf32>
    %134 = arith.addf %133, %132 : vector<16x32xf32>
    %c0_96 = arith.constant 0 : index
    %c0_97 = arith.constant 0 : index
    %135 = vector.load %arg9[%c0_96, %c0_97] : memref<16x32xf32, #tpu.memory_space<vmem>>, vector<16x32xf32>
    tpu.vector_store %arg9[%c0_96, %c0_97], %134 {strides = array<i32>} : memref<16x32xf32, #tpu.memory_space<vmem>>, vector<16x32xf32>,
    %c0_98 = arith.constant 0 : index
    %c0_99 = arith.constant 0 : index
    %c0_100 = arith.constant 0 : index
    %136 = vector.load %arg3[%c0_98, %c0_99, %c0_100] : memref<1x16x32xbf16, #tpu.memory_space<vmem>>, vector<1x16x32xbf16>
    %137 = vector.shape_cast %136 : vector<1x16x32xbf16> to vector<16x32xbf16>
    %138 = arith.extf %137 : vector<16x32xbf16> to vector<16x32xf32>
    %c11_i32 = arith.constant 11 : i32
    %139 = tpu.dynamic_rotate %138 by %c11_i32 dim 0 : vector<16x32xf32>, i32 -> vector<16x32xf32>
    %140 = arith.truncf %139 : vector<16x32xf32> to vector<16x32xbf16>
    %c3_i32_101 = arith.constant 3 : i32
    %141 = vector.broadcast %c3_i32_101 : i32 to vector<16x1xi32>
    %142 = arith.cmpi slt, %0, %141 : vector<16x1xi32>
    %c3_i32_102 = arith.constant 3 : i32
    %143 = vector.broadcast %c3_i32_102 : i32 to vector<16x1xi32>
    %144 = arith.cmpi slt, %1, %143 : vector<16x1xi32>
    %145 = arith.andi %142, %144 : vector<16x1xi1>
    %cst_103 = arith.constant 0.000000e+00 : bf16
    %146 = vector.shape_cast %145 : vector<16x1xi1> to vector<16x1xi1>
    %147 = vector.broadcast %146 : vector<16x1xi1> to vector<16x32xi1>
    %148 = vector.broadcast %cst_103 : bf16 to vector<16x32xbf16>
    %149 = arith.select %147, %140, %148 : vector<16x32xi1>, vector<16x32xbf16>
    %c8 = arith.constant 8 : index
    %c0_104 = arith.constant 0 : index
    %c0_105 = arith.constant 0 : index
    %150 = vector.load %arg4[%c8, %c0_104, %c0_105] : memref<9x32x32xbf16, #tpu.memory_space<vmem>>, vector<1x32x32xbf16>
    %151 = vector.shape_cast %150 : vector<1x32x32xbf16> to vector<32x32xbf16>
    %cst_106 = arith.constant dense<0.000000e+00> : vector<16x32xf32>
    %152 = tpu.matmul %149, %151, %cst_106 {dimension_numbers = #tpu.dot_dimension_numbers<[1], [0], [0], [1], [0, 0, 1, 1], [], []>} : vector<16x32xbf16>, vector<32x32xbf16>, vector<16x32xf32> -> vector<16x32xf32>
    %c0_107 = arith.constant 0 : index
    %c0_108 = arith.constant 0 : index
    %153 = vector.load %arg9[%c0_107, %c0_108] : memref<16x32xf32, #tpu.memory_space<vmem>>, vector<16x32xf32>
    %154 = arith.addf %153, %152 : vector<16x32xf32>
    %c0_109 = arith.constant 0 : index
    %c0_110 = arith.constant 0 : index
    %155 = vector.load %arg9[%c0_109, %c0_110] : memref<16x32xf32, #tpu.memory_space<vmem>>, vector<16x32xf32>
    tpu.vector_store %arg9[%c0_109, %c0_110], %154 {strides = array<i32>} : memref<16x32xf32, #tpu.memory_space<vmem>>, vector<16x32xf32>,
    %c0_111 = arith.constant 0 : index
    %c0_112 = arith.constant 0 : index
    %156 = vector.load %arg9[%c0_111, %c0_112] : memref<16x32xf32, #tpu.memory_space<vmem>>, vector<16x32xf32>
    %c0_113 = arith.constant 0 : index
    %c0_114 = arith.constant 0 : index
    %157 = vector.load %arg5[%c0_113, %c0_114] : memref<1x32xf32, #tpu.memory_space<vmem>>, vector<1x32xf32>
    %158 = vector.broadcast %157 : vector<1x32xf32> to vector<16x32xf32>
    %159 = arith.addf %156, %158 : vector<16x32xf32>
    %c0_115 = arith.constant 0 : index
    %c0_116 = arith.constant 0 : index
    %160 = vector.load %arg9[%c0_115, %c0_116] : memref<16x32xf32, #tpu.memory_space<vmem>>, vector<16x32xf32>
    tpu.vector_store %arg9[%c0_115, %c0_116], %159 {strides = array<i32>} : memref<16x32xf32, #tpu.memory_space<vmem>>, vector<16x32xf32>,
    %c0_117 = arith.constant 0 : index
    %c0_118 = arith.constant 0 : index
    %161 = vector.load %arg9[%c0_117, %c0_118] : memref<16x32xf32, #tpu.memory_space<vmem>>, vector<16x32xf32>
    %cst_119 = arith.constant 0.000000e+00 : f32
    %162 = vector.broadcast %cst_119 : f32 to vector<16x32xf32>
    %163 = arith.maximumf %161, %162 : vector<16x32xf32>
    %c5_i32_120 = arith.constant 5 : i32
    %164 = tpu.dynamic_rotate %163 by %c5_i32_120 dim 0 : vector<16x32xf32>, i32 -> vector<16x32xf32>
    %165 = arith.truncf %164 : vector<16x32xf32> to vector<16x32xbf16>
    %c1_i32_121 = arith.constant 1 : i32
    %166 = vector.broadcast %c1_i32_121 : i32 to vector<16x1xi32>
    %167 = arith.cmpi sge, %0, %166 : vector<16x1xi32>
    %c1_i32_122 = arith.constant 1 : i32
    %168 = vector.broadcast %c1_i32_122 : i32 to vector<16x1xi32>
    %169 = arith.cmpi sge, %1, %168 : vector<16x1xi32>
    %170 = arith.andi %167, %169 : vector<16x1xi1>
    %cst_123 = arith.constant 0.000000e+00 : bf16
    %171 = vector.shape_cast %170 : vector<16x1xi1> to vector<16x1xi1>
    %172 = vector.broadcast %171 : vector<16x1xi1> to vector<16x32xi1>
    %173 = vector.broadcast %cst_123 : bf16 to vector<16x32xbf16>
    %174 = arith.select %172, %165, %173 : vector<16x32xi1>, vector<16x32xbf16>
    %c0_124 = arith.constant 0 : index
    %c0_125 = arith.constant 0 : index
    %c0_126 = arith.constant 0 : index
    %175 = vector.load %arg6[%c0_124, %c0_125, %c0_126] : memref<18x32x8xbf16, #tpu.memory_space<vmem>>, vector<1x32x8xbf16>
    %176 = vector.shape_cast %175 : vector<1x32x8xbf16> to vector<32x8xbf16>
    %cst_127 = arith.constant dense<0.000000e+00> : vector<16x8xf32>
    %177 = tpu.matmul %174, %176, %cst_127 {dimension_numbers = #tpu.dot_dimension_numbers<[1], [0], [0], [1], [0, 0, 1, 1], [], []>} : vector<16x32xbf16>, vector<32x8xbf16>, vector<16x8xf32> -> vector<16x8xf32>
    %c0_128 = arith.constant 0 : index
    %c0_129 = arith.constant 0 : index
    %178 = vector.load %arg10[%c0_128, %c0_129] : memref<16x8xf32, #tpu.memory_space<vmem>>, vector<16x8xf32>
    tpu.vector_store %arg10[%c0_128, %c0_129], %177 {strides = array<i32>} : memref<16x8xf32, #tpu.memory_space<vmem>>, vector<16x8xf32>,
    %c0_130 = arith.constant 0 : index
    %c0_131 = arith.constant 0 : index
    %179 = vector.load %arg9[%c0_130, %c0_131] : memref<16x32xf32, #tpu.memory_space<vmem>>, vector<16x32xf32>
    %cst_132 = arith.constant 0.000000e+00 : f32
    %180 = vector.broadcast %cst_132 : f32 to vector<16x32xf32>
    %181 = arith.maximumf %179, %180 : vector<16x32xf32>
    %c4_i32_133 = arith.constant 4 : i32
    %182 = tpu.dynamic_rotate %181 by %c4_i32_133 dim 0 : vector<16x32xf32>, i32 -> vector<16x32xf32>
    %183 = arith.truncf %182 : vector<16x32xf32> to vector<16x32xbf16>
    %c1_i32_134 = arith.constant 1 : i32
    %184 = vector.broadcast %c1_i32_134 : i32 to vector<16x1xi32>
    %185 = arith.cmpi sge, %0, %184 : vector<16x1xi32>
    %cst_135 = arith.constant 0.000000e+00 : bf16
    %186 = vector.shape_cast %185 : vector<16x1xi1> to vector<16x1xi1>
    %187 = vector.broadcast %186 : vector<16x1xi1> to vector<16x32xi1>
    %188 = vector.broadcast %cst_135 : bf16 to vector<16x32xbf16>
    %189 = arith.select %187, %183, %188 : vector<16x32xi1>, vector<16x32xbf16>
    %c1_136 = arith.constant 1 : index
    %c0_137 = arith.constant 0 : index
    %c0_138 = arith.constant 0 : index
    %190 = vector.load %arg6[%c1_136, %c0_137, %c0_138] : memref<18x32x8xbf16, #tpu.memory_space<vmem>>, vector<1x32x8xbf16>
    %191 = vector.shape_cast %190 : vector<1x32x8xbf16> to vector<32x8xbf16>
    %cst_139 = arith.constant dense<0.000000e+00> : vector<16x8xf32>
    %192 = tpu.matmul %189, %191, %cst_139 {dimension_numbers = #tpu.dot_dimension_numbers<[1], [0], [0], [1], [0, 0, 1, 1], [], []>} : vector<16x32xbf16>, vector<32x8xbf16>, vector<16x8xf32> -> vector<16x8xf32>
    %c0_140 = arith.constant 0 : index
    %c0_141 = arith.constant 0 : index
    %193 = vector.load %arg10[%c0_140, %c0_141] : memref<16x8xf32, #tpu.memory_space<vmem>>, vector<16x8xf32>
    %194 = arith.addf %193, %192 : vector<16x8xf32>
    %c0_142 = arith.constant 0 : index
    %c0_143 = arith.constant 0 : index
    %195 = vector.load %arg10[%c0_142, %c0_143] : memref<16x8xf32, #tpu.memory_space<vmem>>, vector<16x8xf32>
    tpu.vector_store %arg10[%c0_142, %c0_143], %194 {strides = array<i32>} : memref<16x8xf32, #tpu.memory_space<vmem>>, vector<16x8xf32>,
    %c0_144 = arith.constant 0 : index
    %c0_145 = arith.constant 0 : index
    %196 = vector.load %arg9[%c0_144, %c0_145] : memref<16x32xf32, #tpu.memory_space<vmem>>, vector<16x32xf32>
    %cst_146 = arith.constant 0.000000e+00 : f32
    %197 = vector.broadcast %cst_146 : f32 to vector<16x32xf32>
    %198 = arith.maximumf %196, %197 : vector<16x32xf32>
    %c3_i32_147 = arith.constant 3 : i32
    %199 = tpu.dynamic_rotate %198 by %c3_i32_147 dim 0 : vector<16x32xf32>, i32 -> vector<16x32xf32>
    %200 = arith.truncf %199 : vector<16x32xf32> to vector<16x32xbf16>
    %c1_i32_148 = arith.constant 1 : i32
    %201 = vector.broadcast %c1_i32_148 : i32 to vector<16x1xi32>
    %202 = arith.cmpi sge, %0, %201 : vector<16x1xi32>
    %c3_i32_149 = arith.constant 3 : i32
    %203 = vector.broadcast %c3_i32_149 : i32 to vector<16x1xi32>
    %204 = arith.cmpi slt, %1, %203 : vector<16x1xi32>
    %205 = arith.andi %202, %204 : vector<16x1xi1>
    %cst_150 = arith.constant 0.000000e+00 : bf16
    %206 = vector.shape_cast %205 : vector<16x1xi1> to vector<16x1xi1>
    %207 = vector.broadcast %206 : vector<16x1xi1> to vector<16x32xi1>
    %208 = vector.broadcast %cst_150 : bf16 to vector<16x32xbf16>
    %209 = arith.select %207, %200, %208 : vector<16x32xi1>, vector<16x32xbf16>
    %c2_151 = arith.constant 2 : index
    %c0_152 = arith.constant 0 : index
    %c0_153 = arith.constant 0 : index
    %210 = vector.load %arg6[%c2_151, %c0_152, %c0_153] : memref<18x32x8xbf16, #tpu.memory_space<vmem>>, vector<1x32x8xbf16>
    %211 = vector.shape_cast %210 : vector<1x32x8xbf16> to vector<32x8xbf16>
    %cst_154 = arith.constant dense<0.000000e+00> : vector<16x8xf32>
    %212 = tpu.matmul %209, %211, %cst_154 {dimension_numbers = #tpu.dot_dimension_numbers<[1], [0], [0], [1], [0, 0, 1, 1], [], []>} : vector<16x32xbf16>, vector<32x8xbf16>, vector<16x8xf32> -> vector<16x8xf32>
    %c0_155 = arith.constant 0 : index
    %c0_156 = arith.constant 0 : index
    %213 = vector.load %arg10[%c0_155, %c0_156] : memref<16x8xf32, #tpu.memory_space<vmem>>, vector<16x8xf32>
    %214 = arith.addf %213, %212 : vector<16x8xf32>
    %c0_157 = arith.constant 0 : index
    %c0_158 = arith.constant 0 : index
    %215 = vector.load %arg10[%c0_157, %c0_158] : memref<16x8xf32, #tpu.memory_space<vmem>>, vector<16x8xf32>
    tpu.vector_store %arg10[%c0_157, %c0_158], %214 {strides = array<i32>} : memref<16x8xf32, #tpu.memory_space<vmem>>, vector<16x8xf32>,
    %c0_159 = arith.constant 0 : index
    %c0_160 = arith.constant 0 : index
    %216 = vector.load %arg9[%c0_159, %c0_160] : memref<16x32xf32, #tpu.memory_space<vmem>>, vector<16x32xf32>
    %cst_161 = arith.constant 0.000000e+00 : f32
    %217 = vector.broadcast %cst_161 : f32 to vector<16x32xf32>
    %218 = arith.maximumf %216, %217 : vector<16x32xf32>
    %c1_i32_162 = arith.constant 1 : i32
    %219 = tpu.dynamic_rotate %218 by %c1_i32_162 dim 0 : vector<16x32xf32>, i32 -> vector<16x32xf32>
    %220 = arith.truncf %219 : vector<16x32xf32> to vector<16x32xbf16>
    %c1_i32_163 = arith.constant 1 : i32
    %221 = vector.broadcast %c1_i32_163 : i32 to vector<16x1xi32>
    %222 = arith.cmpi sge, %1, %221 : vector<16x1xi32>
    %cst_164 = arith.constant 0.000000e+00 : bf16
    %223 = vector.shape_cast %222 : vector<16x1xi1> to vector<16x1xi1>
    %224 = vector.broadcast %223 : vector<16x1xi1> to vector<16x32xi1>
    %225 = vector.broadcast %cst_164 : bf16 to vector<16x32xbf16>
    %226 = arith.select %224, %220, %225 : vector<16x32xi1>, vector<16x32xbf16>
    %c3_165 = arith.constant 3 : index
    %c0_166 = arith.constant 0 : index
    %c0_167 = arith.constant 0 : index
    %227 = vector.load %arg6[%c3_165, %c0_166, %c0_167] : memref<18x32x8xbf16, #tpu.memory_space<vmem>>, vector<1x32x8xbf16>
    %228 = vector.shape_cast %227 : vector<1x32x8xbf16> to vector<32x8xbf16>
    %cst_168 = arith.constant dense<0.000000e+00> : vector<16x8xf32>
    %229 = tpu.matmul %226, %228, %cst_168 {dimension_numbers = #tpu.dot_dimension_numbers<[1], [0], [0], [1], [0, 0, 1, 1], [], []>} : vector<16x32xbf16>, vector<32x8xbf16>, vector<16x8xf32> -> vector<16x8xf32>
    %c0_169 = arith.constant 0 : index
    %c0_170 = arith.constant 0 : index
    %230 = vector.load %arg10[%c0_169, %c0_170] : memref<16x8xf32, #tpu.memory_space<vmem>>, vector<16x8xf32>
    %231 = arith.addf %230, %229 : vector<16x8xf32>
    %c0_171 = arith.constant 0 : index
    %c0_172 = arith.constant 0 : index
    %232 = vector.load %arg10[%c0_171, %c0_172] : memref<16x8xf32, #tpu.memory_space<vmem>>, vector<16x8xf32>
    tpu.vector_store %arg10[%c0_171, %c0_172], %231 {strides = array<i32>} : memref<16x8xf32, #tpu.memory_space<vmem>>, vector<16x8xf32>,
    %c0_173 = arith.constant 0 : index
    %c0_174 = arith.constant 0 : index
    %233 = vector.load %arg9[%c0_173, %c0_174] : memref<16x32xf32, #tpu.memory_space<vmem>>, vector<16x32xf32>
    %cst_175 = arith.constant 0.000000e+00 : f32
    %234 = vector.broadcast %cst_175 : f32 to vector<16x32xf32>
    %235 = arith.maximumf %233, %234 : vector<16x32xf32>
    %236 = arith.truncf %235 : vector<16x32xf32> to vector<16x32xbf16>
    %c4_176 = arith.constant 4 : index
    %c0_177 = arith.constant 0 : index
    %c0_178 = arith.constant 0 : index
    %237 = vector.load %arg6[%c4_176, %c0_177, %c0_178] : memref<18x32x8xbf16, #tpu.memory_space<vmem>>, vector<1x32x8xbf16>
    %238 = vector.shape_cast %237 : vector<1x32x8xbf16> to vector<32x8xbf16>
    %cst_179 = arith.constant dense<0.000000e+00> : vector<16x8xf32>
    %239 = tpu.matmul %236, %238, %cst_179 {dimension_numbers = #tpu.dot_dimension_numbers<[1], [0], [0], [1], [0, 0, 1, 1], [], []>} : vector<16x32xbf16>, vector<32x8xbf16>, vector<16x8xf32> -> vector<16x8xf32>
    %c0_180 = arith.constant 0 : index
    %c0_181 = arith.constant 0 : index
    %240 = vector.load %arg10[%c0_180, %c0_181] : memref<16x8xf32, #tpu.memory_space<vmem>>, vector<16x8xf32>
    %241 = arith.addf %240, %239 : vector<16x8xf32>
    %c0_182 = arith.constant 0 : index
    %c0_183 = arith.constant 0 : index
    %242 = vector.load %arg10[%c0_182, %c0_183] : memref<16x8xf32, #tpu.memory_space<vmem>>, vector<16x8xf32>
    tpu.vector_store %arg10[%c0_182, %c0_183], %241 {strides = array<i32>} : memref<16x8xf32, #tpu.memory_space<vmem>>, vector<16x8xf32>,
    %c0_184 = arith.constant 0 : index
    %c0_185 = arith.constant 0 : index
    %243 = vector.load %arg9[%c0_184, %c0_185] : memref<16x32xf32, #tpu.memory_space<vmem>>, vector<16x32xf32>
    %cst_186 = arith.constant 0.000000e+00 : f32
    %244 = vector.broadcast %cst_186 : f32 to vector<16x32xf32>
    %245 = arith.maximumf %243, %244 : vector<16x32xf32>
    %c15_i32_187 = arith.constant 15 : i32
    %246 = tpu.dynamic_rotate %245 by %c15_i32_187 dim 0 : vector<16x32xf32>, i32 -> vector<16x32xf32>
    %247 = arith.truncf %246 : vector<16x32xf32> to vector<16x32xbf16>
    %c3_i32_188 = arith.constant 3 : i32
    %248 = vector.broadcast %c3_i32_188 : i32 to vector<16x1xi32>
    %249 = arith.cmpi slt, %1, %248 : vector<16x1xi32>
    %cst_189 = arith.constant 0.000000e+00 : bf16
    %250 = vector.shape_cast %249 : vector<16x1xi1> to vector<16x1xi1>
    %251 = vector.broadcast %250 : vector<16x1xi1> to vector<16x32xi1>
    %252 = vector.broadcast %cst_189 : bf16 to vector<16x32xbf16>
    %253 = arith.select %251, %247, %252 : vector<16x32xi1>, vector<16x32xbf16>
    %c5_190 = arith.constant 5 : index
    %c0_191 = arith.constant 0 : index
    %c0_192 = arith.constant 0 : index
    %254 = vector.load %arg6[%c5_190, %c0_191, %c0_192] : memref<18x32x8xbf16, #tpu.memory_space<vmem>>, vector<1x32x8xbf16>
    %255 = vector.shape_cast %254 : vector<1x32x8xbf16> to vector<32x8xbf16>
    %cst_193 = arith.constant dense<0.000000e+00> : vector<16x8xf32>
    %256 = tpu.matmul %253, %255, %cst_193 {dimension_numbers = #tpu.dot_dimension_numbers<[1], [0], [0], [1], [0, 0, 1, 1], [], []>} : vector<16x32xbf16>, vector<32x8xbf16>, vector<16x8xf32> -> vector<16x8xf32>
    %c0_194 = arith.constant 0 : index
    %c0_195 = arith.constant 0 : index
    %257 = vector.load %arg10[%c0_194, %c0_195] : memref<16x8xf32, #tpu.memory_space<vmem>>, vector<16x8xf32>
    %258 = arith.addf %257, %256 : vector<16x8xf32>
    %c0_196 = arith.constant 0 : index
    %c0_197 = arith.constant 0 : index
    %259 = vector.load %arg10[%c0_196, %c0_197] : memref<16x8xf32, #tpu.memory_space<vmem>>, vector<16x8xf32>
    tpu.vector_store %arg10[%c0_196, %c0_197], %258 {strides = array<i32>} : memref<16x8xf32, #tpu.memory_space<vmem>>, vector<16x8xf32>,
    %c0_198 = arith.constant 0 : index
    %c0_199 = arith.constant 0 : index
    %260 = vector.load %arg9[%c0_198, %c0_199] : memref<16x32xf32, #tpu.memory_space<vmem>>, vector<16x32xf32>
    %cst_200 = arith.constant 0.000000e+00 : f32
    %261 = vector.broadcast %cst_200 : f32 to vector<16x32xf32>
    %262 = arith.maximumf %260, %261 : vector<16x32xf32>
    %c13_i32_201 = arith.constant 13 : i32
    %263 = tpu.dynamic_rotate %262 by %c13_i32_201 dim 0 : vector<16x32xf32>, i32 -> vector<16x32xf32>
    %264 = arith.truncf %263 : vector<16x32xf32> to vector<16x32xbf16>
    %c3_i32_202 = arith.constant 3 : i32
    %265 = vector.broadcast %c3_i32_202 : i32 to vector<16x1xi32>
    %266 = arith.cmpi slt, %0, %265 : vector<16x1xi32>
    %c1_i32_203 = arith.constant 1 : i32
    %267 = vector.broadcast %c1_i32_203 : i32 to vector<16x1xi32>
    %268 = arith.cmpi sge, %1, %267 : vector<16x1xi32>
    %269 = arith.andi %266, %268 : vector<16x1xi1>
    %cst_204 = arith.constant 0.000000e+00 : bf16
    %270 = vector.shape_cast %269 : vector<16x1xi1> to vector<16x1xi1>
    %271 = vector.broadcast %270 : vector<16x1xi1> to vector<16x32xi1>
    %272 = vector.broadcast %cst_204 : bf16 to vector<16x32xbf16>
    %273 = arith.select %271, %264, %272 : vector<16x32xi1>, vector<16x32xbf16>
    %c6_205 = arith.constant 6 : index
    %c0_206 = arith.constant 0 : index
    %c0_207 = arith.constant 0 : index
    %274 = vector.load %arg6[%c6_205, %c0_206, %c0_207] : memref<18x32x8xbf16, #tpu.memory_space<vmem>>, vector<1x32x8xbf16>
    %275 = vector.shape_cast %274 : vector<1x32x8xbf16> to vector<32x8xbf16>
    %cst_208 = arith.constant dense<0.000000e+00> : vector<16x8xf32>
    %276 = tpu.matmul %273, %275, %cst_208 {dimension_numbers = #tpu.dot_dimension_numbers<[1], [0], [0], [1], [0, 0, 1, 1], [], []>} : vector<16x32xbf16>, vector<32x8xbf16>, vector<16x8xf32> -> vector<16x8xf32>
    %c0_209 = arith.constant 0 : index
    %c0_210 = arith.constant 0 : index
    %277 = vector.load %arg10[%c0_209, %c0_210] : memref<16x8xf32, #tpu.memory_space<vmem>>, vector<16x8xf32>
    %278 = arith.addf %277, %276 : vector<16x8xf32>
    %c0_211 = arith.constant 0 : index
    %c0_212 = arith.constant 0 : index
    %279 = vector.load %arg10[%c0_211, %c0_212] : memref<16x8xf32, #tpu.memory_space<vmem>>, vector<16x8xf32>
    tpu.vector_store %arg10[%c0_211, %c0_212], %278 {strides = array<i32>} : memref<16x8xf32, #tpu.memory_space<vmem>>, vector<16x8xf32>,
    %c0_213 = arith.constant 0 : index
    %c0_214 = arith.constant 0 : index
    %280 = vector.load %arg9[%c0_213, %c0_214] : memref<16x32xf32, #tpu.memory_space<vmem>>, vector<16x32xf32>
    %cst_215 = arith.constant 0.000000e+00 : f32
    %281 = vector.broadcast %cst_215 : f32 to vector<16x32xf32>
    %282 = arith.maximumf %280, %281 : vector<16x32xf32>
    %c12_i32_216 = arith.constant 12 : i32
    %283 = tpu.dynamic_rotate %282 by %c12_i32_216 dim 0 : vector<16x32xf32>, i32 -> vector<16x32xf32>
    %284 = arith.truncf %283 : vector<16x32xf32> to vector<16x32xbf16>
    %c3_i32_217 = arith.constant 3 : i32
    %285 = vector.broadcast %c3_i32_217 : i32 to vector<16x1xi32>
    %286 = arith.cmpi slt, %0, %285 : vector<16x1xi32>
    %cst_218 = arith.constant 0.000000e+00 : bf16
    %287 = vector.shape_cast %286 : vector<16x1xi1> to vector<16x1xi1>
    %288 = vector.broadcast %287 : vector<16x1xi1> to vector<16x32xi1>
    %289 = vector.broadcast %cst_218 : bf16 to vector<16x32xbf16>
    %290 = arith.select %288, %284, %289 : vector<16x32xi1>, vector<16x32xbf16>
    %c7_219 = arith.constant 7 : index
    %c0_220 = arith.constant 0 : index
    %c0_221 = arith.constant 0 : index
    %291 = vector.load %arg6[%c7_219, %c0_220, %c0_221] : memref<18x32x8xbf16, #tpu.memory_space<vmem>>, vector<1x32x8xbf16>
    %292 = vector.shape_cast %291 : vector<1x32x8xbf16> to vector<32x8xbf16>
    %cst_222 = arith.constant dense<0.000000e+00> : vector<16x8xf32>
    %293 = tpu.matmul %290, %292, %cst_222 {dimension_numbers = #tpu.dot_dimension_numbers<[1], [0], [0], [1], [0, 0, 1, 1], [], []>} : vector<16x32xbf16>, vector<32x8xbf16>, vector<16x8xf32> -> vector<16x8xf32>
    %c0_223 = arith.constant 0 : index
    %c0_224 = arith.constant 0 : index
    %294 = vector.load %arg10[%c0_223, %c0_224] : memref<16x8xf32, #tpu.memory_space<vmem>>, vector<16x8xf32>
    %295 = arith.addf %294, %293 : vector<16x8xf32>
    %c0_225 = arith.constant 0 : index
    %c0_226 = arith.constant 0 : index
    %296 = vector.load %arg10[%c0_225, %c0_226] : memref<16x8xf32, #tpu.memory_space<vmem>>, vector<16x8xf32>
    tpu.vector_store %arg10[%c0_225, %c0_226], %295 {strides = array<i32>} : memref<16x8xf32, #tpu.memory_space<vmem>>, vector<16x8xf32>,
    %c0_227 = arith.constant 0 : index
    %c0_228 = arith.constant 0 : index
    %297 = vector.load %arg9[%c0_227, %c0_228] : memref<16x32xf32, #tpu.memory_space<vmem>>, vector<16x32xf32>
    %cst_229 = arith.constant 0.000000e+00 : f32
    %298 = vector.broadcast %cst_229 : f32 to vector<16x32xf32>
    %299 = arith.maximumf %297, %298 : vector<16x32xf32>
    %c11_i32_230 = arith.constant 11 : i32
    %300 = tpu.dynamic_rotate %299 by %c11_i32_230 dim 0 : vector<16x32xf32>, i32 -> vector<16x32xf32>
    %301 = arith.truncf %300 : vector<16x32xf32> to vector<16x32xbf16>
    %c3_i32_231 = arith.constant 3 : i32
    %302 = vector.broadcast %c3_i32_231 : i32 to vector<16x1xi32>
    %303 = arith.cmpi slt, %0, %302 : vector<16x1xi32>
    %c3_i32_232 = arith.constant 3 : i32
    %304 = vector.broadcast %c3_i32_232 : i32 to vector<16x1xi32>
    %305 = arith.cmpi slt, %1, %304 : vector<16x1xi32>
    %306 = arith.andi %303, %305 : vector<16x1xi1>
    %cst_233 = arith.constant 0.000000e+00 : bf16
    %307 = vector.shape_cast %306 : vector<16x1xi1> to vector<16x1xi1>
    %308 = vector.broadcast %307 : vector<16x1xi1> to vector<16x32xi1>
    %309 = vector.broadcast %cst_233 : bf16 to vector<16x32xbf16>
    %310 = arith.select %308, %301, %309 : vector<16x32xi1>, vector<16x32xbf16>
    %c8_234 = arith.constant 8 : index
    %c0_235 = arith.constant 0 : index
    %c0_236 = arith.constant 0 : index
    %311 = vector.load %arg6[%c8_234, %c0_235, %c0_236] : memref<18x32x8xbf16, #tpu.memory_space<vmem>>, vector<1x32x8xbf16>
    %312 = vector.shape_cast %311 : vector<1x32x8xbf16> to vector<32x8xbf16>
    %cst_237 = arith.constant dense<0.000000e+00> : vector<16x8xf32>
    %313 = tpu.matmul %310, %312, %cst_237 {dimension_numbers = #tpu.dot_dimension_numbers<[1], [0], [0], [1], [0, 0, 1, 1], [], []>} : vector<16x32xbf16>, vector<32x8xbf16>, vector<16x8xf32> -> vector<16x8xf32>
    %c0_238 = arith.constant 0 : index
    %c0_239 = arith.constant 0 : index
    %314 = vector.load %arg10[%c0_238, %c0_239] : memref<16x8xf32, #tpu.memory_space<vmem>>, vector<16x8xf32>
    %315 = arith.addf %314, %313 : vector<16x8xf32>
    %c0_240 = arith.constant 0 : index
    %c0_241 = arith.constant 0 : index
    %316 = vector.load %arg10[%c0_240, %c0_241] : memref<16x8xf32, #tpu.memory_space<vmem>>, vector<16x8xf32>
    tpu.vector_store %arg10[%c0_240, %c0_241], %315 {strides = array<i32>} : memref<16x8xf32, #tpu.memory_space<vmem>>, vector<16x8xf32>,
    %c0_242 = arith.constant 0 : index
    %c0_243 = arith.constant 0 : index
    %317 = vector.load %arg10[%c0_242, %c0_243] : memref<16x8xf32, #tpu.memory_space<vmem>>, vector<16x8xf32>
    %cst_244 = arith.constant 0.000000e+00 : f32
    %318 = vector.broadcast %cst_244 : f32 to vector<16x8xf32>
    %319 = arith.maximumf %317, %318 : vector<16x8xf32>
    %320 = arith.truncf %319 : vector<16x8xf32> to vector<16x8xbf16>
    %c0_245 = arith.constant 0 : index
    %c0_246 = arith.constant 0 : index
    %321 = vector.load %arg9[%c0_245, %c0_246] : memref<16x32xf32, #tpu.memory_space<vmem>>, vector<16x32xf32>
    %c0_247 = arith.constant 0 : index
    %c0_248 = arith.constant 0 : index
    %c0_249 = arith.constant 0 : index
    %322 = vector.load %arg7[%c0_247, %c0_248, %c0_249] : memref<2x8x32xbf16, #tpu.memory_space<vmem>>, vector<1x8x32xbf16>
    %323 = vector.shape_cast %322 : vector<1x8x32xbf16> to vector<8x32xbf16>
    %cst_250 = arith.constant dense<0.000000e+00> : vector<16x32xf32>
    %324 = tpu.matmul %320, %323, %cst_250 {dimension_numbers = #tpu.dot_dimension_numbers<[1], [0], [0], [1], [0, 0, 1, 1], [], []>} : vector<16x8xbf16>, vector<8x32xbf16>, vector<16x32xf32> -> vector<16x32xf32>
    %325 = arith.addf %321, %324 : vector<16x32xf32>
    %c0_251 = arith.constant 0 : index
    %c0_252 = arith.constant 0 : index
    %326 = vector.load %arg9[%c0_251, %c0_252] : memref<16x32xf32, #tpu.memory_space<vmem>>, vector<16x32xf32>
    tpu.vector_store %arg9[%c0_251, %c0_252], %325 {strides = array<i32>} : memref<16x32xf32, #tpu.memory_space<vmem>>, vector<16x32xf32>,
    %c0_253 = arith.constant 0 : index
    %c0_254 = arith.constant 0 : index
    %327 = vector.load %arg9[%c0_253, %c0_254] : memref<16x32xf32, #tpu.memory_space<vmem>>, vector<16x32xf32>
    %cst_255 = arith.constant 0.000000e+00 : f32
    %328 = vector.broadcast %cst_255 : f32 to vector<16x32xf32>
    %329 = arith.maximumf %327, %328 : vector<16x32xf32>
    %c5_i32_256 = arith.constant 5 : i32
    %330 = tpu.dynamic_rotate %329 by %c5_i32_256 dim 0 : vector<16x32xf32>, i32 -> vector<16x32xf32>
    %331 = arith.truncf %330 : vector<16x32xf32> to vector<16x32xbf16>
    %c1_i32_257 = arith.constant 1 : i32
    %332 = vector.broadcast %c1_i32_257 : i32 to vector<16x1xi32>
    %333 = arith.cmpi sge, %0, %332 : vector<16x1xi32>
    %c1_i32_258 = arith.constant 1 : i32
    %334 = vector.broadcast %c1_i32_258 : i32 to vector<16x1xi32>
    %335 = arith.cmpi sge, %1, %334 : vector<16x1xi32>
    %336 = arith.andi %333, %335 : vector<16x1xi1>
    %cst_259 = arith.constant 0.000000e+00 : bf16
    %337 = vector.shape_cast %336 : vector<16x1xi1> to vector<16x1xi1>
    %338 = vector.broadcast %337 : vector<16x1xi1> to vector<16x32xi1>
    %339 = vector.broadcast %cst_259 : bf16 to vector<16x32xbf16>
    %340 = arith.select %338, %331, %339 : vector<16x32xi1>, vector<16x32xbf16>
    %c9 = arith.constant 9 : index
    %c0_260 = arith.constant 0 : index
    %c0_261 = arith.constant 0 : index
    %341 = vector.load %arg6[%c9, %c0_260, %c0_261] : memref<18x32x8xbf16, #tpu.memory_space<vmem>>, vector<1x32x8xbf16>
    %342 = vector.shape_cast %341 : vector<1x32x8xbf16> to vector<32x8xbf16>
    %cst_262 = arith.constant dense<0.000000e+00> : vector<16x8xf32>
    %343 = tpu.matmul %340, %342, %cst_262 {dimension_numbers = #tpu.dot_dimension_numbers<[1], [0], [0], [1], [0, 0, 1, 1], [], []>} : vector<16x32xbf16>, vector<32x8xbf16>, vector<16x8xf32> -> vector<16x8xf32>
    %c0_263 = arith.constant 0 : index
    %c0_264 = arith.constant 0 : index
    %344 = vector.load %arg10[%c0_263, %c0_264] : memref<16x8xf32, #tpu.memory_space<vmem>>, vector<16x8xf32>
    tpu.vector_store %arg10[%c0_263, %c0_264], %343 {strides = array<i32>} : memref<16x8xf32, #tpu.memory_space<vmem>>, vector<16x8xf32>,
    %c0_265 = arith.constant 0 : index
    %c0_266 = arith.constant 0 : index
    %345 = vector.load %arg9[%c0_265, %c0_266] : memref<16x32xf32, #tpu.memory_space<vmem>>, vector<16x32xf32>
    %cst_267 = arith.constant 0.000000e+00 : f32
    %346 = vector.broadcast %cst_267 : f32 to vector<16x32xf32>
    %347 = arith.maximumf %345, %346 : vector<16x32xf32>
    %c4_i32_268 = arith.constant 4 : i32
    %348 = tpu.dynamic_rotate %347 by %c4_i32_268 dim 0 : vector<16x32xf32>, i32 -> vector<16x32xf32>
    %349 = arith.truncf %348 : vector<16x32xf32> to vector<16x32xbf16>
    %c1_i32_269 = arith.constant 1 : i32
    %350 = vector.broadcast %c1_i32_269 : i32 to vector<16x1xi32>
    %351 = arith.cmpi sge, %0, %350 : vector<16x1xi32>
    %cst_270 = arith.constant 0.000000e+00 : bf16
    %352 = vector.shape_cast %351 : vector<16x1xi1> to vector<16x1xi1>
    %353 = vector.broadcast %352 : vector<16x1xi1> to vector<16x32xi1>
    %354 = vector.broadcast %cst_270 : bf16 to vector<16x32xbf16>
    %355 = arith.select %353, %349, %354 : vector<16x32xi1>, vector<16x32xbf16>
    %c10 = arith.constant 10 : index
    %c0_271 = arith.constant 0 : index
    %c0_272 = arith.constant 0 : index
    %356 = vector.load %arg6[%c10, %c0_271, %c0_272] : memref<18x32x8xbf16, #tpu.memory_space<vmem>>, vector<1x32x8xbf16>
    %357 = vector.shape_cast %356 : vector<1x32x8xbf16> to vector<32x8xbf16>
    %cst_273 = arith.constant dense<0.000000e+00> : vector<16x8xf32>
    %358 = tpu.matmul %355, %357, %cst_273 {dimension_numbers = #tpu.dot_dimension_numbers<[1], [0], [0], [1], [0, 0, 1, 1], [], []>} : vector<16x32xbf16>, vector<32x8xbf16>, vector<16x8xf32> -> vector<16x8xf32>
    %c0_274 = arith.constant 0 : index
    %c0_275 = arith.constant 0 : index
    %359 = vector.load %arg10[%c0_274, %c0_275] : memref<16x8xf32, #tpu.memory_space<vmem>>, vector<16x8xf32>
    %360 = arith.addf %359, %358 : vector<16x8xf32>
    %c0_276 = arith.constant 0 : index
    %c0_277 = arith.constant 0 : index
    %361 = vector.load %arg10[%c0_276, %c0_277] : memref<16x8xf32, #tpu.memory_space<vmem>>, vector<16x8xf32>
    tpu.vector_store %arg10[%c0_276, %c0_277], %360 {strides = array<i32>} : memref<16x8xf32, #tpu.memory_space<vmem>>, vector<16x8xf32>,
    %c0_278 = arith.constant 0 : index
    %c0_279 = arith.constant 0 : index
    %362 = vector.load %arg9[%c0_278, %c0_279] : memref<16x32xf32, #tpu.memory_space<vmem>>, vector<16x32xf32>
    %cst_280 = arith.constant 0.000000e+00 : f32
    %363 = vector.broadcast %cst_280 : f32 to vector<16x32xf32>
    %364 = arith.maximumf %362, %363 : vector<16x32xf32>
    %c3_i32_281 = arith.constant 3 : i32
    %365 = tpu.dynamic_rotate %364 by %c3_i32_281 dim 0 : vector<16x32xf32>, i32 -> vector<16x32xf32>
    %366 = arith.truncf %365 : vector<16x32xf32> to vector<16x32xbf16>
    %c1_i32_282 = arith.constant 1 : i32
    %367 = vector.broadcast %c1_i32_282 : i32 to vector<16x1xi32>
    %368 = arith.cmpi sge, %0, %367 : vector<16x1xi32>
    %c3_i32_283 = arith.constant 3 : i32
    %369 = vector.broadcast %c3_i32_283 : i32 to vector<16x1xi32>
    %370 = arith.cmpi slt, %1, %369 : vector<16x1xi32>
    %371 = arith.andi %368, %370 : vector<16x1xi1>
    %cst_284 = arith.constant 0.000000e+00 : bf16
    %372 = vector.shape_cast %371 : vector<16x1xi1> to vector<16x1xi1>
    %373 = vector.broadcast %372 : vector<16x1xi1> to vector<16x32xi1>
    %374 = vector.broadcast %cst_284 : bf16 to vector<16x32xbf16>
    %375 = arith.select %373, %366, %374 : vector<16x32xi1>, vector<16x32xbf16>
    %c11 = arith.constant 11 : index
    %c0_285 = arith.constant 0 : index
    %c0_286 = arith.constant 0 : index
    %376 = vector.load %arg6[%c11, %c0_285, %c0_286] : memref<18x32x8xbf16, #tpu.memory_space<vmem>>, vector<1x32x8xbf16>
    %377 = vector.shape_cast %376 : vector<1x32x8xbf16> to vector<32x8xbf16>
    %cst_287 = arith.constant dense<0.000000e+00> : vector<16x8xf32>
    %378 = tpu.matmul %375, %377, %cst_287 {dimension_numbers = #tpu.dot_dimension_numbers<[1], [0], [0], [1], [0, 0, 1, 1], [], []>} : vector<16x32xbf16>, vector<32x8xbf16>, vector<16x8xf32> -> vector<16x8xf32>
    %c0_288 = arith.constant 0 : index
    %c0_289 = arith.constant 0 : index
    %379 = vector.load %arg10[%c0_288, %c0_289] : memref<16x8xf32, #tpu.memory_space<vmem>>, vector<16x8xf32>
    %380 = arith.addf %379, %378 : vector<16x8xf32>
    %c0_290 = arith.constant 0 : index
    %c0_291 = arith.constant 0 : index
    %381 = vector.load %arg10[%c0_290, %c0_291] : memref<16x8xf32, #tpu.memory_space<vmem>>, vector<16x8xf32>
    tpu.vector_store %arg10[%c0_290, %c0_291], %380 {strides = array<i32>} : memref<16x8xf32, #tpu.memory_space<vmem>>, vector<16x8xf32>,
    %c0_292 = arith.constant 0 : index
    %c0_293 = arith.constant 0 : index
    %382 = vector.load %arg9[%c0_292, %c0_293] : memref<16x32xf32, #tpu.memory_space<vmem>>, vector<16x32xf32>
    %cst_294 = arith.constant 0.000000e+00 : f32
    %383 = vector.broadcast %cst_294 : f32 to vector<16x32xf32>
    %384 = arith.maximumf %382, %383 : vector<16x32xf32>
    %c1_i32_295 = arith.constant 1 : i32
    %385 = tpu.dynamic_rotate %384 by %c1_i32_295 dim 0 : vector<16x32xf32>, i32 -> vector<16x32xf32>
    %386 = arith.truncf %385 : vector<16x32xf32> to vector<16x32xbf16>
    %c1_i32_296 = arith.constant 1 : i32
    %387 = vector.broadcast %c1_i32_296 : i32 to vector<16x1xi32>
    %388 = arith.cmpi sge, %1, %387 : vector<16x1xi32>
    %cst_297 = arith.constant 0.000000e+00 : bf16
    %389 = vector.shape_cast %388 : vector<16x1xi1> to vector<16x1xi1>
    %390 = vector.broadcast %389 : vector<16x1xi1> to vector<16x32xi1>
    %391 = vector.broadcast %cst_297 : bf16 to vector<16x32xbf16>
    %392 = arith.select %390, %386, %391 : vector<16x32xi1>, vector<16x32xbf16>
    %c12 = arith.constant 12 : index
    %c0_298 = arith.constant 0 : index
    %c0_299 = arith.constant 0 : index
    %393 = vector.load %arg6[%c12, %c0_298, %c0_299] : memref<18x32x8xbf16, #tpu.memory_space<vmem>>, vector<1x32x8xbf16>
    %394 = vector.shape_cast %393 : vector<1x32x8xbf16> to vector<32x8xbf16>
    %cst_300 = arith.constant dense<0.000000e+00> : vector<16x8xf32>
    %395 = tpu.matmul %392, %394, %cst_300 {dimension_numbers = #tpu.dot_dimension_numbers<[1], [0], [0], [1], [0, 0, 1, 1], [], []>} : vector<16x32xbf16>, vector<32x8xbf16>, vector<16x8xf32> -> vector<16x8xf32>
    %c0_301 = arith.constant 0 : index
    %c0_302 = arith.constant 0 : index
    %396 = vector.load %arg10[%c0_301, %c0_302] : memref<16x8xf32, #tpu.memory_space<vmem>>, vector<16x8xf32>
    %397 = arith.addf %396, %395 : vector<16x8xf32>
    %c0_303 = arith.constant 0 : index
    %c0_304 = arith.constant 0 : index
    %398 = vector.load %arg10[%c0_303, %c0_304] : memref<16x8xf32, #tpu.memory_space<vmem>>, vector<16x8xf32>
    tpu.vector_store %arg10[%c0_303, %c0_304], %397 {strides = array<i32>} : memref<16x8xf32, #tpu.memory_space<vmem>>, vector<16x8xf32>,
    %c0_305 = arith.constant 0 : index
    %c0_306 = arith.constant 0 : index
    %399 = vector.load %arg9[%c0_305, %c0_306] : memref<16x32xf32, #tpu.memory_space<vmem>>, vector<16x32xf32>
    %cst_307 = arith.constant 0.000000e+00 : f32
    %400 = vector.broadcast %cst_307 : f32 to vector<16x32xf32>
    %401 = arith.maximumf %399, %400 : vector<16x32xf32>
    %402 = arith.truncf %401 : vector<16x32xf32> to vector<16x32xbf16>
    %c13 = arith.constant 13 : index
    %c0_308 = arith.constant 0 : index
    %c0_309 = arith.constant 0 : index
    %403 = vector.load %arg6[%c13, %c0_308, %c0_309] : memref<18x32x8xbf16, #tpu.memory_space<vmem>>, vector<1x32x8xbf16>
    %404 = vector.shape_cast %403 : vector<1x32x8xbf16> to vector<32x8xbf16>
    %cst_310 = arith.constant dense<0.000000e+00> : vector<16x8xf32>
    %405 = tpu.matmul %402, %404, %cst_310 {dimension_numbers = #tpu.dot_dimension_numbers<[1], [0], [0], [1], [0, 0, 1, 1], [], []>} : vector<16x32xbf16>, vector<32x8xbf16>, vector<16x8xf32> -> vector<16x8xf32>
    %c0_311 = arith.constant 0 : index
    %c0_312 = arith.constant 0 : index
    %406 = vector.load %arg10[%c0_311, %c0_312] : memref<16x8xf32, #tpu.memory_space<vmem>>, vector<16x8xf32>
    %407 = arith.addf %406, %405 : vector<16x8xf32>
    %c0_313 = arith.constant 0 : index
    %c0_314 = arith.constant 0 : index
    %408 = vector.load %arg10[%c0_313, %c0_314] : memref<16x8xf32, #tpu.memory_space<vmem>>, vector<16x8xf32>
    tpu.vector_store %arg10[%c0_313, %c0_314], %407 {strides = array<i32>} : memref<16x8xf32, #tpu.memory_space<vmem>>, vector<16x8xf32>,
    %c0_315 = arith.constant 0 : index
    %c0_316 = arith.constant 0 : index
    %409 = vector.load %arg9[%c0_315, %c0_316] : memref<16x32xf32, #tpu.memory_space<vmem>>, vector<16x32xf32>
    %cst_317 = arith.constant 0.000000e+00 : f32
    %410 = vector.broadcast %cst_317 : f32 to vector<16x32xf32>
    %411 = arith.maximumf %409, %410 : vector<16x32xf32>
    %c15_i32_318 = arith.constant 15 : i32
    %412 = tpu.dynamic_rotate %411 by %c15_i32_318 dim 0 : vector<16x32xf32>, i32 -> vector<16x32xf32>
    %413 = arith.truncf %412 : vector<16x32xf32> to vector<16x32xbf16>
    %c3_i32_319 = arith.constant 3 : i32
    %414 = vector.broadcast %c3_i32_319 : i32 to vector<16x1xi32>
    %415 = arith.cmpi slt, %1, %414 : vector<16x1xi32>
    %cst_320 = arith.constant 0.000000e+00 : bf16
    %416 = vector.shape_cast %415 : vector<16x1xi1> to vector<16x1xi1>
    %417 = vector.broadcast %416 : vector<16x1xi1> to vector<16x32xi1>
    %418 = vector.broadcast %cst_320 : bf16 to vector<16x32xbf16>
    %419 = arith.select %417, %413, %418 : vector<16x32xi1>, vector<16x32xbf16>
    %c14 = arith.constant 14 : index
    %c0_321 = arith.constant 0 : index
    %c0_322 = arith.constant 0 : index
    %420 = vector.load %arg6[%c14, %c0_321, %c0_322] : memref<18x32x8xbf16, #tpu.memory_space<vmem>>, vector<1x32x8xbf16>
    %421 = vector.shape_cast %420 : vector<1x32x8xbf16> to vector<32x8xbf16>
    %cst_323 = arith.constant dense<0.000000e+00> : vector<16x8xf32>
    %422 = tpu.matmul %419, %421, %cst_323 {dimension_numbers = #tpu.dot_dimension_numbers<[1], [0], [0], [1], [0, 0, 1, 1], [], []>} : vector<16x32xbf16>, vector<32x8xbf16>, vector<16x8xf32> -> vector<16x8xf32>
    %c0_324 = arith.constant 0 : index
    %c0_325 = arith.constant 0 : index
    %423 = vector.load %arg10[%c0_324, %c0_325] : memref<16x8xf32, #tpu.memory_space<vmem>>, vector<16x8xf32>
    %424 = arith.addf %423, %422 : vector<16x8xf32>
    %c0_326 = arith.constant 0 : index
    %c0_327 = arith.constant 0 : index
    %425 = vector.load %arg10[%c0_326, %c0_327] : memref<16x8xf32, #tpu.memory_space<vmem>>, vector<16x8xf32>
    tpu.vector_store %arg10[%c0_326, %c0_327], %424 {strides = array<i32>} : memref<16x8xf32, #tpu.memory_space<vmem>>, vector<16x8xf32>,
    %c0_328 = arith.constant 0 : index
    %c0_329 = arith.constant 0 : index
    %426 = vector.load %arg9[%c0_328, %c0_329] : memref<16x32xf32, #tpu.memory_space<vmem>>, vector<16x32xf32>
    %cst_330 = arith.constant 0.000000e+00 : f32
    %427 = vector.broadcast %cst_330 : f32 to vector<16x32xf32>
    %428 = arith.maximumf %426, %427 : vector<16x32xf32>
    %c13_i32_331 = arith.constant 13 : i32
    %429 = tpu.dynamic_rotate %428 by %c13_i32_331 dim 0 : vector<16x32xf32>, i32 -> vector<16x32xf32>
    %430 = arith.truncf %429 : vector<16x32xf32> to vector<16x32xbf16>
    %c3_i32_332 = arith.constant 3 : i32
    %431 = vector.broadcast %c3_i32_332 : i32 to vector<16x1xi32>
    %432 = arith.cmpi slt, %0, %431 : vector<16x1xi32>
    %c1_i32_333 = arith.constant 1 : i32
    %433 = vector.broadcast %c1_i32_333 : i32 to vector<16x1xi32>
    %434 = arith.cmpi sge, %1, %433 : vector<16x1xi32>
    %435 = arith.andi %432, %434 : vector<16x1xi1>
    %cst_334 = arith.constant 0.000000e+00 : bf16
    %436 = vector.shape_cast %435 : vector<16x1xi1> to vector<16x1xi1>
    %437 = vector.broadcast %436 : vector<16x1xi1> to vector<16x32xi1>
    %438 = vector.broadcast %cst_334 : bf16 to vector<16x32xbf16>
    %439 = arith.select %437, %430, %438 : vector<16x32xi1>, vector<16x32xbf16>
    %c15 = arith.constant 15 : index
    %c0_335 = arith.constant 0 : index
    %c0_336 = arith.constant 0 : index
    %440 = vector.load %arg6[%c15, %c0_335, %c0_336] : memref<18x32x8xbf16, #tpu.memory_space<vmem>>, vector<1x32x8xbf16>
    %441 = vector.shape_cast %440 : vector<1x32x8xbf16> to vector<32x8xbf16>
    %cst_337 = arith.constant dense<0.000000e+00> : vector<16x8xf32>
    %442 = tpu.matmul %439, %441, %cst_337 {dimension_numbers = #tpu.dot_dimension_numbers<[1], [0], [0], [1], [0, 0, 1, 1], [], []>} : vector<16x32xbf16>, vector<32x8xbf16>, vector<16x8xf32> -> vector<16x8xf32>
    %c0_338 = arith.constant 0 : index
    %c0_339 = arith.constant 0 : index
    %443 = vector.load %arg10[%c0_338, %c0_339] : memref<16x8xf32, #tpu.memory_space<vmem>>, vector<16x8xf32>
    %444 = arith.addf %443, %442 : vector<16x8xf32>
    %c0_340 = arith.constant 0 : index
    %c0_341 = arith.constant 0 : index
    %445 = vector.load %arg10[%c0_340, %c0_341] : memref<16x8xf32, #tpu.memory_space<vmem>>, vector<16x8xf32>
    tpu.vector_store %arg10[%c0_340, %c0_341], %444 {strides = array<i32>} : memref<16x8xf32, #tpu.memory_space<vmem>>, vector<16x8xf32>,
    %c0_342 = arith.constant 0 : index
    %c0_343 = arith.constant 0 : index
    %446 = vector.load %arg9[%c0_342, %c0_343] : memref<16x32xf32, #tpu.memory_space<vmem>>, vector<16x32xf32>
    %cst_344 = arith.constant 0.000000e+00 : f32
    %447 = vector.broadcast %cst_344 : f32 to vector<16x32xf32>
    %448 = arith.maximumf %446, %447 : vector<16x32xf32>
    %c12_i32_345 = arith.constant 12 : i32
    %449 = tpu.dynamic_rotate %448 by %c12_i32_345 dim 0 : vector<16x32xf32>, i32 -> vector<16x32xf32>
    %450 = arith.truncf %449 : vector<16x32xf32> to vector<16x32xbf16>
    %c3_i32_346 = arith.constant 3 : i32
    %451 = vector.broadcast %c3_i32_346 : i32 to vector<16x1xi32>
    %452 = arith.cmpi slt, %0, %451 : vector<16x1xi32>
    %cst_347 = arith.constant 0.000000e+00 : bf16
    %453 = vector.shape_cast %452 : vector<16x1xi1> to vector<16x1xi1>
    %454 = vector.broadcast %453 : vector<16x1xi1> to vector<16x32xi1>
    %455 = vector.broadcast %cst_347 : bf16 to vector<16x32xbf16>
    %456 = arith.select %454, %450, %455 : vector<16x32xi1>, vector<16x32xbf16>
    %c16 = arith.constant 16 : index
    %c0_348 = arith.constant 0 : index
    %c0_349 = arith.constant 0 : index
    %457 = vector.load %arg6[%c16, %c0_348, %c0_349] : memref<18x32x8xbf16, #tpu.memory_space<vmem>>, vector<1x32x8xbf16>
    %458 = vector.shape_cast %457 : vector<1x32x8xbf16> to vector<32x8xbf16>
    %cst_350 = arith.constant dense<0.000000e+00> : vector<16x8xf32>
    %459 = tpu.matmul %456, %458, %cst_350 {dimension_numbers = #tpu.dot_dimension_numbers<[1], [0], [0], [1], [0, 0, 1, 1], [], []>} : vector<16x32xbf16>, vector<32x8xbf16>, vector<16x8xf32> -> vector<16x8xf32>
    %c0_351 = arith.constant 0 : index
    %c0_352 = arith.constant 0 : index
    %460 = vector.load %arg10[%c0_351, %c0_352] : memref<16x8xf32, #tpu.memory_space<vmem>>, vector<16x8xf32>
    %461 = arith.addf %460, %459 : vector<16x8xf32>
    %c0_353 = arith.constant 0 : index
    %c0_354 = arith.constant 0 : index
    %462 = vector.load %arg10[%c0_353, %c0_354] : memref<16x8xf32, #tpu.memory_space<vmem>>, vector<16x8xf32>
    tpu.vector_store %arg10[%c0_353, %c0_354], %461 {strides = array<i32>} : memref<16x8xf32, #tpu.memory_space<vmem>>, vector<16x8xf32>,
    %c0_355 = arith.constant 0 : index
    %c0_356 = arith.constant 0 : index
    %463 = vector.load %arg9[%c0_355, %c0_356] : memref<16x32xf32, #tpu.memory_space<vmem>>, vector<16x32xf32>
    %cst_357 = arith.constant 0.000000e+00 : f32
    %464 = vector.broadcast %cst_357 : f32 to vector<16x32xf32>
    %465 = arith.maximumf %463, %464 : vector<16x32xf32>
    %c11_i32_358 = arith.constant 11 : i32
    %466 = tpu.dynamic_rotate %465 by %c11_i32_358 dim 0 : vector<16x32xf32>, i32 -> vector<16x32xf32>
    %467 = arith.truncf %466 : vector<16x32xf32> to vector<16x32xbf16>
    %c3_i32_359 = arith.constant 3 : i32
    %468 = vector.broadcast %c3_i32_359 : i32 to vector<16x1xi32>
    %469 = arith.cmpi slt, %0, %468 : vector<16x1xi32>
    %c3_i32_360 = arith.constant 3 : i32
    %470 = vector.broadcast %c3_i32_360 : i32 to vector<16x1xi32>
    %471 = arith.cmpi slt, %1, %470 : vector<16x1xi32>
    %472 = arith.andi %469, %471 : vector<16x1xi1>
    %cst_361 = arith.constant 0.000000e+00 : bf16
    %473 = vector.shape_cast %472 : vector<16x1xi1> to vector<16x1xi1>
    %474 = vector.broadcast %473 : vector<16x1xi1> to vector<16x32xi1>
    %475 = vector.broadcast %cst_361 : bf16 to vector<16x32xbf16>
    %476 = arith.select %474, %467, %475 : vector<16x32xi1>, vector<16x32xbf16>
    %c17 = arith.constant 17 : index
    %c0_362 = arith.constant 0 : index
    %c0_363 = arith.constant 0 : index
    %477 = vector.load %arg6[%c17, %c0_362, %c0_363] : memref<18x32x8xbf16, #tpu.memory_space<vmem>>, vector<1x32x8xbf16>
    %478 = vector.shape_cast %477 : vector<1x32x8xbf16> to vector<32x8xbf16>
    %cst_364 = arith.constant dense<0.000000e+00> : vector<16x8xf32>
    %479 = tpu.matmul %476, %478, %cst_364 {dimension_numbers = #tpu.dot_dimension_numbers<[1], [0], [0], [1], [0, 0, 1, 1], [], []>} : vector<16x32xbf16>, vector<32x8xbf16>, vector<16x8xf32> -> vector<16x8xf32>
    %c0_365 = arith.constant 0 : index
    %c0_366 = arith.constant 0 : index
    %480 = vector.load %arg10[%c0_365, %c0_366] : memref<16x8xf32, #tpu.memory_space<vmem>>, vector<16x8xf32>
    %481 = arith.addf %480, %479 : vector<16x8xf32>
    %c0_367 = arith.constant 0 : index
    %c0_368 = arith.constant 0 : index
    %482 = vector.load %arg10[%c0_367, %c0_368] : memref<16x8xf32, #tpu.memory_space<vmem>>, vector<16x8xf32>
    tpu.vector_store %arg10[%c0_367, %c0_368], %481 {strides = array<i32>} : memref<16x8xf32, #tpu.memory_space<vmem>>, vector<16x8xf32>,
    %c0_369 = arith.constant 0 : index
    %c0_370 = arith.constant 0 : index
    %483 = vector.load %arg10[%c0_369, %c0_370] : memref<16x8xf32, #tpu.memory_space<vmem>>, vector<16x8xf32>
    %cst_371 = arith.constant 0.000000e+00 : f32
    %484 = vector.broadcast %cst_371 : f32 to vector<16x8xf32>
    %485 = arith.maximumf %483, %484 : vector<16x8xf32>
    %486 = arith.truncf %485 : vector<16x8xf32> to vector<16x8xbf16>
    %c0_372 = arith.constant 0 : index
    %c0_373 = arith.constant 0 : index
    %487 = vector.load %arg9[%c0_372, %c0_373] : memref<16x32xf32, #tpu.memory_space<vmem>>, vector<16x32xf32>
    %c1_374 = arith.constant 1 : index
    %c0_375 = arith.constant 0 : index
    %c0_376 = arith.constant 0 : index
    %488 = vector.load %arg7[%c1_374, %c0_375, %c0_376] : memref<2x8x32xbf16, #tpu.memory_space<vmem>>, vector<1x8x32xbf16>
    %489 = vector.shape_cast %488 : vector<1x8x32xbf16> to vector<8x32xbf16>
    %cst_377 = arith.constant dense<0.000000e+00> : vector<16x32xf32>
    %490 = tpu.matmul %486, %489, %cst_377 {dimension_numbers = #tpu.dot_dimension_numbers<[1], [0], [0], [1], [0, 0, 1, 1], [], []>} : vector<16x8xbf16>, vector<8x32xbf16>, vector<16x32xf32> -> vector<16x32xf32>
    %491 = arith.addf %487, %490 : vector<16x32xf32>
    %c0_378 = arith.constant 0 : index
    %c0_379 = arith.constant 0 : index
    %492 = vector.load %arg9[%c0_378, %c0_379] : memref<16x32xf32, #tpu.memory_space<vmem>>, vector<16x32xf32>
    tpu.vector_store %arg9[%c0_378, %c0_379], %491 {strides = array<i32>} : memref<16x32xf32, #tpu.memory_space<vmem>>, vector<16x32xf32>,
    %c0_380 = arith.constant 0 : index
    %c0_381 = arith.constant 0 : index
    %493 = vector.load %arg9[%c0_380, %c0_381] : memref<16x32xf32, #tpu.memory_space<vmem>>, vector<16x32xf32>
    %cst_382 = arith.constant 0.000000e+00 : f32
    %494 = vector.broadcast %cst_382 : f32 to vector<16x32xf32>
    %495 = arith.maximumf %493, %494 : vector<16x32xf32>
    %c0_383 = arith.constant 0 : index
    %c0_384 = arith.constant 0 : index
    %c0_385 = arith.constant 0 : index
    %496 = vector.load %arg8[%c0_383, %c0_384, %c0_385] : memref<1x16x32xf32, #tpu.memory_space<vmem>>, vector<1x16x32xf32>
    %497 = vector.shape_cast %496 : vector<1x16x32xf32> to vector<16x32xf32>
    %498 = vector.shape_cast %495 : vector<16x32xf32> to vector<1x16x32xf32>
    tpu.vector_store %arg8[%c0_383, %c0_384, %c0_385], %498 {strides = array<i32>} : memref<1x16x32xf32, #tpu.memory_space<vmem>>, vector<1x16x32xf32>,
    return
  }
  func.func @transform_0(%arg0: i32) -> (i32, i32) {
    %c0_i32 = arith.constant 0 : i32
    %c0_i32_0 = arith.constant 0 : i32
    %c0_i32_1 = arith.constant 0 : i32
    return %c0_i32, %c0_i32_0 : i32, i32
  }
  func.func @transform_1(%arg0: i32) -> (i32, i32) {
    %c0_i32 = arith.constant 0 : i32
    %c0_i32_0 = arith.constant 0 : i32
    %c0_i32_1 = arith.constant 0 : i32
    return %c0_i32, %c0_i32_0 : i32, i32
  }
  func.func @transform_2(%arg0: i32) -> (i32, i32, i32) {
    %c0_i32 = arith.constant 0 : i32
    %c0_i32_0 = arith.constant 0 : i32
    %c0_i32_1 = arith.constant 0 : i32
    return %arg0, %c0_i32, %c0_i32_0 : i32, i32, i32
  }
  func.func @transform_3(%arg0: i32) -> (i32, i32, i32) {
    %c0_i32 = arith.constant 0 : i32
    %c0_i32_0 = arith.constant 0 : i32
    %c0_i32_1 = arith.constant 0 : i32
    %c0_i32_2 = arith.constant 0 : i32
    return %c0_i32, %c0_i32_0, %c0_i32_1 : i32, i32, i32
  }
  func.func @transform_4(%arg0: i32) -> (i32, i32) {
    %c0_i32 = arith.constant 0 : i32
    %c0_i32_0 = arith.constant 0 : i32
    %c0_i32_1 = arith.constant 0 : i32
    return %c0_i32, %c0_i32_0 : i32, i32
  }
  func.func @transform_5(%arg0: i32) -> (i32, i32, i32) {
    %c0_i32 = arith.constant 0 : i32
    %c0_i32_0 = arith.constant 0 : i32
    %c0_i32_1 = arith.constant 0 : i32
    %c0_i32_2 = arith.constant 0 : i32
    return %c0_i32, %c0_i32_0, %c0_i32_1 : i32, i32, i32
  }
  func.func @transform_6(%arg0: i32) -> (i32, i32, i32) {
    %c0_i32 = arith.constant 0 : i32
    %c0_i32_0 = arith.constant 0 : i32
    %c0_i32_1 = arith.constant 0 : i32
    %c0_i32_2 = arith.constant 0 : i32
    return %c0_i32, %c0_i32_0, %c0_i32_1 : i32, i32, i32
  }
  func.func @transform_7(%arg0: i32) -> (i32, i32, i32) {
    %c0_i32 = arith.constant 0 : i32
    %c0_i32_0 = arith.constant 0 : i32
    %c0_i32_1 = arith.constant 0 : i32
    return %arg0, %c0_i32, %c0_i32_0 : i32, i32, i32
  }
}

</mosaic_0001>

<bundles_post_ra>
// kernel: encoder_forward.4
= control target key start
LH: loop header
LB: loop body
LE: loop exit
PB: predicated region body
PF: predicated region fallthrough
CT: control target
= control target key end

     0   :  { %s1945_s18 = smov 0   ;;  %s2383_s0 = inlined_call_operand.vmem [shape: s32[16,1], index: 0, kind: input, shape index: {}]   ;;  %s2384_s1 = inlined_call_operand.vmem [shape: s32[16,1], index: 1, kind: input, shape index: {}]   ;;  %s2385_s2 = inlined_call_operand.vmem [shape: bf16[2,4,16,16], index: 2, kind: input, shape index: {}]   ;;  %s2386_s3 = inlined_call_operand.vmem [shape: bf16[16,16,32], index: 3, kind: input, shape index: {}]   ;;  %s2387_s4 = inlined_call_operand.vmem [shape: f32[1,32], index: 4, kind: input, shape index: {}]   ;;  %s2388_s5 = inlined_call_operand.vmem [shape: bf16[2,16,32], index: 5, kind: output, shape index: {}]  }
   0x1 LB: > { %s1570_s19 = sadd.s32 4294967295, %s1910_s18   ;;  %p1574_p0 = scmp.ge.s32.totalorder %s1910_s18, 1  ;;  %s1910_s18 = sphi %s1945_s18, %s15_s18  }
   0x2   : > { %p187_p1 = scmp.lt.s32.totalorder %s1910_s18, 3 }
   0x4   : > { %p188_p2 = pnand %p1574_p0, %p187_p1 }
   0x5   : > { %v1956_v0 = vld [vmem:[%s2383_s0] sm:$0xff] (!%p188_p2)  ;;  %v229_v2 = vld [vmem:[%s2383_s0 + $0x8] sm:$0xff] (!%p188_p2)  ;;  %v1912_v3 = vmov (!%p188_p2), 0   ;;  %p215_p3 = scmp.lt.s32.totalorder (!%p188_p2), %s1570_s19, 1  ;;  %v1913_v12 = vmov (!%p188_p2), 0.0   ;;  %vm1914_vm11 = vmmov (!%p188_p2), 0   ;;  %v239_v24 = vlaneseq (!%p188_p2) }
   0x6   : > { %191 = sbr.rel (%p188_p2) target bundleno = 528 (0x210), region = 40  ;;  %v1961_v1 = vld [vmem:[%s2384_s1] sm:$0xff] (!%p188_p2)  ;;  %1883 = vset.pattern.permute.xlu1 (!%p188_p2), %v1912_v3  ;;  %1882 = vset.pattern.permute.xlu0 (!%p188_p2), %v1912_v3  ;;  %vm245_vm0 = vcmp.ge.s32.totalorder (!%p188_p2), %v1956_v0, 1  ;;  %vm246_vm2 = vcmp.ge.s32.totalorder (!%p188_p2), %v229_v2, 1  ;;  %v231_v4 = vld [vmem:[%s2384_s1 + $0x8] sm:$0xff] (!%p188_p2)  ;;  %vm1165_vm10 = vcmp.lt.s32.totalorder (!%p188_p2), %v229_v2, 3 }
   0x7   : > { %vm247_vm1 = vcmp.ge.s32.totalorder (!%p188_p2), %v1961_v1, 1  ;;  %v337_v5 = vsel (!%p188_p2), %vm245_vm0, 1, %v1912_v3  ;;  %vm248_vm4 = vcmp.ge.s32.totalorder (!%p188_p2), %v231_v4, 1  ;;  %vm495_vm5 = vcmp.lt.s32.totalorder (!%p188_p2), %v231_v4, 3  ;;  %v1884_v11 = vld [vmem:[%s2386_s3 + $0x8] sm:$0xff] (!%p188_p2)   ;;  %1781 = vmatprep.subr.bf16.mxu1 (!%p188_p2), %v1913_v12  ;;  %1775 = vmatprep.subr.bf16.mxu0 (!%p188_p2), %v1913_v12  ;;  %v1885_v13 = vld [vmem:[%s2386_s3] sm:$0xff] (!%p188_p2)  }
   0x8   : > { %vm249_vm3 = vmand (!%p188_p2), %vm245_vm0, %vm247_vm1  ;;  %340 = vperm.xlu1 (!%p188_p2), %1883, %v337_v5   ;;  %vm494_vm7 = vcmp.lt.s32.totalorder (!%p188_p2), %v1961_v1, 3  ;;  %v338_v7 = vsel (!%p188_p2), %vm246_vm2, 1, %v1912_v3  ;;  %1782 = vmatpush3.bf16.msra.mxu1 (!%p188_p2), %v1884_v11  ;;  %v588_v14 = vsel (!%p188_p2), %vm248_vm4, 1, %v1912_v3  ;;  %v587_v15 = vsel (!%p188_p2), %vm247_vm1, 1, %v1912_v3  ;;  %v1886_v58 = vld [vmem:[%s2386_s3 + $0x18] sm:$0xff] (!%p188_p2)   ;;  %v1887_v62 = vld [vmem:[%s2386_s3 + $0x10] sm:$0xff] (!%p188_p2)  }
   0x9   : > { %v251_v6 = vsel (!%p188_p2), %vm249_vm3, 1, %v1912_v3  ;;  %vm250_vm6 = vmand (!%p188_p2), %vm246_vm2, %vm248_vm4  ;;  %1776 = vmatpush3.bf16.msra.mxu0 (!%p188_p2), %v1885_v13  ;;  %1783 = vmatprep.mubr.msk.bf16.mxu1 (!%p188_p2), %vm1914_vm11, %v1913_v12  ;;  %vm1164_vm12 = vcmp.lt.s32.totalorder (!%p188_p2), %v1956_v0, 3  ;;  %v808_v16 = vsel (!%p188_p2), %vm495_vm5, 1, %v1912_v3  ;;  %v807_v17 = vsel (!%p188_p2), %vm494_vm7, 1, %v1912_v3 }
   0xa   : > { %254 = vperm.xlu0 (!%p188_p2), %1882, %v251_v6   ;;  %v252_v8 = vsel (!%p188_p2), %vm250_vm6, 1, %v1912_v3  ;;  %vm497_vm8 = vmand (!%p188_p2), %vm246_vm2, %vm495_vm5  ;;  %1777 = vmatprep.mubr.msk.bf16.mxu0 (!%p188_p2), %vm1914_vm11, %v1913_v12  ;;  %v1256_v20 = vsel (!%p188_p2), %vm1165_vm10, 1, %v1912_v3  ;;  %v1255_v21 = vsel (!%p188_p2), %vm1164_vm12, 1, %v1912_v3  ;;  %v2056_v29 = vshrl.u32 (!%p188_p2), %v239_v24, 7  ;;  %v1889_v24 = vld [vmem:[%s2386_s3 + $0x20] sm:$0xff] (!%p188_p2)  }
   0xb   : > { %vm496_vm9 = vmand (!%p188_p2), %vm245_vm0, %vm494_vm7  ;;  %v499_v9 = vsel (!%p188_p2), %vm497_vm8, 1, %v1912_v3  ;;  %1793 = vmatprep.subr.bf16.mxu1 (!%p188_p2), %v1913_v12  ;;  %1787 = vmatprep.subr.bf16.mxu0 (!%p188_p2), %v1913_v12 }
   0xc   : > { %343 = vperm.xlu1 (!%p188_p2), %1883, %v338_v7   ;;  %v498_v10 = vsel (!%p188_p2), %vm496_vm9, 1, %v1912_v3  ;;  %vm1167_vm13 = vmand (!%p188_p2), %vm1165_vm10, %vm248_vm4  ;;  %vm333_vm2 = vcmp.lt.s32.totalorder (!%p188_p2), %v2056_v29, 4 }
   0xd   : > { %s2406_s19 = smov (!%p215_p3, %s1570_s19), 1  ;;  %v1169_v18 = vsel %vm1167_vm13, 1, %v1912_v3  ;;  %vm1166_vm14 = vmand %vm1164_vm12, %vm247_vm1  ;;  %vm490_vm13 = vcmp.lt.s32.totalorder %v2056_v29, 3 }
   0xe   : > { %257 = vperm.xlu0 %1882, %v252_v8   ;;  %s1682_s7 = sshll.u32 %s2406_s19, 5  ;;  %v1168_v19 = vsel %vm1166_vm14, 1, %v1912_v3  ;;  %vm1412_vm15 = vmand %vm1165_vm10, %vm495_vm5  ;;  %vm241_vm5 = vcmp.lt.s32.totalorder %v2056_v29, 5  ;;  %vm278_vm14 = vcmask 130048   ;;  %s1683_s20 = sshll.u32 %s2406_s19, 3 }
   0xf   : > { %s2024_s10 = scalar_lea.vmem %s2385_s2, %s1682_s7  ;;  %vm1411_vm0 = vmand %vm1164_vm12, %vm494_vm7  ;;  %v1414_v22 = vsel %vm1412_vm15, 1, %v1912_v3  ;;  %s224_s23 = scalar_lea.vmem %s2388_s5, %s1683_s20 }
  0x10   : > { %504 = vperm.xlu1 %1883, %v499_v9   ;;  %v1413_v23 = vsel %vm1411_vm0, 1, %v1912_v3  ;;  %v1737_v25 = vld [vmem:[%s2024_s10 + $0x10] sm:$0xff]   ;;  %v1736_v26 = vld [vmem:[%s2024_s10 + $0x18] sm:$0xff]   ;;  %v1738_v61 = vld [vmem:[%s2024_s10 + $0x8] sm:$0xff]  }
  0x11   : > { %v2052_v27 = vunpack.c.l.bf16 %v1737_v25  ;;  %v2054_v28 = vunpack.c.h.bf16 %v1737_v25  ;;  %v2058_v30 = vunpack.c.l.bf16 %v1736_v26  ;;  %v2060_v31 = vunpack.c.h.bf16 %v1736_v26 }
  0x12   : > { %501 = vperm.xlu0 %1882, %v498_v10   ;;  %v2109_v10 = vunpack.c.l.bf16 %v1738_v61  ;;  %v2111_v11 = vunpack.c.h.bf16 %v1738_v61 }
  0x13   : > { %v331_v33 = vrot.slane %v2052_v27, 4  ;;  %v332_v34 = vrot.slane %v2054_v28, 4  ;;  %v237_v36 = vrot.slane %v2058_v30, 3  ;;  %v238_v37 = vrot.slane %v2060_v31, 3 }
  0x14   : > { %593 = vperm.xlu1 %1883, %v588_v14   ;;  %v419_v45 = vrot.slane %v2058_v30, 4  ;;  %v420_v46 = vrot.slane %v2060_v31, 4  ;;  %v488_v48 = vrot.slane %v2052_v27, 5  ;;  %v489_v49 = vrot.slane %v2054_v28, 5 }
  0x15   : > { %v334_v39 = vsel %vm333_vm2, %v331_v33, %v332_v34  ;;  %v335_v40 = vsel %vm333_vm2, %v332_v34, %v331_v33  ;;  %v242_v43 = vsel %vm241_vm5, %v237_v36, %v238_v37  ;;  %v243_v44 = vsel %vm241_vm5, %v238_v37, %v237_v36 }
  0x16   : > { %590 = vperm.xlu0 %1882, %v587_v15   ;;  %v336_v50 = vpack.c.bf16 %v334_v39, %v335_v40  ;;  %v244_v55 = vpack.c.bf16 %v242_v43, %v243_v44  ;;  %v421_v60 = vsel %vm333_vm2, %v419_v45, %v420_v46  ;;  %v422_v63 = vsel %vm333_vm2, %v420_v46, %v419_v45  ;;  %v1890_v40 = vld [vmem:[%s2024_s10] sm:$0xff]   ;;  %v1891_v44 = vld [vmem:[%s2386_s3 + $0x38] sm:$0xff]   ;;  %v1892_v45 = vld [vmem:[%s2386_s3 + $0x30] sm:$0xff]  }
  0x17   : > { %v491_v2 = vsel %vm490_vm13, %v488_v48, %v489_v49  ;;  %v492_v4 = vsel %vm490_vm13, %v489_v49, %v488_v48  ;;  %v423_v15 = vpack.c.bf16 %v421_v60, %v422_v63  ;;  %v1091_v63 = vrot.slane %v2054_v28, 1 }
  0x18   : > { %813 = vperm.xlu1 %1883, %v808_v16   ;;  %v493_v14 = vpack.c.bf16 %v491_v2, %v492_v4  ;;  %v1897_v2 = vld [vmem:[%s2386_s3 + $0x58] sm:$0xff]   ;;  %v1898_v4 = vld [vmem:[%s2386_s3 + $0x50] sm:$0xff]   ;;  %v1160_v13 = vrot.slane %v2111_v11, 3 }
  0x1a   : > { %810 = vperm.xlu0 %1882, %v807_v17   ;;  %v581_v17 = vrot.slane %v2109_v10, 7 }
  0x1c   : > { %1174 = vperm.xlu1 %1883, %v1169_v18   ;;  %v582_v18 = vrot.slane %v2111_v11, 7 }
  0x1e   : > { %1171 = vperm.xlu0 %1882, %v1168_v19  }
  0x20   : > { %1261 = vperm.xlu1 %1883, %v1256_v20   ;;  %v1707_v20 = vld [vmem:[%s2024_s10] sm:$0xff]  }
  0x21   : > { %v2142_v33 = vunpack.c.h.bf16 %v1707_v20 }
  0x22   : > { %1258 = vperm.xlu0 %1882, %v1255_v21   ;;  %v1888_v21 = vld [vmem:[%s2386_s3 + $0x28] sm:$0xff]  }
  0x23   : > { %v802_v39 = vrot.slane %v2142_v33, 1 }
  0x24   : > { %1419 = vperm.xlu1 %1883, %v1414_v22  }
  0x26   : > { %1416 = vperm.xlu0 %1882, %v1413_v23  }
  0x87   : > { %v341_v32 = vpop.permute.xlu1 %340 }
  0x88   : > { %vm345_vm1 = vcmp.eq.s32.totalorder %v341_v32, 1  ;;  %v2140_v32 = vunpack.c.l.bf16 %v1707_v20  ;;  %v1899_v20 = vld [vmem:[%s2024_s10 + $0x18] sm:$0xff]  }
  0x89   : > { %v255_v35 = vpop.permute.xlu0 %254  ;;  %vm347_vm3 = vmpackc.low %vm345_vm1, %vm345_vm1 }
  0x8a   : > { %vm259_vm4 = vcmp.eq.s32.totalorder %v255_v35, 1  ;;  %v349_v41 = vsel %vm347_vm3, 65537, %v1912_v3 }
  0x8b   : > { %v344_v38 = vpop.permute.xlu1 %343  ;;  %vm261_vm6 = vmpackc.low %vm259_vm4, %vm259_vm4 }
  0x8c   : > { %vm346_vm7 = vcmp.eq.s32.totalorder %v344_v38, 1  ;;  %v263_v51 = vsel %vm261_vm6, 65537, %v1912_v3  ;;  %v801_v38 = vrot.slane %v2140_v32, 1 }
  0x8d   : > { %v258_v42 = vpop.permute.xlu0 %257  ;;  %vm348_vm8 = vmpackc.low %vm346_vm7, %vm346_vm7 }
  0x8e   : > { %vm260_vm9 = vcmp.eq.s32.totalorder %v258_v42, 1  ;;  %v350_v47 = vsel %vm348_vm8, 65537, %v1912_v3 }
  0x8f   : > { %vm262_vm10 = vmpackc.low %vm260_vm9, %vm260_vm9  ;;  %v1586_v52 = vcombine.low %v349_v41, %v350_v47  ;;  %v505_v54 = vpop.permute.xlu1 %504 }
  0x90   : > { %v264_v53 = vsel %vm262_vm10, 65537, %v1912_v3  ;;  %vm507_vm12 = vcmp.eq.s32.totalorder %v505_v54, 1 }
  0x91   : > { %v1581_v56 = vcombine.low %v263_v51, %v264_v53  ;;  %v502_v57 = vpop.permute.xlu0 %501  ;;  %vm2088_vm15 = vcmp.ne.s16.totalorder %v1586_v52, 0  ;;  %vm509_vm0 = vmpackc.low %vm507_vm12, %vm507_vm12  ;;  %vm583_vm12 = vcmp.lt.s32.totalorder %v2056_v29, 1  ;;  %v889_v52 = vrot.slane %v2058_v30, 7 }
  0x92   : > { %vm506_vm1 = vcmp.eq.s32.totalorder %v502_v57, 1  ;;  %v511_v0 = vsel %vm509_vm0, 65537, %v1912_v3  ;;  %v355_v1 = vsel %vm2088_vm15, %v336_v50, 0  ;;  %v424_v26 = vsel %vm2088_vm15, %v423_v15, 0 }
  0x93   : > { %vm268_vm3 = vcmp.ne.s16.totalorder %v1581_v56, 0  ;;  %vm508_vm4 = vmpackc.low %vm506_vm1, %vm506_vm1  ;;  %v594_v6 = vpop.permute.xlu1 %593  ;;  %1784 = vmatmul.mubr.msk.bf16.vlgmr.msra.gmra.mrb[0].mxu1 %vm278_vm14, %v355_v1  ;;  %v584_v34 = vsel %vm583_vm12, %v581_v17, %v582_v18  ;;  %v585_v35 = vsel %vm583_vm12, %v582_v18, %v581_v17  ;;  %v890_v53 = vrot.slane %v2060_v31, 7  ;;  %v1894_v56 = vld [vmem:[%s2386_s3 + $0x48] sm:$0xff]   ;;  %v1896_v1 = vld [vmem:[%s2024_s10 + $0x10] sm:$0xff]  }
  0x94   : > { %v510_v5 = vsel %vm508_vm4, 65537, %v1912_v3  ;;  %v269_v7 = vsel %vm268_vm3, %v244_v55, 0  ;;  %vm596_vm6 = vcmp.eq.s32.totalorder %v594_v6, 1  ;;  %1794 = vmatpush3.bf16.msra.mxu1 %v1886_v58  ;;  %1795 = vmatprep.mubr.msk.bf16.mxu1 %vm1914_vm11, %v1913_v12  ;;  %v586_v37 = vpack.c.bf16 %v584_v34, %v585_v35  ;;  %v1893_v55 = vld [vmem:[%s2024_s10 + $0x8] sm:$0xff]   ;;  %v1895_v58 = vld [vmem:[%s2386_s3 + $0x40] sm:$0xff]  }
  0x95   : > { %v1599_v8 = vcombine.low %v510_v5, %v511_v0  ;;  %v591_v9 = vpop.permute.xlu0 %590  ;;  %1778 = vmatmul.mubr.msk.bf16.vlgmr.msra.gmra.mrb[0].mxu0 %vm278_vm14, %v269_v7  ;;  %vm2114_vm7 = vmpackc.low %vm596_vm6, %vm596_vm6  ;;  %1805 = vmatprep.subr.bf16.mxu1 %v1913_v12  ;;  %vm803_vm6 = vcmp.lt.s32.totalorder %v2056_v29, 7  ;;  %v891_v30 = vsel %vm583_vm12, %v889_v52, %v890_v53  ;;  %v892_v31 = vsel %vm583_vm12, %v890_v53, %v889_v52 }
  0x96   : > { %vm595_vm8 = vcmp.eq.s32.totalorder %v591_v9, 1  ;;  %1788 = vmatpush3.bf16.msra.mxu0 %v1887_v62  ;;  %1789 = vmatprep.mubr.msk.bf16.mxu0 %vm1914_vm11, %v1913_v12  ;;  %v600_v22 = vsel %vm2114_vm7, 65537, %v1912_v3  ;;  %v804_v47 = vsel %vm803_vm6, %v801_v38, %v802_v39  ;;  %v805_v48 = vsel %vm803_vm6, %v802_v39, %v801_v38 }
  0x97   : > { %vm597_vm9 = vmpackc.low %vm595_vm8, %vm595_vm8  ;;  %vm515_vm10 = vcmp.ne.s16.totalorder %v1599_v8, 0  ;;  %v814_v16 = vpop.permute.xlu1 %813  ;;  %1799 = vmatprep.subr.bf16.mxu0 %v1913_v12  ;;  %v806_v50 = vpack.c.bf16 %v805_v48, %v804_v47  ;;  %v893_v61 = vpack.c.bf16 %v891_v30, %v892_v31  ;;  %v1090_v62 = vrot.slane %v2052_v27, 1 }
  0x98   : > { %v599_v23 = vsel %vm597_vm9, 65537, %v1912_v3  ;;  %vm816_vm0 = vcmp.eq.s32.totalorder %v814_v16, 1  ;;  %v516_v25 = vsel %vm515_vm10, %v493_v14, 0  ;;  %v1159_v9 = vrot.slane %v2109_v10, 3 }
  0x99   : > { %v811_v19 = vpop.permute.xlu0 %810  ;;  %v1606_v36 = vcombine.low %v599_v23, %v600_v22  ;;  %vm818_vm3 = vmpackc.low %vm816_vm0, %vm816_vm0  ;;  %v1092_v28 = vsel %vm803_vm6, %v1090_v62, %v1091_v63  ;;  %v1093_v5 = vsel %vm803_vm6, %v1091_v63, %v1090_v62  ;;  %v1250_v15 = vrot.slane %v2140_v32, 4 }
  0x9a   : > { %vm815_vm1 = vcmp.eq.s32.totalorder %v811_v19, 1  ;;  %v820_v42 = vsel %vm818_vm3, 65537, %v1912_v3  ;;  %v1094_v8 = vpack.c.bf16 %v1093_v5, %v1092_v28  ;;  %v1251_v16 = vrot.slane %v2142_v33, 4 }
  0x9b   : > { %1796 = vmatmul.mubr.msk.bf16.vlgmr.msra.gmra.mrb[4].mxu1 %vm278_vm14, %v516_v25  ;;  %vm817_vm4 = vmpackc.low %vm815_vm1, %vm815_vm1  ;;  %vm2159_vm15 = vcmp.ne.s16.totalorder %v1606_v36, 0  ;;  %v1175_v54 = vpop.permute.xlu1 %1174  ;;  %v1162_v34 = vsel %vm241_vm5, %v1160_v13, %v1159_v9 }
  0x9c   : > { %1806 = vmatpush3.bf16.msra.mxu1 %v1888_v21  ;;  %1807 = vmatprep.mubr.msk.bf16.mxu1 %vm1914_vm11, %v1913_v12  ;;  %v819_v43 = vsel %vm817_vm4, 65537, %v1912_v3  ;;  %v605_v46 = vsel %vm2159_vm15, %v586_v37, 0  ;;  %vm1177_vm8 = vcmp.eq.s32.totalorder %v1175_v54, 1  ;;  %v894_v27 = vsel %vm2159_vm15, %v893_v61, 0  ;;  %v1900_v21 = vld [vmem:[%s2386_s3 + $0x68] sm:$0xff]  }
  0x9d   : > { %1790 = vmatmul.mubr.msk.bf16.vlgmr.msra.gmra.mrb[4].mxu0 %vm278_vm14, %v424_v26  ;;  %1817 = vmatprep.subr.bf16.mxu1 %v1913_v12  ;;  %v1623_v49 = vcombine.low %v819_v43, %v820_v42  ;;  %v1172_v57 = vpop.permute.xlu0 %1171  ;;  %vm2228_vm12 = vmpackc.low %vm1177_vm8, %vm1177_vm8  ;;  %v1161_v26 = vsel %vm241_vm5, %v1159_v9, %v1160_v13  ;;  %v1252_v35 = vsel %vm333_vm2, %v1250_v15, %v1251_v16  ;;  %v1337_v43 = vrot.slane %v2109_v10, 4  ;;  %v1903_v10 = vld [vmem:[%s2386_s3 + $0x70] sm:$0xff]  }
  0x9e   : > { %1800 = vmatpush3.bf16.msra.mxu0 %v1889_v24  ;;  %1801 = vmatprep.mubr.msk.bf16.mxu0 %vm1914_vm11, %v1913_v12  ;;  %vm1176_vm0 = vcmp.eq.s32.totalorder %v1172_v57, 1  ;;  %v1181_v22 = vsel %vm2228_vm12, 65537, %v1912_v3  ;;  %v1901_v24 = vld [vmem:[%s2386_s3 + $0x60] sm:$0xff]   ;;  %v1253_v36 = vsel %vm333_vm2, %v1251_v16, %v1250_v15 }
  0x9f   : > { %1811 = vmatprep.subr.bf16.mxu0 %v1913_v12  ;;  %vm2185_vm7 = vcmp.ne.s16.totalorder %v1623_v49, 0  ;;  %v1262_v60 = vpop.permute.xlu1 %1261  ;;  %vm1178_vm4 = vmpackc.low %vm1176_vm0, %vm1176_vm0  ;;  %v1254_v41 = vpack.c.bf16 %v1253_v36, %v1252_v35  ;;  %v1902_v49 = vld [vmem:[%s2386_s3 + $0x78] sm:$0xff]  }
  0xa0   : > { %v825_v59 = vsel %vm2185_vm7, %v806_v50, 0  ;;  %vm1264_vm9 = vcmp.eq.s32.totalorder %v1262_v60, 1  ;;  %v1180_v23 = vsel %vm1178_vm4, 65537, %v1912_v3  ;;  %v1095_v25 = vsel %vm2185_vm7, %v1094_v8, 0 }
  0xa1   : > { %v1259_v0 = vpop.permute.xlu0 %1258  ;;  %vm2233_vm1 = vmpackc.low %vm1264_vm9, %vm1264_vm9  ;;  %v1656_v38 = vcombine.low %v1180_v23, %v1181_v22 }
  0xa2   : > { %vm1263_vm10 = vcmp.eq.s32.totalorder %v1259_v0, 1  ;;  %v1268_v18 = vsel %vm2233_vm1, 65537, %v1912_v3 }
  0xa3   : > { %1808 = vmatmul.mubr.msk.bf16.vlgmr.msra.gmra.mrb[8].mxu1 %vm278_vm14, %v1890_v40  ;;  %vm1265_vm3 = vmpackc.low %vm1263_vm10, %vm1263_vm10  ;;  %v1420_v14 = vpop.permute.xlu1 %1419  ;;  %v1163_v40 = vpack.c.bf16 %v1162_v34, %v1161_v26  ;;  %vm1185_vm9 = vcmp.ne.s16.totalorder %v1656_v38, 0 }
  0xa4   : > { %1818 = vmatpush3.bf16.msra.mxu1 %v1891_v44  ;;  %1819 = vmatprep.mubr.msk.bf16.mxu1 %vm1914_vm11, %v1913_v12  ;;  %v1267_v19 = vsel %vm1265_vm3, 65537, %v1912_v3  ;;  %vm1422_vm15 = vcmp.eq.s32.totalorder %v1420_v14, 1  ;;  %v1406_v44 = vrot.slane %v2140_v32, 5 }
  0xa5   : > { %1802 = vmatmul.mubr.msk.bf16.vlgmr.msra.gmra.mrb[8].mxu0 %vm278_vm14, %v605_v46  ;;  %1829 = vmatprep.subr.bf16.mxu1 %v1913_v12  ;;  %v1417_v17 = vpop.permute.xlu0 %1416  ;;  %v1661_v37 = vcombine.low %v1267_v19, %v1268_v18  ;;  %vm2274_vm8 = vmpackc.low %vm1422_vm15, %vm1422_vm15  ;;  %v1338_v46 = vrot.slane %v2111_v11, 4 }
  0xa6   : > { %1812 = vmatpush3.bf16.msra.mxu0 %v1892_v45  ;;  %1813 = vmatprep.mubr.msk.bf16.mxu0 %vm1914_vm11, %v1913_v12  ;;  %vm1421_vm6 = vcmp.eq.s32.totalorder %v1417_v17, 1  ;;  %v1407_v45 = vrot.slane %v2142_v33, 5  ;;  %v1426_v47 = vsel %vm2274_vm8, 65537, %v1912_v3  ;;  %v1186_v33 = vsel %vm1185_vm9, %v1163_v40, 0 }
  0xa7   : > { %1823 = vmatprep.subr.bf16.mxu0 %v1913_v12  ;;  %vm1423_vm7 = vmpackc.low %vm1421_vm6, %vm1421_vm6  ;;  %vm2284_vm5 = vcmp.ne.s16.totalorder %v1661_v37, 0  ;;  %v1340_v52 = vsel %vm333_vm2, %v1338_v46, %v1337_v43 }
  0xa8   : > { %v1425_v48 = vsel %vm1423_vm7, 65537, %v1912_v3  ;;  %v1273_v32 = vsel %vm2284_vm5, %v1254_v41, 0  ;;  %v1408_v11 = vsel %vm490_vm13, %v1406_v44, %v1407_v45  ;;  %v1409_v50 = vsel %vm490_vm13, %v1407_v45, %v1406_v44 }
  0xa9   : > { %v1672_v51 = vcombine.low %v1425_v48, %v1426_v47  ;;  %v1339_v3 = vsel %vm333_vm2, %v1337_v43, %v1338_v46  ;;  %v1410_v53 = vpack.c.bf16 %v1409_v50, %v1408_v11  ;;  %vm323_vm2 = vcmask 261120  }
  0xaa   : > { %v1341_v54 = vpack.c.bf16 %v1340_v52, %v1339_v3 }
  0xab   : > { %1820 = vmatmul.mubr.msk.bf16.vlgmr.msra.gmra.mrb[12].mxu1 %vm278_vm14, %v825_v59  ;;  %vm1430_vm13 = vcmp.ne.s16.totalorder %v1672_v51, 0 }
  0xac   : > { %1830 = vmatpush3.bf16.msra.mxu1 %v1894_v56  ;;  %1831 = vmatprep.mubr.msk.bf16.mxu1 %vm1914_vm11, %v1913_v12  ;;  %v1342_v56 = vsel %vm2284_vm5, %v1341_v54, 0 }
  0xad   : > { %1814 = vmatmul.mubr.msk.bf16.vlgmr.msra.gmra.mrb[12].mxu0 %vm278_vm14, %v1893_v55  ;;  %1841 = vmatprep.subr.bf16.mxu1 %v1913_v12  ;;  %v1431_v55 = vsel %vm1430_vm13, %v1410_v53, 0 }
  0xae   : > { %1824 = vmatpush3.bf16.msra.mxu0 %v1895_v58  ;;  %1825 = vmatprep.mubr.msk.bf16.mxu0 %vm1914_vm11, %v1913_v12 }
  0xaf   : > { %1835 = vmatprep.subr.bf16.mxu0 %v1913_v12 }
  0xb3   : > { %1832 = vmatmul.mubr.msk.bf16.vlgmr.msra.gmra.mrb[16].mxu1 %vm278_vm14, %v1896_v1 }
  0xb4   : > { %1842 = vmatpush3.bf16.msra.mxu1 %v1897_v2  ;;  %1843 = vmatprep.mubr.msk.bf16.mxu1 %vm1914_vm11, %v1913_v12 }
  0xb5   : > { %1826 = vmatmul.mubr.msk.bf16.vlgmr.msra.gmra.mrb[16].mxu0 %vm278_vm14, %v894_v27  ;;  %1853 = vmatprep.subr.bf16.mxu1 %v1913_v12 }
  0xb6   : > { %1836 = vmatpush3.bf16.msra.mxu0 %v1898_v4  ;;  %1837 = vmatprep.mubr.msk.bf16.mxu0 %vm1914_vm11, %v1913_v12 }
  0xb7   : > { %1847 = vmatprep.subr.bf16.mxu0 %v1913_v12 }
  0xbb   : > { %1844 = vmatmul.mubr.msk.bf16.vlgmr.msra.gmra.mrb[20].mxu1 %vm278_vm14, %v1095_v25 }
  0xbc   : > { %1854 = vmatpush3.bf16.msra.mxu1 %v1900_v21  ;;  %1855 = vmatprep.mubr.msk.bf16.mxu1 %vm1914_vm11, %v1913_v12 }
  0xbd   : > { %1838 = vmatmul.mubr.msk.bf16.vlgmr.msra.gmra.mrb[20].mxu0 %vm278_vm14, %v1899_v20  ;;  %1865 = vmatprep.subr.bf16.mxu1 %v1913_v12 }
  0xbe   : > { %1848 = vmatpush3.bf16.msra.mxu0 %v1901_v24  ;;  %1849 = vmatprep.mubr.msk.bf16.mxu0 %vm1914_vm11, %v1913_v12 }
  0xbf   : > { %1859 = vmatprep.subr.bf16.mxu0 %v1913_v12 }
  0xc3   : > { %1856 = vmatmul.mubr.msk.bf16.vlgmr.msra.gmra.mrb[24].mxu1 %vm278_vm14, %v1273_v32 }
  0xc4   : > { %1866 = vmatpush3.bf16.msra.mxu1 %v1902_v49  ;;  %1867 = vmatprep.mubr.msk.bf16.mxu1 %vm1914_vm11, %v1913_v12 }
  0xc5   : > { %1850 = vmatmul.mubr.msk.bf16.vlgmr.msra.gmra.mrb[24].mxu0 %vm278_vm14, %v1186_v33 }
  0xc6   : > { %1860 = vmatpush3.bf16.msra.mxu0 %v1903_v10  ;;  %1861 = vmatprep.mubr.msk.bf16.mxu0 %vm1914_vm11, %v1913_v12  ;;  %vm1512_vm11 = vcmask 257024  }
  0xcb   : > { %1868 = vmatmul.mubr.msk.bf16.vlgmr.msra.gmra.mrb[28].mxu1 %vm278_vm14, %v1431_v55 }
  0xcd   : > { %1862 = vmatmul.mubr.msk.bf16.vlgmr.msra.gmra.mrb[28].mxu0 %vm278_vm14, %v1342_v56 }
 0x166   : > { %v402_v29 = vpop.f32.mrb[0].mxu1 }
 0x167   : > { %v1785_v58 = vpop.f32.mrb[1].mxu1 }
 0x168   : > { %v316_v57 = vpop.f32.mrb[0].mxu0  ;;  %v405_v30 = vpop.f32.mrb[2].mxu1 }
 0x169   : > { %324 = vst.msk [vmem:[#allocation2] sm:$0xff] %vm323_vm2, %v316_v57  ;;  %v1779_v59 = vpop.f32.mrb[1].mxu0  ;;  %v1786_v12 = vpop.f32.mrb[3].mxu1 }
 0x16a   : > { %v319_v31 = vpop.f32.mrb[2].mxu0 }
 0x16b   : > { %325 = vst.msk [vmem:[#allocation2 + $0x8] sm:$0xff] %vm323_vm2, %v319_v31  ;;  %v1780_v60 = vpop.f32.mrb[3].mxu0 }
 0x16e   : > { %v563_v61 = vpop.f32.mrb[4].mxu1 }
 0x16f   : > { %v1797_v0 = vpop.f32.mrb[5].mxu1 }
 0x170   : > { %v409_v62 = vld [vmem:[#allocation2] sm:$0xff]  ;;  %v471_v63 = vpop.f32.mrb[4].mxu0  ;;  %v566_v4 = vpop.f32.mrb[6].mxu1 }
 0x171   : > { %v411_v1 = vadd.f32 %v409_v62, %v402_v29  ;;  %v1791_v2 = vpop.f32.mrb[5].mxu0  ;;  %v1798_v5 = vpop.f32.mrb[7].mxu1 }
 0x172   : > { %v410_v27 = vld [vmem:[#allocation2 + $0x8] sm:$0xff]  ;;  %v474_v28 = vpop.f32.mrb[6].mxu0 }
 0x173   : > { %413 = vst.msk [vmem:[#allocation2] sm:$0xff] %vm323_vm2, %v411_v1  ;;  %v412_v6 = vadd.f32 %v410_v27, %v405_v30  ;;  %v1792_v7 = vpop.f32.mrb[7].mxu0 }
 0x175   : > { %414 = vst.msk [vmem:[#allocation2 + $0x8] sm:$0xff] %vm323_vm2, %v412_v6 }
 0x176   : > { %v718_v8 = vpop.f32.mrb[8].mxu1 }
 0x177   : > { %v1809_v13 = vpop.f32.mrb[9].mxu1 }
 0x178   : > { %v652_v9 = vpop.f32.mrb[8].mxu0  ;;  %v721_v15 = vpop.f32.mrb[10].mxu1 }
 0x179   : > { %v1803_v14 = vpop.f32.mrb[9].mxu0  ;;  %v1810_v18 = vpop.f32.mrb[11].mxu1 }
 0x17a   : > { %v478_v16 = vld [vmem:[#allocation2] sm:$0xff]  ;;  %v655_v17 = vpop.f32.mrb[10].mxu0 }
 0x17b   : > { %v480_v19 = vadd.f32 %v478_v16, %v471_v63  ;;  %v1804_v20 = vpop.f32.mrb[11].mxu0 }
 0x17c   : > { %v479_v21 = vld [vmem:[#allocation2 + $0x8] sm:$0xff] }
 0x17d   : > { %482 = vst.msk [vmem:[#allocation2] sm:$0xff] %vm323_vm2, %v480_v19  ;;  %v481_v22 = vadd.f32 %v479_v21, %v474_v28 }
 0x17e   : > { %v2329_v23 = vpop.f32.mrb[12].mxu1 }
 0x17f   : > { %483 = vst.msk [vmem:[#allocation2 + $0x8] sm:$0xff] %vm323_vm2, %v481_v22  ;;  %v1821_v24 = vpop.f32.mrb[13].mxu1 }
 0x180   : > { %v784_v25 = vpop.f32.mrb[12].mxu0  ;;  %v2331_v26 = vpop.f32.mrb[14].mxu1 }
 0x181   : > { %v1815_v34 = vpop.f32.mrb[13].mxu0  ;;  %v1822_v35 = vpop.f32.mrb[15].mxu1 }
 0x182   : > { %v787_v36 = vpop.f32.mrb[14].mxu0 }
 0x183   : > { %v1816_v37 = vpop.f32.mrb[15].mxu0 }
 0x184   : > { %v570_v38 = vld [vmem:[#allocation2] sm:$0xff] }
 0x185   : > { %v572_v39 = vadd.f32 %v570_v38, %v563_v61 }
 0x186   : > { %v571_v40 = vld [vmem:[#allocation2 + $0x8] sm:$0xff]  ;;  %v2334_v42 = vpop.f32.mrb[16].mxu1 }
 0x187   : > { %574 = vst.msk [vmem:[#allocation2] sm:$0xff] %vm323_vm2, %v572_v39  ;;  %v573_v41 = vadd.f32 %v571_v40, %v566_v4  ;;  %v1833_v44 = vpop.f32.mrb[17].mxu1 }
 0x188   : > { %v941_v43 = vpop.f32.mrb[16].mxu0  ;;  %v1010_v46 = vpop.f32.mrb[18].mxu1 }
 0x189   : > { %575 = vst.msk [vmem:[#allocation2 + $0x8] sm:$0xff] %vm323_vm2, %v573_v41  ;;  %v1827_v45 = vpop.f32.mrb[17].mxu0  ;;  %v1834_v48 = vpop.f32.mrb[19].mxu1 }
 0x18a   : > { %v944_v47 = vpop.f32.mrb[18].mxu0 }
 0x18b   : > { %v1828_v49 = vpop.f32.mrb[19].mxu0 }
 0x18e   : > { %v659_v10 = vld [vmem:[#allocation2] sm:$0xff]  ;;  %v2337_v33 = vpop.f32.mrb[20].mxu1 }
 0x18f   : > { %v661_v32 = vadd.f32 %v659_v10, %v652_v9  ;;  %v1845_v50 = vpop.f32.mrb[21].mxu1 }
 0x190   : > { %v660_v11 = vld [vmem:[#allocation2 + $0x8] sm:$0xff]  ;;  %v1073_v51 = vpop.f32.mrb[20].mxu0  ;;  %v1145_v52 = vpop.f32.mrb[22].mxu1 }
 0x191   : > { %663 = vst.msk [vmem:[#allocation2] sm:$0xff] %vm323_vm2, %v661_v32  ;;  %v662_v3 = vadd.f32 %v660_v11, %v655_v17  ;;  %v1839_v53 = vpop.f32.mrb[21].mxu0  ;;  %v1846_v54 = vpop.f32.mrb[23].mxu1 }
 0x192   : > { %v1076_v55 = vpop.f32.mrb[22].mxu0  ;;  %v1677_v53 = vld [vmem:[%s2387_s4] ss:$0 sm:$0xff] }
 0x193   : > { %664 = vst.msk [vmem:[#allocation2 + $0x8] sm:$0xff] %vm323_vm2, %v662_v3  ;;  %v1840_v56 = vpop.f32.mrb[23].mxu0 }
 0x196   : > { %v2341_v29 = vpop.f32.mrb[24].mxu1 }
 0x197   : > { %v1857_v59 = vpop.f32.mrb[25].mxu1 }
 0x198   : > { %v725_v57 = vld [vmem:[#allocation2] sm:$0xff]  ;;  %v1233_v58 = vpop.f32.mrb[24].mxu0  ;;  %v1323_v12 = vpop.f32.mrb[26].mxu1 }
 0x199   : > { %v727_v30 = vadd.f32 %v725_v57, %v718_v8  ;;  %v1851_v31 = vpop.f32.mrb[25].mxu0  ;;  %v1858_v62 = vpop.f32.mrb[27].mxu1 }
 0x19a   : > { %v726_v60 = vld [vmem:[#allocation2 + $0x8] sm:$0xff]  ;;  %v1236_v61 = vpop.f32.mrb[26].mxu0 }
 0x19b   : > { %729 = vst.msk [vmem:[#allocation2] sm:$0xff] %vm323_vm2, %v727_v30  ;;  %v728_v63 = vadd.f32 %v726_v60, %v721_v15  ;;  %v1852_v0 = vpop.f32.mrb[27].mxu0 }
 0x19d   : > { %730 = vst.msk [vmem:[#allocation2 + $0x8] sm:$0xff] %vm323_vm2, %v728_v63 }
 0x19e   : > { %v2345_v1 = vpop.f32.mrb[28].mxu1 }
 0x19f   : > { %v1869_v4 = vpop.f32.mrb[29].mxu1 }
 0x1a0   : > { %v1389_v2 = vpop.f32.mrb[28].mxu0  ;;  %v1481_v28 = vpop.f32.mrb[30].mxu1 }
 0x1a1   : > { %v1863_v27 = vpop.f32.mrb[29].mxu0  ;;  %v1870_v7 = vpop.f32.mrb[31].mxu1 }
 0x1a2   : > { %v791_v5 = vld [vmem:[#allocation2] sm:$0xff]  ;;  %v1392_v6 = vpop.f32.mrb[30].mxu0 }
 0x1a3   : > { %v793_v8 = vadd.f32 %v791_v5, %v784_v25  ;;  %v1864_v9 = vpop.f32.mrb[31].mxu0 }
 0x1a4   : > { %v792_v13 = vld [vmem:[#allocation2 + $0x8] sm:$0xff] }
 0x1a5   : > { %795 = vst.msk [vmem:[#allocation2] sm:$0xff] %vm323_vm2, %v793_v8  ;;  %v794_v14 = vadd.f32 %v792_v13, %v787_v36 }
 0x1a7   : > { %796 = vst.msk [vmem:[#allocation2 + $0x8] sm:$0xff] %vm323_vm2, %v794_v14 }
 0x1ac   : > { %v879_v15 = vld [vmem:[#allocation2] sm:$0xff] }
 0x1ad   : > { %v881_v16 = vadd.f32 %v879_v15, %v2329_v23 }
 0x1ae   : > { %v880_v17 = vld [vmem:[#allocation2 + $0x8] sm:$0xff] }
 0x1af   : > { %883 = vst.msk [vmem:[#allocation2] sm:$0xff] %vm323_vm2, %v881_v16  ;;  %v882_v18 = vadd.f32 %v880_v17, %v2331_v26 }
 0x1b1   : > { %884 = vst.msk [vmem:[#allocation2 + $0x8] sm:$0xff] %vm323_vm2, %v882_v18 }
 0x1b6   : > { %v948_v19 = vld [vmem:[#allocation2] sm:$0xff] }
 0x1b7   : > { %v950_v20 = vadd.f32 %v948_v19, %v941_v43 }
 0x1b8   : > { %v949_v21 = vld [vmem:[#allocation2 + $0x8] sm:$0xff] }
 0x1b9   : > { %952 = vst.msk [vmem:[#allocation2] sm:$0xff] %vm323_vm2, %v950_v20  ;;  %v951_v22 = vadd.f32 %v949_v21, %v944_v47 }
 0x1bb   : > { %953 = vst.msk [vmem:[#allocation2 + $0x8] sm:$0xff] %vm323_vm2, %v951_v22 }
 0x1c0   : > { %v1014_v24 = vld [vmem:[#allocation2] sm:$0xff] }
 0x1c1   : > { %v1016_v25 = vadd.f32 %v1014_v24, %v2334_v42 }
 0x1c2   : > { %v1015_v34 = vld [vmem:[#allocation2 + $0x8] sm:$0xff] }
 0x1c3   : > { %1018 = vst.msk [vmem:[#allocation2] sm:$0xff] %vm323_vm2, %v1016_v25  ;;  %v1017_v23 = vadd.f32 %v1015_v34, %v1010_v46 }
 0x1c5   : > { %1019 = vst.msk [vmem:[#allocation2 + $0x8] sm:$0xff] %vm323_vm2, %v1017_v23 }
 0x1ca   : > { %v1080_v26 = vld [vmem:[#allocation2] sm:$0xff] }
 0x1cb   : > { %v1082_v35 = vadd.f32 %v1080_v26, %v1073_v51 }
 0x1cc   : > { %v1081_v36 = vld [vmem:[#allocation2 + $0x8] sm:$0xff] }
 0x1cd   : > { %1084 = vst.msk [vmem:[#allocation2] sm:$0xff] %vm323_vm2, %v1082_v35  ;;  %v1083_v37 = vadd.f32 %v1081_v36, %v1076_v55 }
 0x1cf   : > { %1085 = vst.msk [vmem:[#allocation2 + $0x8] sm:$0xff] %vm323_vm2, %v1083_v37 }
 0x1d4   : > { %v1149_v38 = vld [vmem:[#allocation2] sm:$0xff] }
 0x1d5   : > { %v1151_v39 = vadd.f32 %v1149_v38, %v2337_v33 }
 0x1d6   : > { %v1150_v40 = vld [vmem:[#allocation2 + $0x8] sm:$0xff] }
 0x1d7   : > { %1153 = vst.msk [vmem:[#allocation2] sm:$0xff] %vm323_vm2, %v1151_v39  ;;  %v1152_v41 = vadd.f32 %v1150_v40, %v1145_v52 }
 0x1d9   : > { %1154 = vst.msk [vmem:[#allocation2 + $0x8] sm:$0xff] %vm323_vm2, %v1152_v41 }
 0x1de   : > { %v1240_v42 = vld [vmem:[#allocation2] sm:$0xff] }
 0x1df   : > { %v1242_v43 = vadd.f32 %v1240_v42, %v1233_v58 }
 0x1e0   : > { %v1241_v44 = vld [vmem:[#allocation2 + $0x8] sm:$0xff] }
 0x1e1   : > { %1244 = vst.msk [vmem:[#allocation2] sm:$0xff] %vm323_vm2, %v1242_v43  ;;  %v1243_v45 = vadd.f32 %v1241_v44, %v1236_v61 }
 0x1e3   : > { %1245 = vst.msk [vmem:[#allocation2 + $0x8] sm:$0xff] %vm323_vm2, %v1243_v45 }
 0x1e8   : > { %v1327_v46 = vld [vmem:[#allocation2] sm:$0xff] }
 0x1e9   : > { %v1329_v47 = vadd.f32 %v1327_v46, %v2341_v29 }
 0x1ea   : > { %v1328_v48 = vld [vmem:[#allocation2 + $0x8] sm:$0xff] }
 0x1eb   : > { %1331 = vst.msk [vmem:[#allocation2] sm:$0xff] %vm323_vm2, %v1329_v47  ;;  %v1330_v49 = vadd.f32 %v1328_v48, %v1323_v12 }
 0x1ed   : > { %1332 = vst.msk [vmem:[#allocation2 + $0x8] sm:$0xff] %vm323_vm2, %v1330_v49 }
 0x1f2   : > { %v1396_v10 = vld [vmem:[#allocation2] sm:$0xff] }
 0x1f3   : > { %v1398_v32 = vadd.f32 %v1396_v10, %v1389_v2 }
 0x1f4   : > { %v1397_v33 = vld [vmem:[#allocation2 + $0x8] sm:$0xff] }
 0x1f5   : > { %1400 = vst.msk [vmem:[#allocation2] sm:$0xff] %vm323_vm2, %v1398_v32  ;;  %v1399_v11 = vadd.f32 %v1397_v33, %v1392_v6 }
 0x1f7   : > { %1401 = vst.msk [vmem:[#allocation2 + $0x8] sm:$0xff] %vm323_vm2, %v1399_v11 }
 0x1fc   : > { %v1485_v50 = vld [vmem:[#allocation2] sm:$0xff] }
 0x1fd   : > { %v1487_v51 = vadd.f32 %v1485_v50, %v2345_v1 }
 0x1fe   : > { %v1486_v3 = vld [vmem:[#allocation2 + $0x8] sm:$0xff] }
 0x1ff   : > { %1489 = vst.msk [vmem:[#allocation2] sm:$0xff] %vm323_vm2, %v1487_v51  ;;  %v1488_v52 = vadd.f32 %v1486_v3, %v1481_v28 }
 0x201   : > { %1490 = vst.msk [vmem:[#allocation2 + $0x8] sm:$0xff] %vm323_vm2, %v1488_v52 }
 0x206   : > { %v1491_v54 = vld [vmem:[#allocation2] sm:$0xff] }
 0x207   : > { %v1500_v55 = vadd.f32 %v1677_v53, %v1491_v54 }
 0x208   : > { %v1492_v56 = vld [vmem:[#allocation2 + $0x8] sm:$0xff] }
 0x209   : > { %v1502_v29 = vmax.f32 %v1500_v55, 0.0  ;;  %v1501_v57 = vadd.f32 %v1677_v53, %v1492_v56 }
 0x20b   : > { %v1684_v58 = vpack.c.bf16 %v1502_v29, %v1502_v29  ;;  %v1503_v59 = vmax.f32 %v1501_v57, 0.0 }
 0x20d   : > { %1513 = vst.msk [vmem:[%s224_s23] sm:$0xf] %vm1512_vm11, %v1684_v58  ;;  %v1685_v30 = vpack.c.bf16 %v1503_v59, %v1503_v59 }
 0x20f   : > { %1514 = vst.msk [vmem:[%s224_s23 + $0x4] sm:$0xf] %vm1512_vm11, %v1685_v30 }
 0x210 PF: > { %s15_s18 = sadd.s32 1, %s1910_s18  }
 0x211   : > { %p12_p4 = scmp.ge.s32.totalorder %s15_s18, 4  }
 0x213   :  { %14 = sbr.rel (!%p12_p4) target bundleno = 1 (0x1), region = 88 }

// kernel: encoder_forward.5
= control target key start
LH: loop header
LB: loop body
LE: loop exit
PB: predicated region body
PF: predicated region fallthrough
CT: control target
= control target key end

     0   :  { %12 = vsyncpa [#allocation5], 0  ;;  %s4350_s0 = inlined_call_operand.vmem [shape: s32[16,1], index: 0, kind: input, shape index: {}]   ;;  %s4351_s1 = inlined_call_operand.vmem [shape: s32[16,1], index: 1, kind: input, shape index: {}]   ;;  %s4352_s2 = inlined_call_operand.vmem [shape: bf16[2,16,32], index: 2, kind: input, shape index: {}]   ;;  %s4353_s3 = inlined_call_operand.vmem [shape: bf16[9,32,32], index: 3, kind: input, shape index: {}]   ;;  %s4354_s4 = inlined_call_operand.vmem [shape: f32[1,32], index: 4, kind: input, shape index: {}]   ;;  %s4355_s5 = inlined_call_operand.vmem [shape: bf16[18,32,8], index: 5, kind: input, shape index: {}]   ;;  %s4356_s6 = inlined_call_operand.vmem [shape: bf16[2,8,32], index: 6, kind: input, shape index: {}]   ;;  %s4357_s7 = inlined_call_operand.hbm [shape: f32[2,16,32], index: 7, kind: output, shape index: {}]  }
   0x1   :  { %14 = vsyncpa [#allocation5 + $0x1], 0  ;;  %s3484_s24 = smov 0   ;;  %s3486_s25 = smov 0  }
   0x2   :  { %s3488_s26 = smov 0   ;;  %s3490_s27 = smov 0  }
   0x3 LB: > { %s3505_s28 = sadd.s32 4294967295, %s3436_s27   ;;  %s2720_s29 = sadd.s32 4294967294, %s3436_s27   ;;  %s3436_s27 = sphi %s3490_s27, %s4391_s27   ;;  %s3432_s26 = sphi %s3488_s26, %s4390_s26   ;;  %s3428_s25 = sphi %s3486_s25, %s4389_s25   ;;  %s3424_s24 = sphi %s3484_s24, %s4388_s24  }
   0x4   : > { %s3509_s30 = sadd.s32 1, %s3436_s27   ;;  %s179_s8 = sadd.s32 1, %s3432_s26 }
   0x5   : > { %s176_s9 = ssub.s32 %s3436_s27, %s3509_s30  ;;  %p189_p0 = scmp.ne.s32.totalorder %s3432_s26, %s3428_s25 }
   0x6   : > { %p177_p1 = scmp.eq.s32.totalorder %s176_s9, 0  ;;  %p190_p2 = scmp.eq.s32.totalorder %s3505_s28, 1 }
   0x7   : > { %p195_p3 = scmp.ne.s32.totalorder %s3428_s25, %s3424_s24  ;;  %p196_p4 = scmp.eq.s32.totalorder %s2720_s29, 1 }
   0x8   : > { %s3520_s10 = scalar_select %p177_p1, %s3432_s26, %s179_s8  }
   0x9   : > { %p3522_p5 = por %p190_p2, %p189_p0  ;;  %p3526_p6 = por %p196_p4, %p195_p3 }
   0xa   : > { %p2723_p7 = scmp.ge.s32.totalorder %s3436_s27, 1  ;;  %p240_p8 = scmp.lt.s32.totalorder %s3436_s27, 3 }
   0xc   : > { %p241_p9 = pnand %p2723_p7, %p240_p8 }
   0xd   : > { %v3535_v0 = vld [vmem:[%s4350_s0] sm:$0xff] (!%p241_p9)  ;;  %v3545_v2 = vld [vmem:[%s4350_s0 + $0x8] sm:$0xff] (!%p241_p9)  ;;  %v3438_v3 = vmov (!%p241_p9), 0   ;;  %v3320_v10 = vld [vmem:[%s4353_s3 + $0x10] sm:$0xff] (!%p241_p9)   ;;  %p272_p10 = scmp.lt.s32.totalorder (!%p241_p9), %s3505_s28, 1  ;;  %v3439_v11 = vmov (!%p241_p9), 0.0   ;;  %v290_v26 = vlaneseq (!%p241_p9) }
   0xe   : > { %244 = sbr.rel (%p241_p9) target bundleno = 1562 (0x61a), region = 48  ;;  %v3540_v1 = vld [vmem:[%s4351_s1] sm:$0xff] (!%p241_p9)  ;;  %3318 = vset.pattern.permute.xlu1 (!%p241_p9), %v3438_v3  ;;  %3317 = vset.pattern.permute.xlu0 (!%p241_p9), %v3438_v3  ;;  %vm296_vm0 = vcmp.ge.s32.totalorder (!%p241_p9), %v3535_v0, 1  ;;  %vm297_vm2 = vcmp.ge.s32.totalorder (!%p241_p9), %v3545_v2, 1  ;;  %v283_v4 = vld [vmem:[%s4351_s1 + $0x8] sm:$0xff] (!%p241_p9)  ;;  %v3322_v15 = vld [vmem:[%s4353_s3 + $0x18] sm:$0xff] (!%p241_p9)  }
   0xf   : > { %vm298_vm1 = vcmp.ge.s32.totalorder (!%p241_p9), %v3540_v1, 1  ;;  %v394_v5 = vsel (!%p241_p9), %vm296_vm0, 1, %v3438_v3  ;;  %vm299_vm4 = vcmp.ge.s32.totalorder (!%p241_p9), %v283_v4, 1  ;;  %vm491_vm5 = vcmp.lt.s32.totalorder (!%p241_p9), %v283_v4, 3  ;;  %v3319_v9 = vld [vmem:[%s4353_s3] sm:$0xff] (!%p241_p9)   ;;  %3045 = vmatprep.subr.bf16.mxu0 (!%p241_p9), %v3439_v11  ;;  %3053 = vmatprep.subr.bf16.mxu1 (!%p241_p9), %v3439_v11  ;;  %v3321_v14 = vld [vmem:[%s4353_s3 + $0x8] sm:$0xff] (!%p241_p9)  }
  0x10   : > { %vm300_vm3 = vmand (!%p241_p9), %vm296_vm0, %vm298_vm1  ;;  %397 = vperm.xlu1 (!%p241_p9), %3318, %v394_v5   ;;  %vm490_vm7 = vcmp.lt.s32.totalorder (!%p241_p9), %v3540_v1, 3  ;;  %v395_v7 = vsel (!%p241_p9), %vm297_vm2, 1, %v3438_v3  ;;  %3046 = vmatpush3.bf16.msra.mxu0 (!%p241_p9), %v3319_v9  ;;  %vm856_vm10 = vcmp.lt.s32.totalorder (!%p241_p9), %v3545_v2, 3  ;;  %v591_v16 = vsel (!%p241_p9), %vm299_vm4, 1, %v3438_v3  ;;  %v3324_v57 = vld [vmem:[%s4353_s3 + $0x30] sm:$0xff] (!%p241_p9)   ;;  %v3323_v59 = vld [vmem:[%s4353_s3 + $0x20] sm:$0xff] (!%p241_p9)  }
  0x11   : > { %v302_v6 = vsel (!%p241_p9), %vm300_vm3, 1, %v3438_v3  ;;  %vm301_vm6 = vmand (!%p241_p9), %vm297_vm2, %vm299_vm4  ;;  %3054 = vmatpush3.bf16.msra.mxu1 (!%p241_p9), %v3320_v10  ;;  %3047 = vmatprep.subr.bf16.mxu0 (!%p241_p9), %v3439_v11  ;;  %v590_v17 = vsel (!%p241_p9), %vm298_vm1, 1, %v3438_v3  ;;  %vm855_vm11 = vcmp.lt.s32.totalorder (!%p241_p9), %v3535_v0, 3  ;;  %v761_v18 = vsel (!%p241_p9), %vm491_vm5, 1, %v3438_v3  ;;  %v3326_v9 = vld [vmem:[%s4353_s3 + $0x38] sm:$0xff] (!%p241_p9)   ;;  %v3325_v10 = vld [vmem:[%s4353_s3 + $0x28] sm:$0xff] (!%p241_p9)  }
  0x12   : > { %305 = vperm.xlu0 (!%p241_p9), %3317, %v302_v6   ;;  %v303_v8 = vsel (!%p241_p9), %vm301_vm6, 1, %v3438_v3  ;;  %vm493_vm8 = vmand (!%p241_p9), %vm297_vm2, %vm491_vm5  ;;  %3055 = vmatprep.subr.bf16.mxu1 (!%p241_p9), %v3439_v11  ;;  %vm3440_vm13 = vmmov (!%p241_p9), 0   ;;  %v760_v19 = vsel (!%p241_p9), %vm490_vm7, 1, %v3438_v3  ;;  %v955_v22 = vsel (!%p241_p9), %vm856_vm10, 1, %v3438_v3  ;;  %v3362_v58 = vld [vmem:[%s4355_s5 + $0xb8] sm:$0xff] (!%p241_p9)   ;;  %s269_s14 = sand.u32 (!%p241_p9), 1, %s3428_s25  }
  0x13   : > { %vm492_vm9 = vmand (!%p241_p9), %vm296_vm0, %vm490_vm7  ;;  %v495_v12 = vsel (!%p241_p9), %vm493_vm8, 1, %v3438_v3  ;;  %3049 = vmatprep.mubr.msk.bf16.mxu0 (!%p241_p9), %vm3440_vm13, %v3439_v11  ;;  %3057 = vmatprep.mubr.msk.bf16.mxu1 (!%p241_p9), %vm3440_vm13, %v3439_v11  ;;  %v954_v23 = vsel (!%p241_p9), %vm855_vm11, 1, %v3438_v3  ;;  %v3644_v30 = vshrl.u32 (!%p241_p9), %v290_v26, 7  ;;  %s2724_s15 = sshll.u32 (!%p241_p9), %s269_s14, 4  ;;  %s3441_s29 = smov (!%p241_p9), [#allocation4]  }
  0x14   : > { %400 = vperm.xlu1 (!%p241_p9), %3318, %v395_v7   ;;  %v494_v13 = vsel (!%p241_p9), %vm492_vm9, 1, %v3438_v3  ;;  %3048 = vmatpush3.bf16.msra.mxu0 (!%p241_p9), %v3321_v14  ;;  %vm858_vm12 = vmand (!%p241_p9), %vm856_vm10, %vm299_vm4  ;;  %s271_s17 = scalar_lea.vmem (!%p241_p9), [#allocation4], %s2724_s15 }
  0x15   : > { %s273_s8 = scalar_select %p272_p10, %s3505_s28, 1  ;;  %3056 = vmatpush3.bf16.msra.mxu1 %v3322_v15  ;;  %3061 = vmatprep.subr.bf16.mxu0 %v3439_v11  ;;  %v860_v20 = vsel %vm858_vm12, 1, %v3438_v3  ;;  %vm857_vm14 = vmand %vm855_vm11, %vm298_vm1  ;;  %vm390_vm2 = vcmp.lt.s32.totalorder %v3644_v30, 4  ;;  %vm337_vm12 = vcmask 261120  }
  0x16   : > { %308 = vperm.xlu0 %3317, %v303_v8   ;;  %3069 = vmatprep.subr.bf16.mxu1 %v3439_v11  ;;  %v859_v21 = vsel %vm857_vm14, 1, %v3438_v3  ;;  %vm1050_vm15 = vmand %vm856_vm10, %vm491_vm5  ;;  %vm292_vm5 = vcmp.lt.s32.totalorder %v3644_v30, 5  ;;  %vm486_vm10 = vcmp.lt.s32.totalorder %v3644_v30, 3  ;;  %s2658_s18 = sshll.u32 %s271_s17, 4  ;;  %s4305_s18 = int_to_ptr.vmem [resolvable:$true] %s2658_s18 }
  0x17   : > { %s2926_s16 = sshll.u32 %s273_s8, 3  ;;  %v1052_v24 = vsel %vm1050_vm15, 1, %v3438_v3  ;;  %vm1049_vm0 = vmand %vm855_vm11, %vm490_vm7  ;;  %s3374_s23 = scalar_lea.vmem %s4305_s18, 256 }
  0x18   : > { %500 = vperm.xlu1 %3318, %v495_v12   ;;  %s3621_s19 = scalar_lea.vmem %s4352_s2, %s2926_s16  ;;  %v1051_v25 = vsel %vm1049_vm0, 1, %v3438_v3  ;;  %s2927_s16 = sshll.u32 %s3505_s28, 8 }
  0x19   : > { %v2937_v27 = vld [vmem:[%s3621_s19] sm:$0xff]   ;;  %s4303_s22 = scalar_lea.hbm %s4357_s7, %s2927_s16  ;;  %s4309_s28 = scalar_lea.sflag [#allocation5], %s269_s14 }
  0x1a   : > { %497 = vperm.xlu0 %3317, %v494_v13   ;;  %v3640_v28 = vunpack.c.l.bf16 %v2937_v27  ;;  %v3642_v29 = vunpack.c.h.bf16 %v2937_v27  ;;  %p3375_p11 = scmp.ne.s32.totalorder %s4305_s18, %s3374_s23  ;;  %s3378_s8 = sshll.u32 %s3441_s29, 4  ;;  %s3379_s8 = int_to_ptr.vmem [resolvable:$false] %s3378_s8 }
  0x1b   : > { %s3380_s9 = scalar_lea.vmem %s3379_s8, 512  ;;  %p3381_p0 = scmp.lt.s32.totalorder %s4305_s18, %s3379_s8 }
  0x1c   : > { %596 = vperm.xlu1 %3318, %v591_v16   ;;  %v388_v32 = vrot.slane %v3640_v28, 4  ;;  %v389_v33 = vrot.slane %v3642_v29, 4  ;;  %v288_v35 = vrot.slane %v3640_v28, 3  ;;  %v289_v36 = vrot.slane %v3642_v29, 3  ;;  %p3376_p12 = pnand %p3375_p11, %p3522_p5  ;;  %p3382_p1 = scmp.lt.s32.totalorder %s3380_s9, %s3374_s23 }
  0x1d   : > { %v484_v44 = vrot.slane %v3640_v28, 5  ;;  %v485_v46 = vrot.slane %v3642_v29, 5  ;;  %v584_v55 = vrot.slane %v3640_v28, 7  ;;  %v585_v56 = vrot.slane %v3642_v29, 7 }
  0x1e   : > { %593 = vperm.xlu0 %3317, %v590_v17   ;;  %v3654_v38 = vsel %vm390_vm2, %v388_v32, %v389_v33  ;;  %v3658_v39 = vsel %vm390_vm2, %v389_v33, %v388_v32  ;;  %v3663_v42 = vsel %vm292_vm5, %v288_v35, %v289_v36  ;;  %v3667_v43 = vsel %vm292_vm5, %v289_v36, %v288_v35  ;;  %v3329_v36 = vld [vmem:[%s4353_s3 + $0x48] sm:$0xff]   ;;  %p3377_p13 = pneg %p3376_p12  ;;  %p3383_p2 = por %p3382_p1, %p3381_p0 }
  0x1f   : > { %v393_v47 = vpack.c.bf16 %v3654_v38, %v3658_v39  ;;  %v295_v52 = vpack.c.bf16 %v3663_v42, %v3667_v43  ;;  %v3701_v63 = vsel %vm486_vm10, %v484_v44, %v485_v46  ;;  %v3705_v0 = vsel %vm486_vm10, %v485_v46, %v484_v44  ;;  %v3331_v46 = vld [vmem:[%s3621_s19] sm:$0xff]  }
  0x20   : > { %766 = vperm.xlu1 %3318, %v761_v18   ;;  %v489_v13 = vpack.c.bf16 %v3701_v63, %v3705_v0  ;;  %v754_v17 = vrot.slane %v3640_v28, 1  ;;  %v3366_v18 = vld [vmem:[%s4355_s5 + $0xd8] sm:$0xff]   ;;  %p3384_p3 = pnand %p3383_p2, %p3377_p13 }
  0x22   : > { %763 = vperm.xlu0 %3317, %v760_v19  }
  0x24   : > { %865 = vperm.xlu1 %3318, %v860_v20  }
  0x26   : > { %862 = vperm.xlu0 %3317, %v859_v21   ;;  %v755_v21 = vrot.slane %v3642_v29, 1 }
  0x28   : > { %960 = vperm.xlu1 %3318, %v955_v22   ;;  %v3327_v22 = vld [vmem:[%s4353_s3 + $0x40] sm:$0xff]  }
  0x2a   : > { %957 = vperm.xlu0 %3317, %v954_v23   ;;  %v3328_v23 = vld [vmem:[%s4353_s3 + $0x50] sm:$0xff]  }
  0x2c   : > { %1057 = vperm.xlu1 %3318, %v1052_v24   ;;  %v3367_v24 = vld [vmem:[%s4355_s5 + $0xe8] sm:$0xff]  }
  0x2e   : > { %1054 = vperm.xlu0 %3317, %v1051_v25  }
  0x8f   : > { %v398_v31 = vpop.permute.xlu1 %397 }
  0x90   : > { %vm402_vm1 = vcmp.eq.s32.totalorder %v398_v31, 1 }
  0x91   : > { %v306_v34 = vpop.permute.xlu0 %305  ;;  %vm404_vm3 = vmpackc.low %vm402_vm1, %vm402_vm1 }
  0x92   : > { %vm310_vm4 = vcmp.eq.s32.totalorder %v306_v34, 1  ;;  %v406_v40 = vsel %vm404_vm3, 65537, %v3438_v3  ;;  %vm4359_vm3 = vcmp.lt.s32.totalorder %v3644_v30, 1 }
  0x93   : > { %v401_v37 = vpop.permute.xlu1 %400  ;;  %vm312_vm6 = vmpackc.low %vm310_vm4, %vm310_vm4  ;;  %v587_v7 = vsel %vm4359_vm3, %v584_v55, %v585_v56  ;;  %v588_v8 = vsel %vm4359_vm3, %v585_v56, %v584_v55 }
  0x94   : > { %vm403_vm7 = vcmp.eq.s32.totalorder %v401_v37, 1  ;;  %v314_v48 = vsel %vm312_vm6, 65537, %v3438_v3  ;;  %v589_v14 = vpack.c.bf16 %v587_v7, %v588_v8  ;;  %v3330_v37 = vld [vmem:[%s4353_s3 + $0x58] sm:$0xff]   ;;  %v1048_v7 = vpack.c.bf16 %v3705_v0, %v3701_v63  ;;  %v3339_v63 = vld [vmem:[%s4355_s5 + $0x10] sm:$0xff]   ;;  %v3340_v0 = vld [vmem:[%s4355_s5 + $0x8] sm:$0xff]  }
  0x95   : > { %v309_v41 = vpop.permute.xlu0 %308  ;;  %vm405_vm8 = vmpackc.low %vm403_vm7, %vm403_vm7 }
  0x96   : > { %vm311_vm9 = vcmp.eq.s32.totalorder %v309_v41, 1  ;;  %v407_v45 = vsel %vm405_vm8, 65537, %v3438_v3 }
  0x97   : > { %vm313_vm11 = vmpackc.low %vm311_vm9, %vm311_vm9  ;;  %v2731_v49 = vcombine.low %v406_v40, %v407_v45  ;;  %v501_v51 = vpop.permute.xlu1 %500 }
  0x98   : > { %v315_v50 = vsel %vm313_vm11, 65537, %v3438_v3  ;;  %vm503_vm14 = vcmp.eq.s32.totalorder %v501_v51, 1 }
  0x99   : > { %v2727_v53 = vcombine.low %v314_v48, %v315_v50  ;;  %v498_v54 = vpop.permute.xlu0 %497  ;;  %vm3684_vm15 = vcmp.ne.s16.totalorder %v2731_v49, 0  ;;  %vm505_vm0 = vmpackc.low %vm503_vm14, %vm503_vm14  ;;  %v3332_v49 = vld [vmem:[%s4353_s3 + $0x60] sm:$0xff]   ;;  %v3333_v50 = vld [vmem:[%s4353_s3 + $0x70] sm:$0xff]  }
  0x9a   : > { %vm502_vm1 = vcmp.eq.s32.totalorder %v498_v54, 1  ;;  %v507_v61 = vsel %vm505_vm0, 65537, %v3438_v3  ;;  %v412_v62 = vsel %vm3684_vm15, %v393_v47, 0 }
  0x9b   : > { %vm3692_vm4 = vcmp.ne.s16.totalorder %v2727_v53, 0  ;;  %vm504_vm6 = vmpackc.low %vm502_vm1, %vm502_vm1  ;;  %v597_v2 = vpop.permute.xlu1 %596  ;;  %3058 = vmatmul.mubr.msk.bf16.vlgmr.msra.gmra.mrb[0].mxu1 %vm337_vm12, %v412_v62  ;;  %v854_v62 = vpack.c.bf16 %v3667_v43, %v3663_v42 }
  0x9c   : > { %v506_v1 = vsel %vm504_vm6, 65537, %v3438_v3  ;;  %v320_v4 = vsel %vm3692_vm4, %v295_v52, 0  ;;  %vm599_vm7 = vcmp.eq.s32.totalorder %v597_v2, 1  ;;  %3070 = vmatpush3.bf16.msra.mxu1 %v3324_v57  ;;  %3073 = vmatprep.mubr.msk.bf16.mxu1 %vm3440_vm13, %v3439_v11  ;;  %vm4358_vm6 = vcmp.lt.s32.totalorder %v3644_v30, 7 }
  0x9d   : > { %v2739_v5 = vcombine.low %v506_v1, %v507_v61  ;;  %v594_v6 = vpop.permute.xlu0 %593  ;;  %3050 = vmatmul.mubr.msk.bf16.vlgmr.msra.gmra.mrb[0].mxu0 %vm337_vm12, %v320_v4  ;;  %vm601_vm8 = vmpackc.low %vm599_vm7, %vm599_vm7  ;;  %3071 = vmatprep.subr.bf16.mxu1 %v3439_v11  ;;  %v757_v31 = vsel %vm4358_vm6, %v754_v17, %v755_v21  ;;  %v758_v32 = vsel %vm4358_vm6, %v755_v21, %v754_v17  ;;  %v3335_v61 = vld [vmem:[%s4353_s3 + $0x78] sm:$0xff]  }
  0x9e   : > { %vm598_vm9 = vcmp.eq.s32.totalorder %v594_v6, 1  ;;  %3062 = vmatpush3.bf16.msra.mxu0 %v3323_v59  ;;  %v603_v12 = vsel %vm601_vm8, 65537, %v3438_v3  ;;  %3065 = vmatprep.mubr.msk.bf16.mxu0 %vm3440_vm13, %v3439_v11  ;;  %v759_v40 = vpack.c.bf16 %v758_v32, %v757_v31  ;;  %v3334_v59 = vld [vmem:[%s4353_s3 + $0x68] sm:$0xff]   ;;  %v953_v1 = vpack.c.bf16 %v3658_v39, %v3654_v38  ;;  %v3336_v38 = vld [vmem:[%s4353_s3 + $0x80] sm:$0xff]  }
  0x9f   : > { %vm600_vm11 = vmpackc.low %vm598_vm9, %vm598_vm9  ;;  %3063 = vmatprep.subr.bf16.mxu0 %v3439_v11  ;;  %v767_v16 = vpop.permute.xlu1 %766  ;;  %vm3733_vm14 = vcmp.ne.s16.totalorder %v2739_v5, 0 }
  0xa0   : > { %v602_v15 = vsel %vm600_vm11, 65537, %v3438_v3  ;;  %vm769_vm0 = vcmp.eq.s32.totalorder %v767_v16, 1  ;;  %3072 = vmatpush3.bf16.msra.mxu1 %v3326_v9  ;;  %v512_v26 = vsel %vm3733_vm14, %v489_v13, 0 }
  0xa1   : > { %v2747_v19 = vcombine.low %v602_v15, %v603_v12  ;;  %v764_v20 = vpop.permute.xlu0 %763  ;;  %vm771_vm1 = vmpackc.low %vm769_vm0, %vm769_vm0  ;;  %3085 = vmatprep.subr.bf16.mxu1 %v3439_v11  ;;  %v3341_v12 = vld [vmem:[%s4355_s5 + $0x18] sm:$0xff]  }
  0xa2   : > { %vm768_vm7 = vcmp.eq.s32.totalorder %v764_v20, 1  ;;  %3064 = vmatpush3.bf16.msra.mxu0 %v3325_v10  ;;  %v773_v25 = vsel %vm771_vm1, 65537, %v3438_v3  ;;  %v3338_v10 = vld [vmem:[%s4355_s5] sm:$0xff]  }
  0xa3   : > { %vm3746_vm8 = vcmp.ne.s16.totalorder %v2747_v19, 0  ;;  %vm770_vm9 = vmpackc.low %vm768_vm7, %vm768_vm7  ;;  %3077 = vmatprep.subr.bf16.mxu0 %v3439_v11  ;;  %v866_v29 = vpop.permute.xlu1 %865 }
  0xa4   : > { %v608_v27 = vsel %vm3746_vm8, %v589_v14, 0  ;;  %v772_v28 = vsel %vm770_vm9, 65537, %v3438_v3  ;;  %vm868_vm11 = vcmp.eq.s32.totalorder %v866_v29, 1 }
  0xa5   : > { %v2763_v33 = vcombine.low %v772_v28, %v773_v25  ;;  %v863_v34 = vpop.permute.xlu0 %862  ;;  %3066 = vmatmul.mubr.msk.bf16.vlgmr.msra.gmra.mrb[4].mxu0 %vm337_vm12, %v512_v26  ;;  %3074 = vmatmul.mubr.msk.bf16.vlgmr.msra.gmra.mrb[4].mxu1 %vm337_vm12, %v608_v27  ;;  %vm3763_vm0 = vmpackc.low %vm868_vm11, %vm868_vm11 }
  0xa6   : > { %vm867_vm1 = vcmp.eq.s32.totalorder %v863_v34, 1  ;;  %3078 = vmatpush3.bf16.msra.mxu0 %v3327_v22  ;;  %3086 = vmatpush3.bf16.msra.mxu1 %v3328_v23  ;;  %v872_v47 = vsel %vm3763_vm0, 65537, %v3438_v3 }
  0xa7   : > { %vm869_vm7 = vmpackc.low %vm867_vm1, %vm867_vm1  ;;  %3079 = vmatprep.subr.bf16.mxu0 %v3439_v11  ;;  %3087 = vmatprep.subr.bf16.mxu1 %v3439_v11  ;;  %v961_v41 = vpop.permute.xlu1 %960  ;;  %vm3779_vm9 = vcmp.ne.s16.totalorder %v2763_v33, 0 }
  0xa8   : > { %3081 = vmatprep.mubr.msk.bf16.mxu0 %vm3440_vm13, %v3439_v11  ;;  %3089 = vmatprep.mubr.msk.bf16.mxu1 %vm3440_vm13, %v3439_v11  ;;  %vm963_vm11 = vcmp.eq.s32.totalorder %v961_v41, 1  ;;  %v871_v48 = vsel %vm869_vm7, 65537, %v3438_v3  ;;  %v778_v52 = vsel %vm3779_vm9, %v759_v40, 0 }
  0xa9   : > { %v958_v45 = vpop.permute.xlu0 %957  ;;  %vm965_vm1 = vmpackc.low %vm963_vm11, %vm963_vm11  ;;  %v2771_v55 = vcombine.low %v871_v48, %v872_v47 }
  0xaa   : > { %vm962_vm6 = vcmp.eq.s32.totalorder %v958_v45, 1  ;;  %3080 = vmatpush3.bf16.msra.mxu0 %v3329_v36  ;;  %3088 = vmatpush3.bf16.msra.mxu1 %v3330_v37  ;;  %v967_v51 = vsel %vm965_vm1, 65537, %v3438_v3 }
  0xab   : > { %vm964_vm3 = vmpackc.low %vm962_vm6, %vm962_vm6  ;;  %3093 = vmatprep.subr.bf16.mxu0 %v3439_v11  ;;  %3101 = vmatprep.subr.bf16.mxu1 %v3439_v11  ;;  %v1058_v54 = vpop.permute.xlu1 %1057  ;;  %vm3818_vm11 = vcmp.ne.s16.totalorder %v2771_v55, 0 }
  0xac   : > { %v966_v53 = vsel %vm964_vm3, 65537, %v3438_v3  ;;  %vm1060_vm0 = vcmp.eq.s32.totalorder %v1058_v54, 1  ;;  %v877_v39 = vsel %vm3818_vm11, %v854_v62, 0 }
  0xad   : > { %v2779_v56 = vcombine.low %v966_v53, %v967_v51  ;;  %v1055_v57 = vpop.permute.xlu0 %1054  ;;  %3082 = vmatmul.mubr.msk.bf16.vlgmr.msra.gmra.mrb[8].mxu0 %vm337_vm12, %v3331_v46  ;;  %3090 = vmatmul.mubr.msk.bf16.vlgmr.msra.gmra.mrb[8].mxu1 %vm337_vm12, %v778_v52  ;;  %vm1062_vm7 = vmpackc.low %vm1060_vm0, %vm1060_vm0 }
  0xae   : > { %vm1059_vm6 = vcmp.eq.s32.totalorder %v1055_v57, 1  ;;  %3094 = vmatpush3.bf16.msra.mxu0 %v3332_v49  ;;  %3102 = vmatpush3.bf16.msra.mxu1 %v3333_v50  ;;  %v1064_v5 = vsel %vm1062_vm7, 65537, %v3438_v3  ;;  %vm4380_vm7 = vcmp.lt.s32.totalorder %v3644_v30, 1 }
  0xaf   : > { %vm1061_vm3 = vmpackc.low %vm1059_vm6, %vm1059_vm6  ;;  %3095 = vmatprep.subr.bf16.mxu0 %v3439_v11  ;;  %3103 = vmatprep.subr.bf16.mxu1 %v3439_v11  ;;  %vm3822_vm1 = vcmp.ne.s16.totalorder %v2779_v56, 0 }
  0xb0   : > { %3097 = vmatprep.mubr.msk.bf16.mxu0 %vm3440_vm13, %v3439_v11  ;;  %3105 = vmatprep.mubr.msk.bf16.mxu1 %vm3440_vm13, %v3439_v11  ;;  %v1063_v42 = vsel %vm1061_vm3, 65537, %v3438_v3  ;;  %v972_v43 = vsel %vm3822_vm1, %v953_v1, 0  ;;  %v3337_v3 = vld [vmem:[%s4353_s3 + $0x88] sm:$0xff]   ;;  %vm4381_vm6 = vmmov %vm4380_vm7  ;;  %vm4382_vm3 = vcmp.lt.s32.totalorder %v3644_v30, 7 }
  0xb1   : > { %v2787_v6 = vcombine.low %v1063_v42, %v1064_v5 }
  0xb2   : > { %3096 = vmatpush3.bf16.msra.mxu0 %v3334_v59  ;;  %3104 = vmatpush3.bf16.msra.mxu1 %v3335_v61 }
  0xb3   : > { %3109 = vmatprep.subr.bf16.mxu0 %v3439_v11  ;;  %3117 = vmatprep.subr.bf16.mxu1 %v3439_v11  ;;  %vm3849_vm0 = vcmp.ne.s16.totalorder %v2787_v6, 0 }
  0xb4   : > { %v1069_v9 = vsel %vm3849_vm0, %v1048_v7, 0 }
  0xb5   : > { %3098 = vmatmul.mubr.msk.bf16.vlgmr.msra.gmra.mrb[12].mxu0 %vm337_vm12, %v877_v39  ;;  %3106 = vmatmul.mubr.msk.bf16.vlgmr.msra.gmra.mrb[12].mxu1 %vm337_vm12, %v972_v43 }
  0xb6   : > { %3110 = vmatpush3.bf16.msra.mxu0 %v3336_v38  ;;  %3113 = vmatprep.mubr.msk.bf16.mxu0 %vm3440_vm13, %v3439_v11 }
  0xb7   : > { %3111 = vmatprep.subr.bf16.mxu0 %v3439_v11  ;;  %3121 = vmatprep.mubr.msk.bf16.mxu1 %vm3440_vm13, %v3439_v11 }
  0xb8   : > { %3118 = vmatpush3.bf16.msra.mxu1 %v3338_v10 }
  0xb9   : > { %3119 = vmatprep.subr.bf16.mxu1 %v3439_v11 }
  0xba   : > { %3112 = vmatpush3.bf16.msra.mxu0 %v3337_v3 }
  0xbb   : > { %3125 = vmatprep.subr.bf16.mxu0 %v3439_v11 }
  0xbc   : > { %3120 = vmatpush3.bf16.msra.mxu1 %v3340_v0 }
  0xbd   : > { %3114 = vmatmul.mubr.msk.bf16.vlgmr.msra.gmra.mrb[16].mxu0 %vm337_vm12, %v1069_v9  ;;  %3133 = vmatprep.subr.bf16.mxu1 %v3439_v11 }
  0xbe   : > { %3129 = vmatprep.mubr.msk.bf16.mxu0 %vm3440_vm13, %v3439_v11  ;;  %3126 = vmatpush3.bf16.msra.mxu0 %v3339_v63 }
  0xbf   : > { %3127 = vmatprep.subr.bf16.mxu0 %v3439_v11 }
  0xc2   : > { %3128 = vmatpush3.bf16.msra.mxu0 %v3341_v12 }
  0xc3   : > { %3141 = vmatprep.subr.bf16.mxu0 %v3439_v11 }
 0x16e   : > { %v467_v13 = vpop.f32.mrb[0].mxu1 }
 0x16f   : > { %v3059_v15 = vpop.f32.mrb[1].mxu1 }
 0x170   : > { %v375_v14 = vpop.f32.mrb[0].mxu0  ;;  %v470_v17 = vpop.f32.mrb[2].mxu1 }
 0x171   : > { %382 = vst.msk [vmem:[#allocation2] sm:$0xff] %vm337_vm12, %v375_v14  ;;  %v3051_v16 = vpop.f32.mrb[1].mxu0  ;;  %v3060_v20 = vpop.f32.mrb[3].mxu1 }
 0x172   : > { %v378_v19 = vpop.f32.mrb[2].mxu0 }
 0x173   : > { %383 = vst.msk [vmem:[#allocation2 + $0x8] sm:$0xff] %vm337_vm12, %v378_v19  ;;  %v3052_v21 = vpop.f32.mrb[3].mxu0 }
 0x178   : > { %v474_v22 = vld [vmem:[#allocation2] sm:$0xff]  ;;  %v567_v23 = vpop.f32.mrb[4].mxu0  ;;  %v663_v25 = vpop.f32.mrb[4].mxu1 }
 0x179   : > { %v476_v26 = vadd.f32 %v474_v22, %v467_v13  ;;  %v3067_v27 = vpop.f32.mrb[5].mxu0  ;;  %v3075_v28 = vpop.f32.mrb[5].mxu1 }
 0x17a   : > { %v475_v29 = vld [vmem:[#allocation2 + $0x8] sm:$0xff]  ;;  %v570_v31 = vpop.f32.mrb[6].mxu0  ;;  %v666_v32 = vpop.f32.mrb[6].mxu1 }
 0x17b   : > { %478 = vst.msk [vmem:[#allocation2] sm:$0xff] %vm337_vm12, %v476_v26  ;;  %v477_v33 = vadd.f32 %v475_v29, %v470_v17  ;;  %v3068_v34 = vpop.f32.mrb[7].mxu0  ;;  %v3076_v35 = vpop.f32.mrb[7].mxu1  ;;  %v2795_v29 = vld [vmem:[%s4354_s4] ss:$0 sm:$0xff] }
 0x17d   : > { %479 = vst.msk [vmem:[#allocation2 + $0x8] sm:$0xff] %vm337_vm12, %v477_v33 }
 0x180   : > { %v833_v36 = vpop.f32.mrb[8].mxu1  ;;  %v737_v37 = vpop.f32.mrb[8].mxu0 }
 0x181   : > { %v3091_v40 = vpop.f32.mrb[9].mxu1  ;;  %v3083_v41 = vpop.f32.mrb[9].mxu0 }
 0x182   : > { %v574_v45 = vld [vmem:[#allocation2] sm:$0xff]  ;;  %v836_v46 = vpop.f32.mrb[10].mxu1  ;;  %v740_v47 = vpop.f32.mrb[10].mxu0 }
 0x183   : > { %v576_v48 = vadd.f32 %v574_v45, %v567_v23  ;;  %v3092_v49 = vpop.f32.mrb[11].mxu1  ;;  %v3084_v50 = vpop.f32.mrb[11].mxu0 }
 0x184   : > { %v575_v51 = vld [vmem:[#allocation2 + $0x8] sm:$0xff] }
 0x185   : > { %578 = vst.msk [vmem:[#allocation2] sm:$0xff] %vm337_vm12, %v576_v48  ;;  %v577_v52 = vadd.f32 %v575_v51, %v570_v31 }
 0x187   : > { %579 = vst.msk [vmem:[#allocation2 + $0x8] sm:$0xff] %vm337_vm12, %v577_v52 }
 0x188   : > { %v932_v53 = vpop.f32.mrb[12].mxu0  ;;  %v1027_v54 = vpop.f32.mrb[12].mxu1 }
 0x189   : > { %v3099_v55 = vpop.f32.mrb[13].mxu0  ;;  %v3107_v56 = vpop.f32.mrb[13].mxu1 }
 0x18a   : > { %v935_v57 = vpop.f32.mrb[14].mxu0  ;;  %v1030_v59 = vpop.f32.mrb[14].mxu1  ;;  %v3342_v56 = vld [vmem:[%s4355_s5 + $0x20] sm:$0xff]  }
 0x18b   : > { %v3100_v61 = vpop.f32.mrb[15].mxu0  ;;  %v3108_v62 = vpop.f32.mrb[15].mxu1 }
 0x18c   : > { %v670_v1 = vld [vmem:[#allocation2] sm:$0xff] }
 0x18d   : > { %v672_v5 = vadd.f32 %v670_v1, %v663_v25 }
 0x18e   : > { %v671_v42 = vld [vmem:[#allocation2 + $0x8] sm:$0xff] }
 0x18f   : > { %674 = vst.msk [vmem:[#allocation2] sm:$0xff] %vm337_vm12, %v672_v5  ;;  %v673_v38 = vadd.f32 %v671_v42, %v666_v32 }
 0x190   : > { %v1124_v39 = vpop.f32.mrb[16].mxu0 }
 0x191   : > { %675 = vst.msk [vmem:[#allocation2 + $0x8] sm:$0xff] %vm337_vm12, %v673_v38  ;;  %v3115_v43 = vpop.f32.mrb[17].mxu0 }
 0x192   : > { %v1127_v6 = vpop.f32.mrb[18].mxu0  ;;  %v3344_v43 = vld [vmem:[%s4355_s5 + $0x28] sm:$0xff]  }
 0x193   : > { %v3116_v3 = vpop.f32.mrb[19].mxu0 }
 0x196   : > { %v744_v7 = vld [vmem:[#allocation2] sm:$0xff] }
 0x197   : > { %v746_v9 = vadd.f32 %v744_v7, %v737_v37 }
 0x198   : > { %v745_v10 = vld [vmem:[#allocation2 + $0x8] sm:$0xff] }
 0x199   : > { %748 = vst.msk [vmem:[#allocation2] sm:$0xff] %vm337_vm12, %v746_v9  ;;  %v747_v63 = vadd.f32 %v745_v10, %v740_v47  ;;  %v3346_v10 = vld [vmem:[%s4355_s5 + $0x40] sm:$0xff]  }
 0x19b   : > { %749 = vst.msk [vmem:[#allocation2 + $0x8] sm:$0xff] %vm337_vm12, %v747_v63  ;;  %v3347_v63 = vld [vmem:[%s4355_s5 + $0x50] sm:$0xff]  }
 0x1a0   : > { %v840_v0 = vld [vmem:[#allocation2] sm:$0xff] }
 0x1a1   : > { %v842_v12 = vadd.f32 %v840_v0, %v833_v36 }
 0x1a2   : > { %v841_v13 = vld [vmem:[#allocation2 + $0x8] sm:$0xff] }
 0x1a3   : > { %844 = vst.msk [vmem:[#allocation2] sm:$0xff] %vm337_vm12, %v842_v12  ;;  %v843_v14 = vadd.f32 %v841_v13, %v836_v46 }
 0x1a5   : > { %845 = vst.msk [vmem:[#allocation2 + $0x8] sm:$0xff] %vm337_vm12, %v843_v14 }
 0x1aa   : > { %v939_v15 = vld [vmem:[#allocation2] sm:$0xff] }
 0x1ab   : > { %v941_v16 = vadd.f32 %v939_v15, %v932_v53 }
 0x1ac   : > { %v940_v17 = vld [vmem:[#allocation2 + $0x8] sm:$0xff] }
 0x1ad   : > { %943 = vst.msk [vmem:[#allocation2] sm:$0xff] %vm337_vm12, %v941_v16  ;;  %v942_v19 = vadd.f32 %v940_v17, %v935_v57  ;;  %v3343_v57 = vld [vmem:[%s4355_s5 + $0x30] sm:$0xff]   ;;  %v3348_v16 = vld [vmem:[%s4355_s5 + $0x48] sm:$0xff]   ;;  %v3349_v17 = vld [vmem:[%s4355_s5 + $0x58] sm:$0xff]  }
 0x1af   : > { %944 = vst.msk [vmem:[#allocation2 + $0x8] sm:$0xff] %vm337_vm12, %v942_v19 }
 0x1b4   : > { %v1034_v20 = vld [vmem:[#allocation2] sm:$0xff] }
 0x1b5   : > { %v1036_v21 = vadd.f32 %v1034_v20, %v1027_v54  ;;  %v3350_v20 = vld [vmem:[%s4355_s5 + $0x60] sm:$0xff]  }
 0x1b6   : > { %v1035_v22 = vld [vmem:[#allocation2 + $0x8] sm:$0xff] }
 0x1b7   : > { %1038 = vst.msk [vmem:[#allocation2] sm:$0xff] %vm337_vm12, %v1036_v21  ;;  %v1037_v23 = vadd.f32 %v1035_v22, %v1030_v59  ;;  %v3351_v21 = vld [vmem:[%s4355_s5 + $0x70] sm:$0xff]  }
 0x1b9   : > { %1039 = vst.msk [vmem:[#allocation2 + $0x8] sm:$0xff] %vm337_vm12, %v1037_v23 }
 0x1be   : > { %v1131_v25 = vld [vmem:[#allocation2] sm:$0xff] }
 0x1bf   : > { %v1133_v26 = vadd.f32 %v1131_v25, %v1124_v39  ;;  %v3352_v25 = vld [vmem:[%s4355_s5 + $0x68] sm:$0xff]  }
 0x1c0   : > { %v1132_v27 = vld [vmem:[#allocation2 + $0x8] sm:$0xff] }
 0x1c1   : > { %1135 = vst.msk [vmem:[#allocation2] sm:$0xff] %vm337_vm12, %v1133_v26  ;;  %v1134_v28 = vadd.f32 %v1132_v27, %v1127_v6  ;;  %v3345_v6 = vld [vmem:[%s4355_s5 + $0x38] sm:$0xff]  }
 0x1c2   : > { %v3353_v26 = vld [vmem:[%s4355_s5 + $0x78] sm:$0xff]  }
 0x1c3   : > { %1136 = vst.msk [vmem:[#allocation2 + $0x8] sm:$0xff] %vm337_vm12, %v1134_v28 }
 0x1c8   : > { %v1137_v31 = vld [vmem:[#allocation2] sm:$0xff] }
 0x1c9   : > { %v1146_v32 = vadd.f32 %v2795_v29, %v1137_v31 }
 0x1ca   : > { %v1138_v33 = vld [vmem:[#allocation2 + $0x8] sm:$0xff] }
 0x1cb   : > { %1148 = vst.msk [vmem:[#allocation2] sm:$0xff] %vm337_vm12, %v1146_v32  ;;  %v1147_v34 = vadd.f32 %v2795_v29, %v1138_v33  ;;  %v3354_v29 = vld [vmem:[%s4355_s5 + $0x80] sm:$0xff]   ;;  %v3355_v33 = vld [vmem:[%s4355_s5 + $0x88] sm:$0xff]  }
 0x1cd   : > { %1149 = vst.msk [vmem:[#allocation2 + $0x8] sm:$0xff] %vm337_vm12, %v1147_v34 }
 0x1d2   : > { %v3898_v35 = vld [vmem:[#allocation2] sm:$0xff] }
 0x1d3   : > { %v3901_v36 = vmax.f32 %v3898_v35, 0.0 }
 0x1d4   : > { %v3903_v37 = vld [vmem:[#allocation2 + $0x8] sm:$0xff] }
 0x1d5   : > { %v3906_v40 = vmax.f32 %v3903_v37, 0.0  ;;  %v1154_v41 = vrot.slane %v3901_v36, 3  ;;  %v1227_v46 = vrot.slane %v3901_v36, 4  ;;  %v1304_v59 = vrot.slane %v3901_v36, 5 }
 0x1d6   : > { %v1381_v61 = vrot.slane %v3901_v36, 7  ;;  %v1530_v0 = vrot.slane %v3901_v36, 1 }
 0x1d7   : > { %v1155_v45 = vrot.slane %v3906_v40, 3  ;;  %v1228_v47 = vrot.slane %v3906_v40, 4  ;;  %v1305_v48 = vrot.slane %v3906_v40, 5  ;;  %v1382_v49 = vrot.slane %v3906_v40, 7 }
 0x1d8   : > { %v1531_v9 = vrot.slane %v3906_v40, 1  ;;  %v1458_v22 = vpack.c.bf16 %v3906_v40, %v3901_v36  ;;  %v1841_v40 = vld [vmem:[%s4356_s6] sm:$0xf] }
 0x1d9   : > { %v3916_v50 = vsel %vm292_vm5, %v1154_v41, %v1155_v45  ;;  %v3920_v51 = vsel %vm292_vm5, %v1155_v45, %v1154_v41  ;;  %v3924_v52 = vsel %vm390_vm2, %v1227_v46, %v1228_v47  ;;  %v3928_v53 = vsel %vm390_vm2, %v1228_v47, %v1227_v46 }
 0x1da   : > { %v1158_v54 = vpack.c.bf16 %v3916_v50, %v3920_v51  ;;  %v1231_v55 = vpack.c.bf16 %v3924_v52, %v3928_v53  ;;  %v3948_v5 = vsel %vm486_vm10, %v1304_v59, %v1305_v48  ;;  %v3954_v42 = vsel %vm486_vm10, %v1305_v48, %v1304_v59 }
 0x1db   : > { %v1383_v38 = vsel %vm4380_vm7, %v1381_v61, %v1382_v49  ;;  %v1384_v39 = vsel %vm4381_vm6, %v1382_v49, %v1381_v61  ;;  %v1308_v3 = vpack.c.bf16 %v3948_v5, %v3954_v42  ;;  %v1532_v14 = vsel %vm4382_vm3, %v1530_v0, %v1531_v9  ;;  %vm4383_vm7 = vmmov %vm4382_vm3 }
 0x1dc   : > { %v1159_v62 = vsel %vm3692_vm4, %v1158_v54, 0  ;;  %v1232_v1 = vsel %vm3684_vm15, %v1231_v55, 0  ;;  %v1385_v7 = vpack.c.bf16 %v1383_v38, %v1384_v39  ;;  %v1533_v15 = vsel %vm4383_vm7, %v1531_v9, %v1530_v0 }
 0x1dd   : > { %3122 = vmatmul.mubr.msk.bf16.vlgmr.msra.gmra.mrb[16].mxu1 %vm337_vm12, %v1159_v62  ;;  %3130 = vmatmul.mubr.msk.bf16.vlgmr.msra.gmra.mrb[20].mxu0 %vm337_vm12, %v1232_v1  ;;  %v1309_v12 = vsel %vm3733_vm14, %v1308_v3, 0  ;;  %v1534_v19 = vpack.c.bf16 %v1533_v15, %v1532_v14  ;;  %v1611_v27 = vpack.c.bf16 %v3920_v51, %v3916_v50  ;;  %v1688_v28 = vpack.c.bf16 %v3928_v53, %v3924_v52 }
 0x1de   : > { %3134 = vmatpush3.bf16.msra.mxu1 %v3342_v56  ;;  %3142 = vmatpush3.bf16.msra.mxu0 %v3343_v57  ;;  %v1386_v13 = vsel %vm3746_vm8, %v1385_v7, 0  ;;  %v1765_v34 = vpack.c.bf16 %v3954_v42, %v3948_v5  ;;  %vm1845_vm6 = vcmask 1043456   ;;  %vm1220_vm3 = vcmask 64512  }
 0x1df   : > { %3135 = vmatprep.subr.bf16.mxu1 %v3439_v11  ;;  %3143 = vmatprep.subr.bf16.mxu0 %v3439_v11  ;;  %v1535_v23 = vsel %vm3779_vm9, %v1534_v19, 0  ;;  %v1612_v31 = vsel %vm3818_vm11, %v1611_v27, 0  ;;  %v1689_v32 = vsel %vm3822_vm1, %v1688_v28, 0  ;;  %v1847_v41 = vsel %vm1845_vm6, %v1841_v40, 0 }
 0x1e0   : > { %3137 = vmatprep.mubr.msk.bf16.mxu1 %vm3440_vm13, %v3439_v11  ;;  %3145 = vmatprep.mubr.msk.bf16.mxu0 %vm3440_vm13, %v3439_v11  ;;  %v1766_v36 = vsel %vm3849_vm0, %v1765_v34, 0 }
 0x1e2   : > { %3136 = vmatpush3.bf16.msra.mxu1 %v3344_v43  ;;  %3144 = vmatpush3.bf16.msra.mxu0 %v3345_v6 }
 0x1e3   : > { %3149 = vmatprep.subr.bf16.mxu1 %v3439_v11  ;;  %3157 = vmatprep.subr.bf16.mxu0 %v3439_v11 }
 0x1e5   : > { %3138 = vmatmul.mubr.msk.bf16.vlgmr.msra.gmra.mrb[20].mxu1 %vm337_vm12, %v1309_v12  ;;  %3146 = vmatmul.mubr.msk.bf16.vlgmr.msra.gmra.mrb[24].mxu0 %vm337_vm12, %v1386_v13 }
 0x1e6   : > { %3150 = vmatpush3.bf16.msra.mxu1 %v3346_v10  ;;  %3158 = vmatpush3.bf16.msra.mxu0 %v3347_v63 }
 0x1e7   : > { %3151 = vmatprep.subr.bf16.mxu1 %v3439_v11  ;;  %3159 = vmatprep.subr.bf16.mxu0 %v3439_v11 }
 0x1e8   : > { %3153 = vmatprep.mubr.msk.bf16.mxu1 %vm3440_vm13, %v3439_v11  ;;  %3161 = vmatprep.mubr.msk.bf16.mxu0 %vm3440_vm13, %v3439_v11 }
 0x1ea   : > { %3152 = vmatpush3.bf16.msra.mxu1 %v3348_v16  ;;  %3160 = vmatpush3.bf16.msra.mxu0 %v3349_v17 }
 0x1eb   : > { %3165 = vmatprep.subr.bf16.mxu1 %v3439_v11  ;;  %3173 = vmatprep.subr.bf16.mxu0 %v3439_v11 }
 0x1ed   : > { %3154 = vmatmul.mubr.msk.bf16.vlgmr.msra.gmra.mrb[24].mxu1 %vm337_vm12, %v1458_v22  ;;  %3162 = vmatmul.mubr.msk.bf16.vlgmr.msra.gmra.mrb[28].mxu0 %vm337_vm12, %v1535_v23 }
 0x1ee   : > { %3166 = vmatpush3.bf16.msra.mxu1 %v3350_v20  ;;  %3174 = vmatpush3.bf16.msra.mxu0 %v3351_v21 }
 0x1ef   : > { %3167 = vmatprep.subr.bf16.mxu1 %v3439_v11  ;;  %3175 = vmatprep.subr.bf16.mxu0 %v3439_v11 }
 0x1f0   : > { %3169 = vmatprep.mubr.msk.bf16.mxu1 %vm3440_vm13, %v3439_v11  ;;  %3177 = vmatprep.mubr.msk.bf16.mxu0 %vm3440_vm13, %v3439_v11 }
 0x1f2   : > { %3168 = vmatpush3.bf16.msra.mxu1 %v3352_v25  ;;  %3176 = vmatpush3.bf16.msra.mxu0 %v3353_v26 }
 0x1f3   : > { %3181 = vmatprep.subr.bf16.mxu1 %v3439_v11  ;;  %3189 = vmatprep.subr.bf16.mxu0 %v3439_v11 }
 0x1f5   : > { %3170 = vmatmul.mubr.msk.bf16.vlgmr.msra.gmra.mrb[28].mxu1 %vm337_vm12, %v1612_v31  ;;  %3178 = vmatmul.mubr.msk.bf16.vlgmr.msra.gmra.mrb[32].mxu0 %vm337_vm12, %v1689_v32 }
 0x1f6   : > { %3182 = vmatpush3.bf16.msra.mxu1 %v3354_v29  ;;  %3185 = vmatprep.mubr.msk.bf16.mxu1 %vm3440_vm13, %v3439_v11 }
 0x1f7   : > { %3183 = vmatprep.subr.bf16.mxu1 %v3439_v11  ;;  %3191 = vmatprep.mubr.msk.bf16.mxu0 %vm3440_vm13, %v3439_v11 }
 0x1f8   : > { %3190 = vmatpush3.bf16.msra.mxu0 %v1847_v41 }
 0x1f9   : > { %3203 = vmatprep.subr.bf16.mxu0 %v3439_v11 }
 0x1fa   : > { %3184 = vmatpush3.bf16.msra.mxu1 %v3355_v33 }
 0x1fb   : > { %3195 = vmatprep.subr.bf16.mxu1 %v3439_v11 }
 0x1fd   : > { %3186 = vmatmul.mubr.msk.bf16.vlgmr.msra.gmra.mrb[32].mxu1 %vm337_vm12, %v1766_v36 }
 0x1fe   : > { %3199 = vmatprep.mubr.msk.bf16.mxu1 %vm3440_vm13, %v3439_v11 }
 0x2b0   : > { %v1213_v45 = vpop.f32.mrb[16].mxu1  ;;  %v1287_v46 = vpop.f32.mrb[20].mxu0 }
 0x2b1   : > { %1221 = vst.msk [vmem:[#allocation3] sm:$0xff] %vm1220_vm3, %v1213_v45  ;;  %v3123_v47 = vpop.f32.mrb[17].mxu1  ;;  %v3131_v48 = vpop.f32.mrb[21].mxu0 }
 0x2b2   : > { %v1216_v49 = vpop.f32.mrb[18].mxu1  ;;  %v1290_v50 = vpop.f32.mrb[22].mxu0 }
 0x2b3   : > { %1222 = vst.msk [vmem:[#allocation3 + $0x8] sm:$0xff] %vm1220_vm3, %v1216_v49  ;;  %v3124_v51 = vpop.f32.mrb[19].mxu1  ;;  %v3132_v52 = vpop.f32.mrb[23].mxu0 }
 0x2b8   : > { %v1294_v53 = vld [vmem:[#allocation3] sm:$0xff]  ;;  %v1364_v54 = vpop.f32.mrb[20].mxu1  ;;  %v1441_v55 = vpop.f32.mrb[24].mxu0 }
 0x2b9   : > { %v1296_v56 = vadd.f32 %v1294_v53, %v1287_v46  ;;  %v3139_v57 = vpop.f32.mrb[21].mxu1  ;;  %v3147_v59 = vpop.f32.mrb[25].mxu0 }
 0x2ba   : > { %v1295_v61 = vld [vmem:[#allocation3 + $0x8] sm:$0xff]  ;;  %v1367_v62 = vpop.f32.mrb[22].mxu1  ;;  %v1444_v1 = vpop.f32.mrb[26].mxu0 }
 0x2bb   : > { %1298 = vst.msk [vmem:[#allocation3] sm:$0xff] %vm1220_vm3, %v1296_v56  ;;  %v1297_v5 = vadd.f32 %v1295_v61, %v1290_v50  ;;  %v3140_v42 = vpop.f32.mrb[23].mxu1  ;;  %v3148_v38 = vpop.f32.mrb[27].mxu0 }
 0x2bd   : > { %1299 = vst.msk [vmem:[#allocation3 + $0x8] sm:$0xff] %vm1220_vm3, %v1297_v5 }
 0x2c0   : > { %v1513_v39 = vpop.f32.mrb[24].mxu1  ;;  %v1590_v43 = vpop.f32.mrb[28].mxu0 }
 0x2c1   : > { %v3155_v6 = vpop.f32.mrb[25].mxu1  ;;  %v3163_v3 = vpop.f32.mrb[29].mxu0 }
 0x2c2   : > { %v1371_v7 = vld [vmem:[#allocation3] sm:$0xff]  ;;  %v1516_v9 = vpop.f32.mrb[26].mxu1  ;;  %v1593_v10 = vpop.f32.mrb[30].mxu0  ;;  %v3357_v6 = vld [vmem:[%s4355_s5 + $0xa0] sm:$0xff]   ;;  %v3358_v3 = vld [vmem:[%s4355_s5 + $0x98] sm:$0xff]  }
 0x2c3   : > { %v1373_v63 = vadd.f32 %v1371_v7, %v1364_v54  ;;  %v3156_v0 = vpop.f32.mrb[27].mxu1  ;;  %v3164_v12 = vpop.f32.mrb[31].mxu0  ;;  %v3359_v7 = vld [vmem:[%s4355_s5 + $0xa8] sm:$0xff]  }
 0x2c4   : > { %v1372_v13 = vld [vmem:[#allocation3 + $0x8] sm:$0xff] }
 0x2c5   : > { %1375 = vst.msk [vmem:[#allocation3] sm:$0xff] %vm1220_vm3, %v1373_v63  ;;  %v1374_v14 = vadd.f32 %v1372_v13, %v1367_v62 }
 0x2c7   : > { %1376 = vst.msk [vmem:[#allocation3 + $0x8] sm:$0xff] %vm1220_vm3, %v1374_v14 }
 0x2c8   : > { %v1667_v15 = vpop.f32.mrb[28].mxu1  ;;  %v1744_v16 = vpop.f32.mrb[32].mxu0 }
 0x2c9   : > { %v3171_v17 = vpop.f32.mrb[29].mxu1  ;;  %v3179_v19 = vpop.f32.mrb[33].mxu0 }
 0x2ca   : > { %v1670_v20 = vpop.f32.mrb[30].mxu1  ;;  %v1747_v21 = vpop.f32.mrb[34].mxu0 }
 0x2cb   : > { %v3172_v22 = vpop.f32.mrb[31].mxu1  ;;  %v3180_v23 = vpop.f32.mrb[35].mxu0 }
 0x2cc   : > { %v1448_v25 = vld [vmem:[#allocation3] sm:$0xff] }
 0x2cd   : > { %v1450_v26 = vadd.f32 %v1448_v25, %v1441_v55 }
 0x2ce   : > { %v1449_v27 = vld [vmem:[#allocation3 + $0x8] sm:$0xff] }
 0x2cf   : > { %1452 = vst.msk [vmem:[#allocation3] sm:$0xff] %vm1220_vm3, %v1450_v26  ;;  %v1451_v28 = vadd.f32 %v1449_v27, %v1444_v1 }
 0x2d0   : > { %v1821_v29 = vpop.f32.mrb[32].mxu1 }
 0x2d1   : > { %1453 = vst.msk [vmem:[#allocation3 + $0x8] sm:$0xff] %vm1220_vm3, %v1451_v28  ;;  %v3187_v31 = vpop.f32.mrb[33].mxu1 }
 0x2d2   : > { %v1824_v32 = vpop.f32.mrb[34].mxu1  ;;  %v3360_v31 = vld [vmem:[%s4355_s5 + $0xb0] sm:$0xff]  }
 0x2d3   : > { %v3188_v33 = vpop.f32.mrb[35].mxu1 }
 0x2d6   : > { %v1520_v34 = vld [vmem:[#allocation3] sm:$0xff] }
 0x2d7   : > { %v1522_v36 = vadd.f32 %v1520_v34, %v1513_v39 }
 0x2d8   : > { %v1521_v40 = vld [vmem:[#allocation3 + $0x8] sm:$0xff] }
 0x2d9   : > { %1524 = vst.msk [vmem:[#allocation3] sm:$0xff] %vm1220_vm3, %v1522_v36  ;;  %v1523_v41 = vadd.f32 %v1521_v40, %v1516_v9 }
 0x2db   : > { %1525 = vst.msk [vmem:[#allocation3 + $0x8] sm:$0xff] %vm1220_vm3, %v1523_v41 }
 0x2e0   : > { %v1597_v45 = vld [vmem:[#allocation3] sm:$0xff] }
 0x2e1   : > { %v1599_v46 = vadd.f32 %v1597_v45, %v1590_v43  ;;  %v3356_v43 = vld [vmem:[%s4355_s5 + $0x90] sm:$0xff]  }
 0x2e2   : > { %v1598_v47 = vld [vmem:[#allocation3 + $0x8] sm:$0xff]  ;;  %3196 = vmatpush3.bf16.msra.mxu1 %v3356_v43 }
 0x2e3   : > { %1601 = vst.msk [vmem:[#allocation3] sm:$0xff] %vm1220_vm3, %v1599_v46  ;;  %v1600_v48 = vadd.f32 %v1598_v47, %v1593_v10  ;;  %3197 = vmatprep.subr.bf16.mxu1 %v3439_v11  ;;  %v3363_v47 = vld [vmem:[%s4355_s5 + $0xc8] sm:$0xff]  }
 0x2e5   : > { %1602 = vst.msk [vmem:[#allocation3 + $0x8] sm:$0xff] %vm1220_vm3, %v1600_v48 }
 0x2e6   : > { %3198 = vmatpush3.bf16.msra.mxu1 %v3358_v3  ;;  %v3373_v3 = vld [vmem:[%s4355_s5 + $0x118] sm:$0xff]  }
 0x2e7   : > { %3211 = vmatprep.subr.bf16.mxu1 %v3439_v11 }
 0x2ea   : > { %v1674_v49 = vld [vmem:[#allocation3] sm:$0xff] }
 0x2eb   : > { %v1676_v50 = vadd.f32 %v1674_v49, %v1667_v15 }
 0x2ec   : > { %v1675_v51 = vld [vmem:[#allocation3 + $0x8] sm:$0xff] }
 0x2ed   : > { %1678 = vst.msk [vmem:[#allocation3] sm:$0xff] %vm1220_vm3, %v1676_v50  ;;  %v1677_v52 = vadd.f32 %v1675_v51, %v1670_v20  ;;  %v3364_v51 = vld [vmem:[%s4355_s5 + $0xd0] sm:$0xff]  }
 0x2ef   : > { %1679 = vst.msk [vmem:[#allocation3 + $0x8] sm:$0xff] %vm1220_vm3, %v1677_v52  ;;  %v3365_v52 = vld [vmem:[%s4355_s5 + $0xe0] sm:$0xff]  }
 0x2f4   : > { %v1751_v53 = vld [vmem:[#allocation3] sm:$0xff] }
 0x2f5   : > { %v1753_v54 = vadd.f32 %v1751_v53, %v1744_v16 }
 0x2f6   : > { %v1752_v55 = vld [vmem:[#allocation3 + $0x8] sm:$0xff] }
 0x2f7   : > { %1755 = vst.msk [vmem:[#allocation3] sm:$0xff] %vm1220_vm3, %v1753_v54  ;;  %v1754_v56 = vadd.f32 %v1752_v55, %v1747_v21 }
 0x2f9   : > { %1756 = vst.msk [vmem:[#allocation3 + $0x8] sm:$0xff] %vm1220_vm3, %v1754_v56 }
 0x2fe   : > { %v1828_v57 = vld [vmem:[#allocation3] sm:$0xff] }
 0x2ff   : > { %v1830_v59 = vadd.f32 %v1828_v57, %v1821_v29 }
 0x300   : > { %v1829_v61 = vld [vmem:[#allocation3 + $0x8] sm:$0xff] }
 0x301   : > { %1832 = vst.msk [vmem:[#allocation3] sm:$0xff] %vm1220_vm3, %v1830_v59  ;;  %v1831_v62 = vadd.f32 %v1829_v61, %v1824_v32  ;;  %v3361_v32 = vld [vmem:[%s4355_s5 + $0xc0] sm:$0xff]   ;;  %v3368_v59 = vld [vmem:[%s4355_s5 + $0xf0] sm:$0xff]  }
 0x302   : > { %v3369_v61 = vld [vmem:[%s4355_s5 + $0x100] sm:$0xff]  }
 0x303   : > { %1833 = vst.msk [vmem:[#allocation3 + $0x8] sm:$0xff] %vm1220_vm3, %v1831_v62 }
 0x308   : > { %v1834_v1 = vld [vmem:[#allocation3] sm:$0xff] }
 0x309   : > { %v1836_v42 = vmax.f32 %v1834_v1, 0.0 }
 0x30a   : > { %v1835_v5 = vld [vmem:[#allocation3 + $0x8] sm:$0xff] }
 0x30b   : > { %v1837_v38 = vmax.f32 %v1835_v5, 0.0  ;;  %v3370_v5 = vld [vmem:[%s4355_s5 + $0xf8] sm:$0xff]  }
 0x30d   : > { %v1838_v39 = vpack.c.bf16 %v1837_v38, %v1836_v42  ;;  %v3371_v42 = vld [vmem:[%s4355_s5 + $0x108] sm:$0xff]  }
 0x30f   : > { %3192 = vmatmul.mubr.msk.bf16.vlgmr.msra.gmra.mrb[36].mxu0 %vm1220_vm3, %v1838_v39  ;;  %v3372_v39 = vld [vmem:[%s4355_s5 + $0x110] sm:$0xff]  }
 0x310   : > { %3207 = vmatprep.mubr.msk.bf16.mxu0 %vm3440_vm13, %v3439_v11  ;;  %3204 = vmatpush3.bf16.msra.mxu0 %v3357_v6 }
 0x311   : > { %3205 = vmatprep.subr.bf16.mxu0 %v3439_v11 }
 0x314   : > { %3206 = vmatpush3.bf16.msra.mxu0 %v3359_v7  ;;  %v2919_v7 = vld [vmem:[%s4356_s6 + $0x4] sm:$0xf] }
 0x315   : > { %3219 = vmatprep.subr.bf16.mxu0 %v3439_v11 }
 0x3e2   : > { %v1883_v9 = vpop.f32.mrb[36].mxu0 }
 0x3e3   : > { %v1890_v10 = vadd.f32 %v1883_v9, %v3898_v35  ;;  %v3193_v63 = vpop.f32.mrb[37].mxu0  ;;  %v2591_v9 = vsel %vm1845_vm6, %v2919_v7, 0 }
 0x3e4   : > { %v1886_v0 = vpop.f32.mrb[38].mxu0 }
 0x3e5   : > { %1892 = vst.msk [vmem:[#allocation2] sm:$0xff] %vm337_vm12, %v1890_v10  ;;  %v1891_v12 = vadd.f32 %v1886_v0, %v3903_v37  ;;  %v3194_v13 = vpop.f32.mrb[39].mxu0 }
 0x3e7   : > { %1893 = vst.msk [vmem:[#allocation2 + $0x8] sm:$0xff] %vm337_vm12, %v1891_v12 }
 0x3ec   : > { %v4109_v14 = vld [vmem:[#allocation2] sm:$0xff] }
 0x3ed   : > { %v4112_v15 = vmax.f32 %v4109_v14, 0.0 }
 0x3ee   : > { %v4114_v16 = vld [vmem:[#allocation2 + $0x8] sm:$0xff] }
 0x3ef   : > { %v4117_v17 = vmax.f32 %v4114_v16, 0.0  ;;  %v1898_v35 = vrot.slane %v4112_v15, 3  ;;  %v1971_v20 = vrot.slane %v4112_v15, 4  ;;  %v2048_v33 = vrot.slane %v4112_v15, 5 }
 0x3f0   : > { %v2125_v34 = vrot.slane %v4112_v15, 7  ;;  %v2274_v53 = vrot.slane %v4112_v15, 1 }
 0x3f1   : > { %v1899_v19 = vrot.slane %v4117_v17, 3  ;;  %v1972_v37 = vrot.slane %v4117_v17, 4  ;;  %v2049_v21 = vrot.slane %v4117_v17, 5  ;;  %v2126_v22 = vrot.slane %v4117_v17, 7 }
 0x3f2   : > { %v2275_v50 = vrot.slane %v4117_v17, 1  ;;  %v2202_v62 = vpack.c.bf16 %v4117_v17, %v4112_v15 }
 0x3f3   : > { %v4127_v23 = vsel %vm292_vm5, %v1898_v35, %v1899_v19  ;;  %v4131_v25 = vsel %vm292_vm5, %v1899_v19, %v1898_v35  ;;  %v4135_v26 = vsel %vm390_vm2, %v1971_v20, %v1972_v37  ;;  %v4139_v27 = vsel %vm390_vm2, %v1972_v37, %v1971_v20 }
 0x3f4   : > { %v1902_v28 = vpack.c.bf16 %v4127_v23, %v4131_v25  ;;  %v1975_v29 = vpack.c.bf16 %v4135_v26, %v4139_v27  ;;  %v4159_v41 = vsel %vm486_vm10, %v2048_v33, %v2049_v21  ;;  %v4165_v45 = vsel %vm486_vm10, %v2049_v21, %v2048_v33  ;;  %vm4386_vm10 = vmmov %vm4383_vm7 }
 0x3f5   : > { %vm4384_vm2 = vcmp.lt.s32.totalorder %v3644_v30, 1  ;;  %v2052_v48 = vpack.c.bf16 %v4159_v41, %v4165_v45  ;;  %v2276_v56 = vsel %vm4386_vm10, %v2274_v53, %v2275_v50  ;;  %v2355_v44 = vpack.c.bf16 %v4131_v25, %v4127_v23 }
 0x3f6   : > { %v1903_v36 = vsel %vm3692_vm4, %v1902_v28, 0  ;;  %v1976_v40 = vsel %vm3684_vm15, %v1975_v29, 0  ;;  %v2127_v46 = vsel %vm4384_vm2, %v2125_v34, %v2126_v22  ;;  %vm4385_vm5 = vmmov %vm4384_vm2  ;;  %v2432_v38 = vpack.c.bf16 %v4139_v27, %v4135_v26 }
 0x3f7   : > { %3200 = vmatmul.mubr.msk.bf16.vlgmr.msra.gmra.mrb[36].mxu1 %vm337_vm12, %v1903_v36  ;;  %3208 = vmatmul.mubr.msk.bf16.vlgmr.msra.gmra.mrb[40].mxu0 %vm337_vm12, %v1976_v40  ;;  %v2128_v60 = vsel %vm4385_vm5, %v2126_v22, %v2125_v34  ;;  %v2053_v54 = vsel %vm3733_vm14, %v2052_v48, 0  ;;  %vm4387_vm15 = vmmov %vm4383_vm7  ;;  %v2356_v43 = vsel %vm3818_vm11, %v2355_v44, 0  ;;  %v2509_v2 = vpack.c.bf16 %v4165_v45, %v4159_v41 }
 0x3f8   : > { %3212 = vmatpush3.bf16.msra.mxu1 %v3360_v31  ;;  %3220 = vmatpush3.bf16.msra.mxu0 %v3361_v32  ;;  %v2129_v49 = vpack.c.bf16 %v2127_v46, %v2128_v60  ;;  %v2277_v57 = vsel %vm4387_vm15, %v2275_v50, %v2274_v53  ;;  %v2433_v6 = vsel %vm3822_vm1, %v2432_v38, 0 }
 0x3f9   : > { %3213 = vmatprep.subr.bf16.mxu1 %v3439_v11  ;;  %3221 = vmatprep.subr.bf16.mxu0 %v3439_v11  ;;  %v2278_v30 = vpack.c.bf16 %v2277_v57, %v2276_v56  ;;  %v2510_v4 = vsel %vm3849_vm0, %v2509_v2, 0 }
 0x3fa   : > { %3215 = vmatprep.mubr.msk.bf16.mxu1 %vm3440_vm13, %v3439_v11  ;;  %3223 = vmatprep.mubr.msk.bf16.mxu0 %vm3440_vm13, %v3439_v11  ;;  %v2130_v55 = vsel %vm3746_vm8, %v2129_v49, 0 }
 0x3fb   : > { %v2279_v1 = vsel %vm3779_vm9, %v2278_v30, 0 }
 0x3fc   : > { %3214 = vmatpush3.bf16.msra.mxu1 %v3362_v58  ;;  %3222 = vmatpush3.bf16.msra.mxu0 %v3363_v47 }
 0x3fd   : > { %3227 = vmatprep.subr.bf16.mxu1 %v3439_v11  ;;  %3235 = vmatprep.subr.bf16.mxu0 %v3439_v11 }
 0x3ff   : > { %3216 = vmatmul.mubr.msk.bf16.vlgmr.msra.gmra.mrb[40].mxu1 %vm337_vm12, %v2053_v54  ;;  %3224 = vmatmul.mubr.msk.bf16.vlgmr.msra.gmra.mrb[44].mxu0 %vm337_vm12, %v2130_v55 }
 0x400   : > { %3228 = vmatpush3.bf16.msra.mxu1 %v3364_v51  ;;  %3236 = vmatpush3.bf16.msra.mxu0 %v3365_v52 }
 0x401   : > { %3229 = vmatprep.subr.bf16.mxu1 %v3439_v11  ;;  %3237 = vmatprep.subr.bf16.mxu0 %v3439_v11 }
 0x402   : > { %3231 = vmatprep.mubr.msk.bf16.mxu1 %vm3440_vm13, %v3439_v11  ;;  %3239 = vmatprep.mubr.msk.bf16.mxu0 %vm3440_vm13, %v3439_v11 }
 0x404   : > { %3230 = vmatpush3.bf16.msra.mxu1 %v3366_v18  ;;  %3238 = vmatpush3.bf16.msra.mxu0 %v3367_v24 }
 0x405   : > { %3243 = vmatprep.subr.bf16.mxu1 %v3439_v11  ;;  %3251 = vmatprep.subr.bf16.mxu0 %v3439_v11 }
 0x407   : > { %3232 = vmatmul.mubr.msk.bf16.vlgmr.msra.gmra.mrb[44].mxu1 %vm337_vm12, %v2202_v62  ;;  %3240 = vmatmul.mubr.msk.bf16.vlgmr.msra.gmra.mrb[48].mxu0 %vm337_vm12, %v2279_v1 }
 0x408   : > { %3244 = vmatpush3.bf16.msra.mxu1 %v3368_v59  ;;  %3252 = vmatpush3.bf16.msra.mxu0 %v3369_v61 }
 0x409   : > { %3245 = vmatprep.subr.bf16.mxu1 %v3439_v11  ;;  %3253 = vmatprep.subr.bf16.mxu0 %v3439_v11 }
 0x40a   : > { %3247 = vmatprep.mubr.msk.bf16.mxu1 %vm3440_vm13, %v3439_v11  ;;  %3255 = vmatprep.mubr.msk.bf16.mxu0 %vm3440_vm13, %v3439_v11 }
 0x40c   : > { %3246 = vmatpush3.bf16.msra.mxu1 %v3370_v5  ;;  %3254 = vmatpush3.bf16.msra.mxu0 %v3371_v42 }
 0x40d   : > { %3259 = vmatprep.subr.bf16.mxu1 %v3439_v11  ;;  %3267 = vmatprep.subr.bf16.mxu0 %v3439_v11 }
 0x40f   : > { %3248 = vmatmul.mubr.msk.bf16.vlgmr.msra.gmra.mrb[48].mxu1 %vm337_vm12, %v2356_v43  ;;  %3256 = vmatmul.mubr.msk.bf16.vlgmr.msra.gmra.mrb[52].mxu0 %vm337_vm12, %v2433_v6 }
 0x410   : > { %3260 = vmatpush3.bf16.msra.mxu1 %v3372_v39  ;;  %3263 = vmatprep.mubr.msk.bf16.mxu1 %vm3440_vm13, %v3439_v11 }
 0x411   : > { %3261 = vmatprep.subr.bf16.mxu1 %v3439_v11  ;;  %3269 = vmatprep.mubr.msk.bf16.mxu0 %vm3440_vm13, %v3439_v11 }
 0x412   : > { %3268 = vmatpush3.bf16.msra.mxu0 %v2591_v9 }
 0x414   : > { %3262 = vmatpush3.bf16.msra.mxu1 %v3373_v3 }
 0x417   : > { %3264 = vmatmul.mubr.msk.bf16.vlgmr.msra.gmra.mrb[52].mxu1 %vm337_vm12, %v2510_v4 }
 0x4ca   : > { %v1958_v10 = vpop.f32.mrb[36].mxu1  ;;  %v2031_v63 = vpop.f32.mrb[40].mxu0 }
 0x4cb   : > { %1965 = vst.msk [vmem:[#allocation3] sm:$0xff] %vm1220_vm3, %v1958_v10  ;;  %v3201_v11 = vpop.f32.mrb[37].mxu1  ;;  %v3209_v0 = vpop.f32.mrb[41].mxu0 }
 0x4cc   : > { %v1961_v12 = vpop.f32.mrb[38].mxu1  ;;  %v2034_v13 = vpop.f32.mrb[42].mxu0 }
 0x4cd   : > { %1966 = vst.msk [vmem:[#allocation3 + $0x8] sm:$0xff] %vm1220_vm3, %v1961_v12  ;;  %v3202_v8 = vpop.f32.mrb[39].mxu1  ;;  %v3210_v15 = vpop.f32.mrb[43].mxu0 }
 0x4d2   : > { %v2038_v17 = vld [vmem:[#allocation3] sm:$0xff]  ;;  %v2108_v35 = vpop.f32.mrb[40].mxu1  ;;  %v2185_v19 = vpop.f32.mrb[44].mxu0 }
 0x4d3   : > { %v2040_v20 = vadd.f32 %v2038_v17, %v2031_v63  ;;  %v3217_v37 = vpop.f32.mrb[41].mxu1  ;;  %v3225_v21 = vpop.f32.mrb[45].mxu0 }
 0x4d4   : > { %v2039_v22 = vld [vmem:[#allocation3 + $0x8] sm:$0xff]  ;;  %v2111_v23 = vpop.f32.mrb[42].mxu1  ;;  %v2188_v25 = vpop.f32.mrb[46].mxu0 }
 0x4d5   : > { %2042 = vst.msk [vmem:[#allocation3] sm:$0xff] %vm1220_vm3, %v2040_v20  ;;  %v2041_v26 = vadd.f32 %v2039_v22, %v2034_v13  ;;  %v3218_v27 = vpop.f32.mrb[43].mxu1  ;;  %v3226_v28 = vpop.f32.mrb[47].mxu0 }
 0x4d7   : > { %2043 = vst.msk [vmem:[#allocation3 + $0x8] sm:$0xff] %vm1220_vm3, %v2041_v26 }
 0x4da   : > { %v2257_v29 = vpop.f32.mrb[44].mxu1  ;;  %v2334_v31 = vpop.f32.mrb[48].mxu0 }
 0x4db   : > { %v3233_v32 = vpop.f32.mrb[45].mxu1  ;;  %v3241_v33 = vpop.f32.mrb[49].mxu0 }
 0x4dc   : > { %v2115_v34 = vld [vmem:[#allocation3] sm:$0xff]  ;;  %v2260_v36 = vpop.f32.mrb[46].mxu1  ;;  %v2337_v40 = vpop.f32.mrb[50].mxu0 }
 0x4dd   : > { %v2117_v41 = vadd.f32 %v2115_v34, %v2108_v35  ;;  %v3234_v45 = vpop.f32.mrb[47].mxu1  ;;  %v3242_v46 = vpop.f32.mrb[51].mxu0 }
 0x4de   : > { %v2116_v60 = vld [vmem:[#allocation3 + $0x8] sm:$0xff] }
 0x4df   : > { %2119 = vst.msk [vmem:[#allocation3] sm:$0xff] %vm1220_vm3, %v2117_v41  ;;  %v2118_v58 = vadd.f32 %v2116_v60, %v2111_v23 }
 0x4e1   : > { %2120 = vst.msk [vmem:[#allocation3 + $0x8] sm:$0xff] %vm1220_vm3, %v2118_v58 }
 0x4e2   : > { %v2411_v47 = vpop.f32.mrb[48].mxu1  ;;  %v2488_v48 = vpop.f32.mrb[52].mxu0 }
 0x4e3   : > { %v3249_v49 = vpop.f32.mrb[49].mxu1  ;;  %v3257_v50 = vpop.f32.mrb[53].mxu0 }
 0x4e4   : > { %v2414_v51 = vpop.f32.mrb[50].mxu1  ;;  %v2491_v52 = vpop.f32.mrb[54].mxu0 }
 0x4e5   : > { %v3250_v53 = vpop.f32.mrb[51].mxu1  ;;  %v3258_v54 = vpop.f32.mrb[55].mxu0 }
 0x4e6   : > { %v2192_v55 = vld [vmem:[#allocation3] sm:$0xff] }
 0x4e7   : > { %v2194_v56 = vadd.f32 %v2192_v55, %v2185_v19 }
 0x4e8   : > { %v2193_v57 = vld [vmem:[#allocation3 + $0x8] sm:$0xff] }
 0x4e9   : > { %2196 = vst.msk [vmem:[#allocation3] sm:$0xff] %vm1220_vm3, %v2194_v56  ;;  %v2195_v18 = vadd.f32 %v2193_v57, %v2188_v25 }
 0x4ea   : > { %v2565_v24 = vpop.f32.mrb[52].mxu1 }
 0x4eb   : > { %2197 = vst.msk [vmem:[#allocation3 + $0x8] sm:$0xff] %vm1220_vm3, %v2195_v18  ;;  %v3265_v30 = vpop.f32.mrb[53].mxu1 }
 0x4ec   : > { %v2568_v59 = vpop.f32.mrb[54].mxu1 }
 0x4ed   : > { %v3266_v61 = vpop.f32.mrb[55].mxu1 }
 0x4f0   : > { %v2264_v62 = vld [vmem:[#allocation3] sm:$0xff] }
 0x4f1   : > { %v2266_v1 = vadd.f32 %v2264_v62, %v2257_v29 }
 0x4f2   : > { %v2265_v5 = vld [vmem:[#allocation3 + $0x8] sm:$0xff] }
 0x4f3   : > { %2268 = vst.msk [vmem:[#allocation3] sm:$0xff] %vm1220_vm3, %v2266_v1  ;;  %v2267_v42 = vadd.f32 %v2265_v5, %v2260_v36 }
 0x4f5   : > { %2269 = vst.msk [vmem:[#allocation3 + $0x8] sm:$0xff] %vm1220_vm3, %v2267_v42 }
 0x4fa   : > { %v2341_v44 = vld [vmem:[#allocation3] sm:$0xff] }
 0x4fb   : > { %v2343_v38 = vadd.f32 %v2341_v44, %v2334_v31 }
 0x4fc   : > { %v2342_v39 = vld [vmem:[#allocation3 + $0x8] sm:$0xff] }
 0x4fd   : > { %2345 = vst.msk [vmem:[#allocation3] sm:$0xff] %vm1220_vm3, %v2343_v38  ;;  %v2344_v43 = vadd.f32 %v2342_v39, %v2337_v40 }
 0x4ff   : > { %2346 = vst.msk [vmem:[#allocation3 + $0x8] sm:$0xff] %vm1220_vm3, %v2344_v43 }
 0x504   : > { %v2418_v6 = vld [vmem:[#allocation3] sm:$0xff] }
 0x505   : > { %v2420_v3 = vadd.f32 %v2418_v6, %v2411_v47 }
 0x506   : > { %v2419_v2 = vld [vmem:[#allocation3 + $0x8] sm:$0xff] }
 0x507   : > { %2422 = vst.msk [vmem:[#allocation3] sm:$0xff] %vm1220_vm3, %v2420_v3  ;;  %v2421_v4 = vadd.f32 %v2419_v2, %v2414_v51 }
 0x509   : > { %2423 = vst.msk [vmem:[#allocation3 + $0x8] sm:$0xff] %vm1220_vm3, %v2421_v4 }
 0x50e   : > { %v2495_v7 = vld [vmem:[#allocation3] sm:$0xff] }
 0x50f   : > { %v2497_v9 = vadd.f32 %v2495_v7, %v2488_v48 }
 0x510   : > { %v2496_v10 = vld [vmem:[#allocation3 + $0x8] sm:$0xff] }
 0x511   : > { %2499 = vst.msk [vmem:[#allocation3] sm:$0xff] %vm1220_vm3, %v2497_v9  ;;  %v2498_v63 = vadd.f32 %v2496_v10, %v2491_v52 }
 0x513   : > { %2500 = vst.msk [vmem:[#allocation3 + $0x8] sm:$0xff] %vm1220_vm3, %v2498_v63 }
 0x518   : > { %v2572_v11 = vld [vmem:[#allocation3] sm:$0xff] }
 0x519   : > { %v2574_v0 = vadd.f32 %v2572_v11, %v2565_v24 }
 0x51a   : > { %v2573_v12 = vld [vmem:[#allocation3 + $0x8] sm:$0xff] }
 0x51b   : > { %2576 = vst.msk [vmem:[#allocation3] sm:$0xff] %vm1220_vm3, %v2574_v0  ;;  %v2575_v13 = vadd.f32 %v2573_v12, %v2568_v59 }
 0x51d   : > { %2577 = vst.msk [vmem:[#allocation3 + $0x8] sm:$0xff] %vm1220_vm3, %v2575_v13 }
 0x522   : > { %v2578_v8 = vld [vmem:[#allocation3] sm:$0xff] }
 0x523   : > { %v2580_v17 = vmax.f32 %v2578_v8, 0.0 }
 0x524   : > { %v2579_v15 = vld [vmem:[#allocation3 + $0x8] sm:$0xff] }
 0x525   : > { %v2581_v35 = vmax.f32 %v2579_v15, 0.0 }
 0x527   : > { %v2582_v19 = vpack.c.bf16 %v2581_v35, %v2580_v17 }
 0x529   : > { %3270 = vmatmul.mubr.msk.bf16.vlgmr.msra.gmra.mrb[56].mxu0 %vm1220_vm3, %v2582_v19 }
 0x5fc   : > { %v2627_v20 = vpop.f32.mrb[56].mxu0 }
 0x5fd   : > { %v2634_v37 = vadd.f32 %v2627_v20, %v4109_v14  ;;  %v3271_v21 = vpop.f32.mrb[57].mxu0 }
 0x5fe   : > { %v2630_v22 = vpop.f32.mrb[58].mxu0 }
 0x5ff   : > { %2636 = vst.msk [vmem:[#allocation2] sm:$0xff] %vm337_vm12, %v2634_v37  ;;  %v2635_v23 = vadd.f32 %v2630_v22, %v4114_v16  ;;  %v3272_v25 = vpop.f32.mrb[59].mxu0 }
 0x601   : > { %2637 = vst.msk [vmem:[#allocation2 + $0x8] sm:$0xff] %vm337_vm12, %v2635_v23 }
 0x606   : > { %v2638_v26 = vld [vmem:[#allocation2] sm:$0xff] }
 0x607   : > { %v2640_v27 = vmax.f32 %v2638_v26, 0.0 }
 0x608   : > { %v2639_v28 = vld [vmem:[#allocation2 + $0x8] sm:$0xff] }
 0x609   : > { %v2641_v14 = vmax.f32 %v2639_v28, 0.0  ;;  %2642 = vst.msk [vmem:[%s271_s17] sm:$0xff] %vm337_vm12, %v2640_v27 }
 0x60b   : > { %2643 = vst.msk [vmem:[%s271_s17 + $0x8] sm:$0xff] %vm337_vm12, %v2641_v14 }
 0x60c   : > { %3387 = shalt.err (!%p3384_p3)
}
 0x60d   : > { %s3388_s19 = scalar_lea.hbm %s4303_s22, 256  ;;  %s3392_s15 = scalar_lea.hbm %s4357_s7, 512 }
 0x60e   : > { %p3389_p4 = scmp.ne.s32.totalorder %s4303_s22, %s3388_s19  ;;  %p3393_p9 = scmp.lt.u32.totalorder %s4303_s22, %s4357_s7 }
 0x60f   : > { %p3394_p10 = scmp.lt.u32.totalorder %s3392_s15, %s3388_s19  ;;  %p3396_p12 = scmp.lt.u32.totalorder %s3388_s19, %s4303_s22 }
 0x610   : > { %p3390_p7 = pnand %p3389_p4, %p3522_p5 }
 0x611   : > { %p3395_p11 = por %p3394_p10, %p3393_p9 }
 0x612   : > { %p3391_p8 = pneg %p3390_p7 }
 0x613   : > { %p3397_p13 = por %p3396_p12, %p3395_p11 }
 0x615   : > { %p3398_p0 = pnand %p3397_p13, %p3391_p8 }
 0x617   : > { %3401 = shalt.err (!%p3398_p0)
}
 0x618   : > { %s3442_s20 = smov 128   ;;  %s3443_s21 = smov 8  }
 0x619   : > { %3273 = dma.vmem_to_hbm [thread:$0]  (%p3522_p5), %s4305_s18, 256, %s4303_s22, %s4309_s28, %s3442_s20, %s3442_s20, %s3443_s21  }
 0x61a PF: > { %p3279_p1 = scmp.ge.s32.totalorder %s3436_s27, 2  ;;  %s2673_s23 = sand.u32 1, %s3424_s24  }
 0x61b   : > { %s2674_s29 = scalar_lea.sflag [#allocation5], %s2673_s23 }
 0x61c   : > { %p3276_p2 = pnand %p3279_p1, %p3526_p6 }
 0x61e   : > { %3419 = dma.done.wait (!%p3276_p2), %s2674_s29, 256  }
 0x61f   : > { %3421 = vsyncadd (!%p3276_p2), %s2674_s29, 4294967040  ;;  %p17_p3 = scmp.ge.s32.totalorder %s3509_s30, 4   ;;  %s4388_s24 = smov %s3428_s25 }
 0x620   : > { %s4389_s25 = smov %s3432_s26  ;;  %s4390_s26 = smov %s3520_s10 }
 0x621   : > { %s4391_s27 = smov %s3509_s30  ;;  %19 = sbr.rel (!%p17_p3) target bundleno = 3 (0x3), region = 109 }
 0x628   :  { %2679 = vsyncpa [#allocation5], 1 }
 0x629   :  { %2681 = vsyncpa [#allocation5 + $0x1], 1 }

// kernel: encoder_forward.3
= control target key start
LH: loop header
LB: loop body
LE: loop exit
PB: predicated region body
PF: predicated region fallthrough
CT: control target
= control target key end

     0   :  { %s3982_s18 = smov 0   ;;  %s5547_s0 = inlined_call_operand.vmem [shape: s32[64,1], index: 0, kind: input, shape index: {}]   ;;  %s5548_s1 = inlined_call_operand.vmem [shape: s32[64,1], index: 1, kind: input, shape index: {}]   ;;  %s5549_s2 = inlined_call_operand.vmem [shape: bf16[2,4,64,3], index: 2, kind: input, shape index: {}]   ;;  %s5550_s3 = inlined_call_operand.vmem [shape: bf16[16,3,16], index: 3, kind: input, shape index: {}]   ;;  %s5551_s4 = inlined_call_operand.vmem [shape: f32[1,16], index: 4, kind: input, shape index: {}]   ;;  %s5552_s5 = inlined_call_operand.vmem [shape: bf16[2,64,16], index: 5, kind: output, shape index: {}]  }
   0x1 LB: > { %s3231_s19 = sadd.s32 4294967295, %s3948_s18   ;;  %p3235_p0 = scmp.ge.s32.totalorder %s3948_s18, 1  ;;  %s3948_s18 = sphi %s3982_s18, %s15_s18  }
   0x2   : > { %p187_p1 = scmp.lt.s32.totalorder %s3948_s18, 3 }
   0x4   : > { %p188_p2 = pnand %p3235_p0, %p187_p1 }
   0x5   : > { %v3993_v0 = vld [vmem:[%s5547_s0 + $0x10] sm:$0xff] (!%p188_p2)  ;;  %v4003_v2 = vld [vmem:[%s5547_s0] sm:$0xff] (!%p188_p2)  ;;  %v3950_v3 = vmov (!%p188_p2), 0   ;;  %v4018_v5 = vld [vmem:[%s5547_s0 + $0x18] sm:$0xff] (!%p188_p2)  ;;  %p215_p3 = scmp.lt.s32.totalorder (!%p188_p2), %s3231_s19, 1  ;;  %v5592_v34 = vmov (!%p188_p2), 0 }
   0x6   : > { %191 = sbr.rel (%p188_p2) target bundleno = 548 (0x224), region = 40  ;;  %v3998_v1 = vld [vmem:[%s5548_s1 + $0x10] sm:$0xff] (!%p188_p2)  ;;  %3909 = vset.pattern.permute.xlu1 (!%p188_p2), %v3950_v3  ;;  %3908 = vset.pattern.permute.xlu0 (!%p188_p2), %v3950_v3  ;;  %vm5567_vm0 = vcmp.ge.s32.totalorder (!%p188_p2), %v3993_v0, 1  ;;  %v4012_v4 = vld [vmem:[%s5548_s1] sm:$0xff] (!%p188_p2)  ;;  %vm5556_vm2 = vcmp.ge.s32.totalorder (!%p188_p2), %v4003_v2, 1  ;;  %v4023_v6 = vld [vmem:[%s5548_s1 + $0x18] sm:$0xff] (!%p188_p2) }
   0x7   : > { %vm5569_vm1 = vcmp.ge.s32.totalorder (!%p188_p2), %v3998_v1, 1  ;;  %vm5564_vm4 = vcmp.ge.s32.totalorder (!%p188_p2), %v4012_v4, 1  ;;  %vm5571_vm5 = vcmp.ge.s32.totalorder (!%p188_p2), %v4018_v5, 1  ;;  %vm5565_vm6 = vcmp.ge.s32.totalorder (!%p188_p2), %v4023_v6, 1  ;;  %v4035_v7 = vld [vmem:[%s5547_s0 + $0x8] sm:$0xff] (!%p188_p2)  ;;  %v4069_v13 = vld [vmem:[%s5547_s0 + $0x20] sm:$0xff] (!%p188_p2) }
   0x8   : > { %vm302_vm3 = vmand (!%p188_p2), %vm5567_vm0, %vm5569_vm1  ;;  %v4040_v8 = vld [vmem:[%s5548_s1 + $0x8] sm:$0xff] (!%p188_p2)  ;;  %vm285_vm8 = vcmp.ge.s32.totalorder (!%p188_p2), %v4035_v7, 1  ;;  %v4074_v14 = vld [vmem:[%s5548_s1 + $0x20] sm:$0xff] (!%p188_p2)  ;;  %vm5553_vm14 = vcmp.ge.s32.totalorder (!%p188_p2), %v4069_v13, 1  ;;  %v500_v24 = vsel (!%p188_p2), %vm5556_vm2, 1, %v3950_v3  ;;  %v503_v30 = vsel (!%p188_p2), %vm5571_vm5, 1, %v3950_v3 }
   0x9   : > { %v310_v9 = vsel (!%p188_p2), %vm302_vm3, 1, %v3950_v3  ;;  %vm300_vm7 = vmand (!%p188_p2), %vm5556_vm2, %vm5564_vm4  ;;  %vm5561_vm9 = vcmp.ge.s32.totalorder (!%p188_p2), %v4040_v8, 1  ;;  %v4052_v10 = vld [vmem:[%s5547_s0 + $0x28] sm:$0xff] (!%p188_p2)  ;;  %vm5555_vm15 = vcmp.ge.s32.totalorder (!%p188_p2), %v4074_v14, 1  ;;  %v4097_v17 = vld [vmem:[%s5547_s0 + $0x38] sm:$0xff] (!%p188_p2)  ;;  %v501_v23 = vsel (!%p188_p2), %vm285_vm8, 1, %v3950_v3 }
   0xa   : > { %v4057_v11 = vld [vmem:[%s5548_s1 + $0x28] sm:$0xff] (!%p188_p2)  ;;  %323 = vperm.xlu1 (!%p188_p2), %3909, %v310_v9   ;;  %v308_v12 = vsel (!%p188_p2), %vm300_vm7, 1, %v3950_v3  ;;  %vm303_vm10 = vmand (!%p188_p2), %vm5571_vm5, %vm5565_vm6  ;;  %vm5554_vm11 = vcmp.ge.s32.totalorder (!%p188_p2), %v4052_v10, 1  ;;  %v4102_v18 = vld [vmem:[%s5548_s1 + $0x38] sm:$0xff] (!%p188_p2)  ;;  %vm5568_vm2 = vcmp.lt.s32.totalorder (!%p188_p2), %v4003_v2, 7  ;;  %v502_v31 = vsel (!%p188_p2), %vm5567_vm0, 1, %v3950_v3 }
   0xb   : > { %vm5563_vm12 = vcmp.ge.s32.totalorder (!%p188_p2), %v4057_v11, 1  ;;  %317 = vperm.xlu0 (!%p188_p2), %3908, %v308_v12   ;;  %v311_v15 = vsel (!%p188_p2), %vm303_vm10, 1, %v3950_v3  ;;  %vm301_vm13 = vmand (!%p188_p2), %vm285_vm8, %vm5561_vm9  ;;  %v4108_v20 = vld [vmem:[%s5547_s0 + $0x30] sm:$0xff] (!%p188_p2)  ;;  %vm5557_vm10 = vcmp.ge.s32.totalorder (!%p188_p2), %v4097_v17, 1  ;;  %vm5591_vm0 = vcmp.ge.s32.totalorder (!%p188_p2), %v4057_v11, 1 }
   0xc   : > { %v309_v16 = vsel (!%p188_p2), %vm301_vm13, 1, %v3950_v3  ;;  %vm305_vm3 = vmand (!%p188_p2), %vm5554_vm11, %vm5563_vm12  ;;  %v4113_v21 = vld [vmem:[%s5548_s1 + $0x30] sm:$0xff] (!%p188_p2)  ;;  %vm5558_vm13 = vcmp.ge.s32.totalorder (!%p188_p2), %v4102_v18, 1  ;;  %vm5575_vm12 = vcmp.lt.s32.totalorder (!%p188_p2), %v4069_v13, 7  ;;  %v384_v35 = vld [vmem:[%s5550_s3] sm:$0x3] (!%p188_p2) }
   0xd   : > { %vm304_vm7 = vmand %vm5553_vm14, %vm5555_vm15  ;;  %v313_v19 = vsel %vm305_vm3, 1, %v3950_v3  ;;  %s5763_s19 = smov (!%p215_p3, %s3231_s19), 1  ;;  %vm5559_vm3 = vcmp.ge.s32.totalorder %v4108_v20, 1  ;;  %vm5560_vm14 = vcmp.ge.s32.totalorder %v4113_v21, 1  ;;  %vm5562_vm15 = vcmp.lt.s32.totalorder %v4035_v7, 7 }
   0xe   : > { %326 = vperm.xlu1 %3909, %v311_v15   ;;  %v312_v22 = vsel %vm304_vm7, 1, %v3950_v3  ;;  %s3490_s29 = sshll.u32 %s5763_s19, 7  ;;  %vm307_vm7 = vmand %vm5557_vm10, %vm5558_vm13  ;;  %vm5566_vm10 = vcmp.lt.s32.totalorder %v4018_v5, 7  ;;  %vm399_vm5 = vcmask 1041408   ;;  %v5598_v37 = vmov 0  ;;  %s3491_s21 = sshll.u32 %s5763_s19, 5 }
   0xf   : > { %320 = vperm.xlu0 %3908, %v309_v16   ;;  %s4138_s7 = scalar_lea.vmem %s5549_s2, %s3490_s29  ;;  %vm306_vm11 = vmand %vm5559_vm3, %vm5560_vm14  ;;  %v315_v25 = vsel %vm307_vm7, 1, %v3950_v3  ;;  %vm5570_vm3 = vcmp.lt.s32.totalorder %v3993_v0, 7  ;;  %vm5572_vm14 = vcmp.lt.s32.totalorder %v4040_v8, 7  ;;  %v3951_v38 = vmov 65535   ;;  %v3272_v45 = vld [vmem:[%s5550_s3 + $0x2] sm:$0x3]  ;;  %s5525_s23 = scalar_lea.vmem %s5552_s5, %s3491_s21 }
  0x10   : > { %v314_v26 = vsel %vm306_vm11, 1, %v3950_v3  ;;  %vm4153_vm13 = vmand %vm5562_vm15, %vm5561_vm9  ;;  %vm5573_vm11 = vcmp.lt.s32.totalorder %v4052_v10, 7  ;;  %vm5574_vm9 = vcmp.lt.s32.totalorder %v4012_v4, 7  ;;  %v5602_v40 = vmov 0  ;;  %v3289_v54 = vld [vmem:[%s5550_s3 + $0x4] sm:$0x3] }
  0x11   : > { %vm4163_vm7 = vmand %vm5568_vm2, %vm5564_vm4  ;;  %v5607_v43 = vmov 0  ;;  %v5620_v49 = vmov 0  ;;  %v5624_v50 = vmov 0  ;;  %v5628_v53 = vmov 0  ;;  %v3628_v15 = vld [vmem:[%s4138_s7 + $0x60] sm:$0xff]  }
  0x12   : > { %332 = vperm.xlu1 %3909, %v313_v19   ;;  %vm4173_vm15 = vmand %vm5566_vm10, %vm5565_vm6  ;;  %vm5600_vm6 = vcmp.ge.s32.totalorder %v4102_v18, 1  ;;  %v5635_v57 = vmov 0  ;;  %v5638_v58 = vmov 0  ;;  %v5641_v61 = vmov 0  ;;  %v3306_v16 = vld [vmem:[%s5550_s3 + $0x6] sm:$0x3] }
  0x13   : > { %329 = vperm.xlu0 %3908, %v312_v22   ;;  %vm4188_vm4 = vmand %vm5570_vm3, %vm5569_vm1  ;;  %vm398_vm3 = vcmask 1040384   ;;  %v3631_v22 = vld [vmem:[%s4138_s7 + $0x78] sm:$0xff]   ;;  %v3503_v36 = vunpack.c.h.bf16 %v3628_v15  ;;  %v2367_v27 = vsel %vm4173_vm15, 1, %v3950_v3 }
  0x14   : > { %vm4197_vm10 = vmand %vm285_vm8, %vm5572_vm14  ;;  %vm5594_vm8 = vcmp.ge.s32.totalorder %v4003_v2, 1  ;;  %v400_v39 = vsel %vm398_vm3, 4294967295, %v3951_v38  ;;  %vm5606_vm3 = vcmp.lt.s32.totalorder %v4108_v20, 7  ;;  %v3515_v38 = vunpack.c.h.bf16 %v3631_v22 }
  0x15   : > { %vm4205_vm2 = vmand %vm5573_vm11, %vm5591_vm0  ;;  %vm5597_vm11 = vcmp.ge.s32.totalorder %v4074_v14, 1  ;;  %v4238_v41 = vsel %vm399_vm5, %v400_v39, 0  ;;  %vm5609_vm5 = vcmp.ge.s32.totalorder %v4069_v13, 1  ;;  %v866_v60 = vsel %vm4197_vm10, 1, %v3950_v3 }
  0x16   : > { %512 = vperm.xlu1 %3909, %v501_v23   ;;  %v5593_v34 = vsel %vm4205_vm2, 4294967295, %v5592_v34  ;;  %vm4217_vm14 = vmand %vm5594_vm8, %vm5574_vm9  ;;  %vm5601_vm8 = vcmp.lt.s32.totalorder %v4097_v17, 7  ;;  %v403_v44 = vand.u32 %v4238_v41, %v384_v35  ;;  %v504_v46 = vsel %vm5609_vm5, 1, %v3950_v3  ;;  %v3629_v35 = vld [vmem:[%s4138_s7 + $0x68] sm:$0xff]  }
  0x17   : > { %509 = vperm.xlu0 %3908, %v500_v24   ;;  %vm4226_vm1 = vmand %vm5575_vm12, %vm5597_vm11  ;;  %vm5604_vm11 = vcmp.ge.s32.totalorder %v4052_v10, 1  ;;  %vm5605_vm12 = vcmp.ge.s32.totalorder %v4113_v21, 1  ;;  %vm5619_vm5 = vcmp.lt.s32.totalorder %v4003_v2, 7  ;;  %vm5623_vm2 = vcmp.lt.s32.totalorder %v4018_v5, 7 }
  0x18   : > { %v5599_v37 = vsel %vm4226_vm1, 4294967295, %v5598_v37  ;;  %vm4234_vm9 = vmand %vm5601_vm8, %vm5600_vm6  ;;  %v505_v42 = vsel %vm5604_vm11, 1, %v3950_v3  ;;  %vm5610_vm6 = vcmp.lt.s32.totalorder %v4023_v6, 7  ;;  %vm5611_vm8 = vcmp.ge.s32.totalorder %v4018_v5, 1  ;;  %3738 = vmatprep.subr.bf16.mxu0 %v403_v44 }
  0x19   : > { %v5603_v40 = vsel %vm4234_vm9, 4294967295, %v5602_v40  ;;  %vm4247_vm0 = vmand %vm5606_vm3, %vm5605_vm12  ;;  %vm5614_vm12 = vcmp.lt.s32.totalorder %v4040_v8, 7  ;;  %vm5615_vm3 = vcmp.lt.s32.totalorder %v4035_v7, 7  ;;  %vm5618_vm9 = vcmp.lt.s32.totalorder %v4012_v4, 7  ;;  %3739 = vmatpush3.bf16.msra.mxu0 %v403_v44 }
  0x1a   : > { %338 = vperm.xlu1 %3909, %v315_v25   ;;  %v5608_v43 = vsel %vm4247_vm0, 4294967295, %v5607_v43  ;;  %vm4262_vm11 = vmand %vm5611_vm8, %vm5610_vm6  ;;  %vm5576_vm6 = vcmp.lt.s32.totalorder %v3998_v1, 7  ;;  %vm5622_vm8 = vcmp.lt.s32.totalorder %v4023_v6, 7  ;;  %v591_v51 = vand.u32 %v3272_v45, %v4238_v41 }
  0x1b   : > { %335 = vperm.xlu0 %3908, %v314_v26   ;;  %vm4270_vm0 = vmand %vm5615_vm3, %vm5614_vm12  ;;  %vm5577_vm3 = vcmp.lt.s32.totalorder %v4057_v11, 7  ;;  %v4338_v59 = vand.u32 %v3289_v54, %v4238_v41  ;;  %v865_v62 = vsel %vm4217_vm14, 1, %v3950_v3  ;;  %vm5645_vm10 = vcmp.lt.s32.totalorder %v4057_v11, 7 }
  0x1c   : > { %vm4278_vm1 = vmand %vm5619_vm5, %vm5618_vm9  ;;  %vm5626_vm9 = vcmp.ge.s32.totalorder %v4097_v17, 1  ;;  %vm5627_vm5 = vcmp.lt.s32.totalorder %v3993_v0, 7  ;;  %3748 = vmatprep.subr.bf16.mxu1 %v591_v51  ;;  %v868_v63 = vsel %vm4262_vm11, 1, %v3950_v3  ;;  %vm5647_vm14 = vcmp.lt.s32.totalorder %v4074_v14, 7 }
  0x1d   : > { %v5621_v49 = vsel %vm4278_vm1, 4294967295, %v5620_v49  ;;  %vm4287_vm12 = vmand %vm5623_vm2, %vm5622_vm8  ;;  %v507_v52 = vsel %vm5626_vm9, 1, %v3950_v3  ;;  %vm5630_vm2 = vcmp.ge.s32.totalorder %v4108_v20, 1  ;;  %vm5578_vm8 = vcmp.lt.s32.totalorder %v4074_v14, 7  ;;  %3749 = vmatpush3.bf16.msra.mxu1 %v591_v51  ;;  %3758 = vmatprep.subr.bf16.mxu0 %v4338_v59  ;;  %v3630_v51 = vld [vmem:[%s4138_s7 + $0x70] sm:$0xff]  }
  0x1e   : > { %518 = vperm.xlu1 %3909, %v503_v30   ;;  %v5625_v50 = vsel %vm4287_vm12, 4294967295, %v5624_v50  ;;  %vm4300_vm1 = vmand %vm5627_vm5, %vm5576_vm6  ;;  %v506_v55 = vsel %vm5630_vm2, 1, %v3950_v3  ;;  %vm5631_vm9 = vcmp.lt.s32.totalorder %v4052_v10, 7  ;;  %vm5579_vm5 = vcmp.lt.s32.totalorder %v4102_v18, 7 }
  0x1f   : > { %515 = vperm.xlu0 %3908, %v502_v31   ;;  %v5629_v53 = vsel %vm4300_vm1, 4294967295, %v5628_v53  ;;  %vm4315_vm12 = vmand %vm5631_vm9, %vm5577_vm3  ;;  %vm5634_vm6 = vcmp.lt.s32.totalorder %v4069_v13, 7  ;;  %vm5580_vm2 = vcmp.lt.s32.totalorder %v4113_v21, 7  ;;  %vm5637_vm9 = vcmp.lt.s32.totalorder %v4097_v17, 7 }
  0x20   : > { %vm4324_vm1 = vmand %vm5634_vm6, %vm5578_vm8  ;;  %vm5640_vm6 = vcmp.lt.s32.totalorder %v4108_v20, 7  ;;  %v269_v23 = vlaneseq  ;;  %v4383_v24 = vand.u32 %v3306_v16, %v4238_v41  ;;  %vm5651_vm11 = vcmp.lt.s32.totalorder %v4113_v21, 7 }
  0x21   : > { %v5636_v57 = vsel %vm4324_vm1, 4294967295, %v5635_v57  ;;  %vm4333_vm3 = vmand %vm5637_vm9, %vm5579_vm5  ;;  %vm5643_vm9 = vcmp.lt.s32.totalorder %v3998_v1, 7  ;;  %vm5644_vm5 = vcmp.ge.s32.totalorder %v3993_v0, 1  ;;  %vm5646_vm1 = vcmp.ge.s32.totalorder %v4052_v10, 1 }
  0x22   : > { %524 = vperm.xlu1 %3909, %v505_v42   ;;  %v5639_v58 = vsel %vm4333_vm3, 4294967295, %v5638_v58  ;;  %vm4347_vm8 = vmand %vm5640_vm6, %vm5580_vm2  ;;  %vm5648_vm2 = vcmp.ge.s32.totalorder %v4069_v13, 1  ;;  %3768 = vmatprep.subr.bf16.mxu1 %v4383_v24  ;;  %v3502_v31 = vunpack.c.l.bf16 %v3628_v15  ;;  %v4395_v33 = vshrl.u32 %v269_v23, 7 }
  0x23   : > { %521 = vperm.xlu0 %3908, %v504_v46   ;;  %v5642_v61 = vsel %vm4347_vm8, 4294967295, %v5641_v61  ;;  %vm859_vm3 = vmand %vm5644_vm5, %vm5643_vm9  ;;  %vm5649_vm9 = vcmp.lt.s32.totalorder %v4102_v18, 7  ;;  %vm5650_vm8 = vcmp.ge.s32.totalorder %v4097_v17, 1  ;;  %v268_v45 = vrot.slane %v3515_v38, 7 }
  0x24   : > { %vm862_vm6 = vmand %vm5646_vm1, %vm5645_vm10  ;;  %v867_v9 = vsel %vm859_vm3, 1, %v3950_v3  ;;  %vm5652_vm3 = vcmp.ge.s32.totalorder %v4108_v20, 1  ;;  %vm5654_vm10 = vcmp.ge.s32.totalorder %v4012_v4, 1  ;;  %v261_v44 = vrot.slane %v3502_v31, 7 }
  0x25   : > { %vm861_vm5 = vmand %vm5648_vm2, %vm5647_vm14  ;;  %v870_v12 = vsel %vm862_vm6, 1, %v3950_v3  ;;  %vm5653_vm2 = vcmp.ge.s32.totalorder %v4040_v8, 1  ;;  %v1084_v39 = vsel %vm5654_vm10, 1, %v3950_v3  ;;  %vm5655_vm6 = vcmp.ge.s32.totalorder %v4023_v6, 1 }
  0x26   : > { %530 = vperm.xlu1 %3909, %v507_v52   ;;  %vm864_vm1 = vmand %vm5650_vm8, %vm5649_vm9  ;;  %v869_v19 = vsel %vm861_vm5, 1, %v3950_v3  ;;  %v1085_v26 = vsel %vm5653_vm2, 1, %v3950_v3  ;;  %v1087_v42 = vsel %vm5655_vm6, 1, %v3950_v3  ;;  %vm271_vm14 = vcmp.lt.s32.totalorder %v4395_v33, 1 }
  0x27   : > { %527 = vperm.xlu0 %3908, %v506_v55   ;;  %v872_v25 = vsel %vm864_vm1, 1, %v3950_v3  ;;  %vm863_vm8 = vmand %vm5652_vm3, %vm5651_vm11  ;;  %v3506_v46 = vunpack.c.l.bf16 %v3629_v35  ;;  %v262_v47 = vrot.slane %v3503_v36, 7  ;;  %v3507_v52 = vunpack.c.h.bf16 %v3629_v35 }
  0x28   : > { %v871_v30 = vsel %vm863_vm8, 1, %v3950_v3  ;;  %vm5656_vm5 = vcmp.ge.s32.totalorder %v3998_v1, 1  ;;  %vm5657_vm9 = vcmp.ge.s32.totalorder %v4057_v11, 1  ;;  %vm5658_vm1 = vcmp.ge.s32.totalorder %v4074_v14, 1 }
  0x29   : > { %v1086_v54 = vsel %vm5656_vm5, 1, %v3950_v3  ;;  %v263_v55 = vrot.slane %v3506_v46, 7  ;;  %v1089_v15 = vsel %vm5657_vm9, 1, %v3950_v3  ;;  %vm5659_vm11 = vcmp.ge.s32.totalorder %v4102_v18, 1 }
  0x2a   : > { %877 = vperm.xlu1 %3909, %v866_v60   ;;  %v3510_v60 = vunpack.c.l.bf16 %v3630_v51  ;;  %v1091_v31 = vsel %vm5659_vm11, 1, %v3950_v3  ;;  %vm5660_vm3 = vcmp.ge.s32.totalorder %v4113_v21, 1  ;;  %vm5661_vm8 = vcmp.lt.s32.totalorder %v4040_v8, 7 }
  0x2b   : > { %874 = vperm.xlu0 %3908, %v865_v62   ;;  %v4411_v62 = vsel %vm271_vm14, %v268_v45, %v261_v44  ;;  %v4427_v23 = vsel %vm271_vm14, %v262_v47, %v263_v55  ;;  %v1090_v36 = vsel %vm5660_vm3, 1, %v3950_v3  ;;  %vm5662_vm2 = vcmp.lt.s32.totalorder %v4012_v4, 7 }
  0x2c   : > { %vm5663_vm10 = vcmp.lt.s32.totalorder %v4023_v6, 7  ;;  %vm5664_vm6 = vcmp.lt.s32.totalorder %v3998_v1, 7  ;;  %vm5665_vm5 = vcmp.lt.s32.totalorder %v4057_v11, 7  ;;  %vm5666_vm9 = vcmp.lt.s32.totalorder %v4074_v14, 7 }
  0x2d   : > { %v1572_v4 = vsel %vm5664_vm6, 1, %v3950_v3  ;;  %v1575_v6 = vsel %vm5665_vm5, 1, %v3950_v3  ;;  %vm5668_vm11 = vcmp.lt.s32.totalorder %v4113_v21, 7  ;;  %vm836_vm3 = vcmp.lt.s32.totalorder %v4395_v33, 7 }
  0x2e   : > { %883 = vperm.xlu1 %3909, %v868_v63   ;;  %v4415_v63 = vsel %vm271_vm14, %v261_v44, %v262_v47  ;;  %v1571_v44 = vsel %vm5661_vm8, 1, %v3950_v3  ;;  %v1570_v47 = vsel %vm5662_vm2, 1, %v3950_v3  ;;  %v1576_v11 = vsel %vm5668_vm11, 1, %v3950_v3 }
  0x2f   : > { %880 = vperm.xlu0 %3908, %v867_v9   ;;  %v264_v9 = vrot.slane %v3507_v52, 7  ;;  %v1784_v16 = vpack.c.bf16 %v4415_v63, %v4411_v62  ;;  %vm5672_vm15 = vnez %v5608_v43  ;;  %vm5673_vm8 = vcmp.lt.s32.totalorder %v4035_v7, 7 }
  0x30   : > { %vm5674_vm2 = vcmp.lt.s32.totalorder %v4003_v2, 7  ;;  %vm5676_vm6 = vcmp.lt.s32.totalorder %v3993_v0, 7  ;;  %vm5677_vm5 = vcmp.lt.s32.totalorder %v4052_v10, 7  ;;  %vm5680_vm11 = vcmp.lt.s32.totalorder %v4108_v20, 7 }
  0x31   : > { %v2572_v0 = vsel %vm5680_vm11, 1, %v3950_v3  ;;  %v2923_v10 = vsel %vm4270_vm0, 1, %v3950_v3  ;;  %v2927_v48 = vsel %vm4315_vm12, 1, %v3950_v3  ;;  %vm5684_vm0 = vnez %v5636_v57 }
  0x32   : > { %889 = vperm.xlu1 %3909, %v870_v12   ;;  %v3511_v12 = vunpack.c.h.bf16 %v3630_v51  ;;  %vm5686_vm12 = vnez %v5642_v61 }
  0x33   : > { %886 = vperm.xlu0 %3908, %v869_v19   ;;  %v1088_v19 = vsel %vm5658_vm1, 1, %v3950_v3  ;;  %vm5667_vm1 = vcmp.lt.s32.totalorder %v4102_v18, 7  ;;  %v2364_v18 = vsel %vm4163_vm7, 1, %v3950_v3  ;;  %vm5670_vm7 = vnez %v5599_v37 }
  0x34   : > { %v2368_v29 = vsel %vm5670_vm7, 1, %v3950_v3  ;;  %vm5682_vm7 = vnez %v5625_v50  ;;  %v2928_v56 = vsel %vm5686_vm12, 1, %v3950_v3 }
  0x36   : > { %895 = vperm.xlu1 %3909, %v872_v25   ;;  %v265_v25 = vrot.slane %v3510_v60, 7  ;;  %v1574_v60 = vsel %vm5666_vm9, 1, %v3950_v3  ;;  %vm5678_vm9 = vcmp.lt.s32.totalorder %v4069_v13, 7 }
  0x37   : > { %892 = vperm.xlu0 %3908, %v871_v30   ;;  %v266_v30 = vrot.slane %v3511_v12, 7 }
  0x38   : > { %v4443_v38 = vsel %vm271_vm14, %v264_v9, %v265_v25 }
  0x3a   : > { %1096 = vperm.xlu1 %3909, %v1085_v26   ;;  %v4431_v26 = vsel %vm271_vm14, %v263_v55, %v264_v9  ;;  %v4477_v55 = vld [vmem:[%s4138_s7 + $0x40] sm:$0xff]  }
  0x3b   : > { %1093 = vperm.xlu0 %3908, %v1084_v39   ;;  %v1785_v35 = vpack.c.bf16 %v4431_v26, %v4427_v23  ;;  %v4447_v39 = vsel %vm271_vm14, %v265_v25, %v266_v30  ;;  %v3518_v1 = vunpack.c.l.bf16 %v4477_v55 }
  0x3c   : > { %v1786_v46 = vpack.c.bf16 %v4447_v39, %v4443_v38 }
  0x3e   : > { %1102 = vperm.xlu1 %3909, %v1087_v42   ;;  %v3578_v42 = vunpack.c.l.bf16 %v3631_v22  ;;  %v1573_v22 = vsel %vm5663_vm10, 1, %v3950_v3  ;;  %vm5675_vm10 = vcmp.lt.s32.totalorder %v4018_v5, 7 }
  0x3f   : > { %1099 = vperm.xlu0 %3908, %v1086_v54   ;;  %v2569_v7 = vsel %vm5675_vm10, 1, %v3950_v3 }
  0x40   : > { %v1774_v51 = vrot.slane %v3578_v42, 7 }
  0x42   : > { %1108 = vperm.xlu1 %3909, %v1089_v15   ;;  %v4462_v52 = vsel %vm271_vm14, %v1774_v51, %v268_v45  ;;  %v4466_v8 = vsel %vm271_vm14, %v266_v30, %v1774_v51  ;;  %v3635_v45 = vld [vmem:[%s4138_s7 + $0x58] sm:$0xff]   ;;  %v1577_v15 = vsel %vm5667_vm1, 1, %v3950_v3  ;;  %v2365_v30 = vsel %vm4153_vm13, 1, %v3950_v3 }
  0x43   : > { %1105 = vperm.xlu0 %3908, %v1088_v19   ;;  %v1787_v54 = vpack.c.bf16 %v4462_v52, %v4466_v8  ;;  %v3531_v9 = vunpack.c.h.bf16 %v3635_v45  ;;  %v3530_v12 = vunpack.c.l.bf16 %v3635_v45  ;;  %v4490_v19 = vrot.slane %v3518_v1, 1 }
  0x44   : > { %vm5669_vm13 = vnez %v5593_v34  ;;  %v2370_v34 = vsel %vm5672_vm15, 1, %v3950_v3  ;;  %vm5679_vm1 = vcmp.lt.s32.totalorder %v4097_v17, 7  ;;  %v2925_v17 = vsel %vm5682_vm7, 1, %v3950_v3 }
  0x45   : > { %v835_v25 = vrot.slane %v3531_v9, 1  ;;  %v4492_v14 = vrot.slane %v3530_v12, 1  ;;  %v2369_v42 = vsel %vm5669_vm13, 1, %v3950_v3  ;;  %v2568_v9 = vsel %vm5676_vm6, 1, %v3950_v3 }
  0x46   : > { %1114 = vperm.xlu1 %3909, %v1091_v31   ;;  %v2571_v12 = vsel %vm5677_vm5, 1, %v3950_v3  ;;  %v2573_v5 = vsel %vm5679_vm1, 1, %v3950_v3  ;;  %vm5681_vm13 = vnez %v5621_v49  ;;  %v2926_v49 = vsel %vm5684_vm0, 1, %v3950_v3 }
  0x47   : > { %1111 = vperm.xlu0 %3908, %v1090_v36   ;;  %v4504_v21 = vsel %vm836_vm3, %v835_v25, %v4490_v19  ;;  %v4509_v31 = vsel %vm836_vm3, %v4492_v14, %v835_v25  ;;  %v2366_v36 = vsel %vm4188_vm4, 1, %v3950_v3  ;;  %vm5671_vm4 = vnez %v5603_v40  ;;  %v4596_v25 = vld [vmem:[%s4138_s7 + $0x18] sm:$0xff]  }
  0x48   : > { %v2201_v28 = vpack.c.bf16 %v4504_v21, %v4509_v31  ;;  %v2371_v32 = vsel %vm5671_vm4, 1, %v3950_v3  ;;  %v2566_v40 = vsel %vm5674_vm2, 1, %v3950_v3  ;;  %v2922_v13 = vsel %vm5681_vm13, 1, %v3950_v3 }
  0x49   : > { %vm5683_vm4 = vnez %v5629_v53  ;;  %vm5685_vm15 = vnez %v5639_v58 }
  0x4a   : > { %1582 = vperm.xlu1 %3909, %v1571_v44   ;;  %v4523_v44 = vld [vmem:[%s4138_s7 + $0x20] sm:$0xff]   ;;  %v2924_v20 = vsel %vm5683_vm4, 1, %v3950_v3  ;;  %v2929_v53 = vsel %vm5685_vm15, 1, %v3950_v3  ;;  %vm385_vm15 = vcmask 23552  }
  0x4b   : > { %1579 = vperm.xlu0 %3908, %v1570_v47   ;;  %v3639_v47 = vld [vmem:[%s4138_s7 + $0x38] sm:$0xff]   ;;  %v3534_v51 = vunpack.c.l.bf16 %v4523_v44 }
  0x4e   : > { %1588 = vperm.xlu1 %3909, %v1573_v22   ;;  %v3547_v22 = vunpack.c.h.bf16 %v3639_v47 }
  0x4f   : > { %1585 = vperm.xlu0 %3908, %v1572_v4   ;;  %v3546_v4 = vunpack.c.l.bf16 %v3639_v47 }
  0x50   : > { %v1071_v45 = vrot.slane %v3547_v22, 7 }
  0x51   : > { %v4538_v37 = vrot.slane %v3546_v4, 7 }
  0x52   : > { %1594 = vperm.xlu1 %3909, %v1575_v6   ;;  %v4536_v6 = vrot.slane %v3534_v51, 7 }
  0x53   : > { %1591 = vperm.xlu0 %3908, %v1574_v60   ;;  %v2567_v60 = vsel %vm5673_vm8, 1, %v3950_v3  ;;  %v4554_v1 = vsel %vm271_vm14, %v4538_v37, %v1071_v45 }
  0x54   : > { %v4549_v43 = vsel %vm271_vm14, %v1071_v45, %v4536_v6 }
  0x55   : > { %v2347_v2 = vpack.c.bf16 %v4549_v43, %v4554_v1 }
  0x56   : > { %1600 = vperm.xlu1 %3909, %v1577_v15   ;;  %v2570_v15 = vsel %vm5678_vm9, 1, %v3950_v3 }
  0x57   : > { %1597 = vperm.xlu0 %3908, %v1576_v11   ;;  %v3549_v11 = vld [vmem:[%s4138_s7] sm:$0xff]  }
  0x58   : > { %v3550_v50 = vunpack.c.l.bf16 %v3549_v11 }
  0x5a   : > { %2376 = vperm.xlu1 %3909, %v2365_v30   ;;  %v3551_v30 = vunpack.c.h.bf16 %v3549_v11 }
  0x5b   : > { %2373 = vperm.xlu0 %3908, %v2364_v18   ;;  %v3563_v18 = vunpack.c.h.bf16 %v4596_v25 }
  0x5c   : > { %v4605_v57 = vrot.slane %v3551_v30, 1 }
  0x5e   : > { %2382 = vperm.xlu1 %3909, %v2367_v27   ;;  %v1550_v27 = vrot.slane %v3550_v50, 1 }
  0x5f   : > { %2379 = vperm.xlu0 %3908, %v2366_v36   ;;  %v4607_v36 = vrot.slane %v3563_v18, 1 }
  0x61   : > { %v4617_v58 = vsel %vm836_vm3, %v4607_v36, %v1550_v27 }
  0x62   : > { %2388 = vperm.xlu1 %3909, %v2369_v42  }
  0x63   : > { %2385 = vperm.xlu0 %3908, %v2368_v29   ;;  %v4612_v29 = vsel %vm836_vm3, %v1550_v27, %v4605_v57  ;;  %v3911_v27 = vld [vmem:[%s4138_s7 + $0x5c] ss:$-28 sps:$4 sm:$0xff]  }
  0x66   : > { %2394 = vperm.xlu1 %3909, %v2371_v32  }
  0x67   : > { %2391 = vperm.xlu0 %3908, %v2370_v34   ;;  %v281_v34 = vpack.c.bf16 %v4427_v23, %v4415_v63 }
  0x6a   : > { %2578 = vperm.xlu1 %3909, %v2567_v60  }
  0x6b   : > { %2575 = vperm.xlu0 %3908, %v2566_v40  }
  0x6e   : > { %2584 = vperm.xlu1 %3909, %v2569_v7  }
  0x6f   : > { %2581 = vperm.xlu0 %3908, %v2568_v9   ;;  %v280_v9 = vpack.c.bf16 %v4411_v62, %v4462_v52  ;;  %v3928_v62 = vld [vmem:[%s4138_s7 + $0x50] sm:$0xff]  }
  0x72   : > { %2590 = vperm.xlu1 %3909, %v2571_v12  }
  0x73   : > { %2587 = vperm.xlu0 %3908, %v2570_v15  }
  0x76   : > { %2596 = vperm.xlu1 %3909, %v2573_v5   ;;  %v3323_v5 = vld [vmem:[%s5550_s3 + $0x8] sm:$0x3] }
  0x77   : > { %2593 = vperm.xlu0 %3908, %v2572_v0   ;;  %v4637_v11 = vand.u32 %v3323_v5, %v4238_v41 }
  0x7a   : > { %2934 = vperm.xlu1 %3909, %v2923_v10  }
  0x7b   : > { %2931 = vperm.xlu0 %3908, %v2922_v13  }
  0x7e   : > { %2940 = vperm.xlu1 %3909, %v2925_v17  }
  0x7f   : > { %2937 = vperm.xlu0 %3908, %v2924_v20  }
  0x82   : > { %2946 = vperm.xlu1 %3909, %v2927_v48   ;;  %v282_v48 = vpack.c.bf16 %v4443_v38, %v4431_v26  ;;  %v3932_v38 = vld [vmem:[%s4138_s7 + $0x60] sm:$0xff]  }
  0x83   : > { %2943 = vperm.xlu0 %3908, %v2926_v49  }
  0x86   : > { %2952 = vperm.xlu1 %3909, %v2929_v53  }
  0x87   : > { %2949 = vperm.xlu0 %3908, %v2928_v56  }
  0x89   : > { %v324_v42 = vpop.permute.xlu1 %323 }
  0x8a   : > { %vm342_vm8 = vcmp.eq.s32.totalorder %v324_v42, 1  ;;  %v318_v47 = vpop.permute.xlu0 %317 }
  0x8b   : > { %vm340_vm2 = vcmp.eq.s32.totalorder %v318_v47, 1  ;;  %vm350_vm10 = vmpackc.low %vm342_vm8, %vm342_vm8 }
  0x8c   : > { %vm348_vm6 = vmpackc.low %vm340_vm2, %vm340_vm2  ;;  %v358_v4 = vsel %vm350_vm10, 65537, %v3950_v3 }
  0x8d   : > { %v327_v51 = vpop.permute.xlu1 %326  ;;  %v356_v45 = vsel %vm348_vm6, 65537, %v3950_v3 }
  0x8e   : > { %vm343_vm5 = vcmp.eq.s32.totalorder %v327_v51, 1  ;;  %v321_v22 = vpop.permute.xlu0 %320 }
  0x8f   : > { %vm351_vm9 = vmpackc.low %vm343_vm5, %vm343_vm5  ;;  %vm341_vm1 = vcmp.eq.s32.totalorder %v321_v22, 1 }
  0x90   : > { %v359_v32 = vsel %vm351_vm9, 65537, %v3950_v3  ;;  %vm349_vm11 = vmpackc.low %vm341_vm1, %vm341_vm1 }
  0x91   : > { %v3249_v60 = vcombine.low %v358_v4, %v359_v32  ;;  %v357_v40 = vsel %vm349_vm11, 65537, %v3950_v3  ;;  %v333_v7 = vpop.permute.xlu1 %332 }
  0x92   : > { %vm345_vm13 = vcmp.eq.s32.totalorder %v333_v7, 1  ;;  %v330_v12 = vpop.permute.xlu0 %329  ;;  %v3248_v15 = vcombine.low %v356_v45, %v357_v40  ;;  %v3912_v40 = vld [vmem:[%s4138_s7 + $0x7c] ss:$-28 sps:$4 sm:$0xff]  }
  0x93   : > { %vm377_vm7 = vcmp.ne.s16.totalorder %v3249_v60, 0  ;;  %vm353_vm4 = vmpackc.low %vm345_vm13, %vm345_vm13  ;;  %vm344_vm0 = vcmp.eq.s32.totalorder %v330_v12, 1 }
  0x94   : > { %v361_v0 = vsel %vm353_vm4, 65537, %v3950_v3  ;;  %vm352_vm12 = vmpackc.low %vm344_vm0, %vm344_vm0  ;;  %vm376_vm8 = vcmp.ne.s16.totalorder %v3248_v15, 0  ;;  %v381_v10 = vsel %vm377_vm7, %v281_v34, 0  ;;  %v283_v34 = vpack.c.bf16 %v4466_v8, %v4447_v39 }
  0x95   : > { %v360_v13 = vsel %vm352_vm12, 65537, %v3950_v3  ;;  %v513_v17 = vpop.permute.xlu1 %512  ;;  %v380_v20 = vsel %vm376_vm8, %v280_v9, 0  ;;  %v3633_v9 = vld [vmem:[%s4138_s7 + $0x48] sm:$0xff]  }
  0x96   : > { %v3250_v49 = vcombine.low %v360_v13, %v361_v0  ;;  %vm533_vm2 = vcmp.eq.s32.totalorder %v513_v17, 1  ;;  %v510_v50 = vpop.permute.xlu0 %509  ;;  %3740 = vmatprep.mubr.msk.bf16.mxu0 %vm385_vm15, %v380_v20  ;;  %v3913_v0 = vld [vmem:[%s4138_s7 + $0x44] sm:$0xff]  }
  0x97   : > { %vm541_vm10 = vmpackc.low %vm533_vm2, %vm533_vm2  ;;  %vm532_vm6 = vcmp.eq.s32.totalorder %v510_v50, 1  ;;  %3741 = vmatmul.mubr.msk.bf16.vlgmr.msra.gmra.mrb[0].mxu0 %vm385_vm15, %v381_v10  ;;  %v3328_v10 = vld [vmem:[%s5550_s3 + $0xa] sm:$0x3]  ;;  %v3523_v50 = vunpack.c.h.bf16 %v3633_v9 }
  0x98   : > { %vm378_vm5 = vcmp.ne.s16.totalorder %v3250_v49, 0  ;;  %v549_v30 = vsel %vm541_vm10, 65537, %v3950_v3  ;;  %vm540_vm9 = vmpackc.low %vm532_vm6, %vm532_vm6  ;;  %3759 = vmatpush3.bf16.msra.mxu0 %v4338_v59  ;;  %v3522_v49 = vunpack.c.l.bf16 %v3633_v9  ;;  %v3915_v59 = vld [vmem:[%s4138_s7 + $0x6c] sm:$0xff]  }
  0x99   : > { %v548_v18 = vsel %vm540_vm9, 65537, %v3950_v3  ;;  %v339_v53 = vpop.permute.xlu1 %338  ;;  %v382_v56 = vsel %vm378_vm5, %v282_v48, 0  ;;  %3778 = vmatprep.subr.bf16.mxu0 %v4637_v11  ;;  %v3519_v48 = vunpack.c.h.bf16 %v4477_v55 }
  0x9a   : > { %vm347_vm1 = vcmp.eq.s32.totalorder %v339_v53, 1  ;;  %v336_v42 = vpop.permute.xlu0 %335  ;;  %3744 = vmatprep.mubr.msk.bf16.mxu0 %vm385_vm15, %v382_v56  ;;  %v3268_v47 = vcombine.low %v548_v18, %v549_v30  ;;  %v3910_v18 = vld [vmem:[%s4138_s7 + $0x64] sm:$0xff]   ;;  %v3634_v56 = vld [vmem:[%s4138_s7 + $0x50] sm:$0xff]  }
  0x9b   : > { %vm355_vm11 = vmpackc.low %vm347_vm1, %vm347_vm1  ;;  %vm346_vm13 = vcmp.eq.s32.totalorder %v336_v42, 1 }
  0x9c   : > { %v363_v51 = vsel %vm355_vm11, 65537, %v3950_v3  ;;  %vm354_vm7 = vmpackc.low %vm346_vm13, %vm346_vm13  ;;  %vm4648_vm4 = vcmp.ne.s16.totalorder %v3268_v47, 0 }
  0x9d   : > { %v362_v22 = vsel %vm354_vm7, 65537, %v3950_v3  ;;  %v519_v4 = vpop.permute.xlu1 %518  ;;  %v572_v32 = vsel %vm4648_vm4, %v3911_v27, 0  ;;  %v702_v17 = vsel %vm4648_vm4, %v3912_v40, 0  ;;  %v4679_v27 = vand.u32 %v3328_v10, %v4238_v41 }
  0x9e   : > { %v3251_v45 = vcombine.low %v362_v22, %v363_v51  ;;  %vm535_vm0 = vcmp.eq.s32.totalorder %v519_v4, 1  ;;  %v516_v60 = vpop.permute.xlu0 %515  ;;  %3750 = vmatprep.mubr.msk.bf16.mxu1 %vm385_vm15, %v572_v32  ;;  %v3914_v51 = vld [vmem:[%s4138_s7 + $0x4c] sm:$0xff]   ;;  %v3526_v40 = vunpack.c.l.bf16 %v3634_v56 }
  0x9f   : > { %vm543_vm12 = vmpackc.low %vm535_vm0, %vm535_vm0  ;;  %vm534_vm8 = vcmp.eq.s32.totalorder %v516_v60, 1  ;;  %v3345_v22 = vld [vmem:[%s5550_s3 + $0xc] sm:$0x3]  ;;  %v831_v60 = vrot.slane %v3523_v50, 1 }
  0xa0   : > { %vm379_vm2 = vcmp.ne.s16.totalorder %v3251_v45, 0  ;;  %v551_v7 = vsel %vm543_vm12, 65537, %v3950_v3  ;;  %vm542_vm10 = vmpackc.low %vm534_vm8, %vm534_vm8  ;;  %v830_v45 = vrot.slane %v3522_v49, 1 }
  0xa1   : > { %v550_v12 = vsel %vm542_vm10, 65537, %v3950_v3  ;;  %v525_v15 = vpop.permute.xlu1 %524  ;;  %v383_v5 = vsel %vm379_vm2, %v283_v34, 0  ;;  %v829_v34 = vrot.slane %v3519_v48, 1 }
  0xa2   : > { %v3269_v13 = vcombine.low %v550_v12, %v551_v7  ;;  %vm537_vm6 = vcmp.eq.s32.totalorder %v525_v15, 1  ;;  %v522_v20 = vpop.permute.xlu0 %521  ;;  %3745 = vmatmul.mubr.msk.bf16.gmra.mrb[4].mxu0 %vm385_vm15, %v383_v5  ;;  %v3527_v12 = vunpack.c.h.bf16 %v3634_v56  ;;  %v4698_v15 = vand.u32 %v3345_v22, %v4238_v41 }
  0xa3   : > { %vm545_vm5 = vmpackc.low %vm537_vm6, %vm537_vm6  ;;  %vm536_vm9 = vcmp.eq.s32.totalorder %v522_v20, 1  ;;  %3760 = vmatprep.mubr.msk.bf16.mxu0 %vm385_vm15, %v702_v17  ;;  %v3916_v17 = vld [vmem:[%s4138_s7 + $0x54] sm:$0xff]   ;;  %v4713_v49 = vsel %vm836_vm3, %v4490_v19, %v829_v34  ;;  %v4718_v50 = vsel %vm836_vm3, %v830_v45, %v831_v60  ;;  %v4722_v30 = vsel %vm836_vm3, %v829_v34, %v830_v45 }
  0xa4   : > { %vm4671_vm1 = vcmp.ne.s16.totalorder %v3269_v13, 0  ;;  %v553_v53 = vsel %vm545_vm5, 65537, %v3950_v3  ;;  %vm544_vm11 = vmpackc.low %vm536_vm9, %vm536_vm9  ;;  %v833_v56 = vrot.slane %v3527_v12, 1 }
  0xa5   : > { %v552_v55 = vsel %vm544_vm11, 65537, %v3950_v3  ;;  %v531_v42 = vpop.permute.xlu1 %530  ;;  %v573_v47 = vsel %vm4671_vm1, %v3913_v0, 0  ;;  %v703_v5 = vsel %vm4671_vm1, %v3910_v18, 0 }
  0xa6   : > { %v3270_v4 = vcombine.low %v552_v55, %v553_v53  ;;  %vm539_vm13 = vcmp.eq.s32.totalorder %v531_v42, 1  ;;  %v528_v32 = vpop.permute.xlu0 %527  ;;  %3751 = vmatmul.mubr.msk.bf16.vlgmr.msra.gmra.mrb[0].mxu1 %vm385_vm15, %v573_v47  ;;  %v832_v53 = vrot.slane %v3526_v40, 1 }
  0xa7   : > { %vm547_vm7 = vmpackc.low %vm539_vm13, %vm539_vm13  ;;  %vm538_vm4 = vcmp.eq.s32.totalorder %v528_v32, 1  ;;  %3769 = vmatpush3.bf16.msra.mxu1 %v4383_v24 }
  0xa8   : > { %vm4691_vm0 = vcmp.ne.s16.totalorder %v3270_v4, 0  ;;  %v555_v9 = vsel %vm547_vm7, 65537, %v3950_v3  ;;  %vm546_vm12 = vmpackc.low %vm538_vm4, %vm538_vm4  ;;  %3788 = vmatprep.subr.bf16.mxu1 %v4679_v27  ;;  %v846_v4 = vpack.c.bf16 %v4718_v50, %v4722_v30  ;;  %v4743_v34 = vsel %vm836_vm3, %v832_v53, %v833_v56 }
  0xa9   : > { %v554_v24 = vsel %vm546_vm12, 65537, %v3950_v3  ;;  %v878_v0 = vpop.permute.xlu1 %877  ;;  %v574_v10 = vsel %vm4691_vm0, %v3914_v51, 0  ;;  %v704_v13 = vsel %vm4691_vm0, %v3915_v59, 0  ;;  %v3917_v51 = vld [vmem:[%s4138_s7 + $0x74] sm:$0xff]   ;;  %v4747_v45 = vsel %vm836_vm3, %v831_v60, %v832_v53  ;;  %v3637_v60 = vld [vmem:[%s4138_s7 + $0x28] sm:$0xff]  }
  0xaa   : > { %v3271_v20 = vcombine.low %v554_v24, %v555_v9  ;;  %vm898_vm8 = vcmp.eq.s32.totalorder %v878_v0, 1  ;;  %v875_v48 = vpop.permute.xlu0 %874  ;;  %3754 = vmatprep.mubr.msk.bf16.mxu1 %vm385_vm15, %v574_v10  ;;  %3761 = vmatmul.mubr.msk.bf16.vlgmr.msra.gmra.mrb[8].mxu0 %vm385_vm15, %v703_v5  ;;  %v3535_v5 = vunpack.c.h.bf16 %v4523_v44  ;;  %v3358_v24 = vld [vmem:[%s5550_s3 + $0xe] sm:$0x3]  ;;  %v847_v44 = vpack.c.bf16 %v4743_v34, %v4747_v45 }
  0xab   : > { %vm906_vm2 = vmpackc.low %vm898_vm8, %vm898_vm8  ;;  %vm897_vm10 = vcmp.eq.s32.totalorder %v875_v48, 1  ;;  %3764 = vmatprep.mubr.msk.bf16.mxu0 %vm385_vm15, %v704_v13  ;;  %3779 = vmatpush3.bf16.msra.mxu0 %v4637_v11  ;;  %v845_v11 = vpack.c.bf16 %v4713_v49, %v4504_v21  ;;  %v4769_v53 = vsel %vm836_vm3, %v833_v56, %v4492_v14  ;;  %v2199_v8 = vpack.c.bf16 %v4747_v45, %v4718_v50  ;;  %v3933_v45 = vld [vmem:[%s4138_s7 + $0x68] sm:$0xff]  }
  0xac   : > { %vm4725_vm6 = vcmp.ne.s16.totalorder %v3271_v20, 0  ;;  %v914_v19 = vsel %vm906_vm2, 65537, %v3950_v3  ;;  %vm905_vm5 = vmpackc.low %vm897_vm10, %vm897_vm10  ;;  %3798 = vmatprep.subr.bf16.mxu0 %v4698_v15 }
  0xad   : > { %v913_v55 = vsel %vm905_vm5, 65537, %v3950_v3  ;;  %v884_v42 = vpop.permute.xlu1 %883  ;;  %v575_v47 = vsel %vm4725_vm6, %v3916_v17, 0  ;;  %v705_v9 = vsel %vm4725_vm6, %v3917_v51, 0  ;;  %v4763_v17 = vand.u32 %v3358_v24, %v4238_v41  ;;  %v3918_v24 = vld [vmem:[%s4138_s7] sm:$0xff]  }
  0xae   : > { %v3302_v59 = vcombine.low %v913_v55, %v914_v19  ;;  %vm900_vm9 = vcmp.eq.s32.totalorder %v884_v42, 1  ;;  %v881_v22 = vpop.permute.xlu0 %880  ;;  %3755 = vmatmul.mubr.msk.bf16.gmra.mrb[4].mxu1 %vm385_vm15, %v575_v47  ;;  %v1065_v19 = vrot.slane %v3535_v5, 7  ;;  %v3638_v55 = vld [vmem:[%s4138_s7 + $0x30] sm:$0xff]   ;;  %v3538_v51 = vunpack.c.l.bf16 %v3637_v60 }
  0xaf   : > { %vm908_vm1 = vmpackc.low %vm900_vm9, %vm900_vm9  ;;  %vm899_vm11 = vcmp.eq.s32.totalorder %v881_v22, 1  ;;  %v3542_v22 = vunpack.c.l.bf16 %v3638_v55  ;;  %v3543_v14 = vunpack.c.h.bf16 %v3638_v55 }
  0xb0   : > { %vm933_vm13 = vcmp.ne.s16.totalorder %v3302_v59, 0  ;;  %v916_v32 = vsel %vm908_vm1, 65537, %v3950_v3  ;;  %vm907_vm7 = vmpackc.low %vm899_vm11, %vm899_vm11 }
  0xb1   : > { %v915_v40 = vsel %vm907_vm7, 65537, %v3950_v3  ;;  %v890_v7 = vpop.permute.xlu1 %889  ;;  %v937_v12 = vsel %vm933_vm13, %v845_v11, 0  ;;  %v3539_v11 = vunpack.c.h.bf16 %v3637_v60  ;;  %v1069_v60 = vrot.slane %v3543_v14, 7 }
  0xb2   : > { %v3303_v0 = vcombine.low %v915_v40, %v916_v32  ;;  %vm902_vm4 = vcmp.eq.s32.totalorder %v890_v7, 1  ;;  %v887_v10 = vpop.permute.xlu0 %886  ;;  %3765 = vmatmul.mubr.msk.bf16.gmra.mrb[12].mxu0 %vm385_vm15, %v705_v9  ;;  %3770 = vmatprep.mubr.msk.bf16.mxu1 %vm385_vm15, %v937_v12  ;;  %v848_v40 = vpack.c.bf16 %v4509_v31, %v4769_v53  ;;  %v1066_v12 = vrot.slane %v3538_v51, 7 }
  0xb3   : > { %vm910_vm0 = vmpackc.low %vm902_vm4, %vm902_vm4  ;;  %vm901_vm12 = vcmp.eq.s32.totalorder %v887_v10, 1  ;;  %v1067_v5 = vrot.slane %v3539_v11, 7  ;;  %v1068_v10 = vrot.slane %v3542_v22, 7 }
  0xb4   : > { %vm934_vm8 = vcmp.ne.s16.totalorder %v3303_v0, 0  ;;  %v918_v13 = vsel %vm910_vm0, 65537, %v3950_v3  ;;  %vm909_vm2 = vmpackc.low %vm901_vm12, %vm901_vm12 }
  0xb5   : > { %v938_v20 = vsel %vm934_vm8, %v846_v4, 0  ;;  %v917_v48 = vsel %vm909_vm2, 65537, %v3950_v3  ;;  %v896_v18 = vpop.permute.xlu1 %895  ;;  %v4815_v22 = vsel %vm271_vm14, %v1067_v5, %v1068_v10 }
  0xb6   : > { %v3304_v42 = vcombine.low %v917_v48, %v918_v13  ;;  %vm904_vm10 = vcmp.eq.s32.totalorder %v896_v18, 1  ;;  %v893_v47 = vpop.permute.xlu0 %892  ;;  %3771 = vmatmul.mubr.msk.bf16.vlgmr.msra.gmra.mrb[8].mxu1 %vm385_vm15, %v938_v20  ;;  %v4788_v13 = vld [vmem:[%s4138_s7 + $0x8] sm:$0xff]  }
  0xb7   : > { %vm912_vm6 = vmpackc.low %vm904_vm10, %vm904_vm10  ;;  %vm903_vm5 = vcmp.eq.s32.totalorder %v893_v47, 1  ;;  %3789 = vmatpush3.bf16.msra.mxu1 %v4679_v27  ;;  %v4782_v27 = vsel %vm271_vm14, %v4536_v6, %v1065_v19  ;;  %v4799_v47 = vsel %vm271_vm14, %v1065_v19, %v1066_v12  ;;  %v3554_v51 = vunpack.c.l.bf16 %v4788_v13 }
  0xb8   : > { %vm935_vm9 = vcmp.ne.s16.totalorder %v3304_v42, 0  ;;  %v920_v59 = vsel %vm912_vm6, 65537, %v3950_v3  ;;  %vm911_vm1 = vmpackc.low %vm903_vm5, %vm903_vm5  ;;  %3808 = vmatprep.subr.bf16.mxu1 %v4763_v17  ;;  %v1080_v48 = vpack.c.bf16 %v4782_v27, %v4549_v43  ;;  %v4795_v42 = vsel %vm271_vm14, %v1066_v12, %v1067_v5  ;;  %v3919_v12 = vld [vmem:[%s4138_s7 + $0x8] sm:$0xff]   ;;  %v4828_v5 = vld [vmem:[%s4138_s7 + $0x10] sm:$0xff]  }
  0xb9   : > { %v919_v56 = vsel %vm911_vm1, 65537, %v3950_v3  ;;  %v1097_v4 = vpop.permute.xlu1 %1096  ;;  %v939_v32 = vsel %vm935_vm9, %v847_v44, 0  ;;  %v4811_v19 = vsel %vm271_vm14, %v1068_v10, %v1069_v60  ;;  %v1081_v14 = vpack.c.bf16 %v4795_v42, %v4799_v47  ;;  %v3920_v10 = vld [vmem:[%s4138_s7 + $0x10] sm:$0xff]  }
  0xba   : > { %v3305_v7 = vcombine.low %v919_v56, %v920_v59  ;;  %vm1117_vm11 = vcmp.eq.s32.totalorder %v1097_v4, 1  ;;  %v1094_v9 = vpop.permute.xlu0 %1093  ;;  %3774 = vmatprep.mubr.msk.bf16.mxu1 %vm385_vm15, %v939_v32  ;;  %v3930_v43 = vld [vmem:[%s4138_s7 + $0x2c] sm:$0xff]  }
  0xbb   : > { %vm1125_vm13 = vmpackc.low %vm1117_vm11, %vm1117_vm11  ;;  %vm1116_vm7 = vcmp.eq.s32.totalorder %v1094_v9, 1 }
  0xbc   : > { %vm936_vm4 = vcmp.ne.s16.totalorder %v3305_v7, 0  ;;  %v1133_v0 = vsel %vm1125_vm13, 65537, %v3950_v3  ;;  %vm1124_vm0 = vmpackc.low %vm1116_vm7, %vm1116_vm7 }
  0xbd   : > { %v1132_v6 = vsel %vm1124_vm0, 65537, %v3950_v3  ;;  %v1103_v44 = vpop.permute.xlu1 %1102  ;;  %v940_v20 = vsel %vm936_vm4, %v848_v40, 0  ;;  %v3371_v40 = vld [vmem:[%s5550_s3 + $0x10] sm:$0x3] }
  0xbe   : > { %v3319_v18 = vcombine.low %v1132_v6, %v1133_v0  ;;  %vm1119_vm12 = vcmp.eq.s32.totalorder %v1103_v44, 1  ;;  %v1100_v55 = vpop.permute.xlu0 %1099  ;;  %3775 = vmatmul.mubr.msk.bf16.gmra.mrb[12].mxu1 %vm385_vm15, %v940_v20  ;;  %v1082_v0 = vpack.c.bf16 %v4811_v19, %v4815_v22  ;;  %v1552_v6 = vrot.slane %v3554_v51, 1  ;;  %v3931_v20 = vld [vmem:[%s4138_s7 + $0x58] sm:$0xff]  }
  0xbf   : > { %vm1127_vm8 = vmpackc.low %vm1119_vm12, %vm1119_vm12  ;;  %vm1118_vm2 = vcmp.eq.s32.totalorder %v1100_v55, 1  ;;  %3790 = vmatprep.mubr.msk.bf16.mxu1 %vm385_vm15, %v3918_v24  ;;  %v3384_v24 = vld [vmem:[%s5550_s3 + $0x12] sm:$0x3]  ;;  %v4839_v44 = vsel %vm271_vm14, %v1069_v60, %v4538_v37  ;;  %v4848_v55 = vand.u32 %v3371_v40, %v4238_v41  ;;  %v3558_v37 = vunpack.c.l.bf16 %v4828_v5 }
  0xc0   : > { %vm4804_vm10 = vcmp.ne.s16.totalorder %v3319_v18, 0  ;;  %v1135_v59 = vsel %vm1127_vm8, 65537, %v3950_v3  ;;  %vm1126_vm6 = vmpackc.low %vm1118_vm2, %vm1118_vm2  ;;  %v3555_v18 = vunpack.c.h.bf16 %v4788_v13  ;;  %v4855_v60 = vand.u32 %v3384_v24, %v4238_v41 }
  0xc1   : > { %v1134_v56 = vsel %vm1126_vm6, 65537, %v3950_v3  ;;  %v1109_v4 = vpop.permute.xlu1 %1108  ;;  %v1156_v32 = vsel %vm4804_vm10, %v1080_v48, 0  ;;  %v1083_v40 = vpack.c.bf16 %v4554_v1, %v4839_v44 }
  0xc2   : > { %v3320_v7 = vcombine.low %v1134_v56, %v1135_v59  ;;  %vm1121_vm5 = vcmp.eq.s32.totalorder %v1109_v4, 1  ;;  %v1106_v9 = vpop.permute.xlu0 %1105  ;;  %3780 = vmatprep.mubr.msk.bf16.mxu0 %vm385_vm15, %v1156_v32  ;;  %v1553_v24 = vrot.slane %v3555_v18, 1 }
  0xc3   : > { %vm1129_vm9 = vmpackc.low %vm1121_vm5, %vm1121_vm5  ;;  %vm1120_vm1 = vcmp.eq.s32.totalorder %v1106_v9, 1 }
  0xc4   : > { %vm4841_vm11 = vcmp.ne.s16.totalorder %v3320_v7, 0  ;;  %v1137_v48 = vsel %vm1129_vm9, 65537, %v3950_v3  ;;  %vm1128_vm13 = vmpackc.low %vm1120_vm1, %vm1120_vm1  ;;  %v4871_v7 = vsel %vm836_vm3, %v4605_v57, %v1552_v6  ;;  %v3921_v57 = vld [vmem:[%s4138_s7 + $0x18] sm:$0xff]  }
  0xc5   : > { %v1157_v51 = vsel %vm4841_vm11, %v1081_v14, 0  ;;  %v1136_v59 = vsel %vm1128_vm13, 65537, %v3950_v3  ;;  %v1115_v56 = vpop.permute.xlu1 %1114  ;;  %v1566_v18 = vpack.c.bf16 %v4871_v7, %v4612_v29  ;;  %v1789_v63 = vsel %vm4841_vm11, %v1785_v35, 0 }
  0xc6   : > { %v3321_v4 = vcombine.low %v1136_v59, %v1137_v48  ;;  %vm1123_vm14 = vcmp.eq.s32.totalorder %v1115_v56, 1  ;;  %v1112_v32 = vpop.permute.xlu0 %1111  ;;  %3781 = vmatmul.mubr.msk.bf16.vlgmr.msra.gmra.mrb[16].mxu0 %vm385_vm15, %v1157_v51  ;;  %3791 = vmatmul.mubr.msk.bf16.vlgmr.msra.gmra.mrb[16].mxu1 %vm385_vm15, %v3919_v12  ;;  %v3562_v59 = vunpack.c.l.bf16 %v4596_v25  ;;  %v3922_v56 = vld [vmem:[%s4138_s7 + $0x20] sm:$0xff]   ;;  %v4898_v25 = vsel %vm836_vm3, %v1552_v6, %v1553_v24 }
  0xc7   : > { %vm1131_vm7 = vmpackc.low %vm1123_vm14, %vm1123_vm14  ;;  %vm1122_vm4 = vcmp.eq.s32.totalorder %v1112_v32, 1  ;;  %3799 = vmatpush3.bf16.msra.mxu0 %v4698_v15  ;;  %3794 = vmatprep.mubr.msk.bf16.mxu1 %vm385_vm15, %v3920_v10  ;;  %v1554_v10 = vrot.slane %v3558_v37, 1 }
  0xc8   : > { %vm4861_vm0 = vcmp.ne.s16.totalorder %v3321_v4, 0  ;;  %v1139_v14 = vsel %vm1131_vm7, 65537, %v3950_v3  ;;  %vm1130_vm12 = vmpackc.low %vm1122_vm4, %vm1122_vm4  ;;  %3809 = vmatpush3.bf16.msra.mxu1 %v4763_v17  ;;  %3818 = vmatprep.subr.bf16.mxu0 %v4848_v55  ;;  %v3559_v17 = vunpack.c.h.bf16 %v4828_v5  ;;  %v3465_v4 = vld [vmem:[%s5550_s3 + $0x1c] sm:$0x3] }
  0xc9   : > { %v1138_v15 = vsel %vm1130_vm12, 65537, %v3950_v3  ;;  %v1583_v9 = vpop.permute.xlu1 %1582  ;;  %v1158_v12 = vsel %vm4861_vm0, %v1082_v0, 0  ;;  %3828 = vmatprep.subr.bf16.mxu1 %v4855_v60  ;;  %v4894_v5 = vsel %vm836_vm3, %v1553_v24, %v1554_v10  ;;  %v1790_v23 = vsel %vm4861_vm0, %v1786_v46, 0 }
  0xca   : > { %v3322_v48 = vcombine.low %v1138_v15, %v1139_v14  ;;  %vm1603_vm8 = vcmp.eq.s32.totalorder %v1583_v9, 1  ;;  %v1580_v51 = vpop.permute.xlu0 %1579  ;;  %3784 = vmatprep.mubr.msk.bf16.mxu0 %vm385_vm15, %v1158_v12  ;;  %v1555_v12 = vrot.slane %v3559_v17, 1  ;;  %v1567_v24 = vpack.c.bf16 %v4894_v5, %v4898_v25 }
  0xcb   : > { %vm1611_vm2 = vmpackc.low %vm1603_vm8, %vm1603_vm8  ;;  %vm1602_vm6 = vcmp.eq.s32.totalorder %v1580_v51, 1 }
  0xcc   : > { %vm4884_vm5 = vcmp.ne.s16.totalorder %v3322_v48, 0  ;;  %v1619_v0 = vsel %vm1611_vm2, 65537, %v3950_v3  ;;  %vm1610_vm9 = vmpackc.low %vm1602_vm6, %vm1602_vm6  ;;  %v1556_v48 = vrot.slane %v3562_v59, 1  ;;  %v3401_v59 = vld [vmem:[%s5550_s3 + $0x14] sm:$0x3] }
  0xcd   : > { %v1618_v37 = vsel %vm1610_vm9, 65537, %v3950_v3  ;;  %v1589_v32 = vpop.permute.xlu1 %1588  ;;  %v1159_v14 = vsel %vm4884_vm5, %v1083_v40, 0  ;;  %v1791_v46 = vsel %vm4884_vm5, %v1787_v54, 0 }
  0xce   : > { %v3354_v15 = vcombine.low %v1618_v37, %v1619_v0  ;;  %vm1605_vm1 = vcmp.eq.s32.totalorder %v1589_v32, 1  ;;  %v1586_v9 = vpop.permute.xlu0 %1585  ;;  %3785 = vmatmul.mubr.msk.bf16.gmra.mrb[20].mxu0 %vm385_vm15, %v1159_v14  ;;  %3795 = vmatmul.mubr.msk.bf16.gmra.mrb[20].mxu1 %vm385_vm15, %v3921_v57  ;;  %v3923_v37 = vld [vmem:[%s4138_s7 + $0x28] sm:$0xff]   ;;  %v4922_v32 = vsel %vm836_vm3, %v1555_v12, %v1556_v48  ;;  %v4926_v14 = vsel %vm836_vm3, %v1554_v10, %v1555_v12 }
  0xcf   : > { %vm1613_vm13 = vmpackc.low %vm1605_vm1, %vm1605_vm1  ;;  %vm1604_vm14 = vcmp.eq.s32.totalorder %v1586_v9, 1  ;;  %3800 = vmatprep.mubr.msk.bf16.mxu0 %vm385_vm15, %v3922_v56  ;;  %v2911_v1 = vpack.c.bf16 %v4926_v14, %v4894_v5 }
  0xd0   : > { %vm4905_vm7 = vcmp.ne.s16.totalorder %v3354_v15, 0  ;;  %v1621_v40 = vsel %vm1613_vm13, 65537, %v3950_v3  ;;  %vm1612_vm4 = vmpackc.low %vm1604_vm14, %vm1604_vm14  ;;  %v3924_v15 = vld [vmem:[%s4138_s7 + $0x30] sm:$0xff]  }
  0xd1   : > { %v1620_v51 = vsel %vm1612_vm4, 65537, %v3950_v3  ;;  %v1595_v57 = vpop.permute.xlu1 %1594  ;;  %v1642_v17 = vsel %vm4905_vm7, %v1566_v18, 0  ;;  %v3418_v18 = vld [vmem:[%s5550_s3 + $0x16] sm:$0x3] }
  0xd2   : > { %v3355_v56 = vcombine.low %v1620_v51, %v1621_v40  ;;  %vm1607_vm12 = vcmp.eq.s32.totalorder %v1595_v57, 1  ;;  %v1592_v0 = vpop.permute.xlu0 %1591  ;;  %3810 = vmatprep.mubr.msk.bf16.mxu1 %vm385_vm15, %v1642_v17  ;;  %v2075_v51 = vand.u32 %v3401_v59, %v4238_v41  ;;  %v1568_v17 = vpack.c.bf16 %v4922_v32, %v4926_v14 }
  0xd3   : > { %vm1615_vm8 = vmpackc.low %vm1607_vm12, %vm1607_vm12  ;;  %vm1606_vm2 = vcmp.eq.s32.totalorder %v1592_v0, 1  ;;  %v2221_v0 = vand.u32 %v3418_v18, %v4238_v41  ;;  %v4949_v59 = vsel %vm836_vm3, %v1556_v48, %v4607_v36 }
  0xd4   : > { %vm4932_vm6 = vcmp.ne.s16.totalorder %v3355_v56, 0  ;;  %v1623_v40 = vsel %vm1615_vm8, 65537, %v3950_v3  ;;  %vm1614_vm9 = vmpackc.low %vm1606_vm2, %vm1606_vm2  ;;  %v1569_v48 = vpack.c.bf16 %v4617_v58, %v4949_v59 }
  0xd5   : > { %v1643_v10 = vsel %vm4932_vm6, %v1567_v24, 0  ;;  %v1622_v12 = vsel %vm1614_vm9, 65537, %v3950_v3  ;;  %v1601_v57 = vpop.permute.xlu1 %1600 }
  0xd6   : > { %v3356_v56 = vcombine.low %v1622_v12, %v1623_v40  ;;  %vm1609_vm1 = vcmp.eq.s32.totalorder %v1601_v57, 1  ;;  %v1598_v61 = vpop.permute.xlu0 %1597  ;;  %3801 = vmatmul.mubr.msk.bf16.vlgmr.msra.gmra.mrb[24].mxu0 %vm385_vm15, %v3923_v37  ;;  %3811 = vmatmul.mubr.msk.bf16.vlgmr.msra.gmra.mrb[24].mxu1 %vm385_vm15, %v1643_v10  ;;  %v3926_v40 = vld [vmem:[%s4138_s7 + $0x40] sm:$0xff]  }
  0xd7   : > { %vm1617_vm13 = vmpackc.low %vm1609_vm1, %vm1609_vm1  ;;  %vm1608_vm14 = vcmp.eq.s32.totalorder %v1598_v61, 1  ;;  %3804 = vmatprep.mubr.msk.bf16.mxu0 %vm385_vm15, %v3924_v15  ;;  %3819 = vmatpush3.bf16.msra.mxu0 %v4848_v55  ;;  %v3925_v15 = vld [vmem:[%s4138_s7 + $0x38] sm:$0xff]  }
  0xd8   : > { %vm4953_vm4 = vcmp.ne.s16.totalorder %v3356_v56, 0  ;;  %v1625_v37 = vsel %vm1617_vm13, 65537, %v3950_v3  ;;  %vm1616_vm12 = vmpackc.low %vm1608_vm14, %vm1608_vm14  ;;  %3829 = vmatpush3.bf16.msra.mxu1 %v4855_v60  ;;  %3838 = vmatprep.subr.bf16.mxu0 %v2075_v51 }
  0xd9   : > { %v1624_v33 = vsel %vm1616_vm12, 65537, %v3950_v3  ;;  %v2377_v36 = vpop.permute.xlu1 %2376  ;;  %v1644_v61 = vsel %vm4953_vm4, %v1568_v17, 0  ;;  %3848 = vmatprep.subr.bf16.mxu1 %v2221_v0  ;;  %v1788_v17 = vsel %vm4804_vm10, %v1784_v16, 0 }
  0xda   : > { %v3357_v55 = vcombine.low %v1624_v33, %v1625_v37  ;;  %v2374_v18 = vpop.permute.xlu0 %2373  ;;  %3814 = vmatprep.mubr.msk.bf16.mxu1 %vm385_vm15, %v1644_v61  ;;  %v3927_v33 = vld [vmem:[%s4138_s7 + $0x48] sm:$0xff]   ;;  %v3435_v61 = vld [vmem:[%s5550_s3 + $0x18] sm:$0x3]  ;;  %vm2397_vm10 = vcmp.eq.s32.totalorder %v2377_v36, 1 }
  0xdb   : > { %v5000_v11 = vand.u32 %v3435_v61, %v4238_v41  ;;  %vm2396_vm11 = vcmp.eq.s32.totalorder %v2374_v18, 1  ;;  %vm5027_vm8 = vmpackc.low %vm2397_vm10, %vm2397_vm10  ;;  %v2200_v18 = vpack.c.bf16 %v4769_v53, %v4743_v34  ;;  %v5081_v53 = vand.u32 %v3465_v4, %v4238_v41 }
  0xdc   : > { %vm4967_vm3 = vcmp.ne.s16.totalorder %v3357_v55, 0  ;;  %vm2404_vm9 = vmpackc.low %vm2396_vm11, %vm2396_vm11  ;;  %v2413_v6 = vsel %vm5027_vm8, 65537, %v3950_v3  ;;  %v2912_v4 = vpack.c.bf16 %v4949_v59, %v4922_v32  ;;  %v3941_v32 = vld [vmem:[%s4138_s7 + $0x3c] ss:$-28 sps:$4 sm:$0xff]   ;;  %v5761_v59 = vpack.c.bf16 %v4612_v29, %v4617_v58 }
  0xdd   : > { %v2383_v10 = vpop.permute.xlu1 %2382  ;;  %v1645_v12 = vsel %vm4967_vm3, %v1569_v48, 0  ;;  %v3448_v48 = vld [vmem:[%s5550_s3 + $0x1a] sm:$0x3]  ;;  %v2204_v9 = vsel %vm4953_vm4, %v2200_v18, 0 }
  0xde   : > { %v2380_v57 = vpop.permute.xlu0 %2379  ;;  %3805 = vmatmul.mubr.msk.bf16.gmra.mrb[28].mxu0 %vm385_vm15, %v3925_v15  ;;  %3815 = vmatmul.mubr.msk.bf16.gmra.mrb[28].mxu1 %vm385_vm15, %v1645_v12  ;;  %v5003_v55 = vand.u32 %v3448_v48, %v4238_v41  ;;  %vm2399_vm1 = vcmp.eq.s32.totalorder %v2383_v10, 1  ;;  %v3474_v10 = vld [vmem:[%s5550_s3 + $0x1e] sm:$0x3] }
  0xdf   : > { %3820 = vmatprep.mubr.msk.bf16.mxu0 %vm385_vm15, %v1788_v17  ;;  %3830 = vmatprep.mubr.msk.bf16.mxu1 %vm385_vm15, %v3926_v40  ;;  %v2198_v40 = vpack.c.bf16 %v4722_v30, %v4713_v49  ;;  %vm2398_vm5 = vcmp.eq.s32.totalorder %v2380_v57, 1  ;;  %v3934_v57 = vld [vmem:[%s4138_s7 + $0x70] sm:$0xff]   ;;  %v2346_v17 = vpack.c.bf16 %v4839_v44, %v4811_v19 }
  0xe0   : > { %vm5065_vm11 = vmpackc.low %vm2398_vm5, %vm2398_vm5 }
  0xe1   : > { %v2389_v56 = vpop.permute.xlu1 %2388  ;;  %v2202_v49 = vsel %vm4905_vm7, %v2198_v40, 0  ;;  %vm5054_vm7 = vmpackc.low %vm2399_vm1, %vm2399_vm1 }
  0xe2   : > { %v4982_v37 = vpop.permute.xlu0 %2385  ;;  %vm2401_vm14 = vcmp.eq.s32.totalorder %v2389_v56, 1 }
  0xe3   : > { %vm2400_vm10 = vcmp.eq.s32.totalorder %v4982_v37, 1  ;;  %vm5070_vm8 = vmpackc.low %vm2401_vm14, %vm2401_vm14  ;;  %v2203_v37 = vsel %vm4932_vm6, %v2199_v8, 0 }
  0xe5   : > { %v4997_v16 = vpop.permute.xlu1 %2394 }
  0xe6   : > { %v5005_v15 = vpop.permute.xlu0 %2391  ;;  %3821 = vmatmul.mubr.msk.bf16.vlgmr.msra.gmra.mrb[32].mxu0 %vm385_vm15, %v1789_v63  ;;  %3831 = vmatmul.mubr.msk.bf16.vlgmr.msra.gmra.mrb[32].mxu1 %vm385_vm15, %v3927_v33 }
  0xe7   : > { %3824 = vmatprep.mubr.msk.bf16.mxu0 %vm385_vm15, %v1790_v23  ;;  %3834 = vmatprep.mubr.msk.bf16.mxu1 %vm385_vm15, %v3928_v62  ;;  %v5090_v62 = vand.u32 %v3474_v10, %v4238_v41  ;;  %v2345_v10 = vpack.c.bf16 %v4815_v22, %v4795_v42 }
  0xe8   : > { %3839 = vmatpush3.bf16.msra.mxu0 %v2075_v51  ;;  %3849 = vmatpush3.bf16.msra.mxu1 %v2221_v0  ;;  %v2412_v0 = vsel %vm2404_vm9, 65537, %v3950_v3  ;;  %vm5085_vm9 = vmpackc.low %vm2400_vm10, %vm2400_vm10 }
  0xe9   : > { %v2579_v26 = vpop.permute.xlu1 %2578  ;;  %3858 = vmatprep.subr.bf16.mxu0 %v5000_v11  ;;  %3868 = vmatprep.subr.bf16.mxu1 %v5003_v55  ;;  %v3431_v33 = vcombine.low %v2412_v0, %v2413_v6  ;;  %v2205_v6 = vsel %vm4967_vm3, %v2201_v28, 0 }
  0xea   : > { %v2576_v35 = vpop.permute.xlu0 %2575  ;;  %vm2599_vm0 = vcmp.eq.s32.totalorder %v2579_v26, 1 }
  0xeb   : > { %vm2598_vm2 = vcmp.eq.s32.totalorder %v2576_v35, 1  ;;  %vm5037_vm13 = vmpackc.low %vm2599_vm0, %vm2599_vm0  ;;  %vm5112_vm4 = vcmp.ne.s16.totalorder %v3431_v33, 0  ;;  %v3937_v33 = vld [vmem:[%s4138_s7 + $0x14] sm:$0xff]  }
  0xec   : > { %vm5043_vm12 = vmpackc.low %vm2598_vm2, %vm2598_vm2  ;;  %v2615_v56 = vsel %vm5037_vm13, 65537, %v3950_v3 }
  0xed   : > { %v2585_v39 = vpop.permute.xlu1 %2584  ;;  %v2614_v34 = vsel %vm5043_vm12, 65537, %v3950_v3  ;;  %vm2403_vm12 = vcmp.eq.s32.totalorder %v4997_v16, 1 }
  0xee   : > { %v2582_v51 = vpop.permute.xlu0 %2581  ;;  %3825 = vmatmul.mubr.msk.bf16.gmra.mrb[36].mxu0 %vm385_vm15, %v1791_v46  ;;  %3835 = vmatmul.mubr.msk.bf16.gmra.mrb[36].mxu1 %vm385_vm15, %v3931_v20  ;;  %vm2601_vm0 = vcmp.eq.s32.totalorder %v2585_v39, 1  ;;  %v3444_v26 = vcombine.low %v2614_v34, %v2615_v56  ;;  %v2415_v20 = vsel %vm5054_vm7, 65537, %v3950_v3  ;;  %v2417_v39 = vsel %vm5070_vm8, 65537, %v3950_v3  ;;  %vm5153_vm8 = vmpackc.low %vm2403_vm12, %vm2403_vm12 }
  0xef   : > { %3850 = vmatprep.mubr.msk.bf16.mxu1 %vm385_vm15, %v2202_v49  ;;  %3840 = vmatprep.mubr.msk.bf16.mxu0 %vm385_vm15, %v3932_v38  ;;  %vm2600_vm2 = vcmp.eq.s32.totalorder %v2582_v51, 1  ;;  %vm5092_vm5 = vmpackc.low %vm2601_vm0, %vm2601_vm0  ;;  %v2416_v46 = vsel %vm5085_vm9, 65537, %v3950_v3  ;;  %vm2402_vm7 = vcmp.eq.s32.totalorder %v5005_v15, 1  ;;  %v2419_v34 = vsel %vm5153_vm8, 65537, %v3950_v3 }
  0xf0   : > { %vm5100_vm6 = vmpackc.low %vm2600_vm2, %vm2600_vm2  ;;  %vm5140_vm0 = vcmp.ne.s16.totalorder %v3444_v26, 0  ;;  %v2617_v49 = vsel %vm5092_vm5, 65537, %v3950_v3  ;;  %v3433_v36 = vcombine.low %v2416_v46, %v2417_v39  ;;  %v3938_v39 = vld [vmem:[%s4138_s7 + $0x1c] ss:$-28 sps:$4 sm:$0xff]  }
  0xf1   : > { %v2591_v30 = vpop.permute.xlu1 %2590  ;;  %v2616_v52 = vsel %vm5100_vm6, 65537, %v3950_v3  ;;  %vm5163_vm9 = vmpackc.low %vm2402_vm7, %vm2402_vm7 }
  0xf2   : > { %v2588_v50 = vpop.permute.xlu0 %2587  ;;  %vm2603_vm1 = vcmp.eq.s32.totalorder %v2591_v30, 1  ;;  %vm5205_vm12 = vcmp.ne.s16.totalorder %v3433_v36, 0  ;;  %v2418_v42 = vsel %vm5163_vm9, 65537, %v3950_v3 }
  0xf3   : > { %vm2602_vm13 = vcmp.eq.s32.totalorder %v2588_v50, 1  ;;  %vm5106_vm14 = vmpackc.low %vm2603_vm1, %vm2603_vm1  ;;  %v3445_v50 = vcombine.low %v2616_v52, %v2617_v49  ;;  %v2438_v35 = vsel %vm5205_vm12, %v2346_v17, 0  ;;  %v3434_v41 = vcombine.low %v2418_v42, %v2419_v34 }
  0xf4   : > { %vm5120_vm10 = vmpackc.low %vm2602_vm13, %vm2602_vm13  ;;  %v2619_v8 = vsel %vm5106_vm14, 65537, %v3950_v3 }
  0xf5   : > { %v2597_v48 = vpop.permute.xlu1 %2596  ;;  %v2618_v54 = vsel %vm5120_vm10, 65537, %v3950_v3  ;;  %vm5215_vm10 = vcmp.ne.s16.totalorder %v3445_v50, 0 }
  0xf6   : > { %v2594_v23 = vpop.permute.xlu0 %2593  ;;  %3841 = vmatmul.mubr.msk.bf16.vlgmr.msra.gmra.mrb[40].mxu0 %vm385_vm15, %v3933_v45  ;;  %3851 = vmatmul.mubr.msk.bf16.vlgmr.msra.gmra.mrb[40].mxu1 %vm385_vm15, %v2203_v37  ;;  %v3446_v31 = vcombine.low %v2618_v54, %v2619_v8 }
  0xf7   : > { %3854 = vmatprep.mubr.msk.bf16.mxu1 %vm385_vm15, %v2204_v9  ;;  %3844 = vmatprep.mubr.msk.bf16.mxu0 %vm385_vm15, %v3934_v57  ;;  %vm2604_vm2 = vcmp.eq.s32.totalorder %v2594_v23, 1  ;;  %v3929_v57 = vld [vmem:[%s4138_s7 + $0xc] sm:$0xff]  }
  0xf8   : > { %3859 = vmatpush3.bf16.msra.mxu0 %v5000_v11  ;;  %3869 = vmatpush3.bf16.msra.mxu1 %v5003_v55  ;;  %v2344_v11 = vpack.c.bf16 %v4799_v47, %v4782_v27  ;;  %v2414_v55 = vsel %vm5065_vm11, 65537, %v3950_v3  ;;  %v3935_v27 = vld [vmem:[%s4138_s7 + $0x78] sm:$0xff]   ;;  %v3936_v47 = vld [vmem:[%s4138_s7 + $0x4] sm:$0xff]   ;;  %vm2605_vm11 = vcmp.eq.s32.totalorder %v2597_v48, 1  ;;  %vm5184_vm3 = vmpackc.low %vm2604_vm2, %vm2604_vm2  ;;  %vm5220_vm7 = vcmp.ne.s16.totalorder %v3446_v31, 0 }
  0xf9   : > { %v2935_v38 = vpop.permute.xlu1 %2934  ;;  %3878 = vmatprep.subr.bf16.mxu0 %v5081_v53  ;;  %3888 = vmatprep.subr.bf16.mxu1 %v5090_v62  ;;  %v3432_v30 = vcombine.low %v2414_v55, %v2415_v20  ;;  %vm5174_vm5 = vmpackc.low %vm2605_vm11, %vm2605_vm11  ;;  %v2638_v21 = vsel %vm5140_vm0, %v3936_v47, 0  ;;  %v2620_v61 = vsel %vm5184_vm3, 65537, %v3950_v3  ;;  %v2639_v26 = vsel %vm5215_vm10, %v3929_v57, 0 }
  0xfa   : > { %v2932_v13 = vpop.permute.xlu0 %2931  ;;  %vm2955_vm1 = vcmp.eq.s32.totalorder %v2935_v38, 1  ;;  %v2436_v0 = vsel %vm5112_vm4, %v2344_v11, 0  ;;  %v2621_v44 = vsel %vm5174_vm5, 65537, %v3950_v3  ;;  %v2640_v40 = vsel %vm5220_vm7, %v3937_v33, 0 }
  0xfb   : > { %vm2954_vm13 = vcmp.eq.s32.totalorder %v2932_v13, 1  ;;  %vm5192_vm6 = vmpackc.low %vm2955_vm1, %vm2955_vm1  ;;  %vm5198_vm14 = vcmp.ne.s16.totalorder %v3432_v30, 0  ;;  %v3447_v24 = vcombine.low %v2620_v61, %v2621_v44  ;;  %v2910_v47 = vpack.c.bf16 %v4898_v25, %v4871_v7 }
  0xfc   : > { %vm2962_vm4 = vmpackc.low %vm2954_vm13, %vm2954_vm13  ;;  %v2971_v63 = vsel %vm5192_vm6, 65537, %v3950_v3  ;;  %v2437_v9 = vsel %vm5198_vm14, %v2345_v10, 0  ;;  %vm2435_vm6 = vcmp.ne.s16.totalorder %v3434_v41, 0 }
  0xfd   : > { %v2941_v16 = vpop.permute.xlu1 %2940  ;;  %v2970_v23 = vsel %vm2962_vm4, 65537, %v3950_v3  ;;  %vm5257_vm14 = vcmp.ne.s16.totalorder %v3447_v24, 0  ;;  %v2439_v7 = vsel %vm2435_vm6, %v2347_v2, 0  ;;  %v3940_v2 = vld [vmem:[%s4138_s7 + $0x34] sm:$0xff]  }
  0xfe   : > { %v2938_v18 = vpop.permute.xlu0 %2937  ;;  %3845 = vmatmul.mubr.msk.bf16.gmra.mrb[44].mxu0 %vm385_vm15, %v3935_v27  ;;  %3855 = vmatmul.mubr.msk.bf16.gmra.mrb[44].mxu1 %vm385_vm15, %v2205_v6  ;;  %vm2957_vm11 = vcmp.eq.s32.totalorder %v2941_v16, 1  ;;  %v3470_v38 = vcombine.low %v2970_v23, %v2971_v63  ;;  %v3939_v27 = vld [vmem:[%s4138_s7 + $0x24] sm:$0xff]   ;;  %v2641_v25 = vsel %vm5257_vm14, %v3938_v39, 0  ;;  %v2769_v6 = vsel %vm5215_vm10, %v3930_v43, 0 }
  0xff   : > { %3860 = vmatprep.mubr.msk.bf16.mxu0 %vm385_vm15, %v2436_v0  ;;  %3870 = vmatprep.mubr.msk.bf16.mxu1 %vm385_vm15, %v2638_v21  ;;  %vm2956_vm8 = vcmp.eq.s32.totalorder %v2938_v18, 1  ;;  %vm5240_vm9 = vmpackc.low %vm2957_vm11, %vm2957_vm11  ;;  %v2768_v8 = vsel %vm5140_vm0, %v3939_v27, 0  ;;  %v2770_v5 = vsel %vm5220_vm7, %v3940_v2, 0  ;;  %vm470_vm10 = vcmask 130048  }
 0x100   : > { %vm5248_vm5 = vmpackc.low %vm2956_vm8, %vm2956_vm8  ;;  %vm2990_vm4 = vcmp.ne.s16.totalorder %v3470_v38, 0 }
 0x101   : > { %v2947_v37 = vpop.permute.xlu1 %2946  ;;  %v2994_v54 = vsel %vm2990_vm4, %v2910_v47, 0 }
 0x102   : > { %v2944_v48 = vpop.permute.xlu0 %2943  ;;  %vm2959_vm2 = vcmp.eq.s32.totalorder %v2947_v37, 1 }
 0x103   : > { %vm2958_vm1 = vcmp.eq.s32.totalorder %v2944_v48, 1  ;;  %vm2967_vm13 = vmpackc.low %vm2959_vm2, %vm2959_vm2 }
 0x104   : > { %vm2966_vm3 = vmpackc.low %vm2958_vm1, %vm2958_vm1  ;;  %v2975_v49 = vsel %vm2967_vm13, 65537, %v3950_v3 }
 0x105   : > { %v2953_v55 = vpop.permute.xlu1 %2952  ;;  %v2974_v52 = vsel %vm2966_vm3, 65537, %v3950_v3 }
 0x106   : > { %3861 = vmatmul.mubr.msk.bf16.vlgmr.msra.gmra.mrb[48].mxu0 %vm385_vm15, %v2437_v9  ;;  %3871 = vmatmul.mubr.msk.bf16.vlgmr.msra.gmra.mrb[48].mxu1 %vm385_vm15, %v2639_v26  ;;  %v2950_v13 = vpop.permute.xlu0 %2949  ;;  %vm2961_vm12 = vcmp.eq.s32.totalorder %v2953_v55, 1  ;;  %v3472_v30 = vcombine.low %v2974_v52, %v2975_v49 }
 0x107   : > { %3864 = vmatprep.mubr.msk.bf16.mxu0 %vm385_vm15, %v2438_v35  ;;  %3874 = vmatprep.mubr.msk.bf16.mxu1 %vm385_vm15, %v2640_v40  ;;  %vm2960_vm11 = vcmp.eq.s32.totalorder %v2950_v13, 1  ;;  %vm2969_vm8 = vmpackc.low %vm2961_vm12, %vm2961_vm12 }
 0x108   : > { %3879 = vmatpush3.bf16.msra.mxu0 %v5081_v53  ;;  %3889 = vmatpush3.bf16.msra.mxu1 %v5090_v62  ;;  %v2973_v53 = vsel %vm5240_vm9, 65537, %v3950_v3  ;;  %v2972_v62 = vsel %vm5248_vm5, 65537, %v3950_v3  ;;  %vm2968_vm2 = vmpackc.low %vm2960_vm11, %vm2960_vm11  ;;  %vm2992_vm1 = vcmp.ne.s16.totalorder %v3472_v30, 0  ;;  %v2977_v51 = vsel %vm2969_vm8, 65537, %v3950_v3 }
 0x109   : > { %v3471_v15 = vcombine.low %v2972_v62, %v2973_v53  ;;  %v2976_v16 = vsel %vm2968_vm2, 65537, %v3950_v3  ;;  %v2996_v14 = vsel %vm2992_vm1, %v2912_v4, 0  ;;  %v2771_v3 = vsel %vm5257_vm14, %v3941_v32, 0 }
 0x10a   : > { %v3473_v36 = vcombine.low %v2976_v16, %v2977_v51 }
 0x10b   : > { %vm2991_vm9 = vcmp.ne.s16.totalorder %v3471_v15, 0 }
 0x10c   : > { %v2995_v0 = vsel %vm2991_vm9, %v2911_v1, 0  ;;  %vm2993_vm0 = vcmp.ne.s16.totalorder %v3473_v36, 0 }
 0x10d   : > { %v2997_v50 = vsel %vm2993_vm0, %v5761_v59, 0 }
 0x10e   : > { %3865 = vmatmul.mubr.msk.bf16.gmra.mrb[52].mxu0 %vm385_vm15, %v2439_v7  ;;  %3875 = vmatmul.mubr.msk.bf16.gmra.mrb[52].mxu1 %vm385_vm15, %v2641_v25 }
 0x10f   : > { %3880 = vmatprep.mubr.msk.bf16.mxu0 %vm385_vm15, %v2768_v8  ;;  %3890 = vmatprep.mubr.msk.bf16.mxu1 %vm385_vm15, %v2994_v54 }
 0x116   : > { %3881 = vmatmul.mubr.msk.bf16.vlgmr.msra.gmra.mrb[56].mxu0 %vm385_vm15, %v2769_v6  ;;  %3891 = vmatmul.mubr.msk.bf16.vlgmr.msra.gmra.mrb[56].mxu1 %vm385_vm15, %v2995_v0 }
 0x117   : > { %3884 = vmatprep.mubr.msk.bf16.mxu0 %vm385_vm15, %v2770_v5  ;;  %3894 = vmatprep.mubr.msk.bf16.mxu1 %vm385_vm15, %v2996_v14 }
 0x11e   : > { %3885 = vmatmul.mubr.msk.bf16.gmra.mrb[60].mxu0 %vm385_vm15, %v2771_v3  ;;  %3895 = vmatmul.mubr.msk.bf16.gmra.mrb[60].mxu1 %vm385_vm15, %v2997_v50  ;;  %vm3167_vm15 = vcmask 125952  }
 0x16a   : > { %v3742_v45 = vpop.f32.mrb[0].mxu0 }
 0x16b   : > { %473 = vst.msk [vmem:[#allocation2 + $0x10] sm:$0xff] %vm470_vm10, %v3742_v45  ;;  %v439_v18 = vpop.f32.mrb[1].mxu0 }
 0x16c   : > { %471 = vst.msk [vmem:[#allocation2] sm:$0xff] %vm470_vm10, %v439_v18  ;;  %v3743_v21 = vpop.f32.mrb[2].mxu0 }
 0x16d   : > { %474 = vst.msk [vmem:[#allocation2 + $0x18] sm:$0xff] %vm470_vm10, %v3743_v21  ;;  %v442_v31 = vpop.f32.mrb[3].mxu0 }
 0x16e   : > { %472 = vst.msk [vmem:[#allocation2 + $0x8] sm:$0xff] %vm470_vm10, %v442_v31 }
 0x172   : > { %v660_v12 = vld [vmem:[#allocation2 + $0x10] sm:$0xff] }
 0x173   : > { %v658_v56 = vld [vmem:[#allocation2] sm:$0xff] }
 0x174   : > { %v661_v22 = vld [vmem:[#allocation2 + $0x18] sm:$0xff] }
 0x175   : > { %v3746_v28 = vpop.f32.mrb[4].mxu0  ;;  %v659_v19 = vld [vmem:[#allocation2 + $0x8] sm:$0xff] }
 0x176   : > { %477 = vst.msk [vmem:[#allocation2 + $0x30] sm:$0xff] %vm470_vm10, %v3746_v28  ;;  %v455_v29 = vpop.f32.mrb[5].mxu0 }
 0x177   : > { %475 = vst.msk [vmem:[#allocation2 + $0x20] sm:$0xff] %vm470_vm10, %v455_v29  ;;  %v3747_v58 = vpop.f32.mrb[6].mxu0 }
 0x178   : > { %478 = vst.msk [vmem:[#allocation2 + $0x38] sm:$0xff] %vm470_vm10, %v3747_v58  ;;  %v458_v60 = vpop.f32.mrb[7].mxu0 }
 0x179   : > { %476 = vst.msk [vmem:[#allocation2 + $0x28] sm:$0xff] %vm470_vm10, %v458_v60  ;;  %v3752_v10 = vpop.f32.mrb[0].mxu1 }
 0x17a   : > { %v668_v57 = vadd.f32 %v3752_v10, %v660_v12  ;;  %v627_v17 = vpop.f32.mrb[1].mxu1 }
 0x17b   : > { %v666_v34 = vadd.f32 %v658_v56, %v627_v17  ;;  %v3753_v42 = vpop.f32.mrb[2].mxu1 }
 0x17c   : > { %676 = vst.msk [vmem:[#allocation2 + $0x10] sm:$0xff] %vm470_vm10, %v668_v57  ;;  %v669_v37 = vadd.f32 %v3753_v42, %v661_v22  ;;  %v630_v33 = vpop.f32.mrb[3].mxu1 }
 0x17d   : > { %674 = vst.msk [vmem:[#allocation2] sm:$0xff] %vm470_vm10, %v666_v34  ;;  %v667_v44 = vadd.f32 %v659_v19, %v630_v33  ;;  %v3762_v61 = vpop.f32.mrb[8].mxu0  ;;  %v664_v26 = vld [vmem:[#allocation2 + $0x30] sm:$0xff] }
 0x17e   : > { %677 = vst.msk [vmem:[#allocation2 + $0x18] sm:$0xff] %vm470_vm10, %v669_v37  ;;  %v757_v48 = vpop.f32.mrb[9].mxu0  ;;  %v662_v24 = vld [vmem:[#allocation2 + $0x20] sm:$0xff] }
 0x17f   : > { %675 = vst.msk [vmem:[#allocation2 + $0x8] sm:$0xff] %vm470_vm10, %v667_v44  ;;  %v3763_v63 = vpop.f32.mrb[10].mxu0  ;;  %v665_v11 = vld [vmem:[#allocation2 + $0x38] sm:$0xff] }
 0x180   : > { %v760_v23 = vpop.f32.mrb[11].mxu0  ;;  %v663_v27 = vld [vmem:[#allocation2 + $0x28] sm:$0xff] }
 0x181   : > { %v3756_v9 = vpop.f32.mrb[4].mxu1 }
 0x182   : > { %v672_v35 = vadd.f32 %v3756_v9, %v664_v26  ;;  %v643_v41 = vpop.f32.mrb[5].mxu1 }
 0x183   : > { %v790_v20 = vld [vmem:[#allocation2 + $0x10] sm:$0xff]  ;;  %v670_v40 = vadd.f32 %v662_v24, %v643_v41  ;;  %v3757_v38 = vpop.f32.mrb[6].mxu1 }
 0x184   : > { %v798_v55 = vadd.f32 %v3762_v61, %v790_v20  ;;  %v788_v39 = vld [vmem:[#allocation2] sm:$0xff]  ;;  %680 = vst.msk [vmem:[#allocation2 + $0x30] sm:$0xff] %vm470_vm10, %v672_v35  ;;  %v673_v46 = vadd.f32 %v3757_v38, %v665_v11  ;;  %v646_v13 = vpop.f32.mrb[7].mxu1 }
 0x185   : > { %v796_v47 = vadd.f32 %v788_v39, %v757_v48  ;;  %v791_v53 = vld [vmem:[#allocation2 + $0x18] sm:$0xff]  ;;  %678 = vst.msk [vmem:[#allocation2 + $0x20] sm:$0xff] %vm470_vm10, %v670_v40  ;;  %v671_v62 = vadd.f32 %v663_v27, %v646_v13  ;;  %v3766_v49 = vpop.f32.mrb[12].mxu0 }
 0x186   : > { %806 = vst.msk [vmem:[#allocation2 + $0x10] sm:$0xff] %vm470_vm10, %v798_v55  ;;  %v799_v52 = vadd.f32 %v3763_v63, %v791_v53  ;;  %v789_v7 = vld [vmem:[#allocation2 + $0x8] sm:$0xff]  ;;  %681 = vst.msk [vmem:[#allocation2 + $0x38] sm:$0xff] %vm470_vm10, %v673_v46  ;;  %v773_v25 = vpop.f32.mrb[13].mxu0 }
 0x187   : > { %804 = vst.msk [vmem:[#allocation2] sm:$0xff] %vm470_vm10, %v796_v47  ;;  %v797_v15 = vadd.f32 %v789_v7, %v760_v23  ;;  %679 = vst.msk [vmem:[#allocation2 + $0x28] sm:$0xff] %vm470_vm10, %v671_v62  ;;  %v3767_v8 = vpop.f32.mrb[14].mxu0 }
 0x188   : > { %807 = vst.msk [vmem:[#allocation2 + $0x18] sm:$0xff] %vm470_vm10, %v799_v52  ;;  %v776_v54 = vpop.f32.mrb[15].mxu0 }
 0x189   : > { %805 = vst.msk [vmem:[#allocation2 + $0x8] sm:$0xff] %vm470_vm10, %v797_v15  ;;  %v3772_v30 = vpop.f32.mrb[8].mxu1 }
 0x18a   : > { %v992_v43 = vpop.f32.mrb[9].mxu1 }
 0x18b   : > { %v794_v1 = vld [vmem:[#allocation2 + $0x30] sm:$0xff]  ;;  %v3773_v2 = vpop.f32.mrb[10].mxu1 }
 0x18c   : > { %v802_v4 = vadd.f32 %v3766_v49, %v794_v1  ;;  %v792_v51 = vld [vmem:[#allocation2 + $0x20] sm:$0xff]  ;;  %v995_v16 = vpop.f32.mrb[11].mxu1 }
 0x18d   : > { %v800_v6 = vadd.f32 %v792_v51, %v773_v25  ;;  %v795_v0 = vld [vmem:[#allocation2 + $0x38] sm:$0xff]  ;;  %v1025_v36 = vld [vmem:[#allocation2 + $0x10] sm:$0xff] }
 0x18e   : > { %810 = vst.msk [vmem:[#allocation2 + $0x30] sm:$0xff] %vm470_vm10, %v802_v4  ;;  %v803_v5 = vadd.f32 %v3767_v8, %v795_v0  ;;  %v793_v14 = vld [vmem:[#allocation2 + $0x28] sm:$0xff]  ;;  %v1033_v32 = vadd.f32 %v3772_v30, %v1025_v36  ;;  %v1023_v3 = vld [vmem:[#allocation2] sm:$0xff] }
 0x18f   : > { %808 = vst.msk [vmem:[#allocation2 + $0x20] sm:$0xff] %vm470_vm10, %v800_v6  ;;  %v801_v59 = vadd.f32 %v793_v14, %v776_v54  ;;  %v1031_v50 = vadd.f32 %v1023_v3, %v992_v43  ;;  %v1026_v45 = vld [vmem:[#allocation2 + $0x18] sm:$0xff] }
 0x190   : > { %811 = vst.msk [vmem:[#allocation2 + $0x38] sm:$0xff] %vm470_vm10, %v803_v5  ;;  %1041 = vst.msk [vmem:[#allocation2 + $0x10] sm:$0xff] %vm470_vm10, %v1033_v32  ;;  %v1034_v18 = vadd.f32 %v3773_v2, %v1026_v45  ;;  %v1024_v21 = vld [vmem:[#allocation2 + $0x8] sm:$0xff] }
 0x191   : > { %809 = vst.msk [vmem:[#allocation2 + $0x28] sm:$0xff] %vm470_vm10, %v801_v59  ;;  %1039 = vst.msk [vmem:[#allocation2] sm:$0xff] %vm470_vm10, %v1031_v50  ;;  %v1032_v31 = vadd.f32 %v1024_v21, %v995_v16  ;;  %v3776_v28 = vpop.f32.mrb[12].mxu1 }
 0x192   : > { %1042 = vst.msk [vmem:[#allocation2 + $0x18] sm:$0xff] %vm470_vm10, %v1034_v18  ;;  %v1008_v29 = vpop.f32.mrb[13].mxu1 }
 0x193   : > { %1040 = vst.msk [vmem:[#allocation2 + $0x8] sm:$0xff] %vm470_vm10, %v1032_v31  ;;  %v3777_v58 = vpop.f32.mrb[14].mxu1 }
 0x194   : > { %v1011_v60 = vpop.f32.mrb[15].mxu1 }
 0x195   : > { %v1029_v10 = vld [vmem:[#allocation2 + $0x30] sm:$0xff] }
 0x196   : > { %v1037_v12 = vadd.f32 %v3776_v28, %v1029_v10  ;;  %v1027_v57 = vld [vmem:[#allocation2 + $0x20] sm:$0xff] }
 0x197   : > { %v1035_v17 = vadd.f32 %v1027_v57, %v1008_v29  ;;  %v1030_v56 = vld [vmem:[#allocation2 + $0x38] sm:$0xff]  ;;  %v1244_v33 = vld [vmem:[#allocation2 + $0x10] sm:$0xff] }
 0x198   : > { %1045 = vst.msk [vmem:[#allocation2 + $0x30] sm:$0xff] %vm470_vm10, %v1037_v12  ;;  %v1038_v34 = vadd.f32 %v3777_v58, %v1030_v56  ;;  %v1028_v42 = vld [vmem:[#allocation2 + $0x28] sm:$0xff]  ;;  %v1242_v48 = vld [vmem:[#allocation2] sm:$0xff] }
 0x199   : > { %1043 = vst.msk [vmem:[#allocation2 + $0x20] sm:$0xff] %vm470_vm10, %v1035_v17  ;;  %v1036_v22 = vadd.f32 %v1028_v42, %v1011_v60  ;;  %v3782_v37 = vpop.f32.mrb[16].mxu0  ;;  %v3792_v19 = vpop.f32.mrb[16].mxu1  ;;  %v1245_v26 = vld [vmem:[#allocation2 + $0x18] sm:$0xff] }
 0x19a   : > { %1046 = vst.msk [vmem:[#allocation2 + $0x38] sm:$0xff] %vm470_vm10, %v1038_v34  ;;  %v1252_v44 = vadd.f32 %v3782_v37, %v1244_v33  ;;  %v1211_v61 = vpop.f32.mrb[17].mxu0  ;;  %v1345_v63 = vpop.f32.mrb[17].mxu1  ;;  %v1243_v20 = vld [vmem:[#allocation2 + $0x8] sm:$0xff] }
 0x19b   : > { %1044 = vst.msk [vmem:[#allocation2 + $0x28] sm:$0xff] %vm470_vm10, %v1036_v22  ;;  %v1250_v23 = vadd.f32 %v1242_v48, %v1211_v61  ;;  %v3783_v9 = vpop.f32.mrb[18].mxu0  ;;  %v3793_v35 = vpop.f32.mrb[18].mxu1 }
 0x19c   : > { %1260 = vst.msk [vmem:[#allocation2 + $0x10] sm:$0xff] %vm470_vm10, %v1252_v44  ;;  %v1253_v41 = vadd.f32 %v3783_v9, %v1245_v26  ;;  %v1214_v24 = vpop.f32.mrb[19].mxu0  ;;  %v1348_v40 = vpop.f32.mrb[19].mxu1 }
 0x19d   : > { %1258 = vst.msk [vmem:[#allocation2] sm:$0xff] %vm470_vm10, %v1250_v23  ;;  %v1251_v38 = vadd.f32 %v1243_v20, %v1214_v24 }
 0x19e   : > { %1261 = vst.msk [vmem:[#allocation2 + $0x18] sm:$0xff] %vm470_vm10, %v1253_v41 }
 0x19f   : > { %1259 = vst.msk [vmem:[#allocation2 + $0x8] sm:$0xff] %vm470_vm10, %v1251_v38  ;;  %v1248_v55 = vld [vmem:[#allocation2 + $0x30] sm:$0xff] }
 0x1a0   : > { %v1246_v27 = vld [vmem:[#allocation2 + $0x20] sm:$0xff] }
 0x1a1   : > { %v3786_v11 = vpop.f32.mrb[20].mxu0  ;;  %v3796_v39 = vpop.f32.mrb[20].mxu1  ;;  %v1249_v52 = vld [vmem:[#allocation2 + $0x38] sm:$0xff] }
 0x1a2   : > { %v1256_v46 = vadd.f32 %v3786_v11, %v1248_v55  ;;  %v1227_v13 = vpop.f32.mrb[21].mxu0  ;;  %v1361_v47 = vpop.f32.mrb[21].mxu1  ;;  %v1247_v30 = vld [vmem:[#allocation2 + $0x28] sm:$0xff] }
 0x1a3   : > { %v1378_v53 = vld [vmem:[#allocation2 + $0x10] sm:$0xff]  ;;  %v1254_v62 = vadd.f32 %v1246_v27, %v1227_v13  ;;  %v3787_v49 = vpop.f32.mrb[22].mxu0  ;;  %v3797_v7 = vpop.f32.mrb[22].mxu1 }
 0x1a4   : > { %v1386_v25 = vadd.f32 %v3792_v19, %v1378_v53  ;;  %1264 = vst.msk [vmem:[#allocation2 + $0x30] sm:$0xff] %vm470_vm10, %v1256_v46  ;;  %v1376_v15 = vld [vmem:[#allocation2] sm:$0xff]  ;;  %v1257_v8 = vadd.f32 %v3787_v49, %v1249_v52  ;;  %v1230_v54 = vpop.f32.mrb[23].mxu0  ;;  %v1364_v43 = vpop.f32.mrb[23].mxu1 }
 0x1a5   : > { %v1384_v1 = vadd.f32 %v1376_v15, %v1345_v63  ;;  %1262 = vst.msk [vmem:[#allocation2 + $0x20] sm:$0xff] %vm470_vm10, %v1254_v62  ;;  %v1379_v2 = vld [vmem:[#allocation2 + $0x18] sm:$0xff]  ;;  %v1255_v4 = vadd.f32 %v1247_v30, %v1230_v54 }
 0x1a6   : > { %1394 = vst.msk [vmem:[#allocation2 + $0x10] sm:$0xff] %vm470_vm10, %v1386_v25  ;;  %v1387_v51 = vadd.f32 %v3793_v35, %v1379_v2  ;;  %1265 = vst.msk [vmem:[#allocation2 + $0x38] sm:$0xff] %vm470_vm10, %v1257_v8  ;;  %v1377_v16 = vld [vmem:[#allocation2 + $0x8] sm:$0xff] }
 0x1a7   : > { %1392 = vst.msk [vmem:[#allocation2] sm:$0xff] %vm470_vm10, %v1384_v1  ;;  %v1385_v6 = vadd.f32 %v1377_v16, %v1348_v40  ;;  %1263 = vst.msk [vmem:[#allocation2 + $0x28] sm:$0xff] %vm470_vm10, %v1255_v4 }
 0x1a8   : > { %1395 = vst.msk [vmem:[#allocation2 + $0x18] sm:$0xff] %vm470_vm10, %v1387_v51 }
 0x1a9   : > { %1393 = vst.msk [vmem:[#allocation2 + $0x8] sm:$0xff] %vm470_vm10, %v1385_v6  ;;  %v3812_v0 = vpop.f32.mrb[24].mxu1  ;;  %v3802_v36 = vpop.f32.mrb[24].mxu0 }
 0x1aa   : > { %v1697_v5 = vpop.f32.mrb[25].mxu1  ;;  %v1479_v14 = vpop.f32.mrb[25].mxu0 }
 0x1ab   : > { %v1382_v32 = vld [vmem:[#allocation2 + $0x30] sm:$0xff]  ;;  %v3813_v3 = vpop.f32.mrb[26].mxu1  ;;  %v3803_v59 = vpop.f32.mrb[26].mxu0 }
 0x1ac   : > { %v1390_v50 = vadd.f32 %v3796_v39, %v1382_v32  ;;  %v1380_v45 = vld [vmem:[#allocation2 + $0x20] sm:$0xff]  ;;  %v1700_v18 = vpop.f32.mrb[27].mxu1  ;;  %v1482_v21 = vpop.f32.mrb[27].mxu0 }
 0x1ad   : > { %v1388_v31 = vadd.f32 %v1380_v45, %v1361_v47  ;;  %v1383_v28 = vld [vmem:[#allocation2 + $0x38] sm:$0xff]  ;;  %v1512_v29 = vld [vmem:[#allocation2 + $0x10] sm:$0xff] }
 0x1ae   : > { %1398 = vst.msk [vmem:[#allocation2 + $0x30] sm:$0xff] %vm470_vm10, %v1390_v50  ;;  %v1391_v58 = vadd.f32 %v3797_v7, %v1383_v28  ;;  %v1381_v60 = vld [vmem:[#allocation2 + $0x28] sm:$0xff]  ;;  %v1520_v10 = vadd.f32 %v3802_v36, %v1512_v29  ;;  %v1510_v12 = vld [vmem:[#allocation2] sm:$0xff] }
 0x1af   : > { %1396 = vst.msk [vmem:[#allocation2 + $0x20] sm:$0xff] %vm470_vm10, %v1388_v31  ;;  %v1389_v57 = vadd.f32 %v1381_v60, %v1364_v43  ;;  %v1518_v17 = vadd.f32 %v1510_v12, %v1479_v14  ;;  %v1513_v56 = vld [vmem:[#allocation2 + $0x18] sm:$0xff] }
 0x1b0   : > { %1399 = vst.msk [vmem:[#allocation2 + $0x38] sm:$0xff] %vm470_vm10, %v1391_v58  ;;  %1528 = vst.msk [vmem:[#allocation2 + $0x10] sm:$0xff] %vm470_vm10, %v1520_v10  ;;  %v1521_v34 = vadd.f32 %v3803_v59, %v1513_v56  ;;  %v1511_v42 = vld [vmem:[#allocation2 + $0x8] sm:$0xff] }
 0x1b1   : > { %1397 = vst.msk [vmem:[#allocation2 + $0x28] sm:$0xff] %vm470_vm10, %v1389_v57  ;;  %1526 = vst.msk [vmem:[#allocation2] sm:$0xff] %vm470_vm10, %v1518_v17  ;;  %v1519_v22 = vadd.f32 %v1511_v42, %v1482_v21  ;;  %v3816_v37 = vpop.f32.mrb[28].mxu1  ;;  %v3806_v33 = vpop.f32.mrb[28].mxu0 }
 0x1b2   : > { %1529 = vst.msk [vmem:[#allocation2 + $0x18] sm:$0xff] %vm470_vm10, %v1521_v34  ;;  %v1713_v19 = vpop.f32.mrb[29].mxu1  ;;  %v1495_v44 = vpop.f32.mrb[29].mxu0 }
 0x1b3   : > { %1527 = vst.msk [vmem:[#allocation2 + $0x8] sm:$0xff] %vm470_vm10, %v1519_v22  ;;  %v3817_v61 = vpop.f32.mrb[30].mxu1  ;;  %v3807_v48 = vpop.f32.mrb[30].mxu0 }
 0x1b4   : > { %v1716_v63 = vpop.f32.mrb[31].mxu1  ;;  %v1498_v23 = vpop.f32.mrb[31].mxu0 }
 0x1b5   : > { %v1516_v9 = vld [vmem:[#allocation2 + $0x30] sm:$0xff] }
 0x1b6   : > { %v1524_v26 = vadd.f32 %v3806_v33, %v1516_v9  ;;  %v1514_v35 = vld [vmem:[#allocation2 + $0x20] sm:$0xff] }
 0x1b7   : > { %v1522_v41 = vadd.f32 %v1514_v35, %v1495_v44  ;;  %v1517_v24 = vld [vmem:[#allocation2 + $0x38] sm:$0xff]  ;;  %v1730_v20 = vld [vmem:[#allocation2 + $0x10] sm:$0xff] }
 0x1b8   : > { %1532 = vst.msk [vmem:[#allocation2 + $0x30] sm:$0xff] %vm470_vm10, %v1524_v26  ;;  %v1525_v40 = vadd.f32 %v3807_v48, %v1517_v24  ;;  %v1515_v38 = vld [vmem:[#allocation2 + $0x28] sm:$0xff]  ;;  %v1738_v11 = vadd.f32 %v3812_v0, %v1730_v20  ;;  %v1728_v55 = vld [vmem:[#allocation2] sm:$0xff] }
 0x1b9   : > { %1530 = vst.msk [vmem:[#allocation2 + $0x20] sm:$0xff] %vm470_vm10, %v1522_v41  ;;  %v1523_v39 = vadd.f32 %v1515_v38, %v1498_v23  ;;  %v3822_v46 = vpop.f32.mrb[32].mxu0  ;;  %v1736_v13 = vadd.f32 %v1728_v55, %v1697_v5  ;;  %v1731_v27 = vld [vmem:[#allocation2 + $0x18] sm:$0xff]  ;;  %v3832_v47 = vpop.f32.mrb[32].mxu1 }
 0x1ba   : > { %1533 = vst.msk [vmem:[#allocation2 + $0x38] sm:$0xff] %vm470_vm10, %v1525_v40  ;;  %1746 = vst.msk [vmem:[#allocation2 + $0x10] sm:$0xff] %vm470_vm10, %v1738_v11  ;;  %v1843_v53 = vpop.f32.mrb[33].mxu0  ;;  %v1739_v62 = vadd.f32 %v3813_v3, %v1731_v27  ;;  %v1729_v49 = vld [vmem:[#allocation2 + $0x8] sm:$0xff]  ;;  %v1977_v52 = vpop.f32.mrb[33].mxu1 }
 0x1bb   : > { %1531 = vst.msk [vmem:[#allocation2 + $0x28] sm:$0xff] %vm470_vm10, %v1523_v39  ;;  %1744 = vst.msk [vmem:[#allocation2] sm:$0xff] %vm470_vm10, %v1736_v13  ;;  %v3823_v7 = vpop.f32.mrb[34].mxu0  ;;  %v1737_v25 = vadd.f32 %v1729_v49, %v1700_v18  ;;  %v3833_v15 = vpop.f32.mrb[34].mxu1 }
 0x1bc   : > { %1747 = vst.msk [vmem:[#allocation2 + $0x18] sm:$0xff] %vm470_vm10, %v1739_v62  ;;  %v1846_v8 = vpop.f32.mrb[35].mxu0  ;;  %v5366_v54 = vpop.f32.mrb[35].mxu1 }
 0x1bd   : > { %1745 = vst.msk [vmem:[#allocation2 + $0x8] sm:$0xff] %vm470_vm10, %v1737_v25 }
 0x1bf   : > { %v1734_v30 = vld [vmem:[#allocation2 + $0x30] sm:$0xff] }
 0x1c0   : > { %v1742_v43 = vadd.f32 %v3816_v37, %v1734_v30  ;;  %v1732_v1 = vld [vmem:[#allocation2 + $0x20] sm:$0xff] }
 0x1c1   : > { %v1876_v2 = vld [vmem:[#allocation2 + $0x10] sm:$0xff]  ;;  %v3826_v4 = vpop.f32.mrb[36].mxu0  ;;  %v1740_v51 = vadd.f32 %v1732_v1, %v1713_v19  ;;  %v1735_v16 = vld [vmem:[#allocation2 + $0x38] sm:$0xff]  ;;  %v5369_v6 = vpop.f32.mrb[36].mxu1 }
 0x1c2   : > { %v1884_v0 = vadd.f32 %v3822_v46, %v1876_v2  ;;  %v1874_v36 = vld [vmem:[#allocation2] sm:$0xff]  ;;  %1750 = vst.msk [vmem:[#allocation2 + $0x30] sm:$0xff] %vm470_vm10, %v1742_v43  ;;  %v1859_v5 = vpop.f32.mrb[37].mxu0  ;;  %v1743_v14 = vadd.f32 %v3817_v61, %v1735_v16  ;;  %v1733_v32 = vld [vmem:[#allocation2 + $0x28] sm:$0xff]  ;;  %v1993_v3 = vpop.f32.mrb[37].mxu1 }
 0x1c3   : > { %v1882_v59 = vadd.f32 %v1874_v36, %v1843_v53  ;;  %v1877_v50 = vld [vmem:[#allocation2 + $0x18] sm:$0xff]  ;;  %1748 = vst.msk [vmem:[#allocation2 + $0x20] sm:$0xff] %vm470_vm10, %v1740_v51  ;;  %v3827_v45 = vpop.f32.mrb[38].mxu0  ;;  %v1741_v18 = vadd.f32 %v1733_v32, %v1716_v63  ;;  %v3837_v21 = vpop.f32.mrb[38].mxu1 }
 0x1c4   : > { %1892 = vst.msk [vmem:[#allocation2 + $0x10] sm:$0xff] %vm470_vm10, %v1884_v0  ;;  %v1885_v31 = vadd.f32 %v3823_v7, %v1877_v50  ;;  %v1875_v28 = vld [vmem:[#allocation2 + $0x8] sm:$0xff]  ;;  %1751 = vst.msk [vmem:[#allocation2 + $0x38] sm:$0xff] %vm470_vm10, %v1743_v14  ;;  %v1862_v29 = vpop.f32.mrb[39].mxu0  ;;  %v1996_v58 = vpop.f32.mrb[39].mxu1 }
 0x1c5   : > { %1890 = vst.msk [vmem:[#allocation2] sm:$0xff] %vm470_vm10, %v1882_v59  ;;  %v1883_v60 = vadd.f32 %v1875_v28, %v1846_v8  ;;  %1749 = vst.msk [vmem:[#allocation2 + $0x28] sm:$0xff] %vm470_vm10, %v1741_v18 }
 0x1c6   : > { %1893 = vst.msk [vmem:[#allocation2 + $0x18] sm:$0xff] %vm470_vm10, %v1885_v31 }
 0x1c7   : > { %1891 = vst.msk [vmem:[#allocation2 + $0x8] sm:$0xff] %vm470_vm10, %v1883_v60 }
 0x1c9   : > { %v1880_v10 = vld [vmem:[#allocation2 + $0x30] sm:$0xff]  ;;  %v5379_v12 = vpop.f32.mrb[40].mxu1  ;;  %v3842_v57 = vpop.f32.mrb[40].mxu0 }
 0x1ca   : > { %v1888_v17 = vadd.f32 %v3826_v4, %v1880_v10  ;;  %v1878_v56 = vld [vmem:[#allocation2 + $0x20] sm:$0xff]  ;;  %v5381_v34 = vpop.f32.mrb[41].mxu1  ;;  %v2111_v42 = vpop.f32.mrb[41].mxu0 }
 0x1cb   : > { %v2010_v22 = vld [vmem:[#allocation2 + $0x10] sm:$0xff]  ;;  %v1886_v37 = vadd.f32 %v1878_v56, %v1859_v5  ;;  %v1881_v33 = vld [vmem:[#allocation2 + $0x38] sm:$0xff]  ;;  %v5383_v19 = vpop.f32.mrb[42].mxu1  ;;  %v3843_v44 = vpop.f32.mrb[42].mxu0 }
 0x1cc   : > { %1896 = vst.msk [vmem:[#allocation2 + $0x30] sm:$0xff] %vm470_vm10, %v1888_v17  ;;  %v2018_v61 = vadd.f32 %v3832_v47, %v2010_v22  ;;  %v2008_v48 = vld [vmem:[#allocation2] sm:$0xff]  ;;  %v1889_v63 = vadd.f32 %v3827_v45, %v1881_v33  ;;  %v1879_v23 = vld [vmem:[#allocation2 + $0x28] sm:$0xff]  ;;  %v5386_v9 = vpop.f32.mrb[43].mxu1  ;;  %v2114_v26 = vpop.f32.mrb[43].mxu0 }
 0x1cd   : > { %1894 = vst.msk [vmem:[#allocation2 + $0x20] sm:$0xff] %vm470_vm10, %v1886_v37  ;;  %v2016_v35 = vadd.f32 %v2008_v48, %v1977_v52  ;;  %v2011_v41 = vld [vmem:[#allocation2 + $0x18] sm:$0xff]  ;;  %v1887_v24 = vadd.f32 %v1879_v23, %v1862_v29 }
 0x1ce   : > { %2026 = vst.msk [vmem:[#allocation2 + $0x10] sm:$0xff] %vm470_vm10, %v2018_v61  ;;  %1897 = vst.msk [vmem:[#allocation2 + $0x38] sm:$0xff] %vm470_vm10, %v1889_v63  ;;  %v2019_v20 = vadd.f32 %v3833_v15, %v2011_v41  ;;  %v2009_v40 = vld [vmem:[#allocation2 + $0x8] sm:$0xff] }
 0x1cf   : > { %2024 = vst.msk [vmem:[#allocation2] sm:$0xff] %vm470_vm10, %v2016_v35  ;;  %1895 = vst.msk [vmem:[#allocation2 + $0x28] sm:$0xff] %vm470_vm10, %v1887_v24  ;;  %v2017_v38 = vadd.f32 %v2009_v40, %v5366_v54 }
 0x1d0   : > { %2027 = vst.msk [vmem:[#allocation2 + $0x18] sm:$0xff] %vm470_vm10, %v2019_v20 }
 0x1d1   : > { %2025 = vst.msk [vmem:[#allocation2 + $0x8] sm:$0xff] %vm470_vm10, %v2017_v38  ;;  %v5396_v11 = vpop.f32.mrb[44].mxu1  ;;  %v3846_v55 = vpop.f32.mrb[44].mxu0 }
 0x1d2   : > { %v5398_v39 = vpop.f32.mrb[45].mxu1  ;;  %v2127_v46 = vpop.f32.mrb[45].mxu0 }
 0x1d3   : > { %v2014_v13 = vld [vmem:[#allocation2 + $0x30] sm:$0xff]  ;;  %v5400_v27 = vpop.f32.mrb[46].mxu1  ;;  %v3847_v47 = vpop.f32.mrb[46].mxu0 }
 0x1d4   : > { %v2022_v53 = vadd.f32 %v5369_v6, %v2014_v13  ;;  %v2012_v62 = vld [vmem:[#allocation2 + $0x20] sm:$0xff]  ;;  %v5403_v49 = vpop.f32.mrb[47].mxu1  ;;  %v2130_v52 = vpop.f32.mrb[47].mxu0 }
 0x1d5   : > { %v2020_v7 = vadd.f32 %v2012_v62, %v1993_v3  ;;  %v2015_v25 = vld [vmem:[#allocation2 + $0x38] sm:$0xff]  ;;  %v2144_v15 = vld [vmem:[#allocation2 + $0x10] sm:$0xff] }
 0x1d6   : > { %2030 = vst.msk [vmem:[#allocation2 + $0x30] sm:$0xff] %vm470_vm10, %v2022_v53  ;;  %v2023_v8 = vadd.f32 %v3837_v21, %v2015_v25  ;;  %v2013_v54 = vld [vmem:[#allocation2 + $0x28] sm:$0xff]  ;;  %v2152_v30 = vadd.f32 %v3842_v57, %v2144_v15  ;;  %v2142_v43 = vld [vmem:[#allocation2] sm:$0xff] }
 0x1d7   : > { %2028 = vst.msk [vmem:[#allocation2 + $0x20] sm:$0xff] %vm470_vm10, %v2020_v7  ;;  %v2021_v1 = vadd.f32 %v2013_v54, %v1996_v58  ;;  %v2150_v2 = vadd.f32 %v2142_v43, %v2111_v42  ;;  %v2145_v4 = vld [vmem:[#allocation2 + $0x18] sm:$0xff] }
 0x1d8   : > { %2031 = vst.msk [vmem:[#allocation2 + $0x38] sm:$0xff] %vm470_vm10, %v2023_v8  ;;  %2160 = vst.msk [vmem:[#allocation2 + $0x10] sm:$0xff] %vm470_vm10, %v2152_v30  ;;  %v2153_v51 = vadd.f32 %v3843_v44, %v2145_v4  ;;  %v2143_v16 = vld [vmem:[#allocation2 + $0x8] sm:$0xff] }
 0x1d9   : > { %2029 = vst.msk [vmem:[#allocation2 + $0x28] sm:$0xff] %vm470_vm10, %v2021_v1  ;;  %2158 = vst.msk [vmem:[#allocation2] sm:$0xff] %vm470_vm10, %v2150_v2  ;;  %v2151_v6 = vadd.f32 %v2143_v16, %v2114_v26  ;;  %v3862_v0 = vpop.f32.mrb[48].mxu0  ;;  %v5411_v36 = vpop.f32.mrb[48].mxu1 }
 0x1da   : > { %2161 = vst.msk [vmem:[#allocation2 + $0x18] sm:$0xff] %vm470_vm10, %v2153_v51  ;;  %v2491_v5 = vpop.f32.mrb[49].mxu0  ;;  %v5414_v14 = vpop.f32.mrb[49].mxu1 }
 0x1db   : > { %2159 = vst.msk [vmem:[#allocation2 + $0x8] sm:$0xff] %vm470_vm10, %v2151_v6  ;;  %v3863_v32 = vpop.f32.mrb[50].mxu0  ;;  %v5417_v3 = vpop.f32.mrb[50].mxu1 }
 0x1dc   : > { %v2494_v59 = vpop.f32.mrb[51].mxu0  ;;  %v5419_v50 = vpop.f32.mrb[51].mxu1 }
 0x1dd   : > { %v2148_v45 = vld [vmem:[#allocation2 + $0x30] sm:$0xff] }
 0x1de   : > { %v2156_v18 = vadd.f32 %v3846_v55, %v2148_v45  ;;  %v2146_v21 = vld [vmem:[#allocation2 + $0x20] sm:$0xff] }
 0x1df   : > { %v2154_v31 = vadd.f32 %v2146_v21, %v2127_v46  ;;  %v2149_v28 = vld [vmem:[#allocation2 + $0x38] sm:$0xff]  ;;  %v2290_v29 = vld [vmem:[#allocation2 + $0x10] sm:$0xff] }
 0x1e0   : > { %2164 = vst.msk [vmem:[#allocation2 + $0x30] sm:$0xff] %vm470_vm10, %v2156_v18  ;;  %v2157_v58 = vadd.f32 %v3847_v47, %v2149_v28  ;;  %v2147_v60 = vld [vmem:[#allocation2 + $0x28] sm:$0xff]  ;;  %v2298_v10 = vadd.f32 %v5379_v12, %v2290_v29  ;;  %v2288_v57 = vld [vmem:[#allocation2] sm:$0xff] }
 0x1e1   : > { %2162 = vst.msk [vmem:[#allocation2 + $0x20] sm:$0xff] %vm470_vm10, %v2154_v31  ;;  %v2155_v17 = vadd.f32 %v2147_v60, %v2130_v52  ;;  %v2296_v56 = vadd.f32 %v2288_v57, %v5381_v34  ;;  %v2291_v42 = vld [vmem:[#allocation2 + $0x18] sm:$0xff]  ;;  %v3866_v22 = vpop.f32.mrb[52].mxu0  ;;  %v5425_v37 = vpop.f32.mrb[52].mxu1 }
 0x1e2   : > { %2165 = vst.msk [vmem:[#allocation2 + $0x38] sm:$0xff] %vm470_vm10, %v2157_v58  ;;  %2306 = vst.msk [vmem:[#allocation2 + $0x10] sm:$0xff] %vm470_vm10, %v2298_v10  ;;  %v2299_v33 = vadd.f32 %v5383_v19, %v2291_v42  ;;  %v2289_v44 = vld [vmem:[#allocation2 + $0x8] sm:$0xff]  ;;  %v2507_v61 = vpop.f32.mrb[53].mxu0  ;;  %v5430_v48 = vpop.f32.mrb[53].mxu1 }
 0x1e3   : > { %2163 = vst.msk [vmem:[#allocation2 + $0x28] sm:$0xff] %vm470_vm10, %v2155_v17  ;;  %2304 = vst.msk [vmem:[#allocation2] sm:$0xff] %vm470_vm10, %v2296_v56  ;;  %v2297_v12 = vadd.f32 %v2289_v44, %v5386_v9  ;;  %v3867_v34 = vpop.f32.mrb[54].mxu0  ;;  %v5435_v63 = vpop.f32.mrb[54].mxu1 }
 0x1e4   : > { %2307 = vst.msk [vmem:[#allocation2 + $0x18] sm:$0xff] %vm470_vm10, %v2299_v33  ;;  %v2510_v23 = vpop.f32.mrb[55].mxu0  ;;  %v5438_v26 = vpop.f32.mrb[55].mxu1 }
 0x1e5   : > { %2305 = vst.msk [vmem:[#allocation2 + $0x8] sm:$0xff] %vm470_vm10, %v2297_v12 }
 0x1e7   : > { %v2294_v19 = vld [vmem:[#allocation2 + $0x30] sm:$0xff] }
 0x1e8   : > { %v2302_v35 = vadd.f32 %v5396_v11, %v2294_v19  ;;  %v2292_v41 = vld [vmem:[#allocation2 + $0x20] sm:$0xff] }
 0x1e9   : > { %v2524_v24 = vld [vmem:[#allocation2 + $0x10] sm:$0xff]  ;;  %v2300_v20 = vadd.f32 %v2292_v41, %v5398_v39  ;;  %v2295_v40 = vld [vmem:[#allocation2 + $0x38] sm:$0xff]  ;;  %v5443_v38 = vpop.f32.mrb[56].mxu0  ;;  %v5445_v9 = vpop.f32.mrb[56].mxu1 }
 0x1ea   : > { %v2532_v55 = vadd.f32 %v3862_v0, %v2524_v24  ;;  %v2522_v46 = vld [vmem:[#allocation2] sm:$0xff]  ;;  %2310 = vst.msk [vmem:[#allocation2 + $0x30] sm:$0xff] %vm470_vm10, %v2302_v35  ;;  %v2303_v13 = vadd.f32 %v5400_v27, %v2295_v40  ;;  %v2293_v47 = vld [vmem:[#allocation2 + $0x28] sm:$0xff]  ;;  %v5449_v53 = vpop.f32.mrb[57].mxu0  ;;  %v5451_v62 = vpop.f32.mrb[57].mxu1 }
 0x1eb   : > { %v2530_v11 = vadd.f32 %v2522_v46, %v2491_v5  ;;  %v2525_v52 = vld [vmem:[#allocation2 + $0x18] sm:$0xff]  ;;  %2308 = vst.msk [vmem:[#allocation2 + $0x20] sm:$0xff] %vm470_vm10, %v2300_v20  ;;  %v2301_v39 = vadd.f32 %v2293_v47, %v5403_v49  ;;  %v3883_v7 = vpop.f32.mrb[58].mxu0  ;;  %v5455_v25 = vpop.f32.mrb[58].mxu1 }
 0x1ec   : > { %2540 = vst.msk [vmem:[#allocation2 + $0x10] sm:$0xff] %vm470_vm10, %v2532_v55  ;;  %v2533_v15 = vadd.f32 %v3863_v32, %v2525_v52  ;;  %v2523_v8 = vld [vmem:[#allocation2 + $0x8] sm:$0xff]  ;;  %2311 = vst.msk [vmem:[#allocation2 + $0x38] sm:$0xff] %vm470_vm10, %v2303_v13  ;;  %v2826_v27 = vpop.f32.mrb[59].mxu0  ;;  %v5459_v54 = vpop.f32.mrb[59].mxu1 }
 0x1ed   : > { %2538 = vst.msk [vmem:[#allocation2] sm:$0xff] %vm470_vm10, %v2530_v11  ;;  %v2531_v30 = vadd.f32 %v2523_v8, %v2494_v59  ;;  %2309 = vst.msk [vmem:[#allocation2 + $0x28] sm:$0xff] %vm470_vm10, %v2301_v39 }
 0x1ee   : > { %2541 = vst.msk [vmem:[#allocation2 + $0x18] sm:$0xff] %vm470_vm10, %v2533_v15 }
 0x1ef   : > { %2539 = vst.msk [vmem:[#allocation2 + $0x8] sm:$0xff] %vm470_vm10, %v2531_v30 }
 0x1f1   : > { %v2528_v49 = vld [vmem:[#allocation2 + $0x30] sm:$0xff]  ;;  %v3886_v43 = vpop.f32.mrb[60].mxu0  ;;  %v5465_v1 = vpop.f32.mrb[60].mxu1 }
 0x1f2   : > { %v2536_v2 = vadd.f32 %v3866_v22, %v2528_v49  ;;  %v2526_v4 = vld [vmem:[#allocation2 + $0x20] sm:$0xff]  ;;  %v2839_v51 = vpop.f32.mrb[61].mxu0  ;;  %v5467_v16 = vpop.f32.mrb[61].mxu1 }
 0x1f3   : > { %v2726_v6 = vld [vmem:[#allocation2 + $0x10] sm:$0xff]  ;;  %v2534_v0 = vadd.f32 %v2526_v4, %v2507_v61  ;;  %v2529_v5 = vld [vmem:[#allocation2 + $0x38] sm:$0xff]  ;;  %v3887_v32 = vpop.f32.mrb[62].mxu0  ;;  %v5469_v59 = vpop.f32.mrb[62].mxu1 }
 0x1f4   : > { %v2734_v45 = vadd.f32 %v5411_v36, %v2726_v6  ;;  %v2724_v18 = vld [vmem:[#allocation2] sm:$0xff]  ;;  %2544 = vst.msk [vmem:[#allocation2 + $0x30] sm:$0xff] %vm470_vm10, %v2536_v2  ;;  %v2537_v21 = vadd.f32 %v3867_v34, %v2529_v5  ;;  %v2527_v31 = vld [vmem:[#allocation2 + $0x28] sm:$0xff]  ;;  %v2842_v28 = vpop.f32.mrb[63].mxu0  ;;  %v5473_v29 = vpop.f32.mrb[63].mxu1 }
 0x1f5   : > { %v2732_v58 = vadd.f32 %v2724_v18, %v5414_v14  ;;  %v2727_v60 = vld [vmem:[#allocation2 + $0x18] sm:$0xff]  ;;  %2542 = vst.msk [vmem:[#allocation2 + $0x20] sm:$0xff] %vm470_vm10, %v2534_v0  ;;  %v2535_v10 = vadd.f32 %v2527_v31, %v2510_v23 }
 0x1f6   : > { %2742 = vst.msk [vmem:[#allocation2 + $0x10] sm:$0xff] %vm470_vm10, %v2734_v45  ;;  %v2735_v57 = vadd.f32 %v5417_v3, %v2727_v60  ;;  %v2725_v17 = vld [vmem:[#allocation2 + $0x8] sm:$0xff]  ;;  %2545 = vst.msk [vmem:[#allocation2 + $0x38] sm:$0xff] %vm470_vm10, %v2537_v21 }
 0x1f7   : > { %2740 = vst.msk [vmem:[#allocation2] sm:$0xff] %vm470_vm10, %v2732_v58  ;;  %v2733_v36 = vadd.f32 %v2725_v17, %v5419_v50  ;;  %2543 = vst.msk [vmem:[#allocation2 + $0x28] sm:$0xff] %vm470_vm10, %v2535_v10 }
 0x1f8   : > { %2743 = vst.msk [vmem:[#allocation2 + $0x18] sm:$0xff] %vm470_vm10, %v2735_v57 }
 0x1f9   : > { %2741 = vst.msk [vmem:[#allocation2 + $0x8] sm:$0xff] %vm470_vm10, %v2733_v36 }
 0x1fb   : > { %v2730_v14 = vld [vmem:[#allocation2 + $0x30] sm:$0xff] }
 0x1fc   : > { %v2738_v56 = vadd.f32 %v5425_v37, %v2730_v14  ;;  %v2728_v42 = vld [vmem:[#allocation2 + $0x20] sm:$0xff] }
 0x1fd   : > { %v2736_v22 = vadd.f32 %v2728_v42, %v5430_v48  ;;  %v2731_v3 = vld [vmem:[#allocation2 + $0x38] sm:$0xff]  ;;  %v2856_v33 = vld [vmem:[#allocation2 + $0x10] sm:$0xff] }
 0x1fe   : > { %2746 = vst.msk [vmem:[#allocation2 + $0x30] sm:$0xff] %vm470_vm10, %v2738_v56  ;;  %v2739_v44 = vadd.f32 %v5435_v63, %v2731_v3  ;;  %v2729_v61 = vld [vmem:[#allocation2 + $0x28] sm:$0xff]  ;;  %v2864_v50 = vadd.f32 %v5443_v38, %v2856_v33  ;;  %v2854_v12 = vld [vmem:[#allocation2] sm:$0xff] }
 0x1ff   : > { %2744 = vst.msk [vmem:[#allocation2 + $0x20] sm:$0xff] %vm470_vm10, %v2736_v22  ;;  %v2737_v34 = vadd.f32 %v2729_v61, %v5438_v26  ;;  %v2862_v23 = vadd.f32 %v2854_v12, %v5449_v53  ;;  %v2857_v37 = vld [vmem:[#allocation2 + $0x18] sm:$0xff] }
 0x200   : > { %2747 = vst.msk [vmem:[#allocation2 + $0x38] sm:$0xff] %vm470_vm10, %v2739_v44  ;;  %2872 = vst.msk [vmem:[#allocation2 + $0x10] sm:$0xff] %vm470_vm10, %v2864_v50  ;;  %v2865_v48 = vadd.f32 %v3883_v7, %v2857_v37  ;;  %v2855_v19 = vld [vmem:[#allocation2 + $0x8] sm:$0xff] }
 0x201   : > { %2745 = vst.msk [vmem:[#allocation2 + $0x28] sm:$0xff] %vm470_vm10, %v2737_v34  ;;  %2870 = vst.msk [vmem:[#allocation2] sm:$0xff] %vm470_vm10, %v2862_v23  ;;  %v2863_v63 = vadd.f32 %v2855_v19, %v2826_v27 }
 0x202   : > { %2873 = vst.msk [vmem:[#allocation2 + $0x18] sm:$0xff] %vm470_vm10, %v2865_v48 }
 0x203   : > { %2871 = vst.msk [vmem:[#allocation2 + $0x8] sm:$0xff] %vm470_vm10, %v2863_v63 }
 0x205   : > { %v2860_v35 = vld [vmem:[#allocation2 + $0x30] sm:$0xff] }
 0x206   : > { %v2868_v26 = vadd.f32 %v3886_v43, %v2860_v35  ;;  %v2858_v41 = vld [vmem:[#allocation2 + $0x20] sm:$0xff] }
 0x207   : > { %v3082_v24 = vld [vmem:[#allocation2 + $0x10] sm:$0xff]  ;;  %v2866_v20 = vadd.f32 %v2858_v41, %v2839_v51  ;;  %v2861_v40 = vld [vmem:[#allocation2 + $0x38] sm:$0xff] }
 0x208   : > { %v3090_v38 = vadd.f32 %v5445_v9, %v3082_v24  ;;  %v3080_v55 = vld [vmem:[#allocation2] sm:$0xff]  ;;  %2876 = vst.msk [vmem:[#allocation2 + $0x30] sm:$0xff] %vm470_vm10, %v2868_v26  ;;  %v2869_v46 = vadd.f32 %v3887_v32, %v2861_v40  ;;  %v2859_v13 = vld [vmem:[#allocation2 + $0x28] sm:$0xff] }
 0x209   : > { %v3088_v47 = vadd.f32 %v3080_v55, %v5451_v62  ;;  %v3083_v53 = vld [vmem:[#allocation2 + $0x18] sm:$0xff]  ;;  %2874 = vst.msk [vmem:[#allocation2 + $0x20] sm:$0xff] %vm470_vm10, %v2866_v20  ;;  %v2867_v11 = vadd.f32 %v2859_v13, %v2842_v28  ;;  %v3479_v62 = vld [vmem:[%s5551_s4] ss:$0 sm:$0xff] }
 0x20a   : > { %3098 = vst.msk [vmem:[#allocation2 + $0x10] sm:$0xff] %vm470_vm10, %v3090_v38  ;;  %v3091_v52 = vadd.f32 %v5455_v25, %v3083_v53  ;;  %v3081_v39 = vld [vmem:[#allocation2 + $0x8] sm:$0xff]  ;;  %2877 = vst.msk [vmem:[#allocation2 + $0x38] sm:$0xff] %vm470_vm10, %v2869_v46 }
 0x20b   : > { %3096 = vst.msk [vmem:[#allocation2] sm:$0xff] %vm470_vm10, %v3088_v47  ;;  %v3089_v9 = vadd.f32 %v3081_v39, %v5459_v54  ;;  %2875 = vst.msk [vmem:[#allocation2 + $0x28] sm:$0xff] %vm470_vm10, %v2867_v11 }
 0x20c   : > { %3099 = vst.msk [vmem:[#allocation2 + $0x18] sm:$0xff] %vm470_vm10, %v3091_v52 }
 0x20d   : > { %3097 = vst.msk [vmem:[#allocation2 + $0x8] sm:$0xff] %vm470_vm10, %v3089_v9 }
 0x20f   : > { %v3086_v7 = vld [vmem:[#allocation2 + $0x30] sm:$0xff] }
 0x210   : > { %v3094_v25 = vadd.f32 %v5465_v1, %v3086_v7  ;;  %v3084_v15 = vld [vmem:[#allocation2 + $0x20] sm:$0xff] }
 0x211   : > { %v3106_v8 = vld [vmem:[#allocation2 + $0x10] sm:$0xff]  ;;  %v3092_v27 = vadd.f32 %v3084_v15, %v5467_v16  ;;  %v3087_v30 = vld [vmem:[#allocation2 + $0x38] sm:$0xff] }
 0x212   : > { %v3121_v54 = vadd.f32 %v3479_v62, %v3106_v8  ;;  %v3104_v49 = vld [vmem:[#allocation2] sm:$0xff]  ;;  %3102 = vst.msk [vmem:[#allocation2 + $0x30] sm:$0xff] %vm470_vm10, %v3094_v25  ;;  %v3095_v43 = vadd.f32 %v5469_v59, %v3087_v30  ;;  %v3085_v2 = vld [vmem:[#allocation2 + $0x28] sm:$0xff] }
 0x213   : > { %v3119_v4 = vadd.f32 %v3479_v62, %v3104_v49  ;;  %v3107_v51 = vld [vmem:[#allocation2 + $0x18] sm:$0xff]  ;;  %3100 = vst.msk [vmem:[#allocation2 + $0x20] sm:$0xff] %vm470_vm10, %v3092_v27  ;;  %v3093_v6 = vadd.f32 %v3085_v2, %v5473_v29 }
 0x214   : > { %v3129_v1 = vmax.f32 %v3121_v54, 0.0  ;;  %v3122_v0 = vadd.f32 %v3479_v62, %v3107_v51  ;;  %v3105_v5 = vld [vmem:[#allocation2 + $0x8] sm:$0xff]  ;;  %3103 = vst.msk [vmem:[#allocation2 + $0x38] sm:$0xff] %vm470_vm10, %v3095_v43 }
 0x215   : > { %v3127_v16 = vmax.f32 %v3119_v4, 0.0  ;;  %v3120_v32 = vadd.f32 %v3479_v62, %v3105_v5  ;;  %3101 = vst.msk [vmem:[#allocation2 + $0x28] sm:$0xff] %vm470_vm10, %v3093_v6 }
 0x216   : > { %v3494_v59 = vpack.c.bf16 %v3129_v1, %v3129_v1  ;;  %v3130_v45 = vmax.f32 %v3122_v0, 0.0 }
 0x217   : > { %v3492_v18 = vpack.c.bf16 %v3127_v16, %v3127_v16  ;;  %v3128_v21 = vmax.f32 %v3120_v32, 0.0 }
 0x218   : > { %3170 = vst.msk [vmem:[%s5525_s23 + $0x8] sm:$0xf] %vm3167_vm15, %v3494_v59  ;;  %v3495_v31 = vpack.c.bf16 %v3130_v45, %v3130_v45 }
 0x219   : > { %3168 = vst.msk [vmem:[%s5525_s23] sm:$0xf] %vm3167_vm15, %v3492_v18  ;;  %v3493_v28 = vpack.c.bf16 %v3128_v21, %v3128_v21  ;;  %v3110_v29 = vld [vmem:[#allocation2 + $0x30] sm:$0xff] }
 0x21a   : > { %3171 = vst.msk [vmem:[%s5525_s23 + $0xc] sm:$0xf] %vm3167_vm15, %v3495_v31  ;;  %v3125_v58 = vadd.f32 %v3479_v62, %v3110_v29  ;;  %v3108_v60 = vld [vmem:[#allocation2 + $0x20] sm:$0xff] }
 0x21b   : > { %3169 = vst.msk [vmem:[%s5525_s23 + $0x4] sm:$0xf] %vm3167_vm15, %v3493_v28  ;;  %v3123_v10 = vadd.f32 %v3479_v62, %v3108_v60  ;;  %v3111_v57 = vld [vmem:[#allocation2 + $0x38] sm:$0xff] }
 0x21c   : > { %v3133_v17 = vmax.f32 %v3125_v58, 0.0  ;;  %v3126_v36 = vadd.f32 %v3479_v62, %v3111_v57  ;;  %v3109_v14 = vld [vmem:[#allocation2 + $0x28] sm:$0xff] }
 0x21d   : > { %v3131_v56 = vmax.f32 %v3123_v10, 0.0  ;;  %v3124_v42 = vadd.f32 %v3479_v62, %v3109_v14 }
 0x21e   : > { %v3498_v22 = vpack.c.bf16 %v3133_v17, %v3133_v17  ;;  %v3134_v3 = vmax.f32 %v3126_v36, 0.0 }
 0x21f   : > { %v3496_v33 = vpack.c.bf16 %v3131_v56, %v3131_v56  ;;  %v3132_v44 = vmax.f32 %v3124_v42, 0.0 }
 0x220   : > { %3174 = vst.msk [vmem:[%s5525_s23 + $0x18] sm:$0xf] %vm3167_vm15, %v3498_v22  ;;  %v3499_v61 = vpack.c.bf16 %v3134_v3, %v3134_v3 }
 0x221   : > { %3172 = vst.msk [vmem:[%s5525_s23 + $0x10] sm:$0xf] %vm3167_vm15, %v3496_v33  ;;  %v3497_v50 = vpack.c.bf16 %v3132_v44, %v3132_v44 }
 0x222   : > { %3175 = vst.msk [vmem:[%s5525_s23 + $0x1c] sm:$0xf] %vm3167_vm15, %v3499_v61 }
 0x223   : > { %3173 = vst.msk [vmem:[%s5525_s23 + $0x14] sm:$0xf] %vm3167_vm15, %v3497_v50 }
 0x224 PF: > { %s15_s18 = sadd.s32 1, %s3948_s18  }
 0x225   : > { %p12_p4 = scmp.ge.s32.totalorder %s15_s18, 4  }
 0x227   :  { %14 = sbr.rel (!%p12_p4) target bundleno = 1 (0x1), region = 88 }

</bundles_post_ra>
